<compile_context>
chip_gen: v5e
topology: v5e:2x2
jax: 0.10.0
libtpu: 0.0.40
codegen_flags: <defaults>
</compile_context>

<pallas_src>
import functools

import jax
import jax.numpy as jnp
from jax.experimental import pallas as pl
from jax.experimental.pallas import tpu as pltpu

BN_EPS = 1e-5
VMEM_LIMIT = 32 * 1024 * 1024   # explicit scoped-VMEM limit (safe on v5e/v6e/v7x)


# ---------------------------------------------------------------------------
# Kernel 1: init embedding + edge embedding, gridded over the batch dimension.
# Edge output is produced directly in the lane-dense (N, N*D) layout.
# ---------------------------------------------------------------------------
def _embed_kernel(locs_ref, locs_t_ref, wi_ref, bi_ref, ew_ref, ebf_ref,
                  node_ref, edge_ref):
    locs = locs_ref[0]                                   # (N, 2)
    lt = locs_t_ref[0]                                   # (2, N)

    # init embedding Linear(2, D): two VPU FMAs instead of a K=2 MXU matmul.
    node_ref[0] = (locs[:, 0:1] * wi_ref[0:1, :]
                   + locs[:, 1:2] * wi_ref[1:2, :]
                   + bi_ref[...])                        # (N, D)

    # pairwise Euclidean distances in per-coordinate (N, N) layout (j on lanes).
    dx = locs[:, 0:1] - lt[0:1, :]                       # (N, N)
    dy = locs[:, 1:2] - lt[1:2, :]                       # (N, N)
    dist = jnp.sqrt(dx * dx + dy * dy)                   # (N, N)

    # edge embedding Linear(1, D), written lane-dense as (N, N*D):
    # edge[i, j*D+d] = dist[i, j] * we[d] + be[d]  via dist @ kron(I_N, we).
    edge_ref[0] = (jnp.dot(dist, ew_ref[...], preferred_element_type=jnp.float32)
                   + ebf_ref[...])                       # (N, N*D)


def embed_pallas(locs, init_w, init_b, edge_w, edge_b):
    B, N, _ = locs.shape
    D = init_w.shape[1]
    ND = N * D
    locs_t = jnp.swapaxes(locs, 1, 2)                                     # (B, 2, N)
    ew_rep = jnp.kron(jnp.eye(N, dtype=jnp.float32), edge_w)              # (N, ND)
    ebf = jnp.tile(edge_b, (1, N))                                        # (1, ND)
    return pl.pallas_call(
        _embed_kernel,
        out_shape=(
            jax.ShapeDtypeStruct((B, N, D), jnp.float32),
            jax.ShapeDtypeStruct((B, N, ND), jnp.float32),
        ),
        grid=(B,),
        in_specs=[
            pl.BlockSpec((1, N, 2), lambda b: (b, 0, 0)),
            pl.BlockSpec((1, 2, N), lambda b: (b, 0, 0)),
            pl.BlockSpec((2, D), lambda b: (0, 0)),
            pl.BlockSpec((1, D), lambda b: (0, 0)),
            pl.BlockSpec((N, ND), lambda b: (0, 0)),
            pl.BlockSpec((1, ND), lambda b: (0, 0)),
        ],
        out_specs=(
            pl.BlockSpec((1, N, D), lambda b: (b, 0, 0)),
            pl.BlockSpec((1, N, ND), lambda b: (b, 0, 0)),
        ),
        compiler_params=pltpu.CompilerParams(
            dimension_semantics=("parallel",),
            vmem_limit_bytes=VMEM_LIMIT,
        ),
    )(locs, locs_t, init_w, init_b, ew_rep, ebf)


# ---------------------------------------------------------------------------
# Kernel 2: fused vertex linears (one (D, 4D) matmul, lane-dense 4D output).
# ---------------------------------------------------------------------------
def _node_linear_kernel(x_ref, wc_ref, bc_ref, out_ref):
    out_ref[0] = (jnp.dot(x_ref[0], wc_ref[...], preferred_element_type=jnp.float32)
                  + bc_ref[...])


def node_linear_pallas(x, w_cat, b_cat):
    B, N, D = x.shape
    D4 = w_cat.shape[1]
    return pl.pallas_call(
        _node_linear_kernel,
        out_shape=jax.ShapeDtypeStruct((B, N, D4), jnp.float32),
        grid=(B,),
        in_specs=[
            pl.BlockSpec((1, N, D), lambda b: (b, 0, 0)),
            pl.BlockSpec((D, D4), lambda b: (0, 0)),
            pl.BlockSpec((1, D4), lambda b: (0, 0)),
        ],
        out_specs=pl.BlockSpec((1, N, D4), lambda b: (b, 0, 0)),
        compiler_params=pltpu.CompilerParams(
            dimension_semantics=("parallel",),
            vmem_limit_bytes=VMEM_LIMIT,
        ),
    )(x, w_cat, b_cat)


# ---------------------------------------------------------------------------
# Kernel 3: message aggregation + per-batch edge-BN partial statistics.
# Grid (B, source-node tile i). The edge tensor is streamed once per layer for
# this pass; gate sigmoid, mean-over-j aggregation, e_lin matmul and the BN
# sum / sum-of-squares all share that single pass.
# ---------------------------------------------------------------------------
def _msg_stats_kernel(w_ref, xf_ref, x2f_ref, x4f_ref,
                      sel_ref, wblk_ref, rep_ref, ebf_ref,
                      xvpre_ref, stats_ref, *, D, inv_n):
    w0 = w_ref[0]                                        # (TI, N*D)  lane-dense
    xf = xf_ref[0]                                       # (TI, 4D)
    x1 = xf[:, 0:D]
    x3 = xf[:, 2 * D:3 * D]

    # vertex message: agg_i = mean_j sigmoid(w0[i, j]) * x2[j]
    gate = jax.nn.sigmoid(w0)                            # EUP, lane-dense
    msg = gate * x2f_ref[0]                              # (TI, N*D)
    agg = jnp.dot(msg, sel_ref[...],
                  preferred_element_type=jnp.float32) * inv_n          # (TI, D)
    xvpre_ref[0] = x1 + agg                              # pre-BN vertex features

    # pre-BN edge features (needed only for batch statistics here; they are
    # recomputed in the normalize pass instead of round-tripping a second
    # (B,N,N,D)-sized tensor through HBM).
    wv = (jnp.dot(w0, wblk_ref[...], preferred_element_type=jnp.float32)   # e_lin(w0)
          + jnp.dot(x3, rep_ref[...], preferred_element_type=jnp.float32)  # + x3[i]
          + x4f_ref[0] + ebf_ref[...])                                     # + x4[j] + be

    grp = jnp.dot(wv, sel_ref[...], preferred_element_type=jnp.float32)      # (TI, D)
    grp_sq = jnp.dot(wv * wv, sel_ref[...], preferred_element_type=jnp.float32)
    esum = jnp.sum(grp, axis=0, keepdims=True)           # (1, D)
    essq = jnp.sum(grp_sq, axis=0, keepdims=True)        # (1, D)

    @pl.when(pl.program_id(1) == 0)
    def _init():
        stats_ref[...] = jnp.zeros_like(stats_ref)

    stats_ref[0, 0:1, :] += esum
    stats_ref[0, 1:2, :] += essq


# ---------------------------------------------------------------------------
# Kernel 4: normalize + silu + residual for nodes and edges.
# Grid (B, i-tile); no cross-step state, so both axes are 'parallel' (megacore).
# ---------------------------------------------------------------------------
def _normalize_kernel(w_ref, x0_ref, xf_ref, x4f_ref, xvpre_ref,
                      wblk_ref, rep_ref, ebf_ref,
                      ae_ref, ce_ref, av_ref, cv_ref,
                      xout_ref, wout_ref, *, D):
    w0 = w_ref[0]                                        # (TI, N*D)
    xf = xf_ref[0]                                       # (TI, 4D)
    x3 = xf[:, 2 * D:3 * D]

    # vertex update: x = x0 + silu(BN(x1 + agg))
    zv = xvpre_ref[0] * av_ref[...] + cv_ref[...]
    xout_ref[0] = x0_ref[0] + zv * jax.nn.sigmoid(zv)

    # edge update: w = w0 + silu(BN(e_lin(w0) + x3[i] + x4[j]))
    wv = (jnp.dot(w0, wblk_ref[...], preferred_element_type=jnp.float32)
          + jnp.dot(x3, rep_ref[...], preferred_element_type=jnp.float32)
          + x4f_ref[0] + ebf_ref[...])
    ze = wv * ae_ref[...] + ce_ref[...]
    wout_ref[0] = w0 + ze * jax.nn.sigmoid(ze)


# ---------------------------------------------------------------------------
# One anisotropic GNN layer: K2 -> K3 -> (tiny XLA stats) -> K4.
# Edge tensors live in lane-dense (B, N, N*D) layout.
# ---------------------------------------------------------------------------
def gnn_layer_pallas(x, w_flat, p, *, row_tile):
    B, N, D = x.shape
    ND = N * D
    TI = row_tile
    GI = N // TI

    # Fused vertex linears: one (D, 4D) matmul (4D = 128 lanes when D = 32).
    w_cat = jnp.concatenate([p["v1_w"], p["v2_w"], p["v3_w"], p["v4_w"]], axis=1)
    b_cat = jnp.concatenate([p["v1_b"], p["v2_b"], p["v3_b"], p["v4_b"]], axis=1)
    x1234 = node_linear_pallas(x, w_cat, b_cat)                          # (B, N, 4D)

    # Per-batch flattened x2 / x4 rows, broadcast along the source-node axis.
    x2f = x1234[:, :, D:2 * D].reshape(B, 1, ND)
    x4f = x1234[:, :, 3 * D:4 * D].reshape(B, 1, ND)

    # Small constant helper matrices (XLA, cheap):
    eye_d = jnp.eye(D, dtype=jnp.float32)
    sel = jnp.tile(eye_d, (N, 1))                                        # (ND, D)  group-sum over j
    rep = jnp.tile(eye_d, (1, N))                                        # (D, ND)  replicate x3 along j
    w_blk = jnp.kron(jnp.eye(N, dtype=jnp.float32), p["e_w"])            # (ND, ND) block-diag e_lin
    ebf = jnp.tile(p["e_b"], (1, N))                                     # (1, ND)

    # ---- pass 1: aggregation + edge-BN partial statistics ----
    kern = functools.partial(_msg_stats_kernel, D=D, inv_n=1.0 / N)
    xv_pre, stats = pl.pallas_call(
        kern,
        out_shape=(
            jax.ShapeDtypeStruct((B, N, D), jnp.float32),
            jax.ShapeDtypeStruct((B, 2, D), jnp.float32),
        ),
        grid=(B, GI),
        in_specs=[
            pl.BlockSpec((1, TI, ND), lambda b, i: (b, i, 0)),
            pl.BlockSpec((1, TI, 4 * D), lambda b, i: (b, i, 0)),
            pl.BlockSpec((1, 1, ND), lambda b, i: (b, 0, 0)),
            pl.BlockSpec((1, 1, ND), lambda b, i: (b, 0, 0)),
            pl.BlockSpec((ND, D), lambda b, i: (0, 0)),
            pl.BlockSpec((ND, ND), lambda b, i: (0, 0)),
            pl.BlockSpec((D, ND), lambda b, i: (0, 0)),
            pl.BlockSpec((1, ND), lambda b, i: (0, 0)),
        ],
        out_specs=(
            pl.BlockSpec((1, TI, D), lambda b, i: (b, i, 0)),
            pl.BlockSpec((1, 2, D), lambda b, i: (b, 0, 0)),   # per-batch accumulator
        ),
        compiler_params=pltpu.CompilerParams(
            dimension_semantics=("parallel", "arbitrary"),
            vmem_limit_bytes=VMEM_LIMIT,
        ),
    )(w_flat, x1234, x2f, x4f, sel, w_blk, rep, ebf)

    # ---- BatchNorm statistics (training mode, biased variance): D floats each,
    #      combined in plain XLA between the two pallas_calls. ----
    n_cnt = jnp.float32(B * N)
    v_mu = jnp.sum(xv_pre, axis=(0, 1)) / n_cnt                          # (D,)
    v_var = jnp.sum(xv_pre * xv_pre, axis=(0, 1)) / n_cnt - v_mu * v_mu
    a_v = p["v_bn_g"] * jax.lax.rsqrt(v_var + BN_EPS)                    # (1, D)
    c_v = p["v_bn_b"] - a_v * v_mu                                       # (1, D)

    e_cnt = jnp.float32(B * N * N)
    e_mu = jnp.sum(stats[:, 0, :], axis=0) / e_cnt                       # (D,)
    e_var = jnp.sum(stats[:, 1, :], axis=0) / e_cnt - e_mu * e_mu
    a_e = p["e_bn_g"] * jax.lax.rsqrt(e_var + BN_EPS)                    # (1, D)
    c_e = p["e_bn_b"] - a_e * e_mu                                       # (1, D)
    a_e_t = jnp.tile(a_e, (1, N))                                        # (1, ND)
    c_e_t = jnp.tile(c_e, (1, N))                                        # (1, ND)

    # ---- pass 2: normalize + silu + residual ----
    kern2 = functools.partial(_normalize_kernel, D=D)
    x_out, w_out = pl.pallas_call(
        kern2,
        out_shape=(
            jax.ShapeDtypeStruct((B, N, D), jnp.float32),
            jax.ShapeDtypeStruct((B, N, ND), jnp.float32),
        ),
        grid=(B, GI),
        in_specs=[
            pl.BlockSpec((1, TI, ND), lambda b, i: (b, i, 0)),
            pl.BlockSpec((1, TI, D), lambda b, i: (b, i, 0)),
            pl.BlockSpec((1, TI, 4 * D), lambda b, i: (b, i, 0)),
            pl.BlockSpec((1, 1, ND), lambda b, i: (b, 0, 0)),
            pl.BlockSpec((1, TI, D), lambda b, i: (b, i, 0)),
            pl.BlockSpec((ND, ND), lambda b, i: (0, 0)),
            pl.BlockSpec((D, ND), lambda b, i: (0, 0)),
            pl.BlockSpec((1, ND), lambda b, i: (0, 0)),
            pl.BlockSpec((1, ND), lambda b, i: (0, 0)),
            pl.BlockSpec((1, ND), lambda b, i: (0, 0)),
            pl.BlockSpec((1, D), lambda b, i: (0, 0)),
            pl.BlockSpec((1, D), lambda b, i: (0, 0)),
        ],
        out_specs=(
            pl.BlockSpec((1, TI, D), lambda b, i: (b, i, 0)),
            pl.BlockSpec((1, TI, ND), lambda b, i: (b, i, 0)),
        ),
        compiler_params=pltpu.CompilerParams(
            dimension_semantics=("parallel", "parallel"),
            vmem_limit_bytes=VMEM_LIMIT,
        ),
    )(w_flat, x, x1234, x4f, xv_pre, w_blk, rep, ebf, a_e_t, c_e_t, a_v, c_v)

    return x_out, w_out


# ---------------------------------------------------------------------------
# Encoder wrapper: mirrors NonAutoregressiveEncoder.forward.
# Returns (graph.x, graph.edge_attr, node_embed).
# ---------------------------------------------------------------------------
def nonautoregressive_encoder(locs, params, *, row_tile=8):
    B, N, _ = locs.shape
    assert N % row_tile == 0 and (row_tile % 8 == 0 or row_tile == N), \
        "row_tile must divide N and be a multiple of 8 (or equal N)"
    node_embed, edge_flat = embed_pallas(
        locs, params["init_w"], params["init_b"], params["edge_w"], params["edge_b"]
    )
    D = node_embed.shape[-1]
    x, w = node_embed, edge_flat
    for layer_params in params["layers"]:
        x, w = gnn_layer_pallas(x, w, layer_params, row_tile=row_tile)
    edge_attr = w.reshape(B, N, N, D)            # free row-major reshape at the boundary
    return x, edge_attr, node_embed


# ---------------------------------------------------------------------------
# Deterministic parameter init (PyTorch nn.Linear-style uniform bounds).
# ---------------------------------------------------------------------------
def make_linear(key, fan_in, fan_out):
    kw, kb = jax.random.split(key)
    bound = fan_in ** -0.5
    w = jax.random.uniform(kw, (fan_in, fan_out), jnp.float32, -bound, bound)
    b = jax.random.uniform(kb, (1, fan_out), jnp.float32, -bound, bound)
    return w, b


def init_params(key, embedding_dim, num_layers):
    D = embedding_dim
    keys = jax.random.split(key, 2 + num_layers)
    init_w, init_b = make_linear(keys[0], 2, D)     # TSPInitEmbedding: Linear(2, D)
    edge_w, edge_b = make_linear(keys[1], 1, D)     # TSPEdgeEmbedding: Linear(1, D)
    layers = []
    for l in range(num_layers):
        lk = jax.random.split(keys[2 + l], 5)
        v1_w, v1_b = make_linear(lk[0], D, D)
        v2_w, v2_b = make_linear(lk[1], D, D)
        v3_w, v3_b = make_linear(lk[2], D, D)
        v4_w, v4_b = make_linear(lk[3], D, D)
        e_w, e_b = make_linear(lk[4], D, D)
        layers.append(dict(
            v1_w=v1_w, v1_b=v1_b, v2_w=v2_w, v2_b=v2_b,
            v3_w=v3_w, v3_b=v3_b, v4_w=v4_w, v4_b=v4_b,
            e_w=e_w, e_b=e_b,
            v_bn_g=jnp.ones((1, D), jnp.float32), v_bn_b=jnp.zeros((1, D), jnp.float32),
            e_bn_g=jnp.ones((1, D), jnp.float32), e_bn_b=jnp.zeros((1, D), jnp.float32),
        ))
    return dict(init_w=init_w, init_b=init_b, edge_w=edge_w, edge_b=edge_b, layers=layers)


# ---------------------------------------------------------------------------
# Pure-JAX reference of the same math (sanity check only).
# ---------------------------------------------------------------------------
def reference_encoder(locs, params):
    B, N, _ = locs.shape
    node = locs @ params["init_w"] + params["init_b"]
    diff = locs[:, :, None, :] - locs[:, None, :, :]
    dist = jnp.sqrt(jnp.sum(diff * diff, axis=-1, keepdims=True))
    edge = dist * params["edge_w"] + params["edge_b"]
    x, w = node, edge
    for p in params["layers"]:
        x0, w0 = x, w
        x1 = x0 @ p["v1_w"] + p["v1_b"]
        x2 = x0 @ p["v2_w"] + p["v2_b"]
        x3 = x0 @ p["v3_w"] + p["v3_b"]
        x4 = x0 @ p["v4_w"] + p["v4_b"]
        agg = jnp.mean(jax.nn.sigmoid(w0) * x2[:, None, :, :], axis=2)
        xvf = (x1 + agg).reshape(B * N, -1)
        mu = xvf.mean(0)
        var = ((xvf - mu) ** 2).mean(0)
        xn = (xvf - mu) / jnp.sqrt(var + BN_EPS) * p["v_bn_g"] + p["v_bn_b"]
        xn = xn * jax.nn.sigmoid(xn)
        x = x0 + xn.reshape(B, N, -1)
        wv = (w0 @ p["e_w"] + p["e_b"]) + x3[:, :, None, :] + x4[:, None, :, :]
        wvf = wv.reshape(B * N * N, -1)
        emu = wvf.mean(0)
        evar = ((wvf - emu) ** 2).mean(0)
        wn = (wvf - emu) / jnp.sqrt(evar + BN_EPS) * p["e_bn_g"] + p["e_bn_b"]
        wn = wn * jax.nn.sigmoid(wn)
        w = w0 + wn.reshape(B, N, N, -1)
    return x, w, node


if __name__ == "__main__":
    B, N, D, L = 2, 16, 32, 3   # batch, nodes, embedding_dim, num_layers
    key = jax.random.PRNGKey(0)
    k_locs, k_par = jax.random.split(key)
    locs = jax.random.uniform(k_locs, (B, N, 2), jnp.float32)   # td["locs"] (TSP-style env)
    params = init_params(k_par, D, L)

    # row_tile=8 -> 2 source-node tiles per batch, exercising the tiled grid and
    # the per-batch stats accumulation path.
    encoder = jax.jit(functools.partial(nonautoregressive_encoder, row_tile=8))
    x, edge_attr, node_embed = encoder(locs, params)
    jax.block_until_ready((x, edge_attr, node_embed))

    assert x.shape == (B, N, D)
    assert edge_attr.shape == (B, N, N, D)
    assert node_embed.shape == (B, N, D)

    xr, wr, nr = reference_encoder(locs, params)
    assert jnp.allclose(node_embed, nr, atol=1e-2, rtol=1e-2)
    assert jnp.allclose(x, xr, atol=1e-2, rtol=1e-2)
    assert jnp.allclose(edge_attr, wr, atol=1e-2, rtol=1e-2)

    print("KERNEL_OK")
</pallas_src>

<mosaic_0001>
module attributes {stable_mosaic.version = 11 : i64} {
  func.func @_node_linear_kernel(%arg0: i32, %arg1: memref<1x16x32xf32, #tpu.memory_space<vmem>>, %arg2: memref<32x128xf32, #tpu.memory_space<vmem>>, %arg3: memref<1x128xf32, #tpu.memory_space<vmem>>, %arg4: memref<1x16x128xf32, #tpu.memory_space<vmem>>) attributes {dimension_semantics = [#tpu.dimension_semantics<parallel>], iteration_bounds = array<i64: 2>, scalar_prefetch = 0 : i64, scratch_operands = 0 : i64, tpu.core_type = #tpu.core_type<tc>, window_params = [{transform_indices = @transform_0, window_bounds = array<i64: 1, 16, 32>}, {pipeline_mode = #tpu.pipeline_mode<synchronous>, transform_indices = @transform_1, window_bounds = array<i64: 32, 128>}, {pipeline_mode = #tpu.pipeline_mode<synchronous>, transform_indices = @transform_2, window_bounds = array<i64: 1, 128>}, {transform_indices = @transform_3, window_bounds = array<i64: 1, 16, 128>}]} {
    %c0 = arith.constant 0 : index
    %c0_0 = arith.constant 0 : index
    %c0_1 = arith.constant 0 : index
    %0 = vector.load %arg1[%c0, %c0_0, %c0_1] : memref<1x16x32xf32, #tpu.memory_space<vmem>>, vector<1x16x32xf32>
    %1 = vector.shape_cast %0 : vector<1x16x32xf32> to vector<16x32xf32>
    %c0_2 = arith.constant 0 : index
    %c0_3 = arith.constant 0 : index
    %2 = vector.load %arg2[%c0_2, %c0_3] : memref<32x128xf32, #tpu.memory_space<vmem>>, vector<32x128xf32>
    %cst = arith.constant dense<0.000000e+00> : vector<16x128xf32>
    %3 = tpu.matmul %1, %2, %cst {dimension_numbers = #tpu.dot_dimension_numbers<[1], [0], [0], [1], [0, 0, 1, 1], [], []>} : vector<16x32xf32>, vector<32x128xf32>, vector<16x128xf32> -> vector<16x128xf32>
    %c0_4 = arith.constant 0 : index
    %c0_5 = arith.constant 0 : index
    %4 = vector.load %arg3[%c0_4, %c0_5] : memref<1x128xf32, #tpu.memory_space<vmem>>, vector<1x128xf32>
    %5 = vector.broadcast %4 : vector<1x128xf32> to vector<16x128xf32>
    %6 = arith.addf %3, %5 : vector<16x128xf32>
    %c0_6 = arith.constant 0 : index
    %c0_7 = arith.constant 0 : index
    %c0_8 = arith.constant 0 : index
    %7 = vector.load %arg4[%c0_6, %c0_7, %c0_8] : memref<1x16x128xf32, #tpu.memory_space<vmem>>, vector<1x16x128xf32>
    %8 = vector.shape_cast %7 : vector<1x16x128xf32> to vector<16x128xf32>
    %9 = vector.shape_cast %6 : vector<16x128xf32> to vector<1x16x128xf32>
    tpu.vector_store %arg4[%c0_6, %c0_7, %c0_8], %9 {strides = array<i32>} : memref<1x16x128xf32, #tpu.memory_space<vmem>>, vector<1x16x128xf32>,
    return
  }
  func.func @transform_0(%arg0: i32) -> (i32, i32, i32) {
    %c0_i32 = arith.constant 0 : i32
    %c0_i32_0 = arith.constant 0 : i32
    %c0_i32_1 = arith.constant 0 : i32
    return %arg0, %c0_i32, %c0_i32_0 : i32, i32, i32
  }
  func.func @transform_1(%arg0: i32) -> (i32, i32) {
    %c0_i32 = arith.constant 0 : i32
    %c0_i32_0 = arith.constant 0 : i32
    %c0_i32_1 = arith.constant 0 : i32
    return %c0_i32, %c0_i32_0 : i32, i32
  }
  func.func @transform_2(%arg0: i32) -> (i32, i32) {
    %c0_i32 = arith.constant 0 : i32
    %c0_i32_0 = arith.constant 0 : i32
    %c0_i32_1 = arith.constant 0 : i32
    return %c0_i32, %c0_i32_0 : i32, i32
  }
  func.func @transform_3(%arg0: i32) -> (i32, i32, i32) {
    %c0_i32 = arith.constant 0 : i32
    %c0_i32_0 = arith.constant 0 : i32
    %c0_i32_1 = arith.constant 0 : i32
    return %arg0, %c0_i32, %c0_i32_0 : i32, i32, i32
  }
}

module attributes {stable_mosaic.version = 11 : i64} {
  func.func @_embed_kernel(%arg0: i32, %arg1: memref<1x16x2xf32, #tpu.memory_space<vmem>>, %arg2: memref<1x2x16xf32, #tpu.memory_space<vmem>>, %arg3: memref<2x32xf32, #tpu.memory_space<vmem>>, %arg4: memref<1x32xf32, #tpu.memory_space<vmem>>, %arg5: memref<16x512xf32, #tpu.memory_space<vmem>>, %arg6: memref<1x512xf32, #tpu.memory_space<vmem>>, %arg7: memref<1x16x32xf32, #tpu.memory_space<vmem>>, %arg8: memref<1x16x512xf32, #tpu.memory_space<vmem>>) attributes {dimension_semantics = [#tpu.dimension_semantics<parallel>], iteration_bounds = array<i64: 2>, scalar_prefetch = 0 : i64, scratch_operands = 0 : i64, tpu.core_type = #tpu.core_type<tc>, window_params = [{transform_indices = @transform_0, window_bounds = array<i64: 1, 16, 2>}, {transform_indices = @transform_1, window_bounds = array<i64: 1, 2, 16>}, {pipeline_mode = #tpu.pipeline_mode<synchronous>, transform_indices = @transform_2, window_bounds = array<i64: 2, 32>}, {pipeline_mode = #tpu.pipeline_mode<synchronous>, transform_indices = @transform_3, window_bounds = array<i64: 1, 32>}, {pipeline_mode = #tpu.pipeline_mode<synchronous>, transform_indices = @transform_4, window_bounds = array<i64: 16, 512>}, {pipeline_mode = #tpu.pipeline_mode<synchronous>, transform_indices = @transform_5, window_bounds = array<i64: 1, 512>}, {transform_indices = @transform_6, window_bounds = array<i64: 1, 16, 32>}, {transform_indices = @transform_7, window_bounds = array<i64: 1, 16, 512>}]} {
    %c0 = arith.constant 0 : index
    %c0_0 = arith.constant 0 : index
    %c0_1 = arith.constant 0 : index
    %0 = vector.load %arg1[%c0, %c0_0, %c0_1] : memref<1x16x2xf32, #tpu.memory_space<vmem>>, vector<1x16x2xf32>
    %1 = vector.shape_cast %0 : vector<1x16x2xf32> to vector<16x2xf32>
    %c0_2 = arith.constant 0 : index
    %c0_3 = arith.constant 0 : index
    %c0_4 = arith.constant 0 : index
    %2 = vector.load %arg2[%c0_2, %c0_3, %c0_4] : memref<1x2x16xf32, #tpu.memory_space<vmem>>, vector<1x2x16xf32>
    %3 = vector.shape_cast %2 : vector<1x2x16xf32> to vector<2x16xf32>
    %4 = vector.extract_strided_slice %1 {offsets = [0, 0], sizes = [16, 1], strides = [1, 1]} : vector<16x2xf32> to vector<16x1xf32>
    %c0_5 = arith.constant 0 : index
    %c0_6 = arith.constant 0 : index
    %5 = vector.load %arg3[%c0_5, %c0_6] : memref<2x32xf32, #tpu.memory_space<vmem>>, vector<1x32xf32>
    %6 = vector.broadcast %4 : vector<16x1xf32> to vector<16x32xf32>
    %7 = vector.broadcast %5 : vector<1x32xf32> to vector<16x32xf32>
    %8 = arith.mulf %6, %7 : vector<16x32xf32>
    %9 = vector.extract_strided_slice %1 {offsets = [0, 1], sizes = [16, 1], strides = [1, 1]} : vector<16x2xf32> to vector<16x1xf32>
    %c1 = arith.constant 1 : index
    %c0_7 = arith.constant 0 : index
    %10 = vector.load %arg3[%c1, %c0_7] : memref<2x32xf32, #tpu.memory_space<vmem>>, vector<1x32xf32>
    %11 = vector.broadcast %9 : vector<16x1xf32> to vector<16x32xf32>
    %12 = vector.broadcast %10 : vector<1x32xf32> to vector<16x32xf32>
    %13 = arith.mulf %11, %12 : vector<16x32xf32>
    %14 = arith.addf %8, %13 : vector<16x32xf32>
    %c0_8 = arith.constant 0 : index
    %c0_9 = arith.constant 0 : index
    %15 = vector.load %arg4[%c0_8, %c0_9] : memref<1x32xf32, #tpu.memory_space<vmem>>, vector<1x32xf32>
    %16 = vector.broadcast %15 : vector<1x32xf32> to vector<16x32xf32>
    %17 = arith.addf %14, %16 : vector<16x32xf32>
    %c0_10 = arith.constant 0 : index
    %c0_11 = arith.constant 0 : index
    %c0_12 = arith.constant 0 : index
    %18 = vector.load %arg7[%c0_10, %c0_11, %c0_12] : memref<1x16x32xf32, #tpu.memory_space<vmem>>, vector<1x16x32xf32>
    %19 = vector.shape_cast %18 : vector<1x16x32xf32> to vector<16x32xf32>
    %20 = vector.shape_cast %17 : vector<16x32xf32> to vector<1x16x32xf32>
    tpu.vector_store %arg7[%c0_10, %c0_11, %c0_12], %20 {strides = array<i32>} : memref<1x16x32xf32, #tpu.memory_space<vmem>>, vector<1x16x32xf32>,
    %21 = vector.extract_strided_slice %1 {offsets = [0, 0], sizes = [16, 1], strides = [1, 1]} : vector<16x2xf32> to vector<16x1xf32>
    %22 = vector.extract_strided_slice %3 {offsets = [0, 0], sizes = [1, 16], strides = [1, 1]} : vector<2x16xf32> to vector<1x16xf32>
    %23 = vector.broadcast %21 : vector<16x1xf32> to vector<16x16xf32>
    %24 = vector.broadcast %22 : vector<1x16xf32> to vector<16x16xf32>
    %25 = arith.subf %23, %24 : vector<16x16xf32>
    %26 = vector.extract_strided_slice %1 {offsets = [0, 1], sizes = [16, 1], strides = [1, 1]} : vector<16x2xf32> to vector<16x1xf32>
    %27 = vector.extract_strided_slice %3 {offsets = [1, 0], sizes = [1, 16], strides = [1, 1]} : vector<2x16xf32> to vector<1x16xf32>
    %28 = vector.broadcast %26 : vector<16x1xf32> to vector<16x16xf32>
    %29 = vector.broadcast %27 : vector<1x16xf32> to vector<16x16xf32>
    %30 = arith.subf %28, %29 : vector<16x16xf32>
    %31 = arith.mulf %25, %25 : vector<16x16xf32>
    %32 = arith.mulf %30, %30 : vector<16x16xf32>
    %33 = arith.addf %31, %32 : vector<16x16xf32>
    %34 = math.sqrt %33 : vector<16x16xf32>
    %c0_13 = arith.constant 0 : index
    %c0_14 = arith.constant 0 : index
    %35 = vector.load %arg5[%c0_13, %c0_14] : memref<16x512xf32, #tpu.memory_space<vmem>>, vector<16x512xf32>
    %cst = arith.constant dense<0.000000e+00> : vector<16x512xf32>
    %36 = tpu.matmul %34, %35, %cst {dimension_numbers = #tpu.dot_dimension_numbers<[1], [0], [0], [1], [0, 0, 1, 1], [], []>} : vector<16x16xf32>, vector<16x512xf32>, vector<16x512xf32> -> vector<16x512xf32>
    %c0_15 = arith.constant 0 : index
    %c0_16 = arith.constant 0 : index
    %37 = vector.load %arg6[%c0_15, %c0_16] : memref<1x512xf32, #tpu.memory_space<vmem>>, vector<1x512xf32>
    %38 = vector.broadcast %37 : vector<1x512xf32> to vector<16x512xf32>
    %39 = arith.addf %36, %38 : vector<16x512xf32>
    %c0_17 = arith.constant 0 : index
    %c0_18 = arith.constant 0 : index
    %c0_19 = arith.constant 0 : index
    %40 = vector.load %arg8[%c0_17, %c0_18, %c0_19] : memref<1x16x512xf32, #tpu.memory_space<vmem>>, vector<1x16x512xf32>
    %41 = vector.shape_cast %40 : vector<1x16x512xf32> to vector<16x512xf32>
    %42 = vector.shape_cast %39 : vector<16x512xf32> to vector<1x16x512xf32>
    tpu.vector_store %arg8[%c0_17, %c0_18, %c0_19], %42 {strides = array<i32>} : memref<1x16x512xf32, #tpu.memory_space<vmem>>, vector<1x16x512xf32>,
    return
  }
  func.func @transform_0(%arg0: i32) -> (i32, i32, i32) {
    %c0_i32 = arith.constant 0 : i32
    %c0_i32_0 = arith.constant 0 : i32
    %c0_i32_1 = arith.constant 0 : i32
    return %arg0, %c0_i32, %c0_i32_0 : i32, i32, i32
  }
  func.func @transform_1(%arg0: i32) -> (i32, i32, i32) {
    %c0_i32 = arith.constant 0 : i32
    %c0_i32_0 = arith.constant 0 : i32
    %c0_i32_1 = arith.constant 0 : i32
    return %arg0, %c0_i32, %c0_i32_0 : i32, i32, i32
  }
  func.func @transform_2(%arg0: i32) -> (i32, i32) {
    %c0_i32 = arith.constant 0 : i32
    %c0_i32_0 = arith.constant 0 : i32
    %c0_i32_1 = arith.constant 0 : i32
    return %c0_i32, %c0_i32_0 : i32, i32
  }
  func.func @transform_3(%arg0: i32) -> (i32, i32) {
    %c0_i32 = arith.constant 0 : i32
    %c0_i32_0 = arith.constant 0 : i32
    %c0_i32_1 = arith.constant 0 : i32
    return %c0_i32, %c0_i32_0 : i32, i32
  }
  func.func @transform_4(%arg0: i32) -> (i32, i32) {
    %c0_i32 = arith.constant 0 : i32
    %c0_i32_0 = arith.constant 0 : i32
    %c0_i32_1 = arith.constant 0 : i32
    return %c0_i32, %c0_i32_0 : i32, i32
  }
  func.func @transform_5(%arg0: i32) -> (i32, i32) {
    %c0_i32 = arith.constant 0 : i32
    %c0_i32_0 = arith.constant 0 : i32
    %c0_i32_1 = arith.constant 0 : i32
    return %c0_i32, %c0_i32_0 : i32, i32
  }
  func.func @transform_6(%arg0: i32) -> (i32, i32, i32) {
    %c0_i32 = arith.constant 0 : i32
    %c0_i32_0 = arith.constant 0 : i32
    %c0_i32_1 = arith.constant 0 : i32
    return %arg0, %c0_i32, %c0_i32_0 : i32, i32, i32
  }
  func.func @transform_7(%arg0: i32) -> (i32, i32, i32) {
    %c0_i32 = arith.constant 0 : i32
    %c0_i32_0 = arith.constant 0 : i32
    %c0_i32_1 = arith.constant 0 : i32
    return %arg0, %c0_i32, %c0_i32_0 : i32, i32, i32
  }
}

module attributes {stable_mosaic.version = 11 : i64} {
  func.func @_msg_stats_kernel(%arg0: i32, %arg1: i32, %arg2: memref<1x8x512xf32, #tpu.memory_space<vmem>>, %arg3: memref<1x8x128xf32, #tpu.memory_space<vmem>>, %arg4: memref<1x1x512xf32, #tpu.memory_space<vmem>>, %arg5: memref<1x1x512xf32, #tpu.memory_space<vmem>>, %arg6: memref<512x32xf32, #tpu.memory_space<vmem>>, %arg7: memref<512x512xf32, #tpu.memory_space<vmem>>, %arg8: memref<32x512xf32, #tpu.memory_space<vmem>>, %arg9: memref<1x512xf32, #tpu.memory_space<vmem>>, %arg10: memref<1x8x32xf32, #tpu.memory_space<vmem>>, %arg11: memref<1x2x32xf32, #tpu.memory_space<vmem>>) attributes {dimension_semantics = [#tpu.dimension_semantics<parallel>, #tpu.dimension_semantics<arbitrary>], iteration_bounds = array<i64: 2, 2>, scalar_prefetch = 0 : i64, scratch_operands = 0 : i64, tpu.core_type = #tpu.core_type<tc>, window_params = [{transform_indices = @transform_0, window_bounds = array<i64: 1, 8, 512>}, {transform_indices = @transform_1, window_bounds = array<i64: 1, 8, 128>}, {transform_indices = @transform_2, window_bounds = array<i64: 1, 1, 512>}, {transform_indices = @transform_3, window_bounds = array<i64: 1, 1, 512>}, {pipeline_mode = #tpu.pipeline_mode<synchronous>, transform_indices = @transform_4, window_bounds = array<i64: 512, 32>}, {pipeline_mode = #tpu.pipeline_mode<synchronous>, transform_indices = @transform_5, window_bounds = array<i64: 512, 512>}, {pipeline_mode = #tpu.pipeline_mode<synchronous>, transform_indices = @transform_6, window_bounds = array<i64: 32, 512>}, {pipeline_mode = #tpu.pipeline_mode<synchronous>, transform_indices = @transform_7, window_bounds = array<i64: 1, 512>}, {transform_indices = @transform_8, window_bounds = array<i64: 1, 8, 32>}, {transform_indices = @transform_9, window_bounds = array<i64: 1, 2, 32>}]} {
    %c0 = arith.constant 0 : index
    %c0_0 = arith.constant 0 : index
    %c0_1 = arith.constant 0 : index
    %0 = vector.load %arg2[%c0, %c0_0, %c0_1] : memref<1x8x512xf32, #tpu.memory_space<vmem>>, vector<1x8x512xf32>
    %1 = vector.shape_cast %0 : vector<1x8x512xf32> to vector<8x512xf32>
    %c0_2 = arith.constant 0 : index
    %c0_3 = arith.constant 0 : index
    %c0_4 = arith.constant 0 : index
    %2 = vector.load %arg3[%c0_2, %c0_3, %c0_4] : memref<1x8x128xf32, #tpu.memory_space<vmem>>, vector<1x8x128xf32>
    %3 = vector.shape_cast %2 : vector<1x8x128xf32> to vector<8x128xf32>
    %4 = vector.extract_strided_slice %3 {offsets = [0, 0], sizes = [8, 32], strides = [1, 1]} : vector<8x128xf32> to vector<8x32xf32>
    %5 = vector.extract_strided_slice %3 {offsets = [0, 64], sizes = [8, 32], strides = [1, 1]} : vector<8x128xf32> to vector<8x32xf32>
    %6 = arith.negf %1 : vector<8x512xf32>
    %7 = math.exp %6 : vector<8x512xf32>
    %cst = arith.constant 1.000000e+00 : f32
    %8 = vector.broadcast %cst : f32 to vector<8x512xf32>
    %9 = arith.addf %8, %7 : vector<8x512xf32>
    %10 = arith.divf %8, %9 : vector<8x512xf32>
    %c0_5 = arith.constant 0 : index
    %c0_6 = arith.constant 0 : index
    %c0_7 = arith.constant 0 : index
    %11 = vector.load %arg4[%c0_5, %c0_6, %c0_7] : memref<1x1x512xf32, #tpu.memory_space<vmem>>, vector<1x1x512xf32>
    %12 = vector.shape_cast %11 : vector<1x1x512xf32> to vector<1x512xf32>
    %13 = vector.broadcast %12 : vector<1x512xf32> to vector<8x512xf32>
    %14 = arith.mulf %10, %13 : vector<8x512xf32>
    %c0_8 = arith.constant 0 : index
    %c0_9 = arith.constant 0 : index
    %15 = vector.load %arg6[%c0_8, %c0_9] : memref<512x32xf32, #tpu.memory_space<vmem>>, vector<512x32xf32>
    %cst_10 = arith.constant dense<0.000000e+00> : vector<8x32xf32>
    %16 = tpu.matmul %14, %15, %cst_10 {dimension_numbers = #tpu.dot_dimension_numbers<[1], [0], [0], [1], [0, 0, 1, 1], [], []>} : vector<8x512xf32>, vector<512x32xf32>, vector<8x32xf32> -> vector<8x32xf32>
    %cst_11 = arith.constant 6.250000e-02 : f32
    %17 = vector.broadcast %cst_11 : f32 to vector<8x32xf32>
    %18 = arith.mulf %16, %17 : vector<8x32xf32>
    %19 = arith.addf %4, %18 : vector<8x32xf32>
    %c0_12 = arith.constant 0 : index
    %c0_13 = arith.constant 0 : index
    %c0_14 = arith.constant 0 : index
    %20 = vector.load %arg10[%c0_12, %c0_13, %c0_14] : memref<1x8x32xf32, #tpu.memory_space<vmem>>, vector<1x8x32xf32>
    %21 = vector.shape_cast %20 : vector<1x8x32xf32> to vector<8x32xf32>
    %22 = vector.shape_cast %19 : vector<8x32xf32> to vector<1x8x32xf32>
    tpu.vector_store %arg10[%c0_12, %c0_13, %c0_14], %22 {strides = array<i32>} : memref<1x8x32xf32, #tpu.memory_space<vmem>>, vector<1x8x32xf32>,
    %c0_15 = arith.constant 0 : index
    %c0_16 = arith.constant 0 : index
    %23 = vector.load %arg7[%c0_15, %c0_16] : memref<512x512xf32, #tpu.memory_space<vmem>>, vector<512x512xf32>
    %cst_17 = arith.constant dense<0.000000e+00> : vector<8x512xf32>
    %24 = tpu.matmul %1, %23, %cst_17 {dimension_numbers = #tpu.dot_dimension_numbers<[1], [0], [0], [1], [0, 0, 1, 1], [], []>} : vector<8x512xf32>, vector<512x512xf32>, vector<8x512xf32> -> vector<8x512xf32>
    %c0_18 = arith.constant 0 : index
    %c0_19 = arith.constant 0 : index
    %25 = vector.load %arg8[%c0_18, %c0_19] : memref<32x512xf32, #tpu.memory_space<vmem>>, vector<32x512xf32>
    %cst_20 = arith.constant dense<0.000000e+00> : vector<8x512xf32>
    %26 = tpu.matmul %5, %25, %cst_20 {dimension_numbers = #tpu.dot_dimension_numbers<[1], [0], [0], [1], [0, 0, 1, 1], [], []>} : vector<8x32xf32>, vector<32x512xf32>, vector<8x512xf32> -> vector<8x512xf32>
    %27 = arith.addf %24, %26 : vector<8x512xf32>
    %c0_21 = arith.constant 0 : index
    %c0_22 = arith.constant 0 : index
    %c0_23 = arith.constant 0 : index
    %28 = vector.load %arg5[%c0_21, %c0_22, %c0_23] : memref<1x1x512xf32, #tpu.memory_space<vmem>>, vector<1x1x512xf32>
    %29 = vector.shape_cast %28 : vector<1x1x512xf32> to vector<1x512xf32>
    %30 = vector.broadcast %29 : vector<1x512xf32> to vector<8x512xf32>
    %31 = arith.addf %27, %30 : vector<8x512xf32>
    %c0_24 = arith.constant 0 : index
    %c0_25 = arith.constant 0 : index
    %32 = vector.load %arg9[%c0_24, %c0_25] : memref<1x512xf32, #tpu.memory_space<vmem>>, vector<1x512xf32>
    %33 = vector.broadcast %32 : vector<1x512xf32> to vector<8x512xf32>
    %34 = arith.addf %31, %33 : vector<8x512xf32>
    %c0_26 = arith.constant 0 : index
    %c0_27 = arith.constant 0 : index
    %35 = vector.load %arg6[%c0_26, %c0_27] : memref<512x32xf32, #tpu.memory_space<vmem>>, vector<512x32xf32>
    %cst_28 = arith.constant dense<0.000000e+00> : vector<8x32xf32>
    %36 = tpu.matmul %34, %35, %cst_28 {dimension_numbers = #tpu.dot_dimension_numbers<[1], [0], [0], [1], [0, 0, 1, 1], [], []>} : vector<8x512xf32>, vector<512x32xf32>, vector<8x32xf32> -> vector<8x32xf32>
    %37 = arith.mulf %34, %34 : vector<8x512xf32>
    %c0_29 = arith.constant 0 : index
    %c0_30 = arith.constant 0 : index
    %38 = vector.load %arg6[%c0_29, %c0_30] : memref<512x32xf32, #tpu.memory_space<vmem>>, vector<512x32xf32>
    %cst_31 = arith.constant dense<0.000000e+00> : vector<8x32xf32>
    %39 = tpu.matmul %37, %38, %cst_31 {dimension_numbers = #tpu.dot_dimension_numbers<[1], [0], [0], [1], [0, 0, 1, 1], [], []>} : vector<8x512xf32>, vector<512x32xf32>, vector<8x32xf32> -> vector<8x32xf32>
    %cst_32 = arith.constant dense<0.000000e+00> : vector<32xf32>
    %40 = vector.multi_reduction <add>, %36, %cst_32 [0] : vector<8x32xf32> to vector<32xf32>
    %41 = vector.shape_cast %40 : vector<32xf32> to vector<1x32xf32>
    %cst_33 = arith.constant dense<0.000000e+00> : vector<32xf32>
    %42 = vector.multi_reduction <add>, %39, %cst_33 [0] : vector<8x32xf32> to vector<32xf32>
    %43 = vector.shape_cast %42 : vector<32xf32> to vector<1x32xf32>
    %c0_i32 = arith.constant 0 : i32
    %44 = arith.cmpi eq, %arg1, %c0_i32 : i32
    %45 = arith.extui %44 : i1 to i32
    %c0_i32_34 = arith.constant 0 : i32
    %46 = arith.cmpi ne, %45, %c0_i32_34 : i32
    scf.if %46 {
      %cst_46 = arith.constant 0.000000e+00 : f32
      %59 = vector.broadcast %cst_46 : f32 to vector<1x2x32xf32>
      %c0_47 = arith.constant 0 : index
      %c0_48 = arith.constant 0 : index
      %c0_49 = arith.constant 0 : index
      %60 = vector.load %arg11[%c0_47, %c0_48, %c0_49] : memref<1x2x32xf32, #tpu.memory_space<vmem>>, vector<1x2x32xf32>
      tpu.vector_store %arg11[%c0_47, %c0_48, %c0_49], %59 {strides = array<i32>} : memref<1x2x32xf32, #tpu.memory_space<vmem>>, vector<1x2x32xf32>,
    } else {
    }
    %c0_35 = arith.constant 0 : index
    %c0_36 = arith.constant 0 : index
    %c0_37 = arith.constant 0 : index
    %47 = vector.load %arg11[%c0_35, %c0_36, %c0_37] : memref<1x2x32xf32, #tpu.memory_space<vmem>>, vector<1x1x32xf32>
    %48 = vector.shape_cast %47 : vector<1x1x32xf32> to vector<1x32xf32>
    %49 = arith.addf %48, %41 : vector<1x32xf32>
    %c0_38 = arith.constant 0 : index
    %c0_39 = arith.constant 0 : index
    %c0_40 = arith.constant 0 : index
    %50 = vector.load %arg11[%c0_38, %c0_39, %c0_40] : memref<1x2x32xf32, #tpu.memory_space<vmem>>, vector<1x1x32xf32>
    %51 = vector.shape_cast %50 : vector<1x1x32xf32> to vector<1x32xf32>
    %52 = vector.shape_cast %49 : vector<1x32xf32> to vector<1x1x32xf32>
    tpu.vector_store %arg11[%c0_38, %c0_39, %c0_40], %52 {strides = array<i32>} : memref<1x2x32xf32, #tpu.memory_space<vmem>>, vector<1x1x32xf32>,
    %c0_41 = arith.constant 0 : index
    %c1 = arith.constant 1 : index
    %c0_42 = arith.constant 0 : index
    %53 = vector.load %arg11[%c0_41, %c1, %c0_42] : memref<1x2x32xf32, #tpu.memory_space<vmem>>, vector<1x1x32xf32>
    %54 = vector.shape_cast %53 : vector<1x1x32xf32> to vector<1x32xf32>
    %55 = arith.addf %54, %43 : vector<1x32xf32>
    %c0_43 = arith.constant 0 : index
    %c1_44 = arith.constant 1 : index
    %c0_45 = arith.constant 0 : index
    %56 = vector.load %arg11[%c0_43, %c1_44, %c0_45] : memref<1x2x32xf32, #tpu.memory_space<vmem>>, vector<1x1x32xf32>
    %57 = vector.shape_cast %56 : vector<1x1x32xf32> to vector<1x32xf32>
    %58 = vector.shape_cast %55 : vector<1x32xf32> to vector<1x1x32xf32>
    tpu.vector_store %arg11[%c0_43, %c1_44, %c0_45], %58 {strides = array<i32>} : memref<1x2x32xf32, #tpu.memory_space<vmem>>, vector<1x1x32xf32>,
    return
  }
  func.func @transform_0(%arg0: i32, %arg1: i32) -> (i32, i32, i32) {
    %c0_i32 = arith.constant 0 : i32
    %c0_i32_0 = arith.constant 0 : i32
    return %arg0, %arg1, %c0_i32 : i32, i32, i32
  }
  func.func @transform_1(%arg0: i32, %arg1: i32) -> (i32, i32, i32) {
    %c0_i32 = arith.constant 0 : i32
    %c0_i32_0 = arith.constant 0 : i32
    return %arg0, %arg1, %c0_i32 : i32, i32, i32
  }
  func.func @transform_2(%arg0: i32, %arg1: i32) -> (i32, i32, i32) {
    %c0_i32 = arith.constant 0 : i32
    %c0_i32_0 = arith.constant 0 : i32
    %c0_i32_1 = arith.constant 0 : i32
    return %arg0, %c0_i32, %c0_i32_0 : i32, i32, i32
  }
  func.func @transform_3(%arg0: i32, %arg1: i32) -> (i32, i32, i32) {
    %c0_i32 = arith.constant 0 : i32
    %c0_i32_0 = arith.constant 0 : i32
    %c0_i32_1 = arith.constant 0 : i32
    return %arg0, %c0_i32, %c0_i32_0 : i32, i32, i32
  }
  func.func @transform_4(%arg0: i32, %arg1: i32) -> (i32, i32) {
    %c0_i32 = arith.constant 0 : i32
    %c0_i32_0 = arith.constant 0 : i32
    %c0_i32_1 = arith.constant 0 : i32
    return %c0_i32, %c0_i32_0 : i32, i32
  }
  func.func @transform_5(%arg0: i32, %arg1: i32) -> (i32, i32) {
    %c0_i32 = arith.constant 0 : i32
    %c0_i32_0 = arith.constant 0 : i32
    %c0_i32_1 = arith.constant 0 : i32
    return %c0_i32, %c0_i32_0 : i32, i32
  }
  func.func @transform_6(%arg0: i32, %arg1: i32) -> (i32, i32) {
    %c0_i32 = arith.constant 0 : i32
    %c0_i32_0 = arith.constant 0 : i32
    %c0_i32_1 = arith.constant 0 : i32
    return %c0_i32, %c0_i32_0 : i32, i32
  }
  func.func @transform_7(%arg0: i32, %arg1: i32) -> (i32, i32) {
    %c0_i32 = arith.constant 0 : i32
    %c0_i32_0 = arith.constant 0 : i32
    %c0_i32_1 = arith.constant 0 : i32
    return %c0_i32, %c0_i32_0 : i32, i32
  }
  func.func @transform_8(%arg0: i32, %arg1: i32) -> (i32, i32, i32) {
    %c0_i32 = arith.constant 0 : i32
    %c0_i32_0 = arith.constant 0 : i32
    return %arg0, %arg1, %c0_i32 : i32, i32, i32
  }
  func.func @transform_9(%arg0: i32, %arg1: i32) -> (i32, i32, i32) {
    %c0_i32 = arith.constant 0 : i32
    %c0_i32_0 = arith.constant 0 : i32
    %c0_i32_1 = arith.constant 0 : i32
    return %arg0, %c0_i32, %c0_i32_0 : i32, i32, i32
  }
}

module attributes {stable_mosaic.version = 11 : i64} {
  func.func @_normalize_kernel(%arg0: i32, %arg1: i32, %arg2: memref<1x8x512xf32, #tpu.memory_space<vmem>>, %arg3: memref<1x8x32xf32, #tpu.memory_space<vmem>>, %arg4: memref<1x8x128xf32, #tpu.memory_space<vmem>>, %arg5: memref<1x1x512xf32, #tpu.memory_space<vmem>>, %arg6: memref<1x8x32xf32, #tpu.memory_space<vmem>>, %arg7: memref<512x512xf32, #tpu.memory_space<vmem>>, %arg8: memref<32x512xf32, #tpu.memory_space<vmem>>, %arg9: memref<1x512xf32, #tpu.memory_space<vmem>>, %arg10: memref<1x512xf32, #tpu.memory_space<vmem>>, %arg11: memref<1x512xf32, #tpu.memory_space<vmem>>, %arg12: memref<1x32xf32, #tpu.memory_space<vmem>>, %arg13: memref<1x32xf32, #tpu.memory_space<vmem>>, %arg14: memref<1x8x32xf32, #tpu.memory_space<vmem>>, %arg15: memref<1x8x512xf32, #tpu.memory_space<vmem>>) attributes {dimension_semantics = [#tpu.dimension_semantics<parallel>, #tpu.dimension_semantics<parallel>], iteration_bounds = array<i64: 2, 2>, scalar_prefetch = 0 : i64, scratch_operands = 0 : i64, tpu.core_type = #tpu.core_type<tc>, window_params = [{transform_indices = @transform_0, window_bounds = array<i64: 1, 8, 512>}, {transform_indices = @transform_1, window_bounds = array<i64: 1, 8, 32>}, {transform_indices = @transform_2, window_bounds = array<i64: 1, 8, 128>}, {transform_indices = @transform_3, window_bounds = array<i64: 1, 1, 512>}, {transform_indices = @transform_4, window_bounds = array<i64: 1, 8, 32>}, {pipeline_mode = #tpu.pipeline_mode<synchronous>, transform_indices = @transform_5, window_bounds = array<i64: 512, 512>}, {pipeline_mode = #tpu.pipeline_mode<synchronous>, transform_indices = @transform_6, window_bounds = array<i64: 32, 512>}, {pipeline_mode = #tpu.pipeline_mode<synchronous>, transform_indices = @transform_7, window_bounds = array<i64: 1, 512>}, {pipeline_mode = #tpu.pipeline_mode<synchronous>, transform_indices = @transform_8, window_bounds = array<i64: 1, 512>}, {pipeline_mode = #tpu.pipeline_mode<synchronous>, transform_indices = @transform_9, window_bounds = array<i64: 1, 512>}, {pipeline_mode = #tpu.pipeline_mode<synchronous>, transform_indices = @transform_10, window_bounds = array<i64: 1, 32>}, {pipeline_mode = #tpu.pipeline_mode<synchronous>, transform_indices = @transform_11, window_bounds = array<i64: 1, 32>}, {transform_indices = @transform_12, window_bounds = array<i64: 1, 8, 32>}, {transform_indices = @transform_13, window_bounds = array<i64: 1, 8, 512>}]} {
    %c0 = arith.constant 0 : index
    %c0_0 = arith.constant 0 : index
    %c0_1 = arith.constant 0 : index
    %0 = vector.load %arg2[%c0, %c0_0, %c0_1] : memref<1x8x512xf32, #tpu.memory_space<vmem>>, vector<1x8x512xf32>
    %1 = vector.shape_cast %0 : vector<1x8x512xf32> to vector<8x512xf32>
    %c0_2 = arith.constant 0 : index
    %c0_3 = arith.constant 0 : index
    %c0_4 = arith.constant 0 : index
    %2 = vector.load %arg4[%c0_2, %c0_3, %c0_4] : memref<1x8x128xf32, #tpu.memory_space<vmem>>, vector<1x8x128xf32>
    %3 = vector.shape_cast %2 : vector<1x8x128xf32> to vector<8x128xf32>
    %4 = vector.extract_strided_slice %3 {offsets = [0, 64], sizes = [8, 32], strides = [1, 1]} : vector<8x128xf32> to vector<8x32xf32>
    %c0_5 = arith.constant 0 : index
    %c0_6 = arith.constant 0 : index
    %c0_7 = arith.constant 0 : index
    %5 = vector.load %arg6[%c0_5, %c0_6, %c0_7] : memref<1x8x32xf32, #tpu.memory_space<vmem>>, vector<1x8x32xf32>
    %6 = vector.shape_cast %5 : vector<1x8x32xf32> to vector<8x32xf32>
    %c0_8 = arith.constant 0 : index
    %c0_9 = arith.constant 0 : index
    %7 = vector.load %arg12[%c0_8, %c0_9] : memref<1x32xf32, #tpu.memory_space<vmem>>, vector<1x32xf32>
    %8 = vector.broadcast %7 : vector<1x32xf32> to vector<8x32xf32>
    %9 = arith.mulf %6, %8 : vector<8x32xf32>
    %c0_10 = arith.constant 0 : index
    %c0_11 = arith.constant 0 : index
    %10 = vector.load %arg13[%c0_10, %c0_11] : memref<1x32xf32, #tpu.memory_space<vmem>>, vector<1x32xf32>
    %11 = vector.broadcast %10 : vector<1x32xf32> to vector<8x32xf32>
    %12 = arith.addf %9, %11 : vector<8x32xf32>
    %c0_12 = arith.constant 0 : index
    %c0_13 = arith.constant 0 : index
    %c0_14 = arith.constant 0 : index
    %13 = vector.load %arg3[%c0_12, %c0_13, %c0_14] : memref<1x8x32xf32, #tpu.memory_space<vmem>>, vector<1x8x32xf32>
    %14 = vector.shape_cast %13 : vector<1x8x32xf32> to vector<8x32xf32>
    %15 = arith.negf %12 : vector<8x32xf32>
    %16 = math.exp %15 : vector<8x32xf32>
    %cst = arith.constant 1.000000e+00 : f32
    %17 = vector.broadcast %cst : f32 to vector<8x32xf32>
    %18 = arith.addf %17, %16 : vector<8x32xf32>
    %19 = arith.divf %17, %18 : vector<8x32xf32>
    %20 = arith.mulf %12, %19 : vector<8x32xf32>
    %21 = arith.addf %14, %20 : vector<8x32xf32>
    %c0_15 = arith.constant 0 : index
    %c0_16 = arith.constant 0 : index
    %c0_17 = arith.constant 0 : index
    %22 = vector.load %arg14[%c0_15, %c0_16, %c0_17] : memref<1x8x32xf32, #tpu.memory_space<vmem>>, vector<1x8x32xf32>
    %23 = vector.shape_cast %22 : vector<1x8x32xf32> to vector<8x32xf32>
    %24 = vector.shape_cast %21 : vector<8x32xf32> to vector<1x8x32xf32>
    tpu.vector_store %arg14[%c0_15, %c0_16, %c0_17], %24 {strides = array<i32>} : memref<1x8x32xf32, #tpu.memory_space<vmem>>, vector<1x8x32xf32>,
    %c0_18 = arith.constant 0 : index
    %c0_19 = arith.constant 0 : index
    %25 = vector.load %arg7[%c0_18, %c0_19] : memref<512x512xf32, #tpu.memory_space<vmem>>, vector<512x512xf32>
    %cst_20 = arith.constant dense<0.000000e+00> : vector<8x512xf32>
    %26 = tpu.matmul %1, %25, %cst_20 {dimension_numbers = #tpu.dot_dimension_numbers<[1], [0], [0], [1], [0, 0, 1, 1], [], []>} : vector<8x512xf32>, vector<512x512xf32>, vector<8x512xf32> -> vector<8x512xf32>
    %c0_21 = arith.constant 0 : index
    %c0_22 = arith.constant 0 : index
    %27 = vector.load %arg8[%c0_21, %c0_22] : memref<32x512xf32, #tpu.memory_space<vmem>>, vector<32x512xf32>
    %cst_23 = arith.constant dense<0.000000e+00> : vector<8x512xf32>
    %28 = tpu.matmul %4, %27, %cst_23 {dimension_numbers = #tpu.dot_dimension_numbers<[1], [0], [0], [1], [0, 0, 1, 1], [], []>} : vector<8x32xf32>, vector<32x512xf32>, vector<8x512xf32> -> vector<8x512xf32>
    %29 = arith.addf %26, %28 : vector<8x512xf32>
    %c0_24 = arith.constant 0 : index
    %c0_25 = arith.constant 0 : index
    %c0_26 = arith.constant 0 : index
    %30 = vector.load %arg5[%c0_24, %c0_25, %c0_26] : memref<1x1x512xf32, #tpu.memory_space<vmem>>, vector<1x1x512xf32>
    %31 = vector.shape_cast %30 : vector<1x1x512xf32> to vector<1x512xf32>
    %32 = vector.broadcast %31 : vector<1x512xf32> to vector<8x512xf32>
    %33 = arith.addf %29, %32 : vector<8x512xf32>
    %c0_27 = arith.constant 0 : index
    %c0_28 = arith.constant 0 : index
    %34 = vector.load %arg9[%c0_27, %c0_28] : memref<1x512xf32, #tpu.memory_space<vmem>>, vector<1x512xf32>
    %35 = vector.broadcast %34 : vector<1x512xf32> to vector<8x512xf32>
    %36 = arith.addf %33, %35 : vector<8x512xf32>
    %c0_29 = arith.constant 0 : index
    %c0_30 = arith.constant 0 : index
    %37 = vector.load %arg10[%c0_29, %c0_30] : memref<1x512xf32, #tpu.memory_space<vmem>>, vector<1x512xf32>
    %38 = vector.broadcast %37 : vector<1x512xf32> to vector<8x512xf32>
    %39 = arith.mulf %36, %38 : vector<8x512xf32>
    %c0_31 = arith.constant 0 : index
    %c0_32 = arith.constant 0 : index
    %40 = vector.load %arg11[%c0_31, %c0_32] : memref<1x512xf32, #tpu.memory_space<vmem>>, vector<1x512xf32>
    %41 = vector.broadcast %40 : vector<1x512xf32> to vector<8x512xf32>
    %42 = arith.addf %39, %41 : vector<8x512xf32>
    %43 = arith.negf %42 : vector<8x512xf32>
    %44 = math.exp %43 : vector<8x512xf32>
    %cst_33 = arith.constant 1.000000e+00 : f32
    %45 = vector.broadcast %cst_33 : f32 to vector<8x512xf32>
    %46 = arith.addf %45, %44 : vector<8x512xf32>
    %47 = arith.divf %45, %46 : vector<8x512xf32>
    %48 = arith.mulf %42, %47 : vector<8x512xf32>
    %49 = arith.addf %1, %48 : vector<8x512xf32>
    %c0_34 = arith.constant 0 : index
    %c0_35 = arith.constant 0 : index
    %c0_36 = arith.constant 0 : index
    %50 = vector.load %arg15[%c0_34, %c0_35, %c0_36] : memref<1x8x512xf32, #tpu.memory_space<vmem>>, vector<1x8x512xf32>
    %51 = vector.shape_cast %50 : vector<1x8x512xf32> to vector<8x512xf32>
    %52 = vector.shape_cast %49 : vector<8x512xf32> to vector<1x8x512xf32>
    tpu.vector_store %arg15[%c0_34, %c0_35, %c0_36], %52 {strides = array<i32>} : memref<1x8x512xf32, #tpu.memory_space<vmem>>, vector<1x8x512xf32>,
    return
  }
  func.func @transform_0(%arg0: i32, %arg1: i32) -> (i32, i32, i32) {
    %c0_i32 = arith.constant 0 : i32
    %c0_i32_0 = arith.constant 0 : i32
    return %arg0, %arg1, %c0_i32 : i32, i32, i32
  }
  func.func @transform_1(%arg0: i32, %arg1: i32) -> (i32, i32, i32) {
    %c0_i32 = arith.constant 0 : i32
    %c0_i32_0 = arith.constant 0 : i32
    return %arg0, %arg1, %c0_i32 : i32, i32, i32
  }
  func.func @transform_2(%arg0: i32, %arg1: i32) -> (i32, i32, i32) {
    %c0_i32 = arith.constant 0 : i32
    %c0_i32_0 = arith.constant 0 : i32
    return %arg0, %arg1, %c0_i32 : i32, i32, i32
  }
  func.func @transform_3(%arg0: i32, %arg1: i32) -> (i32, i32, i32) {
    %c0_i32 = arith.constant 0 : i32
    %c0_i32_0 = arith.constant 0 : i32
    %c0_i32_1 = arith.constant 0 : i32
    return %arg0, %c0_i32, %c0_i32_0 : i32, i32, i32
  }
  func.func @transform_4(%arg0: i32, %arg1: i32) -> (i32, i32, i32) {
    %c0_i32 = arith.constant 0 : i32
    %c0_i32_0 = arith.constant 0 : i32
    return %arg0, %arg1, %c0_i32 : i32, i32, i32
  }
  func.func @transform_5(%arg0: i32, %arg1: i32) -> (i32, i32) {
    %c0_i32 = arith.constant 0 : i32
    %c0_i32_0 = arith.constant 0 : i32
    %c0_i32_1 = arith.constant 0 : i32
    return %c0_i32, %c0_i32_0 : i32, i32
  }
  func.func @transform_6(%arg0: i32, %arg1: i32) -> (i32, i32) {
    %c0_i32 = arith.constant 0 : i32
    %c0_i32_0 = arith.constant 0 : i32
    %c0_i32_1 = arith.constant 0 : i32
    return %c0_i32, %c0_i32_0 : i32, i32
  }
  func.func @transform_7(%arg0: i32, %arg1: i32) -> (i32, i32) {
    %c0_i32 = arith.constant 0 : i32
    %c0_i32_0 = arith.constant 0 : i32
    %c0_i32_1 = arith.constant 0 : i32
    return %c0_i32, %c0_i32_0 : i32, i32
  }
  func.func @transform_8(%arg0: i32, %arg1: i32) -> (i32, i32) {
    %c0_i32 = arith.constant 0 : i32
    %c0_i32_0 = arith.constant 0 : i32
    %c0_i32_1 = arith.constant 0 : i32
    return %c0_i32, %c0_i32_0 : i32, i32
  }
  func.func @transform_9(%arg0: i32, %arg1: i32) -> (i32, i32) {
    %c0_i32 = arith.constant 0 : i32
    %c0_i32_0 = arith.constant 0 : i32
    %c0_i32_1 = arith.constant 0 : i32
    return %c0_i32, %c0_i32_0 : i32, i32
  }
  func.func @transform_10(%arg0: i32, %arg1: i32) -> (i32, i32) {
    %c0_i32 = arith.constant 0 : i32
    %c0_i32_0 = arith.constant 0 : i32
    %c0_i32_1 = arith.constant 0 : i32
    return %c0_i32, %c0_i32_0 : i32, i32
  }
  func.func @transform_11(%arg0: i32, %arg1: i32) -> (i32, i32) {
    %c0_i32 = arith.constant 0 : i32
    %c0_i32_0 = arith.constant 0 : i32
    %c0_i32_1 = arith.constant 0 : i32
    return %c0_i32, %c0_i32_0 : i32, i32
  }
  func.func @transform_12(%arg0: i32, %arg1: i32) -> (i32, i32, i32) {
    %c0_i32 = arith.constant 0 : i32
    %c0_i32_0 = arith.constant 0 : i32
    return %arg0, %arg1, %c0_i32 : i32, i32, i32
  }
  func.func @transform_13(%arg0: i32, %arg1: i32) -> (i32, i32, i32) {
    %c0_i32 = arith.constant 0 : i32
    %c0_i32_0 = arith.constant 0 : i32
    return %arg0, %arg1, %c0_i32 : i32, i32, i32
  }
}

module attributes {stable_mosaic.version = 11 : i64} {
  func.func @_normalize_kernel(%arg0: i32, %arg1: i32, %arg2: memref<1x8x512xf32, #tpu.memory_space<vmem>>, %arg3: memref<1x8x32xf32, #tpu.memory_space<vmem>>, %arg4: memref<1x8x128xf32, #tpu.memory_space<vmem>>, %arg5: memref<1x1x512xf32, #tpu.memory_space<vmem>>, %arg6: memref<1x8x32xf32, #tpu.memory_space<vmem>>, %arg7: memref<512x512xf32, #tpu.memory_space<vmem>>, %arg8: memref<32x512xf32, #tpu.memory_space<vmem>>, %arg9: memref<1x512xf32, #tpu.memory_space<vmem>>, %arg10: memref<1x512xf32, #tpu.memory_space<vmem>>, %arg11: memref<1x512xf32, #tpu.memory_space<vmem>>, %arg12: memref<1x32xf32, #tpu.memory_space<vmem>>, %arg13: memref<1x32xf32, #tpu.memory_space<vmem>>, %arg14: memref<1x8x32xf32, #tpu.memory_space<vmem>>, %arg15: memref<1x8x512xf32, #tpu.memory_space<vmem>>) attributes {dimension_semantics = [#tpu.dimension_semantics<parallel>, #tpu.dimension_semantics<parallel>], iteration_bounds = array<i64: 2, 2>, scalar_prefetch = 0 : i64, scratch_operands = 0 : i64, tpu.core_type = #tpu.core_type<tc>, window_params = [{transform_indices = @transform_0, window_bounds = array<i64: 1, 8, 512>}, {transform_indices = @transform_1, window_bounds = array<i64: 1, 8, 32>}, {transform_indices = @transform_2, window_bounds = array<i64: 1, 8, 128>}, {transform_indices = @transform_3, window_bounds = array<i64: 1, 1, 512>}, {transform_indices = @transform_4, window_bounds = array<i64: 1, 8, 32>}, {pipeline_mode = #tpu.pipeline_mode<synchronous>, transform_indices = @transform_5, window_bounds = array<i64: 512, 512>}, {pipeline_mode = #tpu.pipeline_mode<synchronous>, transform_indices = @transform_6, window_bounds = array<i64: 32, 512>}, {pipeline_mode = #tpu.pipeline_mode<synchronous>, transform_indices = @transform_7, window_bounds = array<i64: 1, 512>}, {pipeline_mode = #tpu.pipeline_mode<synchronous>, transform_indices = @transform_8, window_bounds = array<i64: 1, 512>}, {pipeline_mode = #tpu.pipeline_mode<synchronous>, transform_indices = @transform_9, window_bounds = array<i64: 1, 512>}, {pipeline_mode = #tpu.pipeline_mode<synchronous>, transform_indices = @transform_10, window_bounds = array<i64: 1, 32>}, {pipeline_mode = #tpu.pipeline_mode<synchronous>, transform_indices = @transform_11, window_bounds = array<i64: 1, 32>}, {transform_indices = @transform_12, window_bounds = array<i64: 1, 8, 32>}, {transform_indices = @transform_13, window_bounds = array<i64: 1, 8, 512>}]} {
    %c0 = arith.constant 0 : index
    %c0_0 = arith.constant 0 : index
    %c0_1 = arith.constant 0 : index
    %0 = vector.load %arg2[%c0, %c0_0, %c0_1] : memref<1x8x512xf32, #tpu.memory_space<vmem>>, vector<1x8x512xf32>
    %1 = vector.shape_cast %0 : vector<1x8x512xf32> to vector<8x512xf32>
    %c0_2 = arith.constant 0 : index
    %c0_3 = arith.constant 0 : index
    %c0_4 = arith.constant 0 : index
    %2 = vector.load %arg4[%c0_2, %c0_3, %c0_4] : memref<1x8x128xf32, #tpu.memory_space<vmem>>, vector<1x8x128xf32>
    %3 = vector.shape_cast %2 : vector<1x8x128xf32> to vector<8x128xf32>
    %4 = vector.extract_strided_slice %3 {offsets = [0, 64], sizes = [8, 32], strides = [1, 1]} : vector<8x128xf32> to vector<8x32xf32>
    %c0_5 = arith.constant 0 : index
    %c0_6 = arith.constant 0 : index
    %c0_7 = arith.constant 0 : index
    %5 = vector.load %arg6[%c0_5, %c0_6, %c0_7] : memref<1x8x32xf32, #tpu.memory_space<vmem>>, vector<1x8x32xf32>
    %6 = vector.shape_cast %5 : vector<1x8x32xf32> to vector<8x32xf32>
    %c0_8 = arith.constant 0 : index
    %c0_9 = arith.constant 0 : index
    %7 = vector.load %arg12[%c0_8, %c0_9] : memref<1x32xf32, #tpu.memory_space<vmem>>, vector<1x32xf32>
    %8 = vector.broadcast %7 : vector<1x32xf32> to vector<8x32xf32>
    %9 = arith.mulf %6, %8 : vector<8x32xf32>
    %c0_10 = arith.constant 0 : index
    %c0_11 = arith.constant 0 : index
    %10 = vector.load %arg13[%c0_10, %c0_11] : memref<1x32xf32, #tpu.memory_space<vmem>>, vector<1x32xf32>
    %11 = vector.broadcast %10 : vector<1x32xf32> to vector<8x32xf32>
    %12 = arith.addf %9, %11 : vector<8x32xf32>
    %c0_12 = arith.constant 0 : index
    %c0_13 = arith.constant 0 : index
    %c0_14 = arith.constant 0 : index
    %13 = vector.load %arg3[%c0_12, %c0_13, %c0_14] : memref<1x8x32xf32, #tpu.memory_space<vmem>>, vector<1x8x32xf32>
    %14 = vector.shape_cast %13 : vector<1x8x32xf32> to vector<8x32xf32>
    %15 = arith.negf %12 : vector<8x32xf32>
    %16 = math.exp %15 : vector<8x32xf32>
    %cst = arith.constant 1.000000e+00 : f32
    %17 = vector.broadcast %cst : f32 to vector<8x32xf32>
    %18 = arith.addf %17, %16 : vector<8x32xf32>
    %19 = arith.divf %17, %18 : vector<8x32xf32>
    %20 = arith.mulf %12, %19 : vector<8x32xf32>
    %21 = arith.addf %14, %20 : vector<8x32xf32>
    %c0_15 = arith.constant 0 : index
    %c0_16 = arith.constant 0 : index
    %c0_17 = arith.constant 0 : index
    %22 = vector.load %arg14[%c0_15, %c0_16, %c0_17] : memref<1x8x32xf32, #tpu.memory_space<vmem>>, vector<1x8x32xf32>
    %23 = vector.shape_cast %22 : vector<1x8x32xf32> to vector<8x32xf32>
    %24 = vector.shape_cast %21 : vector<8x32xf32> to vector<1x8x32xf32>
    tpu.vector_store %arg14[%c0_15, %c0_16, %c0_17], %24 {strides = array<i32>} : memref<1x8x32xf32, #tpu.memory_space<vmem>>, vector<1x8x32xf32>,
    %c0_18 = arith.constant 0 : index
    %c0_19 = arith.constant 0 : index
    %25 = vector.load %arg7[%c0_18, %c0_19] : memref<512x512xf32, #tpu.memory_space<vmem>>, vector<512x512xf32>
    %cst_20 = arith.constant dense<0.000000e+00> : vector<8x512xf32>
    %26 = tpu.matmul %1, %25, %cst_20 {dimension_numbers = #tpu.dot_dimension_numbers<[1], [0], [0], [1], [0, 0, 1, 1], [], []>} : vector<8x512xf32>, vector<512x512xf32>, vector<8x512xf32> -> vector<8x512xf32>
    %c0_21 = arith.constant 0 : index
    %c0_22 = arith.constant 0 : index
    %27 = vector.load %arg8[%c0_21, %c0_22] : memref<32x512xf32, #tpu.memory_space<vmem>>, vector<32x512xf32>
    %cst_23 = arith.constant dense<0.000000e+00> : vector<8x512xf32>
    %28 = tpu.matmul %4, %27, %cst_23 {dimension_numbers = #tpu.dot_dimension_numbers<[1], [0], [0], [1], [0, 0, 1, 1], [], []>} : vector<8x32xf32>, vector<32x512xf32>, vector<8x512xf32> -> vector<8x512xf32>
    %29 = arith.addf %26, %28 : vector<8x512xf32>
    %c0_24 = arith.constant 0 : index
    %c0_25 = arith.constant 0 : index
    %c0_26 = arith.constant 0 : index
    %30 = vector.load %arg5[%c0_24, %c0_25, %c0_26] : memref<1x1x512xf32, #tpu.memory_space<vmem>>, vector<1x1x512xf32>
    %31 = vector.shape_cast %30 : vector<1x1x512xf32> to vector<1x512xf32>
    %32 = vector.broadcast %31 : vector<1x512xf32> to vector<8x512xf32>
    %33 = arith.addf %29, %32 : vector<8x512xf32>
    %c0_27 = arith.constant 0 : index
    %c0_28 = arith.constant 0 : index
    %34 = vector.load %arg9[%c0_27, %c0_28] : memref<1x512xf32, #tpu.memory_space<vmem>>, vector<1x512xf32>
    %35 = vector.broadcast %34 : vector<1x512xf32> to vector<8x512xf32>
    %36 = arith.addf %33, %35 : vector<8x512xf32>
    %c0_29 = arith.constant 0 : index
    %c0_30 = arith.constant 0 : index
    %37 = vector.load %arg10[%c0_29, %c0_30] : memref<1x512xf32, #tpu.memory_space<vmem>>, vector<1x512xf32>
    %38 = vector.broadcast %37 : vector<1x512xf32> to vector<8x512xf32>
    %39 = arith.mulf %36, %38 : vector<8x512xf32>
    %c0_31 = arith.constant 0 : index
    %c0_32 = arith.constant 0 : index
    %40 = vector.load %arg11[%c0_31, %c0_32] : memref<1x512xf32, #tpu.memory_space<vmem>>, vector<1x512xf32>
    %41 = vector.broadcast %40 : vector<1x512xf32> to vector<8x512xf32>
    %42 = arith.addf %39, %41 : vector<8x512xf32>
    %43 = arith.negf %42 : vector<8x512xf32>
    %44 = math.exp %43 : vector<8x512xf32>
    %cst_33 = arith.constant 1.000000e+00 : f32
    %45 = vector.broadcast %cst_33 : f32 to vector<8x512xf32>
    %46 = arith.addf %45, %44 : vector<8x512xf32>
    %47 = arith.divf %45, %46 : vector<8x512xf32>
    %48 = arith.mulf %42, %47 : vector<8x512xf32>
    %49 = arith.addf %1, %48 : vector<8x512xf32>
    %c0_34 = arith.constant 0 : index
    %c0_35 = arith.constant 0 : index
    %c0_36 = arith.constant 0 : index
    %50 = vector.load %arg15[%c0_34, %c0_35, %c0_36] : memref<1x8x512xf32, #tpu.memory_space<vmem>>, vector<1x8x512xf32>
    %51 = vector.shape_cast %50 : vector<1x8x512xf32> to vector<8x512xf32>
    %52 = vector.shape_cast %49 : vector<8x512xf32> to vector<1x8x512xf32>
    tpu.vector_store %arg15[%c0_34, %c0_35, %c0_36], %52 {strides = array<i32>} : memref<1x8x512xf32, #tpu.memory_space<vmem>>, vector<1x8x512xf32>,
    return
  }
  func.func @transform_0(%arg0: i32, %arg1: i32) -> (i32, i32, i32) {
    %c0_i32 = arith.constant 0 : i32
    %c0_i32_0 = arith.constant 0 : i32
    return %arg0, %arg1, %c0_i32 : i32, i32, i32
  }
  func.func @transform_1(%arg0: i32, %arg1: i32) -> (i32, i32, i32) {
    %c0_i32 = arith.constant 0 : i32
    %c0_i32_0 = arith.constant 0 : i32
    return %arg0, %arg1, %c0_i32 : i32, i32, i32
  }
  func.func @transform_2(%arg0: i32, %arg1: i32) -> (i32, i32, i32) {
    %c0_i32 = arith.constant 0 : i32
    %c0_i32_0 = arith.constant 0 : i32
    return %arg0, %arg1, %c0_i32 : i32, i32, i32
  }
  func.func @transform_3(%arg0: i32, %arg1: i32) -> (i32, i32, i32) {
    %c0_i32 = arith.constant 0 : i32
    %c0_i32_0 = arith.constant 0 : i32
    %c0_i32_1 = arith.constant 0 : i32
    return %arg0, %c0_i32, %c0_i32_0 : i32, i32, i32
  }
  func.func @transform_4(%arg0: i32, %arg1: i32) -> (i32, i32, i32) {
    %c0_i32 = arith.constant 0 : i32
    %c0_i32_0 = arith.constant 0 : i32
    return %arg0, %arg1, %c0_i32 : i32, i32, i32
  }
  func.func @transform_5(%arg0: i32, %arg1: i32) -> (i32, i32) {
    %c0_i32 = arith.constant 0 : i32
    %c0_i32_0 = arith.constant 0 : i32
    %c0_i32_1 = arith.constant 0 : i32
    return %c0_i32, %c0_i32_0 : i32, i32
  }
  func.func @transform_6(%arg0: i32, %arg1: i32) -> (i32, i32) {
    %c0_i32 = arith.constant 0 : i32
    %c0_i32_0 = arith.constant 0 : i32
    %c0_i32_1 = arith.constant 0 : i32
    return %c0_i32, %c0_i32_0 : i32, i32
  }
  func.func @transform_7(%arg0: i32, %arg1: i32) -> (i32, i32) {
    %c0_i32 = arith.constant 0 : i32
    %c0_i32_0 = arith.constant 0 : i32
    %c0_i32_1 = arith.constant 0 : i32
    return %c0_i32, %c0_i32_0 : i32, i32
  }
  func.func @transform_8(%arg0: i32, %arg1: i32) -> (i32, i32) {
    %c0_i32 = arith.constant 0 : i32
    %c0_i32_0 = arith.constant 0 : i32
    %c0_i32_1 = arith.constant 0 : i32
    return %c0_i32, %c0_i32_0 : i32, i32
  }
  func.func @transform_9(%arg0: i32, %arg1: i32) -> (i32, i32) {
    %c0_i32 = arith.constant 0 : i32
    %c0_i32_0 = arith.constant 0 : i32
    %c0_i32_1 = arith.constant 0 : i32
    return %c0_i32, %c0_i32_0 : i32, i32
  }
  func.func @transform_10(%arg0: i32, %arg1: i32) -> (i32, i32) {
    %c0_i32 = arith.constant 0 : i32
    %c0_i32_0 = arith.constant 0 : i32
    %c0_i32_1 = arith.constant 0 : i32
    return %c0_i32, %c0_i32_0 : i32, i32
  }
  func.func @transform_11(%arg0: i32, %arg1: i32) -> (i32, i32) {
    %c0_i32 = arith.constant 0 : i32
    %c0_i32_0 = arith.constant 0 : i32
    %c0_i32_1 = arith.constant 0 : i32
    return %c0_i32, %c0_i32_0 : i32, i32
  }
  func.func @transform_12(%arg0: i32, %arg1: i32) -> (i32, i32, i32) {
    %c0_i32 = arith.constant 0 : i32
    %c0_i32_0 = arith.constant 0 : i32
    return %arg0, %arg1, %c0_i32 : i32, i32, i32
  }
  func.func @transform_13(%arg0: i32, %arg1: i32) -> (i32, i32, i32) {
    %c0_i32 = arith.constant 0 : i32
    %c0_i32_0 = arith.constant 0 : i32
    return %arg0, %arg1, %c0_i32 : i32, i32, i32
  }
}

</mosaic_0001>

<bundles_post_ra>
// kernel: tile.94
= control target key start
LH: loop header
LB: loop body
LE: loop exit
PB: predicated region body
PF: predicated region fallthrough
CT: control target
= control target key end

     0   :  { %vm118_vm0 = vcmask 1043458   ;;  %s158_s6 = smov 3  ;;  %vm123_vm1 = vcmask 1045508   ;;  %vm128_vm2 = vcmask 1047558   ;;  %s161_s9 = smov 12  ;;  %vm3_vm3 = vcmask 261120   ;;  %s2654_s0 = inlined_call_operand.vmem [shape: f32[32,16,32], index: 0, kind: input, shape index: {}]   ;;  %s2655_s1 = inlined_call_operand.vmem [shape: f32[32,512], index: 1, kind: output, shape index: {}]  }
   0x1   :  { %v1268_v0 = vld [vmem:[%s2654_s0 + $0x103] ss:$16 sm:%s158_s6]   ;;  %s166_s10 = smov 48  ;;  %s171_s15 = smov 192  ;;  %vm132_vm4 = vcmask 1048320   ;;  %vm499_vm5 = vcmask 785920  }
   0x2   :  { %v1269_v1 = vld [vmem:[%s2654_s0 + $0x103] ss:$16 sm:%s161_s9]   ;;  %s113_s16 = smov 3  ;;  %s116_s21 = smov 12  ;;  %vm866_vm6 = vcmask 523520  }
   0x3   :  { %v1270_v2 = vld [vmem:[%s2654_s0 + $0x103] ss:$16 sm:%s166_s10]   ;;  %v164_v3 = vsel %vm118_vm0, %v1269_v1, %v1268_v0  ;;  %s121_s22 = smov 48  ;;  %s126_s27 = smov 192 }
   0x4   :  { %v1271_v4 = vld [vmem:[%s2654_s0 + $0x103] ss:$16 sm:%s171_s15]   ;;  %v169_v6 = vsel %vm123_vm1, %v1270_v2, %v164_v3  ;;  %s181_s28 = smov 3  ;;  %s184_s4 = smov 12 }
   0x5   :  { %v1259_v5 = vld [vmem:[%s2654_s0 + $0x3] ss:$16 sm:%s113_s16]   ;;  %v174_v9 = vsel %vm128_vm2, %v1271_v4, %v169_v6  ;;  %s189_s5 = smov 48  ;;  %s1499_s6 = smov 96  }
   0x6   :  { %v1260_v7 = vld [vmem:[%s2654_s0 + $0x3] ss:$16 sm:%s116_s21]   ;;  %175 = vrot.lane.b32.xlu1 %v174_v9, %s1499_s6  ;;  %s194_s9 = smov 192  ;;  %s135_s10 = smov 3 }
   0x7   :  { %v1261_v8 = vld [vmem:[%s2654_s0 + $0x3] ss:$16 sm:%s121_s22]   ;;  %v119_v10 = vsel %vm118_vm0, %v1260_v7, %v1259_v5  ;;  %s138_s15 = smov 12  ;;  %s143_s16 = smov 48 }
   0x8   :  { %v1262_v11 = vld [vmem:[%s2654_s0 + $0x3] ss:$16 sm:%s126_s27]   ;;  %v124_v13 = vsel %vm123_vm1, %v1261_v8, %v119_v10  ;;  %s148_s19 = smov 192  ;;  %s273_s20 = smov 3 }
   0x9   :  { %v1273_v12 = vld [vmem:[%s2654_s0 + $0x183] ss:$16 sm:%s181_s28]   ;;  %v129_v15 = vsel %vm128_vm2, %v1262_v11, %v124_v13  ;;  %s276_s25 = smov 12  ;;  %s281_s26 = smov 48  ;;  %v1293_v25 = vld [vmem:[%s2654_s0 + $0x187] ss:$16 sm:%s273_s20]  }
   0xa   :  { %v1274_v14 = vld [vmem:[%s2654_s0 + $0x183] ss:$16 sm:%s184_s4]   ;;  %130 = vrot.lane.b32.xlu0 %v129_v15, %s1499_s6  ;;  %s286_s2 = smov 192  ;;  %s250_s3 = smov 3 }
   0xb   :  { %v187_v16 = vsel %vm118_vm0, %v1274_v14, %v1273_v12  ;;  %v1275_v17 = vld [vmem:[%s2654_s0 + $0x183] ss:$16 sm:%s189_s5]   ;;  %v1294_v28 = vld [vmem:[%s2654_s0 + $0x187] ss:$16 sm:%s276_s25]   ;;  %s253_s7 = smov 12  ;;  %s258_s8 = smov 48 }
   0xc   :  { %v1276_v18 = vld [vmem:[%s2654_s0 + $0x183] ss:$16 sm:%s194_s9]   ;;  %v192_v19 = vsel %vm123_vm1, %v1275_v17, %v187_v16  ;;  %v1288_v29 = vld [vmem:[%s2654_s0 + $0x107] ss:$16 sm:%s250_s3]   ;;  %s204_s11 = smov 3  ;;  %v279_v31 = vsel %vm118_vm0, %v1294_v28, %v1293_v25  ;;  %s212_s17 = smov 48 }
   0xd   :  { %v1263_v20 = vld [vmem:[%s2654_s0 + $0x83] ss:$16 sm:%s135_s10]   ;;  %v197_v26 = vsel %vm128_vm2, %v1276_v18, %v192_v19  ;;  %v1295_v32 = vld [vmem:[%s2654_s0 + $0x187] ss:$16 sm:%s281_s26]   ;;  %s263_s22 = smov 192  ;;  %s217_s23 = smov 192 }
   0xe   :  { %v1264_v21 = vld [vmem:[%s2654_s0 + $0x83] ss:$16 sm:%s138_s15]   ;;  %v1289_v33 = vld [vmem:[%s2654_s0 + $0x107] ss:$16 sm:%s253_s7]   ;;  %s342_s28 = smov 3  ;;  %s345_s29 = smov 12  ;;  %v284_v39 = vsel %vm123_vm1, %v1295_v32, %v279_v31 }
   0xf   :  { %v1265_v22 = vld [vmem:[%s2654_s0 + $0x83] ss:$16 sm:%s143_s16]   ;;  %v141_v23 = vsel %vm118_vm0, %v1264_v21, %v1263_v20  ;;  %s207_s16 = smov 12  ;;  %198 = vrot.lane.b32.xlu1 %v197_v26, %s1499_s6  ;;  %v256_v36 = vsel %vm118_vm0, %v1289_v33, %v1288_v29  ;;  %s322_s9 = smov 12 }
  0x10   :  { %v1266_v24 = vld [vmem:[%s2654_s0 + $0x83] ss:$16 sm:%s148_s19]   ;;  %v146_v27 = vsel %vm123_vm1, %v1265_v22, %v141_v23  ;;  %v1296_v34 = vld [vmem:[%s2654_s0 + $0x187] ss:$16 sm:%s286_s2]   ;;  %s350_s14 = smov 48  ;;  %s327_s15 = smov 48 }
  0x11   :  { %v151_v30 = vsel %vm128_vm2, %v1266_v24, %v146_v27  ;;  %v1290_v35 = vld [vmem:[%s2654_s0 + $0x107] ss:$16 sm:%s258_s8]   ;;  %s319_s8 = smov 3  ;;  %v1308_v47 = vld [vmem:[%s2654_s0 + $0x10b] ss:$16 sm:%s342_s28]   ;;  %v289_v49 = vsel %vm128_vm2, %v1296_v34, %v284_v39  ;;  %s240_s28 = smov 192 }
  0x12   :  { %v1278_v37 = vld [vmem:[%s2654_s0 + $0x7] ss:$16 sm:%s204_s11]   ;;  %152 = vrot.lane.b32.xlu0 %v151_v30, %s1499_s6  ;;  %v261_v45 = vsel %vm123_vm1, %v1290_v35, %v256_v36  ;;  %s332_s2 = smov 192  ;;  %s411_s10 = smov 3 }
  0x13   :  { %v1279_v38 = vld [vmem:[%s2654_s0 + $0x7] ss:$16 sm:%s207_s16]   ;;  %v1309_v48 = vld [vmem:[%s2654_s0 + $0x10b] ss:$16 sm:%s345_s29]   ;;  %s355_s16 = smov 192  ;;  %s414_s11 = smov 12 }
  0x14   :  { %v210_v40 = vsel %vm118_vm0, %v1279_v38, %v1278_v37  ;;  %v1280_v41 = vld [vmem:[%s2654_s0 + $0x7] ss:$16 sm:%s212_s17]   ;;  %s227_s17 = smov 3  ;;  %v1303_v50 = vld [vmem:[%s2654_s0 + $0x8b] ss:$16 sm:%s319_s8]   ;;  %v348_v53 = vsel %vm118_vm0, %v1309_v48, %v1308_v47  ;;  %s391_s18 = smov 12 }
  0x15   :  { %v1291_v42 = vld [vmem:[%s2654_s0 + $0x107] ss:$16 sm:%s263_s22]   ;;  %v215_v43 = vsel %vm123_vm1, %v1280_v41, %v210_v40  ;;  %v1304_v51 = vld [vmem:[%s2654_s0 + $0x8b] ss:$16 sm:%s322_s9]   ;;  %s230_s22 = smov 12  ;;  %s296_s24 = smov 3 }
  0x16   :  { %v1281_v44 = vld [vmem:[%s2654_s0 + $0x7] ss:$16 sm:%s217_s23]   ;;  %s235_s23 = smov 48  ;;  %v266_v52 = vsel %vm128_vm2, %v1291_v42, %v261_v45  ;;  %v1310_v54 = vld [vmem:[%s2654_s0 + $0x10b] ss:$16 sm:%s350_s14]   ;;  %v325_v58 = vsel %vm118_vm0, %v1304_v51, %v1303_v50  ;;  %s419_s14 = smov 48 }
  0x17   :  { %v220_v46 = vsel %vm128_vm2, %v1281_v44, %v215_v43  ;;  %v1305_v55 = vld [vmem:[%s2654_s0 + $0x8b] ss:$16 sm:%s327_s15]   ;;  %290 = vrot.lane.b32.xlu1 %v289_v49, %s1499_s6  ;;  %v353_v61 = vsel %vm123_vm1, %v1310_v54, %v348_v53  ;;  %s299_s27 = smov 12  ;;  %s304_s3 = smov 48 }
  0x18   :  { %221 = vrot.lane.b32.xlu2 %v220_v46, %s1499_s6  ;;  %v1311_v56 = vld [vmem:[%s2654_s0 + $0x10b] ss:$16 sm:%s355_s16]   ;;  %v330_v2 = vsel %vm123_vm1, %v1305_v55, %v325_v58  ;;  %s309_s4 = smov 192  ;;  %s424_s5 = smov 192 }
  0x19   :  { %v1283_v57 = vld [vmem:[%s2654_s0 + $0x87] ss:$16 sm:%s227_s17]   ;;  %v1306_v0 = vld [vmem:[%s2654_s0 + $0x8b] ss:$16 sm:%s332_s2]   ;;  %s388_s17 = smov 3  ;;  %v358_v6 = vsel %vm128_vm2, %v1311_v56, %v353_v61  ;;  %s483_s19 = smov 12 }
  0x1a   :  { %v1284_v59 = vld [vmem:[%s2654_s0 + $0x87] ss:$16 sm:%s230_s22]   ;;  %267 = vrot.lane.b32.xlu0 %v266_v52, %s1499_s6  ;;  %v335_v10 = vsel %vm128_vm2, %v1306_v0, %v330_v2  ;;  %s488_s22 = smov 48  ;;  %s457_s25 = smov 3 }
  0x1b   :  { %v1285_v60 = vld [vmem:[%s2654_s0 + $0x87] ss:$16 sm:%s235_s23]   ;;  %v233_v62 = vsel %vm118_vm0, %v1284_v59, %v1283_v57  ;;  %v1323_v4 = vld [vmem:[%s2654_s0 + $0x8f] ss:$16 sm:%s411_s10]   ;;  %s396_s23 = smov 48  ;;  %s460_s26 = smov 12 }
  0x1c   :  { %v1286_v63 = vld [vmem:[%s2654_s0 + $0x87] ss:$16 sm:%s240_s28]   ;;  %v238_v1 = vsel %vm123_vm1, %v1285_v60, %v233_v62  ;;  %v1324_v5 = vld [vmem:[%s2654_s0 + $0x8f] ss:$16 sm:%s414_s11]   ;;  %s401_s11 = smov 192  ;;  %s365_s2 = smov 3 }
  0x1d   :  { %v243_v3 = vsel %vm128_vm2, %v1286_v63, %v238_v1  ;;  %v1325_v7 = vld [vmem:[%s2654_s0 + $0x8f] ss:$16 sm:%s419_s14]   ;;  %v417_v11 = vsel %vm118_vm0, %v1324_v5, %v1323_v4  ;;  %v1298_v13 = vld [vmem:[%s2654_s0 + $0xb] ss:$16 sm:%s296_s24]   ;;  %s373_s7 = smov 48  ;;  %s465_s12 = smov 48 }
  0x1e   :  { %v1318_v8 = vld [vmem:[%s2654_s0 + $0xf] ss:$16 sm:%s388_s17]   ;;  %v1299_v14 = vld [vmem:[%s2654_s0 + $0xb] ss:$16 sm:%s299_s27]   ;;  %v422_v19 = vsel %vm123_vm1, %v1325_v7, %v417_v11  ;;  %s378_s13 = smov 192  ;;  %s493_s14 = smov 192 }
  0x1f   :  { %v1319_v9 = vld [vmem:[%s2654_s0 + $0xf] ss:$16 sm:%s391_s18]   ;;  %359 = vrot.lane.b32.xlu1 %v358_v6, %s1499_s6  ;;  %v302_v16 = vsel %vm118_vm0, %v1299_v14, %v1298_v13  ;;  %s480_s18 = smov 3  ;;  %s551_s27 = smov 12 }
  0x20   :  { %244 = vrot.lane.b32.xlu2 %v243_v3, %s1499_s6  ;;  %v1320_v12 = vld [vmem:[%s2654_s0 + $0xf] ss:$16 sm:%s396_s23]   ;;  %v394_v15 = vsel %vm118_vm0, %v1319_v9, %v1318_v8  ;;  %s556_s30 = smov 48  ;;  %s533_s21 = smov 48 }
  0x21   :  { %v1300_v17 = vld [vmem:[%s2654_s0 + $0xb] ss:$16 sm:%s304_s3]   ;;  %v1326_v20 = vld [vmem:[%s2654_s0 + $0x8f] ss:$16 sm:%s424_s5]   ;;  %v399_v24 = vsel %vm123_vm1, %v1320_v12, %v394_v15  ;;  %s368_s3 = smov 12  ;;  %s528_s5 = smov 12 }
  0x22   :  { %v1301_v18 = vld [vmem:[%s2654_s0 + $0xb] ss:$16 sm:%s309_s4]   ;;  %336 = vrot.lane.b32.xlu0 %v335_v10, %s1499_s6  ;;  %v307_v21 = vsel %vm123_vm1, %v1300_v17, %v302_v16  ;;  %v427_v27 = vsel %vm128_vm2, %v1326_v20, %v422_v19  ;;  %s561_s24 = smov 192  ;;  %s1500_s29 = smov 64  }
  0x23   :  { %v1321_v22 = vld [vmem:[%s2654_s0 + $0xf] ss:$16 sm:%s401_s11]   ;;  %v312_v23 = vsel %vm128_vm2, %v1301_v18, %v307_v21  ;;  %v1338_v25 = vld [vmem:[%s2654_s0 + $0x2] ss:$16 sm:%s480_s18]   ;;  %s447_s18 = smov 192  ;;  %s617_s4 = smov 3 }
  0x24   :  { %v1339_v26 = vld [vmem:[%s2654_s0 + $0x2] ss:$16 sm:%s483_s19]   ;;  %v1333_v29 = vld [vmem:[%s2654_s0 + $0x18f] ss:$16 sm:%s457_s25]   ;;  %v404_v31 = vsel %vm128_vm2, %v1321_v22, %v399_v24  ;;  %s470_s19 = smov 192  ;;  %s620_s8 = smov 12 }
  0x25   :  { %v1340_v28 = vld [vmem:[%s2654_s0 + $0x2] ss:$16 sm:%s488_s22]   ;;  %v1334_v30 = vld [vmem:[%s2654_s0 + $0x18f] ss:$16 sm:%s460_s26]   ;;  %v486_v32 = vsel %vm118_vm0, %v1339_v26, %v1338_v25  ;;  %s548_s26 = smov 3  ;;  %s594_s9 = smov 3 }
  0x26   :  { %v1313_v33 = vld [vmem:[%s2654_s0 + $0x18b] ss:$16 sm:%s365_s2]   ;;  %v463_v37 = vsel %vm118_vm0, %v1334_v30, %v1333_v29  ;;  %v1335_v38 = vld [vmem:[%s2654_s0 + $0x18f] ss:$16 sm:%s465_s12]   ;;  %v491_v41 = vsel %vm123_vm1, %v1340_v28, %v486_v32  ;;  %s525_s2 = smov 3  ;;  %s437_s12 = smov 12 }
  0x27   :  { %v1314_v34 = vld [vmem:[%s2654_s0 + $0x18b] ss:$16 sm:%s368_s3]   ;;  %428 = vrot.lane.b32.xlu1 %v427_v27, %s1499_s6  ;;  %v468_v45 = vsel %vm123_vm1, %v1335_v38, %v463_v37  ;;  %s515_s25 = smov 192  ;;  %s666_s20 = smov 12 }
  0x28   :  { %313 = vrot.lane.b32.xlu2 %v312_v23, %s1499_s6  ;;  %v371_v35 = vsel %vm118_vm0, %v1314_v34, %v1313_v33  ;;  %v1315_v36 = vld [vmem:[%s2654_s0 + $0x18b] ss:$16 sm:%s373_s7]   ;;  %s434_s7 = smov 3  ;;  %s571_s23 = smov 3 }
  0x29   :  { %v376_v39 = vsel %vm123_vm1, %v1315_v36, %v371_v35  ;;  %v1316_v40 = vld [vmem:[%s2654_s0 + $0x18b] ss:$16 sm:%s378_s13]   ;;  %v1341_v42 = vld [vmem:[%s2654_s0 + $0x2] ss:$16 sm:%s493_s14]   ;;  %s442_s13 = smov 48  ;;  %s689_s14 = smov 12 }
  0x2a   :  { %405 = vrot.lane.b32.xlu0 %v404_v31, %s1499_s6  ;;  %v381_v43 = vsel %vm128_vm2, %v1316_v40, %v376_v39  ;;  %v1336_v44 = vld [vmem:[%s2654_s0 + $0x18f] ss:$16 sm:%s470_s19]   ;;  %v496_v48 = vsel %vm128_vm2, %v1341_v42, %v491_v41  ;;  %s505_s19 = smov 12  ;;  %s579_s28 = smov 48 }
  0x2b   :  { %v1352_v46 = vld [vmem:[%s2654_s0 + $0x182] ss:$16 sm:%s548_s26]   ;;  %v1328_v52 = vld [vmem:[%s2654_s0 + $0x10f] ss:$16 sm:%s434_s7]   ;;  %v473_v53 = vsel %vm128_vm2, %v1336_v44, %v468_v45  ;;  %s584_s7 = smov 192  ;;  %s699_s10 = smov 192 }
  0x2c   :  { %v1353_v47 = vld [vmem:[%s2654_s0 + $0x182] ss:$16 sm:%s551_s27]   ;;  %v1329_v55 = vld [vmem:[%s2654_s0 + $0x10f] ss:$16 sm:%s437_s12]   ;;  %s625_s12 = smov 48  ;;  %s574_s27 = smov 12 }
  0x2d   :  { %v1354_v49 = vld [vmem:[%s2654_s0 + $0x182] ss:$16 sm:%s556_s30]   ;;  %v554_v54 = vsel %vm118_vm0, %v1353_v47, %v1352_v46  ;;  %v1330_v56 = vld [vmem:[%s2654_s0 + $0x10f] ss:$16 sm:%s442_s13]   ;;  %s538_s30 = smov 192  ;;  %v440_v57 = vsel %vm118_vm0, %v1329_v55, %v1328_v52  ;;  %s597_s13 = smov 12 }
  0x2e   :  { %v1347_v50 = vld [vmem:[%s2654_s0 + $0x102] ss:$16 sm:%s525_s2]   ;;  %v1331_v58 = vld [vmem:[%s2654_s0 + $0x10f] ss:$16 sm:%s447_s18]   ;;  %v445_v61 = vsel %vm123_vm1, %v1330_v56, %v440_v57  ;;  %v559_v62 = vsel %vm123_vm1, %v1354_v49, %v554_v54  ;;  %s502_s18 = smov 3  ;;  %s602_s2 = smov 48 }
  0x2f   :  { %v1348_v51 = vld [vmem:[%s2654_s0 + $0x102] ss:$16 sm:%s528_s5]   ;;  %497 = vrot.lane.b32.xlu1 %v496_v48, %s1500_s29  ;;  %v450_v0 = vsel %vm128_vm2, %v1331_v58, %v445_v61  ;;  %s671_s11 = smov 48  ;;  %s758_s22 = smov 12 }
  0x30   :  { %382 = vrot.lane.b32.xlu2 %v381_v43, %s1499_s6  ;;  %v531_v59 = vsel %vm118_vm0, %v1348_v51, %v1347_v50  ;;  %v1349_v60 = vld [vmem:[%s2654_s0 + $0x102] ss:$16 sm:%s533_s21]   ;;  %s755_s21 = smov 3  ;;  %s732_s26 = smov 3 }
  0x31   :  { %v1355_v63 = vld [vmem:[%s2654_s0 + $0x182] ss:$16 sm:%s561_s24]   ;;  %v1367_v2 = vld [vmem:[%s2654_s0 + $0x106] ss:$16 sm:%s617_s4]   ;;  %v536_v3 = vsel %vm123_vm1, %v1349_v60, %v531_v59  ;;  %s510_s24 = smov 48  ;;  %s653_s15 = smov 192 }
  0x32   :  { %474 = vrot.lane.b32.xlu0 %v473_v53, %s1499_s6  ;;  %v1350_v1 = vld [vmem:[%s2654_s0 + $0x102] ss:$16 sm:%s538_s30]   ;;  %v564_v6 = vsel %vm128_vm2, %v1355_v63, %v559_v62  ;;  %s630_s30 = smov 192  ;;  %s801_s16 = smov 3 }
  0x33   :  { %v1368_v4 = vld [vmem:[%s2654_s0 + $0x106] ss:$16 sm:%s620_s8]   ;;  %v1342_v9 = vld [vmem:[%s2654_s0 + $0x82] ss:$16 sm:%s502_s18]   ;;  %v541_v11 = vsel %vm128_vm2, %v1350_v1, %v536_v3  ;;  %s607_s8 = smov 192  ;;  %s676_s18 = smov 192 }
  0x34   :  { %v1362_v5 = vld [vmem:[%s2654_s0 + $0x86] ss:$16 sm:%s594_s9]   ;;  %v1343_v10 = vld [vmem:[%s2654_s0 + $0x82] ss:$16 sm:%s505_s19]   ;;  %v623_v12 = vsel %vm118_vm0, %v1368_v4, %v1367_v2  ;;  %s663_s19 = smov 3  ;;  %s648_s9 = smov 48 }
  0x35   :  { %v1369_v7 = vld [vmem:[%s2654_s0 + $0x106] ss:$16 sm:%s625_s12]   ;;  %v508_v13 = vsel %vm118_vm0, %v1343_v10, %v1342_v9  ;;  %v1344_v14 = vld [vmem:[%s2654_s0 + $0x82] ss:$16 sm:%s510_s24]   ;;  %s804_s17 = smov 12  ;;  %s814_s5 = smov 192 }
  0x36   :  { %v1363_v8 = vld [vmem:[%s2654_s0 + $0x86] ss:$16 sm:%s597_s13]   ;;  %v1345_v15 = vld [vmem:[%s2654_s0 + $0x82] ss:$16 sm:%s515_s25]   ;;  %v513_v16 = vsel %vm123_vm1, %v1344_v14, %v508_v13  ;;  %s686_s13 = smov 3  ;;  %v628_v20 = vsel %vm123_vm1, %v1369_v7, %v623_v12  ;;  %s869_s24 = smov 3 }
  0x37   :  { %565 = vrot.lane.b32.xlu1 %v564_v6, %s1500_s29  ;;  %v1370_v17 = vld [vmem:[%s2654_s0 + $0x106] ss:$16 sm:%s630_s30]   ;;  %v600_v18 = vsel %vm118_vm0, %v1363_v8, %v1362_v5  ;;  %v518_v22 = vsel %vm128_vm2, %v1345_v15, %v513_v16  ;;  %s694_s30 = smov 48  ;;  %s872_s25 = smov 12 }
  0x38   :  { %451 = vrot.lane.b32.xlu2 %v450_v0, %s1499_s6  ;;  %v1364_v19 = vld [vmem:[%s2654_s0 + $0x86] ss:$16 sm:%s602_s2]   ;;  %v633_v28 = vsel %vm128_vm2, %v1370_v17, %v628_v20  ;;  %s643_s2 = smov 12  ;;  %s745_s6 = smov 192 }
  0x39   :  { %v1365_v21 = vld [vmem:[%s2654_s0 + $0x86] ss:$16 sm:%s607_s8]   ;;  %v1382_v23 = vld [vmem:[%s2654_s0 + $0x8a] ss:$16 sm:%s686_s13]   ;;  %v605_v25 = vsel %vm123_vm1, %v1364_v19, %v600_v18  ;;  %s735_s8 = smov 12  ;;  %s791_s4 = smov 192 }
  0x3a   :  { %542 = vrot.lane.b32.xlu0 %v541_v11, %s1500_s29  ;;  %v1383_v24 = vld [vmem:[%s2654_s0 + $0x8a] ss:$16 sm:%s689_s14]   ;;  %v610_v32 = vsel %vm128_vm2, %v1365_v21, %v605_v25  ;;  %s882_s14 = smov 192  ;;  %s860_s13 = smov 192 }
  0x3b   :  { %v1377_v26 = vld [vmem:[%s2654_s0 + $0xa] ss:$16 sm:%s663_s19]   ;;  %v1357_v29 = vld [vmem:[%s2654_s0 + $0x6] ss:$16 sm:%s571_s23]   ;;  %v692_v33 = vsel %vm118_vm0, %v1383_v24, %v1382_v23  ;;  %s722_s23 = smov 192  ;;  %s850_s19 = smov 12 }
  0x3c   :  { %v1378_v27 = vld [vmem:[%s2654_s0 + $0xa] ss:$16 sm:%s666_s20]   ;;  %v1358_v30 = vld [vmem:[%s2654_s0 + $0x6] ss:$16 sm:%s574_s27]   ;;  %s640_s27 = smov 3  ;;  %s1033_s3 = smov 12 }
  0x3d   :  { %v1359_v31 = vld [vmem:[%s2654_s0 + $0x6] ss:$16 sm:%s579_s28]   ;;  %v1384_v34 = vld [vmem:[%s2654_s0 + $0x8a] ss:$16 sm:%s694_s30]   ;;  %v577_v35 = vsel %vm118_vm0, %v1358_v30, %v1357_v29  ;;  %v669_v39 = vsel %vm118_vm0, %v1378_v27, %v1377_v26  ;;  %s824_s28 = smov 3  ;;  %s827_s30 = smov 12 }
  0x3e   :  { %v1360_v36 = vld [vmem:[%s2654_s0 + $0x6] ss:$16 sm:%s584_s7]   ;;  %v582_v37 = vsel %vm123_vm1, %v1359_v31, %v577_v35  ;;  %v1385_v38 = vld [vmem:[%s2654_s0 + $0x8a] ss:$16 sm:%s699_s10]   ;;  %v697_v41 = vsel %vm123_vm1, %v1384_v34, %v692_v33  ;;  %s763_s10 = smov 48  ;;  %s709_s7 = smov 3 }
  0x3f   :  { %634 = vrot.lane.b32.xlu1 %v633_v28, %s1500_s29  ;;  %v1379_v40 = vld [vmem:[%s2654_s0 + $0xa] ss:$16 sm:%s671_s11]   ;;  %v587_v43 = vsel %vm128_vm2, %v1360_v36, %v582_v37  ;;  %v702_v49 = vsel %vm128_vm2, %v1385_v38, %v697_v41  ;;  %s717_s11 = smov 48  ;;  %s1007_s12 = smov 3 }
  0x40   :  { %519 = vrot.lane.b32.xlu2 %v518_v22, %s1500_s29  ;;  %v1380_v42 = vld [vmem:[%s2654_s0 + $0xa] ss:$16 sm:%s676_s18]   ;;  %v674_v46 = vsel %vm123_vm1, %v1379_v40, %v669_v39  ;;  %s768_s18 = smov 192  ;;  %s928_s20 = smov 192 }
  0x41   :  { %v1397_v44 = vld [vmem:[%s2654_s0 + $0xe] ss:$16 sm:%s755_s21]   ;;  %v1392_v47 = vld [vmem:[%s2654_s0 + $0x18a] ss:$16 sm:%s732_s26]   ;;  %s740_s21 = smov 48  ;;  %v679_v54 = vsel %vm128_vm2, %v1380_v42, %v674_v46  ;;  %s918_s26 = smov 12 }
  0x42   :  { %611 = vrot.lane.b32.xlu0 %v610_v32, %s1500_s29  ;;  %v1398_v45 = vld [vmem:[%s2654_s0 + $0xe] ss:$16 sm:%s758_s22]   ;;  %s1015_s22 = smov 48 }
  0x43   :  { %v1372_v48 = vld [vmem:[%s2654_s0 + $0x186] ss:$16 sm:%s640_s27]   ;;  %v1393_v51 = vld [vmem:[%s2654_s0 + $0x18a] ss:$16 sm:%s735_s8]   ;;  %v761_v55 = vsel %vm118_vm0, %v1398_v45, %v1397_v44  ;;  %s712_s8 = smov 12  ;;  %s900_s27 = smov 48 }
  0x44   :  { %v1373_v50 = vld [vmem:[%s2654_s0 + $0x186] ss:$16 sm:%s643_s2]   ;;  %v1399_v56 = vld [vmem:[%s2654_s0 + $0xe] ss:$16 sm:%s763_s10]   ;;  %v738_v60 = vsel %vm118_vm0, %v1393_v51, %v1392_v47  ;;  %s809_s2 = smov 48  ;;  %s895_s10 = smov 12 }
  0x45   :  { %v646_v52 = vsel %vm118_vm0, %v1373_v50, %v1372_v48  ;;  %v1374_v53 = vld [vmem:[%s2654_s0 + $0x186] ss:$16 sm:%s648_s9]   ;;  %v1400_v59 = vld [vmem:[%s2654_s0 + $0xe] ss:$16 sm:%s768_s18]   ;;  %v766_v62 = vsel %vm123_vm1, %v1399_v56, %v761_v55  ;;  %s832_s18 = smov 48  ;;  %s892_s9 = smov 3 }
  0x46   :  { %v651_v57 = vsel %vm123_vm1, %v1374_v53, %v646_v52  ;;  %v1375_v58 = vld [vmem:[%s2654_s0 + $0x186] ss:$16 sm:%s653_s15]   ;;  %v1394_v61 = vld [vmem:[%s2654_s0 + $0x18a] ss:$16 sm:%s740_s21]   ;;  %v771_v6 = vsel %vm128_vm2, %v1400_v59, %v766_v62  ;;  %s951_s21 = smov 192  ;;  %s1102_s15 = smov 12 }
  0x47   :  { %703 = vrot.lane.b32.xlu1 %v702_v49, %s1500_s29  ;;  %v1395_v63 = vld [vmem:[%s2654_s0 + $0x18a] ss:$16 sm:%s745_s6]   ;;  %v656_v0 = vsel %vm128_vm2, %v1375_v58, %v651_v57  ;;  %v743_v3 = vsel %vm123_vm1, %v1394_v61, %v738_v60  ;;  %s837_s6 = smov 192 }
  0x48   :  { %588 = vrot.lane.b32.xlu2 %v587_v43, %s1500_s29  ;;  %v1412_v1 = vld [vmem:[%s2654_s0 + $0x18e] ss:$16 sm:%s824_s28]   ;;  %v748_v11 = vsel %vm128_vm2, %v1395_v63, %v743_v3  ;;  %s1079_s28 = smov 12 }
  0x49   :  { %v1413_v2 = vld [vmem:[%s2654_s0 + $0x18e] ss:$16 sm:%s827_s30]   ;;  %v1387_v4 = vld [vmem:[%s2654_s0 + $0x10a] ss:$16 sm:%s709_s7]   ;;  %s938_s30 = smov 3  ;;  %s997_s7 = smov 192 }
  0x4a   :  { %680 = vrot.lane.b32.xlu0 %v679_v54, %s1500_s29  ;;  %v1388_v5 = vld [vmem:[%s2654_s0 + $0x10a] ss:$16 sm:%s712_s8]   ;;  %v830_v12 = vsel %vm118_vm0, %v1413_v2, %v1412_v1  ;;  %s987_s8 = smov 12 }
  0x4b   :  { %v715_v7 = vsel %vm118_vm0, %v1388_v5, %v1387_v4  ;;  %v1389_v8 = vld [vmem:[%s2654_s0 + $0x10a] ss:$16 sm:%s717_s11]   ;;  %v1407_v9 = vld [vmem:[%s2654_s0 + $0x10e] ss:$16 sm:%s801_s16]   ;;  %s778_s11 = smov 3  ;;  %s781_s16 = smov 12 }
  0x4c   :  { %v1408_v10 = vld [vmem:[%s2654_s0 + $0x10e] ss:$16 sm:%s804_s17]   ;;  %v720_v14 = vsel %vm123_vm1, %v1389_v8, %v715_v7  ;;  %v1390_v15 = vld [vmem:[%s2654_s0 + $0x10a] ss:$16 sm:%s722_s23]   ;;  %s786_s17 = smov 48 }
  0x4d   :  { %v1414_v13 = vld [vmem:[%s2654_s0 + $0x18e] ss:$16 sm:%s832_s18]   ;;  %v807_v17 = vsel %vm118_vm0, %v1408_v10, %v1407_v9  ;;  %v725_v21 = vsel %vm128_vm2, %v1390_v15, %v720_v14  ;;  %v1426_v22 = vld [vmem:[%s2654_s0 + $0x101] ss:$16 sm:%s892_s9]   ;;  %s847_s18 = smov 3  ;;  %s1084_s9 = smov 48 }
  0x4e   :  { %v1415_v16 = vld [vmem:[%s2654_s0 + $0x18e] ss:$16 sm:%s837_s6]   ;;  %v835_v19 = vsel %vm123_vm1, %v1414_v13, %v830_v12  ;;  %v1427_v23 = vld [vmem:[%s2654_s0 + $0x101] ss:$16 sm:%s895_s10]   ;;  %s969_s10 = smov 48  ;;  %s1030_s6 = smov 3 }
  0x4f   :  { %772 = vrot.lane.b32.xlu1 %v771_v6, %s1500_s29  ;;  %v1409_v18 = vld [vmem:[%s2654_s0 + $0x10e] ss:$16 sm:%s809_s2]   ;;  %v840_v28 = vsel %vm128_vm2, %v1415_v16, %v835_v19  ;;  %v898_v33 = vsel %vm118_vm0, %v1427_v23, %v1426_v22  ;;  %s941_s2 = smov 12  ;;  %v1223_v8 = vld [vmem:[%s2654_s0 + $0x80] ss:$4 sm:$0xff]  }
  0x50   :  { %657 = vrot.lane.b32.xlu2 %v656_v0, %s1500_s29  ;;  %v1410_v20 = vld [vmem:[%s2654_s0 + $0x10e] ss:$16 sm:%s814_s5]   ;;  %v812_v25 = vsel %vm123_vm1, %v1409_v18, %v807_v17  ;;  %s905_s5 = smov 192  ;;  %1224 = vst.msk [vmem:[%s2655_s1 + $0x20] ss:$8 sm:$0xf] %vm3_vm3, %v1223_v8  }
  0x51   :  { %v1402_v24 = vld [vmem:[%s2654_s0 + $0x8e] ss:$16 sm:%s778_s11]   ;;  %v1421_v30 = vld [vmem:[%s2654_s0 + $0x81] ss:$16 sm:%s869_s24]   ;;  %s877_s11 = smov 48  ;;  %v817_v32 = vsel %vm128_vm2, %v1410_v20, %v812_v25  ;;  %s964_s24 = smov 12 }
  0x52   :  { %749 = vrot.lane.b32.xlu0 %v748_v11, %s1500_s29  ;;  %v1403_v26 = vld [vmem:[%s2654_s0 + $0x8e] ss:$16 sm:%s781_s16]   ;;  %1225 = vst.msk [vmem:[%s2655_s1 + $0x1] ss:$8 sm:$0xf0] %vm3_vm3, %v1223_v8   ;;  %s1056_s16 = smov 12 }
  0x53   :  { %v1404_v27 = vld [vmem:[%s2654_s0 + $0x8e] ss:$16 sm:%s786_s17]   ;;  %v784_v29 = vsel %vm118_vm0, %v1403_v26, %v1402_v24  ;;  %v1422_v31 = vld [vmem:[%s2654_s0 + $0x81] ss:$16 sm:%s872_s25]   ;;  %s961_s17 = smov 3  ;;  %s855_s25 = smov 48 }
  0x54   :  { %v1428_v34 = vld [vmem:[%s2654_s0 + $0x101] ss:$16 sm:%s900_s27]   ;;  %v789_v35 = vsel %vm123_vm1, %v1404_v27, %v784_v29  ;;  %v1405_v36 = vld [vmem:[%s2654_s0 + $0x8e] ss:$16 sm:%s791_s4]   ;;  %v875_v38 = vsel %vm118_vm0, %v1422_v31, %v1421_v30  ;;  %s923_s4 = smov 48  ;;  %s1076_s27 = smov 3 }
  0x55   :  { %v1429_v37 = vld [vmem:[%s2654_s0 + $0x101] ss:$16 sm:%s905_s5]   ;;  %v903_v40 = vsel %vm123_vm1, %v1428_v34, %v898_v33  ;;  %v794_v42 = vsel %vm128_vm2, %v1405_v36, %v789_v35  ;;  %v1441_v43 = vld [vmem:[%s2654_s0 + $0x85] ss:$16 sm:%s961_s17]   ;;  %s1038_s17 = smov 48  ;;  %s1061_s5 = smov 48 }
  0x56   :  { %v1423_v39 = vld [vmem:[%s2654_s0 + $0x81] ss:$16 sm:%s877_s11]   ;;  %v1442_v47 = vld [vmem:[%s2654_s0 + $0x85] ss:$16 sm:%s964_s24]   ;;  %v908_v50 = vsel %vm128_vm2, %v1429_v37, %v903_v40  ;;  %s915_s24 = smov 3  ;;  %s1099_s11 = smov 3 }
  0x57   :  { %841 = vrot.lane.b32.xlu1 %v840_v28, %s1500_s29  ;;  %v1424_v41 = vld [vmem:[%s2654_s0 + $0x81] ss:$16 sm:%s882_s14]   ;;  %v880_v46 = vsel %vm123_vm1, %v1423_v39, %v875_v38  ;;  %v967_v54 = vsel %vm118_vm0, %v1442_v47, %v1441_v43  ;;  %v1226_v30 = vld [vmem:[%s2654_s0 + $0xa0] ss:$4 sm:$0xff]  }
  0x58   :  { %726 = vrot.lane.b32.xlu2 %v725_v21, %s1500_s29  ;;  %v1417_v44 = vld [vmem:[%s2654_s0 + $0x1] ss:$16 sm:%s847_s18]   ;;  %s946_s18 = smov 48  ;;  %v885_v53 = vsel %vm128_vm2, %v1424_v41, %v880_v46  ;;  %1227 = vst.msk [vmem:[%s2655_s1 + $0x22] ss:$8 sm:$0xf] %vm3_vm3, %v1226_v30  }
  0x59   :  { %v1418_v45 = vld [vmem:[%s2654_s0 + $0x1] ss:$16 sm:%s850_s19]   ;;  %v1436_v51 = vld [vmem:[%s2654_s0 + $0x5] ss:$16 sm:%s938_s30]   ;;  %s1020_s30 = smov 192  ;;  %s1089_s19 = smov 192 }
  0x5a   :  { %818 = vrot.lane.b32.xlu0 %v817_v32, %s1500_s29  ;;  %v853_v48 = vsel %vm118_vm0, %v1418_v45, %v1417_v44  ;;  %v1419_v49 = vld [vmem:[%s2654_s0 + $0x1] ss:$16 sm:%s855_s25]   ;;  %s1501_s25 = smov 32   ;;  %1228 = vst.msk [vmem:[%s2655_s1 + $0x3] ss:$8 sm:$0xf0] %vm3_vm3, %v1226_v30  }
  0x5b   :  { %v1437_v52 = vld [vmem:[%s2654_s0 + $0x5] ss:$16 sm:%s941_s2]   ;;  %v858_v56 = vsel %vm123_vm1, %v1419_v49, %v853_v48  ;;  %v1420_v57 = vld [vmem:[%s2654_s0 + $0x1] ss:$16 sm:%s860_s13]   ;;  %s1010_s13 = smov 12  ;;  %s984_s2 = smov 3 }
  0x5c   :  { %v1443_v55 = vld [vmem:[%s2654_s0 + $0x85] ss:$16 sm:%s969_s10]   ;;  %v944_v59 = vsel %vm118_vm0, %v1437_v52, %v1436_v51  ;;  %v863_v63 = vsel %vm128_vm2, %v1420_v57, %v858_v56  ;;  %v1431_v0 = vld [vmem:[%s2654_s0 + $0x181] ss:$16 sm:%s915_s24]  }
  0x5d   :  { %v1438_v60 = vld [vmem:[%s2654_s0 + $0x5] ss:$16 sm:%s946_s18]   ;;  %v972_v61 = vsel %vm123_vm1, %v1443_v55, %v967_v54  ;;  %v1456_v1 = vld [vmem:[%s2654_s0 + $0x9] ss:$16 sm:%s1030_s6]   ;;  %s992_s18 = smov 48  ;;  %s1171_s6 = smov 12 }
  0x5e   :  { %v1439_v62 = vld [vmem:[%s2654_s0 + $0x5] ss:$16 sm:%s951_s21]   ;;  %v1432_v2 = vld [vmem:[%s2654_s0 + $0x181] ss:$16 sm:%s918_s26]   ;;  %v949_v3 = vsel %vm123_vm1, %v1438_v60, %v944_v59  ;;  %s1043_s21 = smov 192 }
  0x5f   :  { %909 = vrot.lane.b32.xlu1 %v908_v50, %s1501_s25  ;;  %v1457_v4 = vld [vmem:[%s2654_s0 + $0x9] ss:$16 sm:%s1033_s3]   ;;  %v921_v5 = vsel %vm118_vm0, %v1432_v2, %v1431_v0  ;;  %v954_v11 = vsel %vm128_vm2, %v1439_v62, %v949_v3  ;;  %s1107_s3 = smov 48  ;;  %v1229_v54 = vld [vmem:[%s2654_s0 + $0xc0] ss:$4 sm:$0xff]  }
  0x60   :  { %795 = vrot.lane.b32.xlu2 %v794_v42, %s1500_s29  ;;  %s974_s29 = smov 192  ;;  %v1433_v6 = vld [vmem:[%s2654_s0 + $0x181] ss:$16 sm:%s923_s4]   ;;  %v1036_v12 = vsel %vm118_vm0, %v1457_v4, %v1456_v1  ;;  %s1181_s4 = smov 192  ;;  %v1232_v0 = vld [vmem:[%s2654_s0 + $0xe0] ss:$4 sm:$0xff]  }
  0x61   :  { %v1444_v58 = vld [vmem:[%s2654_s0 + $0x85] ss:$16 sm:%s974_s29]   ;;  %v1458_v13 = vld [vmem:[%s2654_s0 + $0x9] ss:$16 sm:%s1038_s17]   ;;  %v926_v14 = vsel %vm123_vm1, %v1433_v6, %v921_v5 }
  0x62   :  { %886 = vrot.lane.b32.xlu0 %v885_v53, %s1501_s25  ;;  %v977_v7 = vsel %vm128_vm2, %v1444_v58, %v972_v61  ;;  %v1451_v9 = vld [vmem:[%s2654_s0 + $0x185] ss:$16 sm:%s1007_s12]   ;;  %v1041_v20 = vsel %vm123_vm1, %v1458_v13, %v1036_v12  ;;  %s1158_s12 = smov 192  ;;  %1230 = vst.msk [vmem:[%s2655_s1 + $0x24] ss:$8 sm:$0xf] %vm3_vm3, %v1229_v54  }
  0x63   :  { %v1452_v10 = vld [vmem:[%s2654_s0 + $0x185] ss:$16 sm:%s1010_s13]   ;;  %v1434_v15 = vld [vmem:[%s2654_s0 + $0x181] ss:$16 sm:%s928_s20]   ;;  %s1130_s20 = smov 48 }
  0x64   :  { %v1459_v16 = vld [vmem:[%s2654_s0 + $0x9] ss:$16 sm:%s1043_s21]   ;;  %v1013_v17 = vsel %vm118_vm0, %v1452_v10, %v1451_v9  ;;  %v1453_v18 = vld [vmem:[%s2654_s0 + $0x185] ss:$16 sm:%s1015_s22]   ;;  %v931_v21 = vsel %vm128_vm2, %v1434_v15, %v926_v14  ;;  %s1168_s22 = smov 3  ;;  %s1066_s21 = smov 192 }
  0x65   :  { %v1446_v19 = vld [vmem:[%s2654_s0 + $0x105] ss:$16 sm:%s984_s2]   ;;  %v1471_v24 = vld [vmem:[%s2654_s0 + $0x189] ss:$16 sm:%s1099_s11]   ;;  %v1018_v25 = vsel %vm123_vm1, %v1453_v18, %v1013_v17  ;;  %v1046_v29 = vsel %vm128_vm2, %v1459_v16, %v1041_v20  ;;  %s1199_s2 = smov 48 }
  0x66   :  { %v1447_v22 = vld [vmem:[%s2654_s0 + $0x105] ss:$16 sm:%s987_s8]   ;;  %v1472_v26 = vld [vmem:[%s2654_s0 + $0x189] ss:$16 sm:%s1102_s15]   ;;  %s1112_s8 = smov 192  ;;  %s1053_s15 = smov 3 }
  0x67   :  { %978 = vrot.lane.b32.xlu1 %v977_v7, %s1501_s25  ;;  %v1454_v23 = vld [vmem:[%s2654_s0 + $0x185] ss:$16 sm:%s1020_s30]   ;;  %v990_v27 = vsel %vm118_vm0, %v1447_v22, %v1446_v19  ;;  %v1105_v34 = vsel %vm118_vm0, %v1472_v26, %v1471_v24  ;;  %v2_v1 = vld [vmem:[%s2654_s0] ss:$4 sm:$0xff]  }
  0x68   :  { %864 = vrot.lane.b32.xlu2 %v863_v63, %s1501_s25  ;;  %v1448_v28 = vld [vmem:[%s2654_s0 + $0x105] ss:$16 sm:%s992_s18]   ;;  %v1023_v33 = vsel %vm128_vm2, %v1454_v23, %v1018_v25  ;;  %1231 = vst.msk [vmem:[%s2655_s1 + $0x5] ss:$8 sm:$0xf0] %vm3_vm3, %v1229_v54  }
  0x69   :  { %v1466_v31 = vld [vmem:[%s2654_s0 + $0x109] ss:$16 sm:%s1076_s27]   ;;  %v995_v37 = vsel %vm123_vm1, %v1448_v28, %v990_v27  ;;  %v1449_v38 = vld [vmem:[%s2654_s0 + $0x105] ss:$16 sm:%s997_s7]   ;;  %s1191_s7 = smov 3 }
  0x6a   :  { %955 = vrot.lane.b32.xlu0 %v954_v11, %s1501_s25  ;;  %v1467_v32 = vld [vmem:[%s2654_s0 + $0x109] ss:$16 sm:%s1079_s28]   ;;  %s1176_s28 = smov 48  ;;  %v1000_v45 = vsel %vm128_vm2, %v1449_v38, %v995_v37  ;;  %1233 = vst.msk [vmem:[%s2655_s1 + $0x26] ss:$8 sm:$0xf] %vm3_vm3, %v1232_v0  }
  0x6b   :  { %v1473_v35 = vld [vmem:[%s2654_s0 + $0x189] ss:$16 sm:%s1107_s3]   ;;  %v1082_v40 = vsel %vm118_vm0, %v1467_v32, %v1466_v31  ;;  %v1486_v47 = vld [vmem:[%s2654_s0 + $0x10d] ss:$16 sm:%s1168_s22]   ;;  %s1122_s22 = smov 3  ;;  %s1125_s3 = smov 12 }
  0x6c   :  { %v1468_v39 = vld [vmem:[%s2654_s0 + $0x109] ss:$16 sm:%s1084_s9]   ;;  %v1110_v43 = vsel %vm123_vm1, %v1473_v35, %v1105_v34  ;;  %v1487_v49 = vld [vmem:[%s2654_s0 + $0x10d] ss:$16 sm:%s1171_s6]   ;;  %s1135_s6 = smov 192 }
  0x6d   :  { %v1461_v41 = vld [vmem:[%s2654_s0 + $0x89] ss:$16 sm:%s1053_s15]   ;;  %s1148_s15 = smov 12  ;;  %v1087_v48 = vsel %vm123_vm1, %v1468_v39, %v1082_v40  ;;  %v1488_v53 = vld [vmem:[%s2654_s0 + $0x10d] ss:$16 sm:%s1176_s28]   ;;  %v1174_v58 = vsel %vm118_vm0, %v1487_v49, %v1486_v47 }
  0x6e   :  { %v1462_v42 = vld [vmem:[%s2654_s0 + $0x89] ss:$16 sm:%s1056_s16]   ;;  %s1153_s16 = smov 48  ;;  %v1482_v56 = vld [vmem:[%s2654_s0 + $0x8d] ss:$16 sm:%s1148_s15]   ;;  %v1179_v5 = vsel %vm123_vm1, %v1488_v53, %v1174_v58  ;;  %s1194_s15 = smov 12 }
  0x6f   :  { %1047 = vrot.lane.b32.xlu1 %v1046_v29, %s1501_s25  ;;  %v1474_v44 = vld [vmem:[%s2654_s0 + $0x189] ss:$16 sm:%s1112_s8]   ;;  %s1145_s8 = smov 3  ;;  %v1059_v50 = vsel %vm118_vm0, %v1462_v42, %v1461_v41  ;;  %1234 = vst.msk [vmem:[%s2655_s1 + $0x7] ss:$8 sm:$0xf0] %vm3_vm3, %v1232_v0  }
  0x70   :  { %932 = vrot.lane.b32.xlu2 %v931_v21, %s1501_s25  ;;  %v1469_v46 = vld [vmem:[%s2654_s0 + $0x109] ss:$16 sm:%s1089_s19]   ;;  %v1115_v52 = vsel %vm128_vm2, %v1474_v44, %v1110_v43  ;;  %v1214_v13 = vld [vmem:[%s2654_s0 + $0x20] ss:$4 sm:$0xff]  }
  0x71   :  { %v1463_v51 = vld [vmem:[%s2654_s0 + $0x89] ss:$16 sm:%s1061_s5]   ;;  %v1481_v55 = vld [vmem:[%s2654_s0 + $0x8d] ss:$16 sm:%s1145_s8]   ;;  %v1092_v57 = vsel %vm128_vm2, %v1469_v46, %v1087_v48 }
  0x72   :  { %v2190_v36 = vpop.permute.xlu2 %221   ;;  %1024 = vrot.lane.b32.xlu0 %v1023_v33, %s1501_s25  ;;  %v1483_v59 = vld [vmem:[%s2654_s0 + $0x8d] ss:$16 sm:%s1153_s16]   ;;  %v1064_v61 = vsel %vm123_vm1, %v1463_v51, %v1059_v50  ;;  %v1151_v2 = vsel %vm118_vm0, %v1482_v56, %v1481_v55  ;;  %4 = vst.msk [vmem:[%s2655_s1] ss:$8 sm:$0xf] %vm3_vm3, %v2_v1  }
  0x73   :  { %v1464_v62 = vld [vmem:[%s2654_s0 + $0x89] ss:$16 sm:%s1066_s21]   ;;  %v1476_v63 = vld [vmem:[%s2654_s0 + $0xd] ss:$16 sm:%s1122_s22]   ;;  %v1156_v10 = vsel %vm123_vm1, %v1483_v59, %v1151_v2 }
  0x74   :  { %v1477_v3 = vld [vmem:[%s2654_s0 + $0xd] ss:$16 sm:%s1125_s3]   ;;  %v1069_v7 = vsel %vm128_vm2, %v1464_v62, %v1064_v61  ;;  %1213 = vst.msk [vmem:[%s2655_s1 - $0x1f] ss:$8 sm:$0xf0] %vm3_vm3, %v2_v1  }
  0x75   :  { %v1489_v6 = vld [vmem:[%s2654_s0 + $0x10d] ss:$16 sm:%s1181_s4]   ;;  %v1128_v11 = vsel %vm118_vm0, %v1477_v3, %v1476_v63  ;;  %v1217_v16 = vld [vmem:[%s2654_s0 + $0x40] ss:$4 sm:$0xff]  }
  0x76   :  { %v1484_v8 = vld [vmem:[%s2654_s0 + $0x8d] ss:$16 sm:%s1158_s12]   ;;  %v1184_v14 = vsel %vm128_vm2, %v1489_v6, %v1179_v5  ;;  %1215 = vst.msk [vmem:[%s2655_s1 + $0x2] ss:$8 sm:$0xf] %vm3_vm3, %v1214_v13   ;;  %s1204_s12 = smov 192 }
  0x77   :  { %1116 = vrot.lane.b32.xlu1 %v1115_v52, %s1501_s25  ;;  %v1478_v12 = vld [vmem:[%s2654_s0 + $0xd] ss:$16 sm:%s1130_s20]   ;;  %v1161_v17 = vsel %vm128_vm2, %v1484_v8, %v1156_v10  ;;  %1216 = vst.msk [vmem:[%s2655_s1 - $0x1d] ss:$8 sm:$0xf0] %vm3_vm3, %v1214_v13  }
  0x78   :  { %1001 = vrot.lane.b32.xlu2 %v1000_v45, %s1501_s25  ;;  %v2281_v4 = vpop.permute.xlu1 %175   ;;  %v1479_v15 = vld [vmem:[%s2654_s0 + $0xd] ss:$16 sm:%s1135_s6]   ;;  %v1133_v19 = vsel %vm123_vm1, %v1478_v12, %v1128_v11  ;;  %v1220_v21 = vld [vmem:[%s2654_s0 + $0x60] ss:$4 sm:$0xff]  }
  0x79   :  { %v1491_v20 = vld [vmem:[%s2654_s0 + $0x18d] ss:$16 sm:%s1191_s7]   ;;  %1218 = vst.msk [vmem:[%s2655_s1 + $0x4] ss:$8 sm:$0xf] %vm3_vm3, %v1217_v16   ;;  %v1138_v24 = vsel %vm128_vm2, %v1479_v15, %v1133_v19 }
  0x7a   :  { %v245_v60 = vpop.permute.xlu2 %244   ;;  %1093 = vrot.lane.b32.xlu0 %v1092_v57, %s1501_s25  ;;  %v1492_v22 = vld [vmem:[%s2654_s0 + $0x18d] ss:$16 sm:%s1194_s15]   ;;  %1219 = vst.msk [vmem:[%s2655_s1 - $0x1b] ss:$8 sm:$0xf0] %vm3_vm3, %v1217_v16  }
  0x7b   :  { %1287 = vst.msk [vmem:[%s2655_s1 + $0x28] sm:$0xff] %vm132_vm4, %v245_v60   ;;  %v1197_v26 = vsel %vm118_vm0, %v1492_v22, %v1491_v20  ;;  %v1493_v27 = vld [vmem:[%s2654_s0 + $0x18d] ss:$16 sm:%s1199_s2]   ;;  %v1247_v28 = vld [vmem:[%s2654_s0 + $0x180] ss:$4 sm:$0xff]  }
  0x7c   :  { %v131_v9 = vpop.permute.xlu0 %130   ;;  %1221 = vst.msk [vmem:[%s2655_s1 + $0x6] ss:$8 sm:$0xf] %vm3_vm3, %v1220_v21   ;;  %v1202_v30 = vsel %vm123_vm1, %v1493_v27, %v1197_v26  ;;  %v1494_v31 = vld [vmem:[%s2654_s0 + $0x18d] ss:$16 sm:%s1204_s12]  }
  0x7d   :  { %1222 = vst.msk [vmem:[%s2655_s1 - $0x19] ss:$8 sm:$0xf0] %vm3_vm3, %v1220_v21   ;;  %v1250_v32 = vld [vmem:[%s2654_s0 + $0x1a0] ss:$4 sm:$0xff]   ;;  %v1207_v34 = vsel %vm128_vm2, %v1494_v31, %v1202_v30 }
  0x7e   :  { %133 = vst.msk [vmem:[%s2655_s1] sm:$0xff] %vm132_vm4, %v131_v9   ;;  %v1253_v35 = vld [vmem:[%s2654_s0 + $0x1c0] ss:$4 sm:$0xff]  }
  0x7f   :  { %1185 = vrot.lane.b32.xlu1 %v1184_v14, %s1501_s25  ;;  %1282 = vst.msk [vmem:[%s2655_s1 + $0x8] sm:$0xff] %vm132_vm4, %v2190_v36   ;;  %v1256_v37 = vld [vmem:[%s2654_s0 + $0x1e0] ss:$4 sm:$0xff]  }
  0x80   :  { %1070 = vrot.lane.b32.xlu2 %v1069_v7, %s1501_s25  ;;  %1248 = vst.msk [vmem:[%s2655_s1 + $0x60] ss:$8 sm:$0xf] %vm3_vm3, %v1247_v28   ;;  %v1235_v39 = vld [vmem:[%s2654_s0 + $0x100] ss:$4 sm:$0xff]  }
  0x81   :  { %v199_v23 = vpop.permute.xlu1 %198   ;;  %1249 = vst.msk [vmem:[%s2655_s1 + $0x41] ss:$8 sm:$0xf0] %vm3_vm3, %v1247_v28   ;;  %v1238_v42 = vld [vmem:[%s2654_s0 + $0x120] ss:$4 sm:$0xff]  }
  0x82   :  { %v314_v18 = vpop.permute.xlu2 %313   ;;  %1162 = vrot.lane.b32.xlu0 %v1161_v17, %s1501_s25  ;;  %1251 = vst.msk [vmem:[%s2655_s1 + $0x62] ss:$8 sm:$0xf] %vm3_vm3, %v1250_v32   ;;  %v1241_v44 = vld [vmem:[%s2654_s0 + $0x140] ss:$4 sm:$0xff]  }
  0x83   :  { %1302 = vst.msk [vmem:[%s2655_s1 + $0x10] sm:$0xff] %vm132_vm4, %v314_v18   ;;  %v1244_v46 = vld [vmem:[%s2654_s0 + $0x160] ss:$4 sm:$0xff]  }
  0x84   :  { %v153_v25 = vpop.permute.xlu0 %152   ;;  %1252 = vst.msk [vmem:[%s2655_s1 + $0x43] ss:$8 sm:$0xf0] %vm3_vm3, %v1250_v32  }
  0x85   :  { %1267 = vst.msk [vmem:[%s2655_s1 + $0x20] sm:$0xff] %vm132_vm4, %v153_v25  }
  0x86   :  { %1254 = vst.msk [vmem:[%s2655_s1 + $0x64] ss:$8 sm:$0xf] %vm3_vm3, %v1253_v35  }
  0x87   :  { %1255 = vst.msk [vmem:[%s2655_s1 + $0x45] ss:$8 sm:$0xf0] %vm3_vm3, %v1253_v35  }
  0x88   :  { %1139 = vrot.lane.b32.xlu2 %v1138_v24, %s1501_s25  ;;  %1257 = vst.msk [vmem:[%s2655_s1 + $0x66] ss:$8 sm:$0xf] %vm3_vm3, %v1256_v37  }
  0x89   :  { %v291_v33 = vpop.permute.xlu1 %290   ;;  %1258 = vst.msk [vmem:[%s2655_s1 + $0x47] ss:$8 sm:$0xf0] %vm3_vm3, %v1256_v37  }
  0x8a   :  { %v383_v29 = vpop.permute.xlu2 %382   ;;  %1277 = vst.msk [vmem:[%s2655_s1 + $0x60] sm:$0xff] %vm132_vm4, %v199_v23  }
  0x8b   :  { %1297 = vst.msk [vmem:[%s2655_s1 + $0x68] sm:$0xff] %vm132_vm4, %v291_v33  }
  0x8c   :  { %v268_v36 = vpop.permute.xlu0 %267   ;;  %1317 = vst.msk [vmem:[%s2655_s1 + $0x70] sm:$0xff] %vm132_vm4, %v383_v29  }
  0x8d   :  { %1236 = vst.msk [vmem:[%s2655_s1 + $0x40] ss:$8 sm:$0xf] %vm3_vm3, %v1235_v39  }
  0x8e   :  { %1237 = vst.msk [vmem:[%s2655_s1 + $0x21] ss:$8 sm:$0xf0] %vm3_vm3, %v1235_v39  }
  0x8f   :  { %1239 = vst.msk [vmem:[%s2655_s1 + $0x42] ss:$8 sm:$0xf] %vm3_vm3, %v1238_v42  }
  0x90   :  { %1208 = vrot.lane.b32.xlu2 %v1207_v34, %s1501_s25  ;;  %1240 = vst.msk [vmem:[%s2655_s1 + $0x23] ss:$8 sm:$0xf0] %vm3_vm3, %v1238_v42  }
  0x91   :  { %v360_v40 = vpop.permute.xlu1 %359   ;;  %1242 = vst.msk [vmem:[%s2655_s1 + $0x44] ss:$8 sm:$0xf] %vm3_vm3, %v1241_v44  }
  0x92   :  { %v452_v38 = vpop.permute.xlu2 %451   ;;  %1243 = vst.msk [vmem:[%s2655_s1 + $0x25] ss:$8 sm:$0xf0] %vm3_vm3, %v1241_v44  }
  0x93   :  { %1245 = vst.msk [vmem:[%s2655_s1 + $0x46] ss:$8 sm:$0xf] %vm3_vm3, %v1244_v46  }
  0x94   :  { %v337_v41 = vpop.permute.xlu0 %336   ;;  %1246 = vst.msk [vmem:[%s2655_s1 + $0x27] ss:$8 sm:$0xf0] %vm3_vm3, %v1244_v46  }
  0x95   :  { %1307 = vst.msk [vmem:[%s2655_s1 + $0x30] sm:$0xff] %vm132_vm4, %v337_v41  }
  0x96   :  { %1272 = vst.msk [vmem:[%s2655_s1 + $0x40] sm:$0xff] %vm132_vm4, %v2281_v4  }
  0x97   :  { %1292 = vst.msk [vmem:[%s2655_s1 + $0x48] sm:$0xff] %vm132_vm4, %v268_v36  }
  0x98   :  { %1312 = vst.msk [vmem:[%s2655_s1 + $0x50] sm:$0xff] %vm132_vm4, %v360_v40  }
  0x99   :  { %v429_v45 = vpop.permute.xlu1 %428   ;;  %1332 = vst.msk [vmem:[%s2655_s1 + $0x58] sm:$0xff] %vm132_vm4, %v452_v38  }
  0x9a   :  { %v520_v43 = vpop.permute.xlu2 %519   ;;  %1327 = vst.msk [vmem:[%s2655_s1 + $0x38] sm:$0xff] %vm132_vm4, %v429_v45  }
  0x9b   :  { %1346 = vst.msk [vmem:[%s2655_s1 + $0x20] sm:$0xff] %vm499_vm5, %v520_v43  }
  0x9c   :  { %v406_v47 = vpop.permute.xlu0 %405  }
  0x9d   :  { %1322 = vst.msk [vmem:[%s2655_s1 + $0x18] sm:$0xff] %vm132_vm4, %v406_v47  }
  0xa1   :  { %v498_v49 = vpop.permute.xlu1 %497  }
  0xa2   :  { %v589_v48 = vpop.permute.xlu2 %588   ;;  %500 = vst.msk [vmem:[%s2655_s1] sm:$0xff] %vm499_vm5, %v498_v49  }
  0xa3   :  { %1361 = vst.msk [vmem:[%s2655_s1 + $0x8] sm:$0xff] %vm499_vm5, %v589_v48  }
  0xa4   :  { %v475_v50 = vpop.permute.xlu0 %474  }
  0xa5   :  { %1337 = vst.msk [vmem:[%s2655_s1 + $0x78] sm:$0xff] %vm132_vm4, %v475_v50  }
  0xa9   :  { %v566_v52 = vpop.permute.xlu1 %565  }
  0xaa   :  { %v658_v51 = vpop.permute.xlu2 %657   ;;  %1356 = vst.msk [vmem:[%s2655_s1 + $0x60] sm:$0xff] %vm499_vm5, %v566_v52  }
  0xab   :  { %1376 = vst.msk [vmem:[%s2655_s1 + $0x68] sm:$0xff] %vm499_vm5, %v658_v51  }
  0xac   :  { %v543_v53 = vpop.permute.xlu0 %542  }
  0xad   :  { %1351 = vst.msk [vmem:[%s2655_s1 + $0x40] sm:$0xff] %vm499_vm5, %v543_v53  }
  0xb1   :  { %v635_v55 = vpop.permute.xlu1 %634  }
  0xb2   :  { %v727_v54 = vpop.permute.xlu2 %726   ;;  %1371 = vst.msk [vmem:[%s2655_s1 + $0x48] sm:$0xff] %vm499_vm5, %v635_v55  }
  0xb3   :  { %1391 = vst.msk [vmem:[%s2655_s1 + $0x50] sm:$0xff] %vm499_vm5, %v727_v54  }
  0xb4   :  { %v612_v56 = vpop.permute.xlu0 %611  }
  0xb5   :  { %1366 = vst.msk [vmem:[%s2655_s1 + $0x28] sm:$0xff] %vm499_vm5, %v612_v56  }
  0xb9   :  { %v704_v58 = vpop.permute.xlu1 %703  }
  0xba   :  { %v796_v57 = vpop.permute.xlu2 %795   ;;  %1386 = vst.msk [vmem:[%s2655_s1 + $0x30] sm:$0xff] %vm499_vm5, %v704_v58  }
  0xbb   :  { %1406 = vst.msk [vmem:[%s2655_s1 + $0x38] sm:$0xff] %vm499_vm5, %v796_v57  }
  0xbc   :  { %v681_v59 = vpop.permute.xlu0 %680  }
  0xbd   :  { %1381 = vst.msk [vmem:[%s2655_s1 + $0x10] sm:$0xff] %vm499_vm5, %v681_v59  }
  0xc1   :  { %v773_v61 = vpop.permute.xlu1 %772  }
  0xc2   :  { %v865_v60 = vpop.permute.xlu2 %864   ;;  %1401 = vst.msk [vmem:[%s2655_s1 + $0x18] sm:$0xff] %vm499_vm5, %v773_v61  }
  0xc3   :  { %867 = vst.msk [vmem:[%s2655_s1] sm:$0xff] %vm866_vm6, %v865_v60  }
  0xc4   :  { %v750_v62 = vpop.permute.xlu0 %749  }
  0xc5   :  { %1396 = vst.msk [vmem:[%s2655_s1 + $0x70] sm:$0xff] %vm499_vm5, %v750_v62  }
  0xc9   :  { %v842_v0 = vpop.permute.xlu1 %841  }
  0xca   :  { %v933_v63 = vpop.permute.xlu2 %932   ;;  %1416 = vst.msk [vmem:[%s2655_s1 + $0x78] sm:$0xff] %vm499_vm5, %v842_v0  }
  0xcb   :  { %1435 = vst.msk [vmem:[%s2655_s1 + $0x60] sm:$0xff] %vm866_vm6, %v933_v63  }
  0xcc   :  { %v819_v1 = vpop.permute.xlu0 %818  }
  0xcd   :  { %1411 = vst.msk [vmem:[%s2655_s1 + $0x58] sm:$0xff] %vm499_vm5, %v819_v1  }
  0xd1   :  { %v910_v3 = vpop.permute.xlu1 %909  }
  0xd2   :  { %v1002_v2 = vpop.permute.xlu2 %1001   ;;  %1430 = vst.msk [vmem:[%s2655_s1 + $0x40] sm:$0xff] %vm866_vm6, %v910_v3  }
  0xd3   :  { %1450 = vst.msk [vmem:[%s2655_s1 + $0x48] sm:$0xff] %vm866_vm6, %v1002_v2  }
  0xd4   :  { %v887_v4 = vpop.permute.xlu0 %886  }
  0xd5   :  { %1425 = vst.msk [vmem:[%s2655_s1 + $0x20] sm:$0xff] %vm866_vm6, %v887_v4  }
  0xd9   :  { %v979_v6 = vpop.permute.xlu1 %978  }
  0xda   :  { %v1071_v5 = vpop.permute.xlu2 %1070   ;;  %1445 = vst.msk [vmem:[%s2655_s1 + $0x28] sm:$0xff] %vm866_vm6, %v979_v6  }
  0xdb   :  { %1465 = vst.msk [vmem:[%s2655_s1 + $0x30] sm:$0xff] %vm866_vm6, %v1071_v5  }
  0xdc   :  { %v956_v7 = vpop.permute.xlu0 %955  }
  0xdd   :  { %1440 = vst.msk [vmem:[%s2655_s1 + $0x8] sm:$0xff] %vm866_vm6, %v956_v7  }
  0xe1   :  { %v1048_v9 = vpop.permute.xlu1 %1047  }
  0xe2   :  { %v1140_v8 = vpop.permute.xlu2 %1139   ;;  %1460 = vst.msk [vmem:[%s2655_s1 + $0x10] sm:$0xff] %vm866_vm6, %v1048_v9  }
  0xe3   :  { %1480 = vst.msk [vmem:[%s2655_s1 + $0x18] sm:$0xff] %vm866_vm6, %v1140_v8  }
  0xe4   :  { %v1025_v10 = vpop.permute.xlu0 %1024  }
  0xe5   :  { %1455 = vst.msk [vmem:[%s2655_s1 + $0x68] sm:$0xff] %vm866_vm6, %v1025_v10  }
  0xe9   :  { %v1117_v12 = vpop.permute.xlu1 %1116  }
  0xea   :  { %v1209_v11 = vpop.permute.xlu2 %1208   ;;  %1475 = vst.msk [vmem:[%s2655_s1 + $0x70] sm:$0xff] %vm866_vm6, %v1117_v12  }
  0xeb   :  { %1495 = vst.msk [vmem:[%s2655_s1 + $0x78] sm:$0xff] %vm866_vm6, %v1209_v11  }
  0xec   :  { %v1094_v13 = vpop.permute.xlu0 %1093  }
  0xed   :  { %1470 = vst.msk [vmem:[%s2655_s1 + $0x50] sm:$0xff] %vm866_vm6, %v1094_v13  }
  0xf1   :  { %v1186_v14 = vpop.permute.xlu1 %1185  }
  0xf2   :  { %1490 = vst.msk [vmem:[%s2655_s1 + $0x58] sm:$0xff] %vm866_vm6, %v1186_v14  }
  0xf4   :  { %v1163_v15 = vpop.permute.xlu0 %1162  }
  0xf5   :  { %1485 = vst.msk [vmem:[%s2655_s1 + $0x38] sm:$0xff] %vm866_vm6, %v1163_v15  }

// kernel: nonautoregressive_encoder.11
= control target key start
LH: loop header
LB: loop body
LE: loop exit
PB: predicated region body
PF: predicated region fallthrough
CT: control target
= control target key end

     0   :  { %s324_s12 = smov 0   ;;  %s356_s0 = inlined_call_operand.vmem [shape: f32[2,16,32], index: 0, kind: input, shape index: {}]   ;;  %s357_s1 = inlined_call_operand.vmem [shape: f32[32,128], index: 1, kind: input, shape index: {}]   ;;  %s358_s2 = inlined_call_operand.vmem [shape: f32[1,128], index: 2, kind: input, shape index: {}]   ;;  %s359_s3 = inlined_call_operand.vmem [shape: f32[2,16,128], index: 3, kind: output, shape index: {}]  }
   0x1 LB: > { %s268_s13 = sadd.s32 4294967295, %s302_s12   ;;  %p272_p0 = scmp.ge.s32.totalorder %s302_s12, 1  ;;  %s302_s12 = sphi %s324_s12, %s13_s12  }
   0x2   : > { %p137_p1 = scmp.lt.s32.totalorder %s302_s12, 3 }
   0x4   : > { %p138_p2 = pnand %p272_p0, %p137_p1 }
   0x5   : > { %p161_p3 = scmp.lt.s32.totalorder (!%p138_p2), %s268_s13, 1 }
   0x6   : > { %141 = sbr.rel (%p138_p2) target bundleno = 149 (0x95), region = 32 }
   0xb   : > { %v176_v0 = vld [vmem:[%s357_s1 + $0x18] sm:$0xff]  ;;  %v175_v1 = vld [vmem:[%s357_s1 + $0x10] sm:$0xff]  ;;  %v174_v2 = vld [vmem:[%s357_s1 + $0x8] sm:$0xff]  ;;  %s361_s13 = smov (!%p161_p3, %s268_s13), 1  ;;  %vm181_vm0 = vcmask 261120  }
   0xc   : > { %200 = vmatpush.msra.mxu0 %v176_v0  ;;  %283 = vmatpush.msra.mxu1 %v176_v0  ;;  %v173_v3 = vld [vmem:[%s357_s1] sm:$0xff]  ;;  %s281_s22 = sshll.u32 %s361_s13, 4 }
   0xd   : > { %s165_s25 = scalar_lea.vmem %s356_s0, %s281_s22  ;;  %v295_v6 = vld [vmem:[%s358_s2] ss:$0 sm:$0xff]  ;;  %s170_s30 = scalar_lea.vmem %s359_s3, %s281_s22 }
   0xe   : > { %201 = vmatpush.msra.mxu0 %v175_v1  ;;  %284 = vmatpush.msra.mxu1 %v175_v1  ;;  %v171_v4 = vld [vmem:[%s165_s25] sm:$0xff]  ;;  %v172_v5 = vld [vmem:[%s165_s25 + $0x8] sm:$0xff] }
  0x10   : > { %202 = vmatpush.msra.mxu0 %v174_v2  ;;  %285 = vmatpush.msra.mxu1 %v174_v2 }
  0x12   : > { %203 = vmatpush.msra.mxu0 %v173_v3  ;;  %286 = vmatpush.msra.mxu1 %v173_v3 }
  0x13   : > { %277 = vmatmul.msk.f32.vlgmr.msra.gmra.mxu0 %vm181_vm0, %v171_v4  ;;  %278 = vmatmul.msk.f32.vlgmr.msra.gmra.mxu1 %vm181_vm0, %v172_v5 }
  0x90   : > { %v205_v7 = vpop.f32.mrf.mxu0  ;;  %v208_v8 = vpop.f32.mrf.mxu1 }
  0x91   : > { %v206_v9 = vadd.f32 %v295_v6, %v205_v7  ;;  %v209_v10 = vadd.f32 %v295_v6, %v208_v8 }
  0x93   : > { %211 = vst [vmem:[%s170_s30] sm:$0xff] %v206_v9 }
  0x94   : > { %212 = vst [vmem:[%s170_s30 + $0x8] sm:$0xff] %v209_v10 }
  0x95 PF: > { %s13_s12 = sadd.s32 1, %s302_s12  }
  0x96   : > { %p10_p4 = scmp.ge.s32.totalorder %s13_s12, 4  }
  0x98   :  { %12 = sbr.rel (!%p10_p4) target bundleno = 1 (0x1), region = 62 }

// kernel: nonautoregressive_encoder.10
= control target key start
LH: loop header
LB: loop body
LE: loop exit
PB: predicated region body
PF: predicated region fallthrough
CT: control target
= control target key end

     0   :  { %13 = vsyncpa [#allocation3], 0  ;;  %s1129_s0 = inlined_call_operand.vmem [shape: f32[2,16,2], index: 0, kind: input, shape index: {}]   ;;  %s1130_s1 = inlined_call_operand.hbm [shape: f32[2,2,16], index: 1, kind: input, shape index: {}]   ;;  %s1131_s2 = inlined_call_operand.hbm [shape: f32[2,32], index: 2, kind: input, shape index: {}]   ;;  %s1132_s3 = inlined_call_operand.hbm [shape: f32[1,32], index: 3, kind: input, shape index: {}]   ;;  %s1133_s4 = inlined_call_operand.vmem [shape: f32[16,512], index: 4, kind: input, shape index: {}]   ;;  %s1134_s5 = inlined_call_operand.vmem [shape: f32[1,512], index: 5, kind: input, shape index: {}]   ;;  %s1135_s6 = inlined_call_operand.vmem [shape: f32[2,16,32], index: 6, kind: output, shape index: {0}]   ;;  %s1136_s7 = inlined_call_operand.vmem [shape: f32[2,16,512], index: 7, kind: output, shape index: {1}]  }
   0x1   :  { %15 = vsyncpa [#allocation3 + $0x1], 0 }
   0x2   :  { %16 = vsyncpa [#allocation5], 0  ;;  %s969_s24 = smov 0   ;;  %s971_s25 = smov 0  }
   0x3   :  { %s973_s26 = smov 0   ;;  %s975_s27 = smov 0  }
   0x4 LB: > { %s988_s28 = sadd.s32 4294967295, %s923_s27   ;;  %p68_p0 = scmp.ne.s32.totalorder %s915_s25, %s911_s24  ;;  %s923_s27 = sphi %s975_s27, %s1143_s27   ;;  %s919_s26 = sphi %s973_s26, %s1142_s26   ;;  %s915_s25 = sphi %s971_s25, %s1141_s25   ;;  %s911_s24 = sphi %s969_s24, %s1140_s24  }
   0x5   : > { %p69_p1 = scmp.eq.s32.totalorder %s988_s28, 0  ;;  %p693_p2 = scmp.ge.s32.totalorder %s923_s27, 1 }
   0x6   : > { %p215_p3 = scmp.lt.s32.totalorder %s923_s27, 3  ;;  %s227_s9 = sshll.u32 %s1131_s2, 4  ;;  %s228_s9 = int_to_ptr.hbm [resolvable:$true] %s227_s9 }
   0x7   : > { %p996_p4 = por %p69_p1, %p68_p0  ;;  %s925_s11 = smov [#allocation4]  }
   0x8   : > { %p1003_p5 = pnand %p693_p2, %p215_p3  ;;  %s229_s12 = sshll.u32 %s925_s11, 4  ;;  %s230_s12 = int_to_ptr.vmem [resolvable:$true] %s229_s12 }
   0x9   : > { %s239_s15 = sshll.u32 %s1132_s3, 4  ;;  %s926_s16 = smov [#allocation6]   ;;  %s240_s15 = int_to_ptr.hbm [resolvable:$true] %s239_s15 }
   0xa   : > { %p732_p6 = pneg %p1003_p5  ;;  %s241_s17 = sshll.u32 %s926_s16, 4  ;;  %s242_s17 = int_to_ptr.vmem [resolvable:$true] %s241_s17 }
   0xb   : > { %s1015_s18 = sadd.s32 1, %s923_s27   ;;  %s55_s19 = sadd.s32 1, %s919_s26 }
   0xc   : > { %p733_p7 = pnand %p732_p6, %p69_p1  ;;  %s52_s20 = ssub.s32 %s923_s27, %s1015_s18 }
   0xd   : > { %p62_p8 = scmp.ne.s32.totalorder %s919_s26, %s915_s25  ;;  %p53_p9 = scmp.eq.s32.totalorder %s52_s20, 0 }
   0xe   : > { %735 = dma.hbm_to_vmem [thread:$0]  (!%p733_p7), %s228_s9, 32, %s230_s12, [#allocation5]  }
   0xf   : > { %738 = dma.hbm_to_vmem [thread:$0]  (!%p733_p7), %s240_s15, 16, %s242_s17, [#allocation5]  }
  0x10   : > { %p63_p10 = scmp.eq.s32.totalorder %s923_s27, 0  ;;  %s266_s21 = sand.u32 1, %s919_s26  }
  0x11   : > { %s1025_s22 = scalar_select %p53_p9, %s919_s26, %s55_s19  }
  0x12   : > { %p64_p11 = por %p63_p10, %p62_p8  ;;  %p745_p12 = scmp.lt.s32.totalorder %s923_s27, 2 }
  0x13   : > { %s697_s23 = sshll.u32 %s266_s21, 1  ;;  %s698_s24 = sshll.u32 %s923_s27, 1 }
  0x14   : > { %s274_s9 = scalar_lea.hbm %s1130_s1, %s698_s24  ;;  %s270_s12 = scalar_lea.vmem [#allocation2], %s697_s23 }
  0x15   : > { %s276_s11 = sshll.u32 %s274_s9, 4  ;;  %s278_s13 = sshll.u32 %s270_s12, 4  ;;  %s277_s11 = int_to_ptr.hbm [resolvable:$true] %s276_s11  ;;  %s279_s13 = int_to_ptr.vmem [resolvable:$true] %s278_s13 }
  0x16   : > { %p1032_p13 = pnand %p745_p12, %p64_p11  ;;  %s267_s15 = scalar_lea.sflag [#allocation3], %s266_s21 }
  0x17   : > { %s855_s16 = sshra.s32 %s277_s11, 4  ;;  %s862_s20 = scalar_lea.hbm %s1130_s1, 4  ;;  %s856_s16 = int_to_ptr.hbm [resolvable:$true] %s855_s16 }
  0x18   : > { %s857_s17 = scalar_lea.hbm %s856_s16, 2  ;;  %p859_p2 = pneg %p1032_p13 }
  0x19   : > { %p858_p0 = scmp.ne.s32.totalorder %s856_s16, %s857_s17  ;;  %p863_p7 = scmp.lt.s32.totalorder %s856_s16, %s1130_s1 }
  0x1a   : > { %p864_p8 = scmp.lt.s32.totalorder %s862_s20, %s857_s17 }
  0x1b   : > { %p860_p3 = pnand %p859_p2, %p858_p0 }
  0x1c   : > { %p865_p9 = por %p864_p8, %p863_p7 }
  0x1d   : > { %p861_p6 = pneg %p860_p3 }
  0x1f   : > { %p866_p10 = pnand %p865_p9, %p861_p6 }
  0x21   : > { %869 = shalt.err (!%p866_p10)
}
  0x22   : > { %742 = dma.hbm_to_vmem [thread:$0]  (!%p1032_p13), %s277_s11, 32, %s279_s13, %s267_s15  }
  0x23   : > { %287 = sbr.rel (%p1003_p5) target bundleno = 346 (0x15a), region = 44  ;;  %s289_s21 = sand.u32 (!%p1003_p5), 1, %s915_s25  }
  0x24   : > { %s1049_s30 = sshll.u32 (!%p1003_p5), %s289_s21, 1  ;;  %s290_s8 = scalar_lea.sflag (!%p1003_p5), [#allocation3], %s289_s21 }
  0x25   : > { %s293_s9 = scalar_lea.vmem (!%p1003_p5), [#allocation2], %s1049_s30 }
  0x28   : > { %902 = dma.done.wait (%p996_p4), %s290_s8, 32  }
  0x29   : > { %904 = vsyncadd (%p996_p4), %s290_s8, 4294967264 }
  0x2a   : > { %906 = dma.done.wait (%p69_p1), [#allocation5], 48  }
  0x2b   : > { %908 = vsyncadd (%p69_p1), [#allocation5], 4294967248  ;;  %p345_p5 = scmp.lt.s32.totalorder %s988_s28, 1  ;;  %v927_v0 = vmov 0   ;;  %v928_v3 = vmov 1   ;;  %v440_v4 = vld [vmem:[%s1133_s4 + $0x20] sm:$0xff] }
  0x2c   : > { %786 = vset.pattern.permute.xlu1 %v927_v0  ;;  %784 = vset.pattern.permute.xlu0 %v927_v0  ;;  %v441_v5 = vld [vmem:[%s1133_s4 + $0x28] sm:$0xff]  ;;  %v442_v6 = vld [vmem:[%s1133_s4 + $0x30] sm:$0xff]  ;;  %v443_v7 = vld [vmem:[%s1133_s4 + $0x38] sm:$0xff]  ;;  %vm397_vm0 = vcmask 261120   ;;  %vm454_vm2 = vcmask 130048  }
  0x2d   : > { %s1145_s28 = smov (!%p345_p5, %s988_s28), 1  ;;  %475 = vmatpush.msra.mxu0 %v440_v4  ;;  %498 = vmatpush.msra.mxu1 %v441_v5  ;;  %v436_v8 = vld [vmem:[%s1133_s4] sm:$0xff]  ;;  %v437_v9 = vld [vmem:[%s1133_s4 + $0x8] sm:$0xff]  ;;  %v438_v10 = vld [vmem:[%s1133_s4 + $0x10] sm:$0xff] }
  0x2e   : > { %s719_s10 = sshll.u32 %s1145_s28, 4  ;;  %521 = vmatpush.msra.mxu2 %v442_v6  ;;  %544 = vmatpush.msra.mxu3 %v443_v7  ;;  %v439_v11 = vld [vmem:[%s1133_s4 + $0x18] sm:$0xff]  ;;  %v362_v12 = vld [vmem:[%s293_s9] sm:$0x3]  ;;  %v788_v16 = vld [vmem:[#allocation4] ss:$0 sm:$0xff] }
  0x2f   : > { %s349_s12 = scalar_lea.vmem %s1129_s0, %s719_s10  ;;  %476 = vmatpush.msra.mxu0 %v436_v8  ;;  %499 = vmatpush.msra.mxu1 %v437_v9  ;;  %v400_v15 = vperm.slane %v362_v12, 0  ;;  %v789_v18 = vld [vmem:[#allocation4 + $0x1] ss:$0 sm:$0xff]  ;;  %v403_v19 = vperm.slane %v362_v12, 1  ;;  %v790_v26 = vld [vmem:[#allocation6] ss:$0 sm:$0xff]  ;;  %s354_s14 = scalar_lea.vmem %s1135_s6, %s719_s10 }
  0x30   : > { %v361_v1 = vld [vmem:[%s349_s12 + $0x8] sm:$0xff]  ;;  %v360_v2 = vld [vmem:[%s349_s12] sm:$0xff]  ;;  %522 = vmatpush.msra.mxu2 %v438_v10  ;;  %545 = vmatpush.msra.mxu3 %v439_v11  ;;  %s721_s16 = sshll.u32 %s1145_s28, 6 }
  0x31   : > { %371 = vperm.xlu1 %786, %v361_v1   ;;  %366 = vperm.xlu0 %784, %v360_v2   ;;  %v444_v60 = vld [vmem:[%s1134_s5] sm:$0xf]  ;;  %s359_s19 = scalar_lea.vmem %s1136_s7, %s721_s16 }
  0x32   : > { %v446_v61 = vperm.slane %v444_v60, 0  ;;  %v447_v62 = vperm.slane %v444_v60, 1  ;;  %v449_v4 = vperm.slane %v444_v60, 3 }
  0x39   : > { %787 = vset.pattern.permute.xlu1 %v928_v3  ;;  %785 = vset.pattern.permute.xlu0 %v928_v3  ;;  %v448_v3 = vperm.slane %v444_v60, 2 }
  0x3a   : > { %383 = vperm.xlu1 %787, %v361_v1   ;;  %379 = vperm.xlu0 %785, %v360_v2  }
  0xa3   : > { %v367_v13 = vpop.permute.xlu0 %366  ;;  %v372_v14 = vpop.permute.xlu1 %371 }
  0xa4   : > { %v402_v17 = vsub.f32 %v372_v14, %v400_v15  ;;  %v401_v20 = vsub.f32 %v367_v13, %v400_v15  ;;  %v376_v21 = vmul.f32 %v788_v16, %v372_v14  ;;  %v375_v22 = vmul.f32 %v788_v16, %v367_v13 }
  0xa6   : > { %v407_v23 = vmul.f32 %v402_v17, %v402_v17  ;;  %v406_v31 = vmul.f32 %v401_v20, %v401_v20 }
  0xac   : > { %v384_v24 = vpop.permute.xlu1 %383  ;;  %v380_v25 = vpop.permute.xlu0 %379 }
  0xad   : > { %v388_v27 = vmul.f32 %v789_v18, %v384_v24  ;;  %v405_v28 = vsub.f32 %v384_v24, %v403_v19  ;;  %v387_v29 = vmul.f32 %v789_v18, %v380_v25  ;;  %v404_v30 = vsub.f32 %v380_v25, %v403_v19 }
  0xaf   : > { %v390_v32 = vadd.f32 %v388_v27, %v376_v21  ;;  %v409_v33 = vmul.f32 %v405_v28, %v405_v28  ;;  %v389_v34 = vadd.f32 %v387_v29, %v375_v22  ;;  %v408_v35 = vmul.f32 %v404_v30, %v404_v30 }
  0xb1   : > { %v396_v36 = vadd.f32 %v790_v26, %v390_v32  ;;  %v411_v37 = vadd.f32 %v409_v33, %v407_v23  ;;  %v395_v38 = vadd.f32 %v790_v26, %v389_v34  ;;  %v410_v39 = vadd.f32 %v408_v35, %v406_v31 }
  0xb3   : > { %399 = vst.msk [vmem:[%s354_s14 + $0x8] sm:$0xff] %vm397_vm0, %v396_v36  ;;  %791 = vrsqrt.f32 %v411_v37  ;;  %vm419_vm1 = vcmp.eq.f32.partialorder %v410_v39, inf  ;;  %v422_v53 = vand.u32 2147483648, %v410_v39  ;;  %vm421_vm3 = vcmp.eq.f32.partialorder %v410_v39, 0.0 }
  0xb4   : > { %398 = vst.msk [vmem:[%s354_s14] sm:$0xff] %vm397_vm0, %v395_v38  ;;  %793 = vrsqrt.f32 %v410_v39  ;;  %vm431_vm4 = vcmp.eq.f32.partialorder %v411_v37, inf  ;;  %v434_v58 = vand.u32 2147483648, %v411_v37  ;;  %vm433_vm5 = vcmp.eq.f32.partialorder %v411_v37, 0.0 }
  0xb9   : > { %v792_v40 = vpop.eup %791 }
  0xba   : > { %v794_v41 = vpop.eup %793  ;;  %v425_v42 = vmul.f32 %v792_v40, %v411_v37 }
  0xbb   : > { %v413_v43 = vmul.f32 %v794_v41, %v410_v39 }
  0xbc   : > { %v426_v44 = vmul.f32 %v792_v40, %v425_v42 }
  0xbd   : > { %v414_v45 = vmul.f32 %v794_v41, %v413_v43 }
  0xbe   : > { %v427_v46 = vmul.f32 0.5, %v426_v44 }
  0xbf   : > { %v415_v47 = vmul.f32 0.5, %v414_v45 }
  0xc0   : > { %v428_v49 = vsub.f32 1.5, %v427_v46 }
  0xc1   : > { %v416_v48 = vsub.f32 1.5, %v415_v47 }
  0xc2   : > { %v429_v52 = vmul.f32 %v792_v40, %v428_v49 }
  0xc3   : > { %v417_v50 = vmul.f32 %v794_v41, %v416_v48 }
  0xc4   : > { %v430_v56 = vmul.f32 %v429_v52, %v411_v37 }
  0xc5   : > { %v418_v51 = vmul.f32 %v417_v50, %v410_v39 }
  0xc6   : > { %v432_v57 = vsel %vm431_vm4, %v411_v37, %v430_v56 }
  0xc7   : > { %v420_v54 = vsel %vm419_vm1, %v410_v39, %v418_v51  ;;  %v435_v59 = vsel %vm433_vm5, %v434_v58, %v432_v57 }
  0xc8   : > { %v423_v55 = vsel %vm421_vm3, %v422_v53, %v420_v54 }
  0xc9   : > { %709 = vmatmul.msk.f32.vlgmr.msra.gmra.mxu0 %vm454_vm2, %v423_v55  ;;  %711 = vmatmul.msk.f32.vlgmr.msra.gmra.mxu1 %vm454_vm2, %v423_v55 }
  0xca   : > { %713 = vmatmul.msk.f32.vlgmr.msra.gmra.mxu2 %vm454_vm2, %v423_v55  ;;  %715 = vmatmul.msk.f32.vlgmr.msra.gmra.mxu3 %vm454_vm2, %v423_v55 }
  0xd1   : > { %710 = vmatmul.msk.f32.gmra.mxu0 %vm454_vm2, %v435_v59  ;;  %712 = vmatmul.msk.f32.gmra.mxu1 %vm454_vm2, %v435_v59 }
  0xd2   : > { %714 = vmatmul.msk.f32.gmra.mxu2 %vm454_vm2, %v435_v59  ;;  %716 = vmatmul.msk.f32.gmra.mxu3 %vm454_vm2, %v435_v59 }
 0x146   : > { %v478_v63 = vpop.f32.mrf.mxu0  ;;  %v501_v0 = vpop.f32.mrf.mxu1 }
 0x147   : > { %v479_v1 = vadd.f32 %v478_v63, %v446_v61  ;;  %v502_v2 = vadd.f32 %v501_v0, %v447_v62 }
 0x149   : > { %553 = vst [vmem:[%s359_s19] sm:$0xff] %v479_v1 }
 0x14a   : > { %554 = vst [vmem:[%s359_s19 + $0x8] sm:$0xff] %v502_v2 }
 0x14d   : > { %v524_v5 = vpop.f32.mrf.mxu2  ;;  %v547_v6 = vpop.f32.mrf.mxu3 }
 0x14e   : > { %v525_v7 = vadd.f32 %v524_v5, %v448_v3  ;;  %v548_v8 = vadd.f32 %v547_v6, %v449_v4  ;;  %v481_v9 = vpop.f32.mrf.mxu0  ;;  %v504_v10 = vpop.f32.mrf.mxu1 }
 0x14f   : > { %v482_v11 = vadd.f32 %v481_v9, %v446_v61  ;;  %v505_v12 = vadd.f32 %v504_v10, %v447_v62 }
 0x150   : > { %555 = vst [vmem:[%s359_s19 + $0x10] sm:$0xff] %v525_v7 }
 0x151   : > { %556 = vst [vmem:[%s359_s19 + $0x18] sm:$0xff] %v548_v8 }
 0x152   : > { %557 = vst [vmem:[%s359_s19 + $0x20] sm:$0xff] %v482_v11 }
 0x153   : > { %558 = vst [vmem:[%s359_s19 + $0x28] sm:$0xff] %v505_v12 }
 0x155   : > { %v527_v13 = vpop.f32.mrf.mxu2  ;;  %v550_v14 = vpop.f32.mrf.mxu3 }
 0x156   : > { %v528_v15 = vadd.f32 %v527_v13, %v448_v3  ;;  %v551_v16 = vadd.f32 %v550_v14, %v449_v4 }
 0x158   : > { %559 = vst [vmem:[%s359_s19 + $0x30] sm:$0xff] %v528_v15 }
 0x159   : > { %560 = vst [vmem:[%s359_s19 + $0x38] sm:$0xff] %v551_v16 }
 0x15a PF: > { %p19_p1 = scmp.ge.s32.totalorder %s1015_s18, 4   ;;  %s1140_s24 = smov %s915_s25 }
 0x15b   : > { %s1141_s25 = smov %s919_s26  ;;  %s1142_s26 = smov %s1025_s22 }
 0x15c   : > { %s1143_s27 = smov %s1015_s18  ;;  %21 = sbr.rel (!%p19_p1) target bundleno = 4 (0x4), region = 107 }
 0x161   :  { %598 = vsyncpa [#allocation3], 1 }
 0x162   :  { %600 = vsyncpa [#allocation3 + $0x1], 1 }
 0x163   :  { %601 = vsyncpa [#allocation5], 1 }

// kernel: nonautoregressive_encoder.12
= control target key start
LH: loop header
LB: loop body
LE: loop exit
PB: predicated region body
PF: predicated region fallthrough
CT: control target
= control target key end

     0   :  { %s1989_s30 = smov 0   ;;  %s1991_s10 = smov 0   ;;  %s3707_s0 = inlined_call_operand.vmem [shape: f32[2,16,512], index: 0, kind: input, shape index: {}]   ;;  %s3708_s1 = inlined_call_operand.vmem [shape: f32[2,16,128], index: 1, kind: input, shape index: {}]   ;;  %s3709_s2 = inlined_call_operand.vmem [shape: f32[2,1,512], index: 2, kind: input, shape index: {}]   ;;  %s3710_s3 = inlined_call_operand.vmem [shape: f32[2,1,512], index: 3, kind: input, shape index: {}]   ;;  %s3711_s4 = inlined_call_operand.vmem [shape: f32[512,32], index: 4, kind: input, shape index: {}]   ;;  %s3712_s5 = inlined_call_operand.vmem [shape: f32[512,512], index: 5, kind: input, shape index: {}]   ;;  %s3713_s6 = inlined_call_operand.vmem [shape: f32[32,512], index: 6, kind: input, shape index: {}]   ;;  %s3714_s7 = inlined_call_operand.vmem [shape: f32[1,512], index: 7, kind: input, shape index: {}]   ;;  %s3715_s8 = inlined_call_operand.vmem [shape: f32[2,16,32], index: 8, kind: output, shape index: {0}]   ;;  %s3716_s9 = inlined_call_operand.vmem [shape: f32[2,2,32], index: 9, kind: output, shape index: {1}]  }
   0x1   :  { %3720 = sst [smem:[#allocation2_spill]] %s3707_s0  ;;  %s1993_s11 = smov 0  }
   0x2   :  { %s1995_s12 = smov 0   ;;  %s1997_s13 = smov 0  }
   0x3 LB: > { %s29_s14 = sadd.s32 1, %s1927_s11  ;;  %s32_s15 = sadd.s32 1, %s1931_s12  ;;  %s1935_s13 = sphi %s1997_s13, %s20_s13   ;;  %s1931_s12 = sphi %s1995_s12, %s3744_s12   ;;  %s1927_s11 = sphi %s1993_s11, %s3743_s11   ;;  %s1923_s10 = sphi %s1991_s10, %s3742_s10   ;;  %s1919_s30 = sphi %s1989_s30, %s3741_s30  }
   0x4   : > { %p30_p0 = scmp.ge.s32.totalorder %s29_s14, 2  ;;  %p1812_p1 = scmp.ge.s32.totalorder %s1935_s13, 1 }
   0x5   : > { %p343_p2 = scmp.lt.s32.totalorder %s1935_s13, 5 }
   0x6   : > { %s3746_s14 = smov (%p30_p0, %s29_s14), 0  ;;  %s3748_s15 = smov (!%p30_p0, %s32_s15), %s1931_s12 }
   0x7   : > { %p344_p3 = pnand %p1812_p1, %p343_p2  ;;  %p34_p4 = scmp.ge.s32.totalorder %s3748_s15, 2 }
   0x8   : > { %p406_p5 = scmp.lt.s32.totalorder (!%p344_p3), %s1923_s10, 1  ;;  %p408_p6 = scmp.lt.s32.totalorder (!%p344_p3), %s1919_s30, 1 }
   0x9   : > { %s3750_s15 = smov (%p34_p4, %s3748_s15), 0  ;;  %347 = sbr.rel (%p344_p3) target bundleno = 549 (0x225), region = 52 }
   0xa   : > { %s3721_s0 = sld [smem:[#allocation2_spill]] (!%p344_p3)  ;;  %p1831_p7 = scmp.ne.s32.totalorder (!%p344_p3), %s1919_s30, 0 }
   0xe   : > { %v553_v0 = vld [vmem:[%s3711_s4 + $0x78] sm:$0xff]  ;;  %v552_v2 = vld [vmem:[%s3711_s4 + $0x70] sm:$0xff]  ;;  %s3752_s10 = smov (!%p406_p5, %s1923_s10), 1  ;;  %v551_v6 = vld [vmem:[%s3711_s4 + $0x68] sm:$0xff] }
   0xf   : > { %v585_v1 = vld [vmem:[%s3711_s4 + $0x178] sm:$0xff]  ;;  %602 = vmatpush.msra.mxu0 %v553_v0  ;;  %v584_v4 = vld [vmem:[%s3711_s4 + $0x170] sm:$0xff]  ;;  %v583_v8 = vld [vmem:[%s3711_s4 + $0x168] sm:$0xff]  ;;  %s409_s20 = scalar_select %p408_p6, %s1919_s30, 1 }
  0x10   : > { %642 = vmatpush.msra.mxu2 %v585_v1  ;;  %v569_v3 = vld [vmem:[%s3711_s4 + $0xf8] sm:$0xff]  ;;  %v568_v7 = vld [vmem:[%s3711_s4 + $0xf0] sm:$0xff]  ;;  %v567_v10 = vld [vmem:[%s3711_s4 + $0xe8] sm:$0xff]  ;;  %s1814_s25 = sshll.u32 %s3752_s10, 3  ;;  %s3717_s26 = sshll.u32 %s3752_s10, 1 }
  0x11   : > { %v601_v5 = vld [vmem:[%s3711_s4 + $0x1f8] sm:$0xff]  ;;  %622 = vmatpush.msra.mxu1 %v569_v3  ;;  %603 = vmatpush.msra.mxu0 %v552_v2  ;;  %v600_v9 = vld [vmem:[%s3711_s4 + $0x1f0] sm:$0xff]  ;;  %v550_v11 = vld [vmem:[%s3711_s4 + $0x60] sm:$0xff]  ;;  %s1813_s19 = sshll.u32 %s409_s20, 2  ;;  %s2073_s21 = sadd.s32 %s3717_s26, %s409_s20 }
  0x12   : > { %662 = vmatpush.msra.mxu3 %v601_v5  ;;  %643 = vmatpush.msra.mxu2 %v584_v4  ;;  %v582_v12 = vld [vmem:[%s3711_s4 + $0x160] sm:$0xff]  ;;  %v599_v13 = vld [vmem:[%s3711_s4 + $0x1e8] sm:$0xff]  ;;  %s412_s28 = sadd.s32 %s1814_s25, %s1813_s19  ;;  %s3718_s29 = sshll.u32 %s2073_s21, 3  ;;  %v549_v16 = vld [vmem:[%s3711_s4 + $0x58] sm:$0xff] }
  0x13   : > { %623 = vmatpush.msra.mxu1 %v568_v7  ;;  %604 = vmatpush.msra.mxu0 %v551_v6  ;;  %v566_v14 = vld [vmem:[%s3711_s4 + $0xe0] sm:$0xff]  ;;  %v581_v17 = vld [vmem:[%s3711_s4 + $0x158] sm:$0xff]  ;;  %v548_v18 = vld [vmem:[%s3711_s4 + $0x50] sm:$0xff]  ;;  %s1815_s23 = sshll.u32 %s412_s28, 3  ;;  %s2096_s19 = scalar_lea.vmem %s3708_s1, %s3718_s29 }
  0x14   : > { %663 = vmatpush.msra.mxu3 %v600_v9  ;;  %644 = vmatpush.msra.mxu2 %v583_v8  ;;  %v598_v15 = vld [vmem:[%s3711_s4 + $0x1e0] sm:$0xff]  ;;  %v565_v19 = vld [vmem:[%s3711_s4 + $0xd8] sm:$0xff]  ;;  %v580_v20 = vld [vmem:[%s3711_s4 + $0x150] sm:$0xff]  ;;  %s2110_s24 = scalar_lea.vmem %s3721_s0, %s1815_s23  ;;  %s3722_s20 = sshll.u32 %s3752_s10, 1 }
  0x15   : > { %624 = vmatpush.msra.mxu1 %v567_v10  ;;  %605 = vmatpush.msra.mxu0 %v550_v11  ;;  %v597_v21 = vld [vmem:[%s3711_s4 + $0x1d8] sm:$0xff]  ;;  %v447_v22 = vld [vmem:[%s2096_s19] sm:$0xff]  ;;  %v547_v23 = vld [vmem:[%s3711_s4 + $0x48] sm:$0xff]  ;;  %s2124_s23 = scalar_lea.vmem %s3716_s9, %s3722_s20  ;;  %s1937_s28 = smov 64  }
  0x16   : > { %664 = vmatpush.msra.mxu3 %v599_v13  ;;  %645 = vmatpush.msra.mxu2 %v582_v12  ;;  %v564_v24 = vld [vmem:[%s3711_s4 + $0xd0] sm:$0xff]  ;;  %v2127_v25 = vld [vmem:[%s2110_s24] sm:$0xff]  ;;  %v2130_v26 = vld [vmem:[%s2110_s24 + $0x8] sm:$0xff]  ;;  %s3719_s18 = sshll.u32 %s3752_s10, 2  ;;  %s3739_s26 = sshll.u32 %s2073_s21, 3 }
  0x17   : > { %625 = vmatpush.msra.mxu1 %v566_v14  ;;  %v2133_v27 = vld [vmem:[%s2110_s24 + $0x10] sm:$0xff]  ;;  %959 = vrot.lane.b32.xlu0 %v447_v22, %s1937_s28  ;;  %v2136_v28 = vld [vmem:[%s2110_s24 + $0x18] sm:$0xff]  ;;  %v1823_v29 = vmul.f32 -1.442695, %v2127_v25  ;;  %v1824_v30 = vmul.f32 -1.442695, %v2130_v26  ;;  %s426_s17 = scalar_lea.vmem %s3709_s2, %s3719_s18  ;;  %s438_s22 = scalar_lea.vmem %s3715_s8, %s3739_s26 }
  0x18   : > { %665 = vmatpush.msra.mxu3 %v598_v15  ;;  %606 = vmatpush.msra.mxu0 %v549_v16  ;;  %v596_v31 = vld [vmem:[%s3711_s4 + $0x1d0] sm:$0xff]  ;;  %v1825_v32 = vmul.f32 -1.442695, %v2133_v27  ;;  %v1826_v33 = vmul.f32 -1.442695, %v2136_v28  ;;  %v579_v34 = vld [vmem:[%s3711_s4 + $0x148] sm:$0xff] }
  0x19   : > { %646 = vmatpush.msra.mxu2 %v581_v17  ;;  %626 = vmatpush.msra.mxu1 %v565_v19  ;;  %v563_v35 = vld [vmem:[%s3711_s4 + $0xc8] sm:$0xff]  ;;  %1876 = vpow2.f32 %v1823_v29  ;;  %v546_v36 = vld [vmem:[%s3711_s4 + $0x40] sm:$0xff]  ;;  %v545_v40 = vld [vmem:[%s3711_s4 + $0x38] sm:$0xff]  ;;  %s3740_s28 = sshll.u32 %s3752_s10, 2 }
  0x1a   : > { %607 = vmatpush.msra.mxu0 %v548_v18  ;;  %666 = vmatpush.msra.mxu3 %v597_v21  ;;  %v595_v37 = vld [vmem:[%s3711_s4 + $0x1c8] sm:$0xff]  ;;  %1878 = vpow2.f32 %v1824_v30  ;;  %v578_v38 = vld [vmem:[%s3711_s4 + $0x140] sm:$0xff]  ;;  %v577_v42 = vld [vmem:[%s3711_s4 + $0x138] sm:$0xff]  ;;  %s430_s16 = scalar_lea.vmem %s3710_s3, %s3740_s28 }
  0x1b   : > { %647 = vmatpush.msra.mxu2 %v580_v20  ;;  %627 = vmatpush.msra.mxu1 %v564_v24  ;;  %v562_v39 = vld [vmem:[%s3711_s4 + $0xc0] sm:$0xff]  ;;  %1880 = vpow2.f32 %v1825_v32  ;;  %v561_v43 = vld [vmem:[%s3711_s4 + $0xb8] sm:$0xff]  ;;  %v544_v44 = vld [vmem:[%s3711_s4 + $0x30] sm:$0xff] }
  0x1c   : > { %608 = vmatpush.msra.mxu0 %v547_v23  ;;  %667 = vmatpush.msra.mxu3 %v596_v31  ;;  %v594_v41 = vld [vmem:[%s3711_s4 + $0x1c0] sm:$0xff]  ;;  %1882 = vpow2.f32 %v1826_v33  ;;  %v593_v45 = vld [vmem:[%s3711_s4 + $0x1b8] sm:$0xff]  ;;  %v576_v46 = vld [vmem:[%s3711_s4 + $0x130] sm:$0xff] }
  0x1d   : > { %648 = vmatpush.msra.mxu2 %v579_v34  ;;  %628 = vmatpush.msra.mxu1 %v563_v35  ;;  %v560_v47 = vld [vmem:[%s3711_s4 + $0xb0] sm:$0xff]  ;;  %v543_v49 = vld [vmem:[%s3711_s4 + $0x28] sm:$0xff]  ;;  %v542_v56 = vld [vmem:[%s3711_s4 + $0x20] sm:$0xff] }
  0x1e   : > { %609 = vmatpush.msra.mxu0 %v546_v36  ;;  %668 = vmatpush.msra.mxu3 %v595_v37  ;;  %v592_v50 = vld [vmem:[%s3711_s4 + $0x1b0] sm:$0xff]  ;;  %v575_v52 = vld [vmem:[%s3711_s4 + $0x128] sm:$0xff]  ;;  %v574_v60 = vld [vmem:[%s3711_s4 + $0x120] sm:$0xff] }
  0x1f   : > { %649 = vmatpush.msra.mxu2 %v578_v38  ;;  %629 = vmatpush.msra.mxu1 %v562_v39  ;;  %v1877_v48 = vpop.eup %1876  ;;  %v559_v53 = vld [vmem:[%s3711_s4 + $0xa8] sm:$0xff]  ;;  %v558_v61 = vld [vmem:[%s3711_s4 + $0xa0] sm:$0xff]  ;;  %v541_v63 = vld [vmem:[%s3711_s4 + $0x18] sm:$0xff] }
  0x20   : > { %610 = vmatpush.msra.mxu0 %v545_v40  ;;  %669 = vmatpush.msra.mxu3 %v594_v41  ;;  %v1879_v51 = vpop.eup %1878  ;;  %v2199_v54 = vadd.f32 1.0, %v1877_v48  ;;  %v591_v57 = vld [vmem:[%s3711_s4 + $0x1a8] sm:$0xff]  ;;  %v590_v0 = vld [vmem:[%s3711_s4 + $0x1a0] sm:$0xff]  ;;  %v573_v2 = vld [vmem:[%s3711_s4 + $0x118] sm:$0xff] }
  0x21   : > { %650 = vmatpush.msra.mxu2 %v577_v42  ;;  %630 = vmatpush.msra.mxu1 %v561_v43  ;;  %v1881_v55 = vpop.eup %1880  ;;  %v2207_v58 = vadd.f32 1.0, %v1879_v51  ;;  %v557_v3 = vld [vmem:[%s3711_s4 + $0x98] sm:$0xff]  ;;  %v540_v4 = vld [vmem:[%s3711_s4 + $0x10] sm:$0xff]  ;;  %v539_v12 = vld [vmem:[%s3711_s4 + $0x8] sm:$0xff] }
  0x22   : > { %611 = vmatpush.msra.mxu0 %v544_v44  ;;  %670 = vmatpush.msra.mxu3 %v593_v45  ;;  %v1883_v59 = vpop.eup %1882  ;;  %v2215_v62 = vadd.f32 1.0, %v1881_v55  ;;  %1884 = vrcp.f32 %v2199_v54  ;;  %v589_v5 = vld [vmem:[%s3711_s4 + $0x198] sm:$0xff]  ;;  %v473_v6 = vand.u32 2147483647, %v2199_v54  ;;  %v475_v7 = vand.u32 2147483648, %v2199_v54  ;;  %v572_v8 = vld [vmem:[%s3711_s4 + $0x110] sm:$0xff] }
  0x23   : > { %651 = vmatpush.msra.mxu2 %v576_v46  ;;  %631 = vmatpush.msra.mxu1 %v560_v47  ;;  %v2224_v1 = vadd.f32 1.0, %v1883_v59  ;;  %1886 = vrcp.f32 %v2207_v58  ;;  %v556_v9 = vld [vmem:[%s3711_s4 + $0x90] sm:$0xff]  ;;  %v571_v15 = vld [vmem:[%s3711_s4 + $0x108] sm:$0xff]  ;;  %vm469_vm1 = vweird.f32 %v2199_v54  ;;  %vm484_vm2 = vweird.f32 %v2207_v58  ;;  %v538_v18 = vld [vmem:[%s3711_s4] sm:$0xff] }
  0x24   : > { %612 = vmatpush.msra.mxu0 %v543_v49  ;;  %671 = vmatpush.msra.mxu3 %v592_v50  ;;  %1888 = vrcp.f32 %v2215_v62  ;;  %v503_v10 = vand.u32 2147483647, %v2215_v62  ;;  %v505_v11 = vand.u32 2147483648, %v2215_v62  ;;  %v588_v13 = vld [vmem:[%s3711_s4 + $0x190] sm:$0xff]  ;;  %v555_v16 = vld [vmem:[%s3711_s4 + $0x88] sm:$0xff]  ;;  %vm499_vm0 = vweird.f32 %v2215_v62  ;;  %v570_v24 = vld [vmem:[%s3711_s4 + $0x100] sm:$0xff] }
  0x25   : > { %652 = vmatpush.msra.mxu2 %v575_v52  ;;  %632 = vmatpush.msra.mxu1 %v559_v53  ;;  %1890 = vrcp.f32 %v2224_v1  ;;  %v587_v19 = vld [vmem:[%s3711_s4 + $0x188] sm:$0xff]  ;;  %vm2279_vm3 = vcmp.eq.f32.partialorder %v473_v6, 8.507059e+37  ;;  %v2283_v22 = vor.u32 1.1754944e-38, %v475_v7  ;;  %vm514_vm4 = vweird.f32 %v2224_v1  ;;  %v954_v29 = vld [vmem:[%s3713_s6 + $0x60] sm:$0xff]  ;;  %v956_v35 = vld [vmem:[%s3713_s6 + $0x70] sm:$0xff] }
  0x26   : > { %613 = vmatpush.msra.mxu0 %v542_v56  ;;  %672 = vmatpush.msra.mxu3 %v591_v57  ;;  %vm2299_vm5 = vcmp.eq.f32.partialorder %v503_v10, 8.507059e+37  ;;  %v2303_v31 = vor.u32 1.1754944e-38, %v505_v11  ;;  %v520_v32 = vand.u32 2147483648, %v2224_v1  ;;  %v554_v36 = vld [vmem:[%s3711_s4 + $0x80] sm:$0xff]  ;;  %v490_v39 = vand.u32 2147483648, %v2207_v58  ;;  %v955_v42 = vld [vmem:[%s3713_s6 + $0x68] sm:$0xff] }
  0x27   : > { %653 = vmatpush.msra.mxu2 %v574_v60  ;;  %633 = vmatpush.msra.mxu1 %v558_v61  ;;  %v586_v40 = vld [vmem:[%s3711_s4 + $0x180] sm:$0xff]  ;;  %v488_v45 = vand.u32 2147483647, %v2207_v58  ;;  %v952_v46 = vld [vmem:[%s3713_s6 + $0x50] sm:$0xff]  ;;  %v518_v50 = vand.u32 2147483647, %v2224_v1 }
  0x28   : > { %614 = vmatpush.msra.mxu0 %v541_v63  ;;  %673 = vmatpush.msra.mxu3 %v590_v0  ;;  %v2258_v14 = vpop.eup %1884  ;;  %v950_v41 = vld [vmem:[%s3713_s6 + $0x40] sm:$0xff]  ;;  %v957_v51 = vld [vmem:[%s3713_s6 + $0x78] sm:$0xff]  ;;  %v521_v56 = vor.u32 1.1754944e-38, %v520_v32  ;;  %v951_v59 = vld [vmem:[%s3713_s6 + $0x48] sm:$0xff] }
  0x29   : > { %654 = vmatpush.msra.mxu2 %v573_v2  ;;  %634 = vmatpush.msra.mxu1 %v557_v3  ;;  %v2269_v17 = vpop.eup %1886  ;;  %v465_v20 = vmul.f32 %v2258_v14, %v2199_v54  ;;  %vm470_vm6 = vweird.f32 %v2258_v14  ;;  %v2337_v48 = vld [vmem:[%s426_s17] sm:$0xf]  ;;  %v948_v54 = vld [vmem:[%s3713_s6 + $0x30] sm:$0xff]  ;;  %v491_v2 = vor.u32 1.1754944e-38, %v490_v39  ;;  %v953_v3 = vld [vmem:[%s3713_s6 + $0x58] sm:$0xff]  ;;  %vm2391_vm13 = vcmp.eq.f32.partialorder %v488_v45, 8.507059e+37 }
  0x2a   : > { %615 = vmatpush.msra.mxu0 %v540_v4  ;;  %674 = vmatpush.msra.mxu3 %v589_v5  ;;  %v2286_v23 = vpop.eup %1888  ;;  %v480_v33 = vmul.f32 %v2269_v17, %v2207_v58  ;;  %vm485_vm7 = vweird.f32 %v2269_v17  ;;  %v946_v52 = vld [vmem:[%s3713_s6 + $0x20] sm:$0xff]  ;;  %vm2351_vm9 = vmor %vm469_vm1, %vm470_vm6  ;;  %v526_v63 = vperm.slane %v2337_v48, 0  ;;  %v528_v58 = vperm.slane %v2337_v48, 2  ;;  %v944_v10 = vld [vmem:[%s3713_s6 + $0x10] sm:$0xff] }
  0x2b   : > { %655 = vmatpush.msra.mxu2 %v572_v8  ;;  %635 = vmatpush.msra.mxu1 %v556_v9  ;;  %v2308_v34 = vpop.eup %1890  ;;  %v495_v37 = vmul.f32 %v2286_v23, %v2215_v62  ;;  %v466_v38 = vsub.f32 1.0, %v465_v20  ;;  %vm500_vm8 = vweird.f32 %v2286_v23  ;;  %vm2370_vm11 = vmor %vm484_vm2, %vm485_vm7  ;;  %v942_v5 = vld [vmem:[%s3713_s6] sm:$0xff]  ;;  %v947_v9 = vld [vmem:[%s3713_s6 + $0x28] sm:$0xff]  ;;  %vm2413_vm15 = vcmp.eq.f32.partialorder %v518_v50, 8.507059e+37 }
  0x2c   : > { %616 = vmatpush.msra.mxu0 %v539_v12  ;;  %675 = vmatpush.msra.mxu3 %v588_v13  ;;  %v510_v43 = vmul.f32 %v2308_v34, %v2224_v1  ;;  %v481_v44 = vsub.f32 1.0, %v480_v33  ;;  %vm515_vm10 = vweird.f32 %v2308_v34  ;;  %vm2381_vm12 = vmor %vm499_vm0, %vm500_vm8  ;;  %v746_v21 = vld [vmem:[%s3712_s5 + $0x1e0] sm:$0xff]  ;;  %v945_v32 = vld [vmem:[%s3713_s6 + $0x18] sm:$0xff]  ;;  %vm684_vm0 = vcmask 261120  }
  0x2d   : > { %656 = vmatpush.msra.mxu2 %v571_v15  ;;  %636 = vmatpush.msra.mxu1 %v555_v16  ;;  %v496_v47 = vsub.f32 1.0, %v495_v37  ;;  %v467_v49 = vmul.f32 %v2258_v14, %v466_v38  ;;  %vm2409_vm14 = vmor %vm514_vm4, %vm515_vm10  ;;  %v527_v15 = vperm.slane %v2337_v48, 1  ;;  %v874_v30 = vld [vmem:[%s3712_s5 + $0x5e0] sm:$0xff] }
  0x2e   : > { %617 = vmatpush.msra.mxu0 %v538_v18  ;;  %676 = vmatpush.msra.mxu3 %v587_v19  ;;  %v511_v55 = vsub.f32 1.0, %v510_v43  ;;  %v482_v57 = vmul.f32 %v2269_v17, %v481_v44  ;;  %v529_v18 = vperm.slane %v2337_v48, 3  ;;  %v810_v37 = vld [vmem:[%s3712_s5 + $0x3e0] sm:$0xff] }
  0x2f   : > { %657 = vmatpush.msra.mxu2 %v570_v24  ;;  %637 = vmatpush.msra.mxu1 %v554_v36  ;;  %v497_v60 = vmul.f32 %v2286_v23, %v496_v47  ;;  %v468_v61 = vadd.f32 %v2258_v14, %v467_v49  ;;  %v870_v38 = vld [vmem:[%s3712_s5 + $0x5c0] sm:$0xff] }
  0x30   : > { %975 = vmatpush.msrb.mxu0 %v954_v29  ;;  %677 = vmatpush.msra.mxu3 %v586_v40  ;;  %v512_v6 = vmul.f32 %v2308_v34, %v511_v55  ;;  %v483_v7 = vadd.f32 %v2269_v17, %v482_v57  ;;  %v938_v39 = vld [vmem:[%s3712_s5 + $0x7e0] sm:$0xff] }
  0x31   : > { %1015 = vmatpush.msrb.mxu2 %v956_v35  ;;  %995 = vmatpush.msrb.mxu1 %v955_v42  ;;  %v498_v62 = vadd.f32 %v2286_v23, %v497_v60  ;;  %v472_v11 = vsel %vm2351_vm9, %v2258_v14, %v468_v61  ;;  %v949_v14 = vld [vmem:[%s3713_s6 + $0x38] sm:$0xff]  ;;  %v738_v40 = vld [vmem:[%s3712_s5 + $0x1a0] sm:$0xff] }
  0x32   : > { %976 = vmatpush.msrb.mxu0 %v950_v41  ;;  %1035 = vmatpush.msrb.mxu3 %v957_v51  ;;  %v477_v1 = vsel %vm2279_vm3, %v2283_v22, %v472_v11  ;;  %v513_v16 = vadd.f32 %v2308_v34, %v512_v6  ;;  %v487_v19 = vsel %vm2370_vm11, %v2269_v17, %v483_v7  ;;  %v943_v22 = vld [vmem:[%s3713_s6 + $0x8] sm:$0xff]  ;;  %v806_v41 = vld [vmem:[%s3712_s5 + $0x3c0] sm:$0xff] }
  0x33   : > { %1016 = vmatpush.msrb.mxu2 %v952_v46  ;;  %996 = vmatpush.msrb.mxu1 %v951_v59  ;;  %v502_v20 = vsel %vm2381_vm12, %v2286_v23, %v498_v62  ;;  %v534_v24 = vmul.f32 %v526_v63, %v477_v1  ;;  %v492_v29 = vsel %vm2391_vm13, %v491_v2, %v487_v19  ;;  %v866_v42 = vld [vmem:[%s3712_s5 + $0x5a0] sm:$0xff] }
  0x34   : > { %977 = vmatpush.msrb.mxu0 %v946_v52  ;;  %1036 = vmatpush.msrb.mxu3 %v953_v3  ;;  %v507_v17 = vsel %vm2299_vm5, %v2303_v31, %v502_v20  ;;  %v517_v23 = vsel %vm2409_vm14, %v2308_v34, %v513_v16  ;;  %v535_v31 = vmul.f32 %v527_v15, %v492_v29  ;;  %v742_v34 = vld [vmem:[%s3712_s5 + $0x1c0] sm:$0xff] }
  0x35   : > { %1017 = vmatpush.msrb.mxu2 %v948_v54  ;;  %997 = vmatpush.msrb.mxu1 %v947_v9  ;;  %v536_v33 = vmul.f32 %v528_v58, %v507_v17  ;;  %v522_v35 = vsel %vm2413_vm15, %v521_v56, %v517_v23  ;;  %v934_v43 = vld [vmem:[%s3712_s5 + $0x7c0] sm:$0xff] }
  0x36   : > { %978 = vmatpush.msrb.mxu0 %v942_v5  ;;  %1037 = vmatpush.msrb.mxu3 %v949_v14  ;;  %v537_v36 = vmul.f32 %v529_v18, %v522_v35  ;;  %v734_v44 = vld [vmem:[%s3712_s5 + $0x180] sm:$0xff] }
  0x37   : > { %1018 = vmatpush.msrb.mxu2 %v944_v10  ;;  %618 = vmatmul.f32.vlgmr.msra.gmra.mxu0 %v534_v24  ;;  %v802_v45 = vld [vmem:[%s3712_s5 + $0x3a0] sm:$0xff] }
  0x38   : > { %1043 = vmatpush.msra.mxu0 %v746_v21  ;;  %998 = vmatpush.msrb.mxu1 %v943_v22  ;;  %v862_v46 = vld [vmem:[%s3712_s5 + $0x580] sm:$0xff] }
  0x39   : > { %658 = vmatmul.f32.vlgmr.msra.gmra.mxu2 %v536_v33  ;;  %1038 = vmatpush.msrb.mxu3 %v945_v32  ;;  %v930_v47 = vld [vmem:[%s3712_s5 + $0x7a0] sm:$0xff] }
  0x3a   : > { %678 = vmatmul.f32.vlgmr.msra.gmra.mxu3 %v537_v36  ;;  %1083 = vmatpush.msra.mxu2 %v874_v30  ;;  %v730_v48 = vld [vmem:[%s3712_s5 + $0x160] sm:$0xff] }
  0x3b   : > { %638 = vmatmul.f32.vlgmr.msra.gmra.mxu1 %v535_v31  ;;  %1044 = vmatpush.msra.mxu0 %v742_v34  ;;  %v798_v49 = vld [vmem:[%s3712_s5 + $0x380] sm:$0xff] }
  0x3c   : > { %1063 = vmatpush.msra.mxu1 %v810_v37  ;;  %1084 = vmatpush.msra.mxu2 %v870_v38  ;;  %v858_v50 = vld [vmem:[%s3712_s5 + $0x560] sm:$0xff] }
  0x3d   : > { %1103 = vmatpush.msra.mxu3 %v938_v39  ;;  %1045 = vmatpush.msra.mxu0 %v738_v40  ;;  %v926_v51 = vld [vmem:[%s3712_s5 + $0x780] sm:$0xff]  ;;  %v747_v39 = vld [vmem:[%s3712_s5 + $0x1e8] sm:$0xff] }
  0x3e   : > { %1064 = vmatpush.msra.mxu1 %v806_v41  ;;  %1085 = vmatpush.msra.mxu2 %v866_v42  ;;  %v726_v52 = vld [vmem:[%s3712_s5 + $0x140] sm:$0xff]  ;;  %v875_v40 = vld [vmem:[%s3712_s5 + $0x5e8] sm:$0xff] }
  0x3f   : > { %1104 = vmatpush.msra.mxu3 %v934_v43  ;;  %1046 = vmatpush.msra.mxu0 %v734_v44  ;;  %v794_v53 = vld [vmem:[%s3712_s5 + $0x360] sm:$0xff]  ;;  %v811_v41 = vld [vmem:[%s3712_s5 + $0x3e8] sm:$0xff] }
  0x40   : > { %1065 = vmatpush.msra.mxu1 %v802_v45  ;;  %1086 = vmatpush.msra.mxu2 %v862_v46  ;;  %v854_v55 = vld [vmem:[%s3712_s5 + $0x540] sm:$0xff]  ;;  %v939_v42 = vld [vmem:[%s3712_s5 + $0x7e8] sm:$0xff] }
  0x41   : > { %1105 = vmatpush.msra.mxu3 %v930_v47  ;;  %1047 = vmatpush.msra.mxu0 %v730_v48  ;;  %v922_v56 = vld [vmem:[%s3712_s5 + $0x760] sm:$0xff]  ;;  %v743_v43 = vld [vmem:[%s3712_s5 + $0x1c8] sm:$0xff] }
  0x42   : > { %1066 = vmatpush.msra.mxu1 %v798_v49  ;;  %1087 = vmatpush.msra.mxu2 %v858_v50  ;;  %v722_v57 = vld [vmem:[%s3712_s5 + $0x120] sm:$0xff]  ;;  %v871_v44 = vld [vmem:[%s3712_s5 + $0x5c8] sm:$0xff] }
  0x43   : > { %1106 = vmatpush.msra.mxu3 %v926_v51  ;;  %1048 = vmatpush.msra.mxu0 %v726_v52  ;;  %v790_v59 = vld [vmem:[%s3712_s5 + $0x340] sm:$0xff]  ;;  %v807_v45 = vld [vmem:[%s3712_s5 + $0x3c8] sm:$0xff] }
  0x44   : > { %v850_v54 = vld [vmem:[%s3712_s5 + $0x520] sm:$0xff]  ;;  %1067 = vmatpush.msra.mxu1 %v794_v53  ;;  %1088 = vmatpush.msra.mxu2 %v854_v55  ;;  %v935_v46 = vld [vmem:[%s3712_s5 + $0x7c8] sm:$0xff] }
  0x45   : > { %v918_v60 = vld [vmem:[%s3712_s5 + $0x740] sm:$0xff]  ;;  %1107 = vmatpush.msra.mxu3 %v922_v56  ;;  %1049 = vmatpush.msra.mxu0 %v722_v57  ;;  %v739_v47 = vld [vmem:[%s3712_s5 + $0x1a8] sm:$0xff] }
  0x46   : > { %v718_v61 = vld [vmem:[%s3712_s5 + $0x100] sm:$0xff]  ;;  %1068 = vmatpush.msra.mxu1 %v790_v59  ;;  %1089 = vmatpush.msra.mxu2 %v850_v54  ;;  %v867_v48 = vld [vmem:[%s3712_s5 + $0x5a8] sm:$0xff] }
  0x47   : > { %v786_v63 = vld [vmem:[%s3712_s5 + $0x320] sm:$0xff]  ;;  %1108 = vmatpush.msra.mxu3 %v918_v60  ;;  %1050 = vmatpush.msra.mxu0 %v718_v61  ;;  %v803_v49 = vld [vmem:[%s3712_s5 + $0x3a8] sm:$0xff] }
  0x48   : > { %v846_v0 = vld [vmem:[%s3712_s5 + $0x500] sm:$0xff]  ;;  %1069 = vmatpush.msra.mxu1 %v786_v63  ;;  %v931_v50 = vld [vmem:[%s3712_s5 + $0x7a8] sm:$0xff] }
  0x49   : > { %v914_v2 = vld [vmem:[%s3712_s5 + $0x720] sm:$0xff]  ;;  %1090 = vmatpush.msra.mxu2 %v846_v0  ;;  %v735_v51 = vld [vmem:[%s3712_s5 + $0x188] sm:$0xff] }
  0x4a   : > { %v714_v3 = vld [vmem:[%s3712_s5 + $0xe0] sm:$0xff]  ;;  %1109 = vmatpush.msra.mxu3 %v914_v2  ;;  %v863_v52 = vld [vmem:[%s3712_s5 + $0x588] sm:$0xff] }
  0x4b   : > { %v782_v4 = vld [vmem:[%s3712_s5 + $0x300] sm:$0xff]  ;;  %1051 = vmatpush.msra.mxu0 %v714_v3  ;;  %v731_v53 = vld [vmem:[%s3712_s5 + $0x168] sm:$0xff] }
  0x4c   : > { %v842_v58 = vld [vmem:[%s3712_s5 + $0x4e0] sm:$0xff]  ;;  %1070 = vmatpush.msra.mxu1 %v782_v4  ;;  %v799_v55 = vld [vmem:[%s3712_s5 + $0x388] sm:$0xff] }
  0x4d   : > { %v910_v5 = vld [vmem:[%s3712_s5 + $0x700] sm:$0xff]  ;;  %1091 = vmatpush.msra.mxu2 %v842_v58  ;;  %v859_v56 = vld [vmem:[%s3712_s5 + $0x568] sm:$0xff] }
  0x4e   : > { %v710_v6 = vld [vmem:[%s3712_s5 + $0xc0] sm:$0xff]  ;;  %1110 = vmatpush.msra.mxu3 %v910_v5  ;;  %v927_v57 = vld [vmem:[%s3712_s5 + $0x788] sm:$0xff] }
  0x4f   : > { %v778_v7 = vld [vmem:[%s3712_s5 + $0x2e0] sm:$0xff]  ;;  %1052 = vmatpush.msra.mxu0 %v710_v6  ;;  %v727_v59 = vld [vmem:[%s3712_s5 + $0x148] sm:$0xff] }
  0x50   : > { %v838_v8 = vld [vmem:[%s3712_s5 + $0x4c0] sm:$0xff]  ;;  %1071 = vmatpush.msra.mxu1 %v778_v7  ;;  %v795_v54 = vld [vmem:[%s3712_s5 + $0x368] sm:$0xff] }
  0x51   : > { %v906_v62 = vld [vmem:[%s3712_s5 + $0x6e0] sm:$0xff]  ;;  %1092 = vmatpush.msra.mxu2 %v838_v8  ;;  %v855_v60 = vld [vmem:[%s3712_s5 + $0x548] sm:$0xff] }
  0x52   : > { %v706_v9 = vld [vmem:[%s3712_s5 + $0xa0] sm:$0xff]  ;;  %1111 = vmatpush.msra.mxu3 %v906_v62  ;;  %v923_v61 = vld [vmem:[%s3712_s5 + $0x768] sm:$0xff] }
  0x53   : > { %v774_v10 = vld [vmem:[%s3712_s5 + $0x2c0] sm:$0xff]  ;;  %1053 = vmatpush.msra.mxu0 %v706_v9  ;;  %v723_v63 = vld [vmem:[%s3712_s5 + $0x128] sm:$0xff] }
  0x54   : > { %v834_v11 = vld [vmem:[%s3712_s5 + $0x4a0] sm:$0xff]  ;;  %1072 = vmatpush.msra.mxu1 %v774_v10  ;;  %v791_v0 = vld [vmem:[%s3712_s5 + $0x348] sm:$0xff] }
  0x55   : > { %v902_v12 = vld [vmem:[%s3712_s5 + $0x6c0] sm:$0xff]  ;;  %1093 = vmatpush.msra.mxu2 %v834_v11  ;;  %v851_v2 = vld [vmem:[%s3712_s5 + $0x528] sm:$0xff] }
  0x56   : > { %v702_v13 = vld [vmem:[%s3712_s5 + $0x80] sm:$0xff]  ;;  %1112 = vmatpush.msra.mxu3 %v902_v12  ;;  %v919_v3 = vld [vmem:[%s3712_s5 + $0x748] sm:$0xff] }
  0x57   : > { %v770_v15 = vld [vmem:[%s3712_s5 + $0x2a0] sm:$0xff]  ;;  %1054 = vmatpush.msra.mxu0 %v702_v13  ;;  %v719_v4 = vld [vmem:[%s3712_s5 + $0x108] sm:$0xff] }
  0x58   : > { %v830_v14 = vld [vmem:[%s3712_s5 + $0x480] sm:$0xff]  ;;  %1073 = vmatpush.msra.mxu1 %v770_v15  ;;  %v787_v58 = vld [vmem:[%s3712_s5 + $0x328] sm:$0xff] }
  0x59   : > { %v898_v1 = vld [vmem:[%s3712_s5 + $0x6a0] sm:$0xff]  ;;  %1094 = vmatpush.msra.mxu2 %v830_v14  ;;  %v847_v5 = vld [vmem:[%s3712_s5 + $0x508] sm:$0xff] }
  0x5a   : > { %v698_v16 = vld [vmem:[%s3712_s5 + $0x60] sm:$0xff]  ;;  %1113 = vmatpush.msra.mxu3 %v898_v1  ;;  %v915_v6 = vld [vmem:[%s3712_s5 + $0x728] sm:$0xff] }
  0x5b   : > { %v766_v18 = vld [vmem:[%s3712_s5 + $0x280] sm:$0xff]  ;;  %1055 = vmatpush.msra.mxu0 %v698_v16  ;;  %v715_v7 = vld [vmem:[%s3712_s5 + $0xe8] sm:$0xff] }
  0x5c   : > { %v826_v19 = vld [vmem:[%s3712_s5 + $0x460] sm:$0xff]  ;;  %1074 = vmatpush.msra.mxu1 %v766_v18  ;;  %v783_v8 = vld [vmem:[%s3712_s5 + $0x308] sm:$0xff] }
  0x5d   : > { %v894_v20 = vld [vmem:[%s3712_s5 + $0x680] sm:$0xff]  ;;  %1095 = vmatpush.msra.mxu2 %v826_v19  ;;  %v843_v62 = vld [vmem:[%s3712_s5 + $0x4e8] sm:$0xff] }
  0x5e   : > { %v694_v24 = vld [vmem:[%s3712_s5 + $0x40] sm:$0xff]  ;;  %1114 = vmatpush.msra.mxu3 %v894_v20  ;;  %v911_v9 = vld [vmem:[%s3712_s5 + $0x708] sm:$0xff] }
  0x5f   : > { %v762_v21 = vld [vmem:[%s3712_s5 + $0x260] sm:$0xff]  ;;  %1056 = vmatpush.msra.mxu0 %v694_v24  ;;  %v711_v10 = vld [vmem:[%s3712_s5 + $0xc8] sm:$0xff] }
  0x60   : > { %v822_v22 = vld [vmem:[%s3712_s5 + $0x440] sm:$0xff]  ;;  %1075 = vmatpush.msra.mxu1 %v762_v21  ;;  %v779_v11 = vld [vmem:[%s3712_s5 + $0x2e8] sm:$0xff] }
  0x61   : > { %v890_v29 = vld [vmem:[%s3712_s5 + $0x660] sm:$0xff]  ;;  %1096 = vmatpush.msra.mxu2 %v822_v22  ;;  %v839_v12 = vld [vmem:[%s3712_s5 + $0x4c8] sm:$0xff] }
  0x62   : > { %v690_v17 = vld [vmem:[%s3712_s5 + $0x20] sm:$0xff]  ;;  %1115 = vmatpush.msra.mxu3 %v890_v29  ;;  %v907_v13 = vld [vmem:[%s3712_s5 + $0x6e8] sm:$0xff] }
  0x63   : > { %v758_v23 = vld [vmem:[%s3712_s5 + $0x240] sm:$0xff]  ;;  %1057 = vmatpush.msra.mxu0 %v690_v17  ;;  %v707_v15 = vld [vmem:[%s3712_s5 + $0xa8] sm:$0xff] }
  0x64   : > { %v818_v32 = vld [vmem:[%s3712_s5 + $0x420] sm:$0xff]  ;;  %1076 = vmatpush.msra.mxu1 %v758_v23  ;;  %v775_v14 = vld [vmem:[%s3712_s5 + $0x2c8] sm:$0xff] }
  0x65   : > { %v886_v33 = vld [vmem:[%s3712_s5 + $0x640] sm:$0xff]  ;;  %1097 = vmatpush.msra.mxu2 %v818_v32  ;;  %v835_v1 = vld [vmem:[%s3712_s5 + $0x4a8] sm:$0xff] }
  0x66   : > { %1116 = vmatpush.msra.mxu3 %v886_v33  ;;  %v686_v35 = vld [vmem:[%s3712_s5] sm:$0xff]  ;;  %v903_v16 = vld [vmem:[%s3712_s5 + $0x6c8] sm:$0xff] }
  0x67   : > { %v754_v30 = vld [vmem:[%s3712_s5 + $0x220] sm:$0xff]  ;;  %1058 = vmatpush.msra.mxu0 %v686_v35  ;;  %v703_v18 = vld [vmem:[%s3712_s5 + $0x88] sm:$0xff] }
  0x68   : > { %v814_v31 = vld [vmem:[%s3712_s5 + $0x400] sm:$0xff]  ;;  %1077 = vmatpush.msra.mxu1 %v754_v30  ;;  %v771_v19 = vld [vmem:[%s3712_s5 + $0x2a8] sm:$0xff] }
  0x69   : > { %v882_v36 = vld [vmem:[%s3712_s5 + $0x620] sm:$0xff]  ;;  %1098 = vmatpush.msra.mxu2 %v814_v31  ;;  %v831_v20 = vld [vmem:[%s3712_s5 + $0x488] sm:$0xff] }
  0x6a   : > { %1117 = vmatpush.msra.mxu3 %v882_v36  ;;  %v750_v34 = vld [vmem:[%s3712_s5 + $0x200] sm:$0xff]  ;;  %v899_v24 = vld [vmem:[%s3712_s5 + $0x6a8] sm:$0xff] }
  0x6b   : > { %v878_v37 = vld [vmem:[%s3712_s5 + $0x600] sm:$0xff]  ;;  %1078 = vmatpush.msra.mxu1 %v750_v34  ;;  %v699_v21 = vld [vmem:[%s3712_s5 + $0x68] sm:$0xff] }
  0x6c   : > { %1118 = vmatpush.msra.mxu3 %v878_v37  ;;  %v767_v22 = vld [vmem:[%s3712_s5 + $0x288] sm:$0xff] }
  0x6d   : > { %v827_v29 = vld [vmem:[%s3712_s5 + $0x468] sm:$0xff] }
  0x6e   : > { %v895_v17 = vld [vmem:[%s3712_s5 + $0x688] sm:$0xff] }
  0x6f   : > { %v695_v23 = vld [vmem:[%s3712_s5 + $0x48] sm:$0xff] }
  0x70   : > { %v763_v32 = vld [vmem:[%s3712_s5 + $0x268] sm:$0xff] }
  0x71   : > { %v823_v33 = vld [vmem:[%s3712_s5 + $0x448] sm:$0xff] }
  0x72   : > { %v891_v35 = vld [vmem:[%s3712_s5 + $0x668] sm:$0xff] }
  0x73   : > { %v691_v30 = vld [vmem:[%s3712_s5 + $0x28] sm:$0xff] }
  0x74   : > { %v759_v31 = vld [vmem:[%s3712_s5 + $0x248] sm:$0xff] }
  0x75   : > { %v819_v36 = vld [vmem:[%s3712_s5 + $0x428] sm:$0xff] }
  0x76   : > { %v887_v34 = vld [vmem:[%s3712_s5 + $0x648] sm:$0xff] }
  0x77   : > { %v687_v37 = vld [vmem:[%s3712_s5 + $0x8] sm:$0xff] }
  0x89   : > { %v960_v38 = vpop.permute.xlu0 %959 }
  0x8a   : > { %1827 = vmatmul.msk.f32.vlgmr.msrb.gmra.mxu0 %vm684_vm0, %v960_v38  ;;  %1828 = vmatmul.msk.f32.vlgmr.msrb.gmra.mxu1 %vm684_vm0, %v960_v38 }
  0x8b   : > { %1829 = vmatmul.msk.f32.vlgmr.msrb.gmra.mxu2 %vm684_vm0, %v960_v38  ;;  %1830 = vmatmul.msk.f32.vlgmr.msrb.gmra.mxu3 %vm684_vm0, %v960_v38  ;;  %v755_v38 = vld [vmem:[%s3712_s5 + $0x228] sm:$0xff] }
  0x8c   : > { %1123 = vmatpush.msrb.mxu0 %v747_v39  ;;  %1163 = vmatpush.msrb.mxu2 %v875_v40  ;;  %v815_v39 = vld [vmem:[%s3712_s5 + $0x408] sm:$0xff] }
  0x8d   : > { %1143 = vmatpush.msrb.mxu1 %v811_v41  ;;  %1183 = vmatpush.msrb.mxu3 %v939_v42  ;;  %v883_v40 = vld [vmem:[%s3712_s5 + $0x628] sm:$0xff]  ;;  %v748_v41 = vld [vmem:[%s3712_s5 + $0x1f0] sm:$0xff] }
  0x8e   : > { %1124 = vmatpush.msrb.mxu0 %v743_v43  ;;  %1164 = vmatpush.msrb.mxu2 %v871_v44  ;;  %v876_v42 = vld [vmem:[%s3712_s5 + $0x5f0] sm:$0xff]  ;;  %v751_v43 = vld [vmem:[%s3712_s5 + $0x208] sm:$0xff] }
  0x8f   : > { %1144 = vmatpush.msrb.mxu1 %v807_v45  ;;  %1184 = vmatpush.msrb.mxu3 %v935_v46  ;;  %v879_v44 = vld [vmem:[%s3712_s5 + $0x608] sm:$0xff]  ;;  %v744_v45 = vld [vmem:[%s3712_s5 + $0x1d0] sm:$0xff] }
  0x90   : > { %1125 = vmatpush.msrb.mxu0 %v739_v47  ;;  %1165 = vmatpush.msrb.mxu2 %v867_v48  ;;  %v812_v46 = vld [vmem:[%s3712_s5 + $0x3f0] sm:$0xff] }
  0x91   : > { %1145 = vmatpush.msrb.mxu1 %v803_v49  ;;  %1185 = vmatpush.msrb.mxu3 %v931_v50  ;;  %v872_v47 = vld [vmem:[%s3712_s5 + $0x5d0] sm:$0xff] }
  0x92   : > { %1126 = vmatpush.msrb.mxu0 %v735_v51  ;;  %1166 = vmatpush.msrb.mxu2 %v863_v52  ;;  %v808_v48 = vld [vmem:[%s3712_s5 + $0x3d0] sm:$0xff] }
  0x93   : > { %1059 = vmatmul.f32.vlgmr.msra.gmra.mxu0 %v2127_v25  ;;  %1099 = vmatmul.f32.vlgmr.msra.gmra.mxu2 %v2133_v27  ;;  %v868_v49 = vld [vmem:[%s3712_s5 + $0x5b0] sm:$0xff] }
  0x94   : > { %1127 = vmatpush.msrb.mxu0 %v731_v53  ;;  %1146 = vmatpush.msrb.mxu1 %v799_v55  ;;  %v804_v50 = vld [vmem:[%s3712_s5 + $0x3b0] sm:$0xff] }
  0x95   : > { %1167 = vmatpush.msrb.mxu2 %v859_v56  ;;  %1186 = vmatpush.msrb.mxu3 %v927_v57  ;;  %v864_v51 = vld [vmem:[%s3712_s5 + $0x590] sm:$0xff] }
  0x96   : > { %1079 = vmatmul.f32.vlgmr.msra.gmra.mxu1 %v2130_v26  ;;  %1119 = vmatmul.f32.vlgmr.msra.gmra.mxu3 %v2136_v28  ;;  %v932_v52 = vld [vmem:[%s3712_s5 + $0x7b0] sm:$0xff] }
  0x97   : > { %1128 = vmatpush.msrb.mxu0 %v727_v59  ;;  %1147 = vmatpush.msrb.mxu1 %v795_v54  ;;  %v732_v53 = vld [vmem:[%s3712_s5 + $0x170] sm:$0xff] }
  0x98   : > { %1168 = vmatpush.msrb.mxu2 %v855_v60  ;;  %1187 = vmatpush.msrb.mxu3 %v923_v61  ;;  %v800_v55 = vld [vmem:[%s3712_s5 + $0x390] sm:$0xff] }
  0x99   : > { %1129 = vmatpush.msrb.mxu0 %v723_v63  ;;  %1148 = vmatpush.msrb.mxu1 %v791_v0  ;;  %v860_v56 = vld [vmem:[%s3712_s5 + $0x570] sm:$0xff] }
  0x9a   : > { %1169 = vmatpush.msrb.mxu2 %v851_v2  ;;  %1188 = vmatpush.msrb.mxu3 %v919_v3  ;;  %v928_v57 = vld [vmem:[%s3712_s5 + $0x790] sm:$0xff] }
  0x9b   : > { %1130 = vmatpush.msrb.mxu0 %v719_v4  ;;  %1149 = vmatpush.msrb.mxu1 %v787_v58  ;;  %v728_v59 = vld [vmem:[%s3712_s5 + $0x150] sm:$0xff] }
  0x9c   : > { %1170 = vmatpush.msrb.mxu2 %v847_v5  ;;  %1189 = vmatpush.msrb.mxu3 %v915_v6  ;;  %v796_v54 = vld [vmem:[%s3712_s5 + $0x370] sm:$0xff] }
  0x9d   : > { %1131 = vmatpush.msrb.mxu0 %v715_v7  ;;  %1150 = vmatpush.msrb.mxu1 %v783_v8  ;;  %v856_v60 = vld [vmem:[%s3712_s5 + $0x550] sm:$0xff] }
  0x9e   : > { %1171 = vmatpush.msrb.mxu2 %v843_v62  ;;  %1190 = vmatpush.msrb.mxu3 %v911_v9  ;;  %v924_v61 = vld [vmem:[%s3712_s5 + $0x770] sm:$0xff] }
  0x9f   : > { %1132 = vmatpush.msrb.mxu0 %v711_v10  ;;  %1151 = vmatpush.msrb.mxu1 %v779_v11  ;;  %v724_v63 = vld [vmem:[%s3712_s5 + $0x130] sm:$0xff] }
  0xa0   : > { %1172 = vmatpush.msrb.mxu2 %v839_v12  ;;  %1191 = vmatpush.msrb.mxu3 %v907_v13  ;;  %v792_v0 = vld [vmem:[%s3712_s5 + $0x350] sm:$0xff] }
  0xa1   : > { %1133 = vmatpush.msrb.mxu0 %v707_v15  ;;  %1152 = vmatpush.msrb.mxu1 %v775_v14  ;;  %v852_v2 = vld [vmem:[%s3712_s5 + $0x530] sm:$0xff] }
  0xa2   : > { %1173 = vmatpush.msrb.mxu2 %v835_v1  ;;  %1192 = vmatpush.msrb.mxu3 %v903_v16  ;;  %v920_v3 = vld [vmem:[%s3712_s5 + $0x750] sm:$0xff] }
  0xa3   : > { %1134 = vmatpush.msrb.mxu0 %v703_v18  ;;  %1153 = vmatpush.msrb.mxu1 %v771_v19  ;;  %v720_v4 = vld [vmem:[%s3712_s5 + $0x110] sm:$0xff] }
  0xa4   : > { %1174 = vmatpush.msrb.mxu2 %v831_v20  ;;  %1193 = vmatpush.msrb.mxu3 %v899_v24  ;;  %v788_v58 = vld [vmem:[%s3712_s5 + $0x330] sm:$0xff] }
  0xa5   : > { %1135 = vmatpush.msrb.mxu0 %v699_v21  ;;  %1154 = vmatpush.msrb.mxu1 %v767_v22  ;;  %v848_v5 = vld [vmem:[%s3712_s5 + $0x510] sm:$0xff] }
  0xa6   : > { %1175 = vmatpush.msrb.mxu2 %v827_v29  ;;  %1194 = vmatpush.msrb.mxu3 %v895_v17  ;;  %v916_v6 = vld [vmem:[%s3712_s5 + $0x730] sm:$0xff] }
  0xa7   : > { %1136 = vmatpush.msrb.mxu0 %v695_v23  ;;  %1155 = vmatpush.msrb.mxu1 %v763_v32  ;;  %v716_v7 = vld [vmem:[%s3712_s5 + $0xf0] sm:$0xff] }
  0xa8   : > { %1176 = vmatpush.msrb.mxu2 %v823_v33  ;;  %1195 = vmatpush.msrb.mxu3 %v891_v35  ;;  %v784_v8 = vld [vmem:[%s3712_s5 + $0x310] sm:$0xff] }
  0xa9   : > { %1137 = vmatpush.msrb.mxu0 %v691_v30  ;;  %1156 = vmatpush.msrb.mxu1 %v759_v31  ;;  %v844_v62 = vld [vmem:[%s3712_s5 + $0x4f0] sm:$0xff] }
  0xaa   : > { %1177 = vmatpush.msrb.mxu2 %v819_v36  ;;  %1196 = vmatpush.msrb.mxu3 %v887_v34  ;;  %v912_v9 = vld [vmem:[%s3712_s5 + $0x710] sm:$0xff] }
  0xab   : > { %1138 = vmatpush.msrb.mxu0 %v687_v37  ;;  %1157 = vmatpush.msrb.mxu1 %v755_v38  ;;  %v712_v10 = vld [vmem:[%s3712_s5 + $0xd0] sm:$0xff] }
  0xac   : > { %1178 = vmatpush.msrb.mxu2 %v815_v39  ;;  %1197 = vmatpush.msrb.mxu3 %v883_v40  ;;  %v780_v11 = vld [vmem:[%s3712_s5 + $0x2f0] sm:$0xff] }
  0xad   : > { %1139 = vmatmul.f32.vlgmr.msrb.gmra.mxu0 %v2127_v25  ;;  %1179 = vmatmul.f32.vlgmr.msrb.gmra.mxu2 %v2133_v27  ;;  %v940_v25 = vld [vmem:[%s3712_s5 + $0x7f0] sm:$0xff] }
  0xae   : > { %1203 = vmatpush.msra.mxu0 %v748_v41  ;;  %1243 = vmatpush.msra.mxu2 %v876_v42  ;;  %v740_v27 = vld [vmem:[%s3712_s5 + $0x1b0] sm:$0xff]  ;;  %v749_v41 = vld [vmem:[%s3712_s5 + $0x1f8] sm:$0xff] }
  0xaf   : > { %1158 = vmatpush.msrb.mxu1 %v751_v43  ;;  %1198 = vmatpush.msrb.mxu3 %v879_v44  ;;  %v840_v12 = vld [vmem:[%s3712_s5 + $0x4d0] sm:$0xff]  ;;  %v877_v42 = vld [vmem:[%s3712_s5 + $0x5f8] sm:$0xff] }
  0xb0   : > { %1159 = vmatmul.f32.vlgmr.msrb.gmra.mxu1 %v2130_v26  ;;  %1199 = vmatmul.f32.vlgmr.msrb.gmra.mxu3 %v2136_v28  ;;  %v936_v26 = vld [vmem:[%s3712_s5 + $0x7d0] sm:$0xff] }
  0xb1   : > { %1204 = vmatpush.msra.mxu0 %v744_v45  ;;  %1223 = vmatpush.msra.mxu1 %v812_v46  ;;  %v736_v28 = vld [vmem:[%s3712_s5 + $0x190] sm:$0xff]  ;;  %v3043_v45 = vld [vmem:[%s2110_s24] sm:$0xff] }
  0xb2   : > { %1244 = vmatpush.msra.mxu2 %v872_v47  ;;  %1263 = vmatpush.msra.mxu3 %v940_v25  ;;  %v908_v13 = vld [vmem:[%s3712_s5 + $0x6f0] sm:$0xff]  ;;  %v745_v47 = vld [vmem:[%s3712_s5 + $0x1d8] sm:$0xff] }
  0xb3   : > { %1205 = vmatpush.msra.mxu0 %v740_v27  ;;  %1224 = vmatpush.msra.mxu1 %v808_v48  ;;  %v708_v15 = vld [vmem:[%s3712_s5 + $0xb0] sm:$0xff]  ;;  %v813_v25 = vld [vmem:[%s3712_s5 + $0x3f8] sm:$0xff] }
  0xb4   : > { %1245 = vmatpush.msra.mxu2 %v868_v49  ;;  %1264 = vmatpush.msra.mxu3 %v936_v26  ;;  %v776_v14 = vld [vmem:[%s3712_s5 + $0x2d0] sm:$0xff]  ;;  %v873_v27 = vld [vmem:[%s3712_s5 + $0x5d8] sm:$0xff]  ;;  %v3063_v49 = vld [vmem:[%s2110_s24 + $0x8] sm:$0xff] }
  0xb5   : > { %1206 = vmatpush.msra.mxu0 %v736_v28  ;;  %1225 = vmatpush.msra.mxu1 %v804_v50  ;;  %v836_v1 = vld [vmem:[%s3712_s5 + $0x4b0] sm:$0xff]  ;;  %v941_v48 = vld [vmem:[%s3712_s5 + $0x7f8] sm:$0xff] }
  0xb6   : > { %1246 = vmatpush.msra.mxu2 %v864_v51  ;;  %1265 = vmatpush.msra.mxu3 %v932_v52  ;;  %v904_v16 = vld [vmem:[%s3712_s5 + $0x6d0] sm:$0xff]  ;;  %v3067_v26 = vld [vmem:[%s2110_s24 + $0x18] sm:$0xff] }
  0xb7   : > { %1207 = vmatpush.msra.mxu0 %v732_v53  ;;  %1226 = vmatpush.msra.mxu1 %v800_v55  ;;  %v704_v18 = vld [vmem:[%s3712_s5 + $0x90] sm:$0xff]  ;;  %v741_v28 = vld [vmem:[%s3712_s5 + $0x1b8] sm:$0xff] }
  0xb8   : > { %1247 = vmatpush.msra.mxu2 %v860_v56  ;;  %1266 = vmatpush.msra.mxu3 %v928_v57  ;;  %v772_v19 = vld [vmem:[%s3712_s5 + $0x2b0] sm:$0xff]  ;;  %v809_v50 = vld [vmem:[%s3712_s5 + $0x3d8] sm:$0xff]  ;;  %v619_v56 = vpop.f32.mrf.mxu0  ;;  %v639_v57 = vpop.f32.mrf.mxu1 }
  0xb9   : > { %1208 = vmatpush.msra.mxu0 %v728_v59  ;;  %1227 = vmatpush.msra.mxu1 %v796_v54  ;;  %v832_v20 = vld [vmem:[%s3712_s5 + $0x490] sm:$0xff]  ;;  %v869_v51 = vld [vmem:[%s3712_s5 + $0x5b8] sm:$0xff] }
  0xba   : > { %1248 = vmatpush.msra.mxu2 %v856_v60  ;;  %1267 = vmatpush.msra.mxu3 %v924_v61  ;;  %v900_v24 = vld [vmem:[%s3712_s5 + $0x6b0] sm:$0xff]  ;;  %v937_v52 = vld [vmem:[%s3712_s5 + $0x7d8] sm:$0xff]  ;;  %v640_v60 = vadd.f32 %v639_v57, %v619_v56 }
  0xbb   : > { %1209 = vmatpush.msra.mxu0 %v724_v63  ;;  %1228 = vmatpush.msra.mxu1 %v792_v0  ;;  %v700_v21 = vld [vmem:[%s3712_s5 + $0x70] sm:$0xff]  ;;  %v737_v53 = vld [vmem:[%s3712_s5 + $0x198] sm:$0xff] }
  0xbc   : > { %1249 = vmatpush.msra.mxu2 %v852_v2  ;;  %1268 = vmatpush.msra.mxu3 %v920_v3  ;;  %v768_v22 = vld [vmem:[%s3712_s5 + $0x290] sm:$0xff]  ;;  %v805_v55 = vld [vmem:[%s3712_s5 + $0x3b8] sm:$0xff]  ;;  %v659_v61 = vpop.f32.mrf.mxu2 }
  0xbd   : > { %1210 = vmatpush.msra.mxu0 %v720_v4  ;;  %1229 = vmatpush.msra.mxu1 %v788_v58  ;;  %v828_v29 = vld [vmem:[%s3712_s5 + $0x470] sm:$0xff]  ;;  %v865_v59 = vld [vmem:[%s3712_s5 + $0x598] sm:$0xff]  ;;  %v660_v4 = vadd.f32 %v659_v61, %v640_v60  ;;  %v679_v58 = vpop.f32.mrf.mxu3  ;;  %v3291_v61 = vld [vmem:[%s3711_s4 + $0x60] sm:$0xff] }
  0xbe   : > { %1250 = vmatpush.msra.mxu2 %v848_v5  ;;  %1269 = vmatpush.msra.mxu3 %v916_v6  ;;  %v896_v17 = vld [vmem:[%s3712_s5 + $0x690] sm:$0xff]  ;;  %v933_v54 = vld [vmem:[%s3712_s5 + $0x7b8] sm:$0xff] }
  0xbf   : > { %1211 = vmatpush.msra.mxu0 %v716_v7  ;;  %1230 = vmatpush.msra.mxu1 %v784_v8  ;;  %v696_v23 = vld [vmem:[%s3712_s5 + $0x50] sm:$0xff]  ;;  %v733_v63 = vld [vmem:[%s3712_s5 + $0x178] sm:$0xff] }
  0xc0   : > { %1251 = vmatpush.msra.mxu2 %v844_v62  ;;  %1270 = vmatpush.msra.mxu3 %v912_v9  ;;  %v764_v32 = vld [vmem:[%s3712_s5 + $0x270] sm:$0xff]  ;;  %v801_v0 = vld [vmem:[%s3712_s5 + $0x398] sm:$0xff]  ;;  %v680_v62 = vadd.f32 %v679_v58, %v660_v4  ;;  %v3327_v4 = vld [vmem:[%s3711_s4 + $0x48] sm:$0xff] }
  0xc1   : > { %1212 = vmatpush.msra.mxu0 %v712_v10  ;;  %1231 = vmatpush.msra.mxu1 %v780_v11  ;;  %v824_v33 = vld [vmem:[%s3712_s5 + $0x450] sm:$0xff]  ;;  %v861_v2 = vld [vmem:[%s3712_s5 + $0x578] sm:$0xff]  ;;  %v3334_v58 = vld [vmem:[%s3711_s4 + $0xc8] sm:$0xff] }
  0xc2   : > { %1252 = vmatpush.msra.mxu2 %v840_v12  ;;  %1271 = vmatpush.msra.mxu3 %v908_v13  ;;  %v892_v35 = vld [vmem:[%s3712_s5 + $0x670] sm:$0xff]  ;;  %v929_v3 = vld [vmem:[%s3712_s5 + $0x798] sm:$0xff]  ;;  %v682_v13 = vmul.f32 0.0625, %v680_v62 }
  0xc3   : > { %1213 = vmatpush.msra.mxu0 %v708_v15  ;;  %1232 = vmatpush.msra.mxu1 %v776_v14  ;;  %v692_v30 = vld [vmem:[%s3712_s5 + $0x30] sm:$0xff]  ;;  %v729_v5 = vld [vmem:[%s3712_s5 + $0x158] sm:$0xff] }
  0xc4   : > { %1253 = vmatpush.msra.mxu2 %v836_v1  ;;  %1272 = vmatpush.msra.mxu3 %v904_v16  ;;  %v760_v31 = vld [vmem:[%s3712_s5 + $0x250] sm:$0xff]  ;;  %v797_v6 = vld [vmem:[%s3712_s5 + $0x378] sm:$0xff] }
  0xc5   : > { %1214 = vmatpush.msra.mxu0 %v704_v18  ;;  %1233 = vmatpush.msra.mxu1 %v772_v19  ;;  %v820_v36 = vld [vmem:[%s3712_s5 + $0x430] sm:$0xff]  ;;  %v857_v7 = vld [vmem:[%s3712_s5 + $0x558] sm:$0xff]  ;;  %v1896_v18 = vld [vmem:[%s2096_s19] sm:$0xff] }
  0xc6   : > { %1254 = vmatpush.msra.mxu2 %v832_v20  ;;  %1273 = vmatpush.msra.mxu3 %v900_v24  ;;  %v888_v34 = vld [vmem:[%s3712_s5 + $0x650] sm:$0xff]  ;;  %v925_v8 = vld [vmem:[%s3712_s5 + $0x778] sm:$0xff]  ;;  %v683_v19 = vadd.f32 %v1896_v18, %v682_v13 }
  0xc7   : > { %1215 = vmatpush.msra.mxu0 %v700_v21  ;;  %1234 = vmatpush.msra.mxu1 %v768_v22  ;;  %v688_v37 = vld [vmem:[%s3712_s5 + $0x10] sm:$0xff]  ;;  %v725_v9 = vld [vmem:[%s3712_s5 + $0x138] sm:$0xff] }
  0xc8   : > { %1255 = vmatpush.msra.mxu2 %v828_v29  ;;  %1274 = vmatpush.msra.mxu3 %v896_v17  ;;  %v756_v38 = vld [vmem:[%s3712_s5 + $0x230] sm:$0xff]  ;;  %v793_v10 = vld [vmem:[%s3712_s5 + $0x358] sm:$0xff]  ;;  %685 = vst.msk [vmem:[%s438_s22] sm:$0xff] %vm684_vm0, %v683_v19 }
  0xc9   : > { %1216 = vmatpush.msra.mxu0 %v696_v23  ;;  %1235 = vmatpush.msra.mxu1 %v764_v32  ;;  %v816_v39 = vld [vmem:[%s3712_s5 + $0x410] sm:$0xff]  ;;  %v853_v11 = vld [vmem:[%s3712_s5 + $0x538] sm:$0xff] }
  0xca   : > { %1256 = vmatpush.msra.mxu2 %v824_v33  ;;  %1275 = vmatpush.msra.mxu3 %v892_v35  ;;  %v884_v40 = vld [vmem:[%s3712_s5 + $0x630] sm:$0xff]  ;;  %v921_v12 = vld [vmem:[%s3712_s5 + $0x758] sm:$0xff] }
  0xcb   : > { %1217 = vmatpush.msra.mxu0 %v692_v30  ;;  %1236 = vmatpush.msra.mxu1 %v760_v31  ;;  %v752_v43 = vld [vmem:[%s3712_s5 + $0x210] sm:$0xff]  ;;  %v721_v15 = vld [vmem:[%s3712_s5 + $0x118] sm:$0xff] }
  0xcc   : > { %1257 = vmatpush.msra.mxu2 %v820_v36  ;;  %1276 = vmatpush.msra.mxu3 %v888_v34  ;;  %v880_v44 = vld [vmem:[%s3712_s5 + $0x610] sm:$0xff]  ;;  %v789_v14 = vld [vmem:[%s3712_s5 + $0x338] sm:$0xff] }
  0xcd   : > { %1218 = vmatpush.msra.mxu0 %v688_v37  ;;  %1237 = vmatpush.msra.mxu1 %v756_v38  ;;  %v3047_v46 = vld [vmem:[%s2110_s24 + $0x10] sm:$0xff]  ;;  %v849_v1 = vld [vmem:[%s3712_s5 + $0x518] sm:$0xff] }
  0xce   : > { %1258 = vmatpush.msra.mxu2 %v816_v39  ;;  %1277 = vmatpush.msra.mxu3 %v884_v40  ;;  %v917_v16 = vld [vmem:[%s3712_s5 + $0x738] sm:$0xff]  ;;  %v3266_v60 = vld [vmem:[%s3711_s4 + $0x70] sm:$0xff] }
  0xcf   : > { %1219 = vmatmul.f32.vlgmr.msra.gmra.mxu0 %v3043_v45  ;;  %1259 = vmatmul.f32.vlgmr.msra.gmra.mxu2 %v3047_v46  ;;  %v717_v20 = vld [vmem:[%s3712_s5 + $0xf8] sm:$0xff]  ;;  %v3363_v62 = vld [vmem:[%s3711_s4 + $0x30] sm:$0xff] }
  0xd0   : > { %1283 = vmatpush.msrb.mxu0 %v749_v41  ;;  %1323 = vmatpush.msrb.mxu2 %v877_v42  ;;  %v785_v24 = vld [vmem:[%s3712_s5 + $0x318] sm:$0xff]  ;;  %v3417_v18 = vld [vmem:[%s3711_s4 + $0x10] sm:$0xff] }
  0xd1   : > { %1238 = vmatpush.msra.mxu1 %v752_v43  ;;  %1278 = vmatpush.msra.mxu3 %v880_v44  ;;  %v845_v21 = vld [vmem:[%s3712_s5 + $0x4f8] sm:$0xff]  ;;  %v3423_v19 = vld [vmem:[%s3711_s4 + $0x170] sm:$0xff] }
  0xd2   : > { %1239 = vmatmul.f32.vlgmr.msra.gmra.mxu1 %v3063_v49  ;;  %1279 = vmatmul.f32.vlgmr.msra.gmra.mxu3 %v3067_v26  ;;  %v913_v22 = vld [vmem:[%s3712_s5 + $0x718] sm:$0xff] }
  0xd3   : > { %1284 = vmatpush.msrb.mxu0 %v745_v47  ;;  %1303 = vmatpush.msrb.mxu1 %v813_v25  ;;  %v713_v29 = vld [vmem:[%s3712_s5 + $0xd8] sm:$0xff] }
  0xd4   : > { %1324 = vmatpush.msrb.mxu2 %v873_v27  ;;  %1343 = vmatpush.msrb.mxu3 %v941_v48  ;;  %v781_v17 = vld [vmem:[%s3712_s5 + $0x2f8] sm:$0xff] }
  0xd5   : > { %1285 = vmatpush.msrb.mxu0 %v741_v28  ;;  %1304 = vmatpush.msrb.mxu1 %v809_v50  ;;  %v841_v23 = vld [vmem:[%s3712_s5 + $0x4d8] sm:$0xff] }
  0xd6   : > { %1325 = vmatpush.msrb.mxu2 %v869_v51  ;;  %1344 = vmatpush.msrb.mxu3 %v937_v52  ;;  %v909_v32 = vld [vmem:[%s3712_s5 + $0x6f8] sm:$0xff] }
  0xd7   : > { %1286 = vmatpush.msrb.mxu0 %v737_v53  ;;  %1305 = vmatpush.msrb.mxu1 %v805_v55  ;;  %v709_v33 = vld [vmem:[%s3712_s5 + $0xb8] sm:$0xff] }
  0xd8   : > { %1326 = vmatpush.msrb.mxu2 %v865_v59  ;;  %1345 = vmatpush.msrb.mxu3 %v933_v54  ;;  %v777_v35 = vld [vmem:[%s3712_s5 + $0x2d8] sm:$0xff] }
  0xd9   : > { %1287 = vmatpush.msrb.mxu0 %v733_v63  ;;  %1306 = vmatpush.msrb.mxu1 %v801_v0  ;;  %v837_v30 = vld [vmem:[%s3712_s5 + $0x4b8] sm:$0xff] }
  0xda   : > { %1327 = vmatpush.msrb.mxu2 %v861_v2  ;;  %1346 = vmatpush.msrb.mxu3 %v929_v3  ;;  %v905_v31 = vld [vmem:[%s3712_s5 + $0x6d8] sm:$0xff]  ;;  %v3315_v2 = vld [vmem:[%s3711_s4 + $0x50] sm:$0xff] }
  0xdb   : > { %1288 = vmatpush.msrb.mxu0 %v729_v5  ;;  %1307 = vmatpush.msrb.mxu1 %v797_v6  ;;  %v705_v36 = vld [vmem:[%s3712_s5 + $0x98] sm:$0xff]  ;;  %v3322_v3 = vld [vmem:[%s3711_s4 + $0xd0] sm:$0xff]  ;;  %v3339_v5 = vld [vmem:[%s3711_s4 + $0x40] sm:$0xff] }
  0xdc   : > { %1328 = vmatpush.msrb.mxu2 %v857_v7  ;;  %1347 = vmatpush.msrb.mxu3 %v925_v8  ;;  %v773_v34 = vld [vmem:[%s3712_s5 + $0x2b8] sm:$0xff]  ;;  %v3346_v6 = vld [vmem:[%s3711_s4 + $0xc0] sm:$0xff] }
  0xdd   : > { %1289 = vmatpush.msrb.mxu0 %v725_v9  ;;  %1308 = vmatpush.msrb.mxu1 %v793_v10  ;;  %v833_v37 = vld [vmem:[%s3712_s5 + $0x498] sm:$0xff]  ;;  %v3370_v9 = vld [vmem:[%s3711_s4 + $0xb0] sm:$0xff]  ;;  %v3375_v10 = vld [vmem:[%s3711_s4 + $0x28] sm:$0xff] }
  0xde   : > { %1329 = vmatpush.msrb.mxu2 %v853_v11  ;;  %1348 = vmatpush.msrb.mxu3 %v921_v12  ;;  %v901_v38 = vld [vmem:[%s3712_s5 + $0x6b8] sm:$0xff]  ;;  %v3382_v11 = vld [vmem:[%s3711_s4 + $0xa8] sm:$0xff]  ;;  %v3387_v12 = vld [vmem:[%s3711_s4 + $0x20] sm:$0xff] }
  0xdf   : > { %1290 = vmatpush.msrb.mxu0 %v721_v15  ;;  %1309 = vmatpush.msrb.mxu1 %v789_v14  ;;  %v701_v39 = vld [vmem:[%s3712_s5 + $0x78] sm:$0xff]  ;;  %v3394_v15 = vld [vmem:[%s3711_s4 + $0xa0] sm:$0xff] }
  0xe0   : > { %1330 = vmatpush.msrb.mxu2 %v849_v1  ;;  %1349 = vmatpush.msrb.mxu3 %v917_v16  ;;  %v769_v40 = vld [vmem:[%s3712_s5 + $0x298] sm:$0xff] }
  0xe1   : > { %1291 = vmatpush.msrb.mxu0 %v717_v20  ;;  %1310 = vmatpush.msrb.mxu1 %v785_v24  ;;  %v829_v41 = vld [vmem:[%s3712_s5 + $0x478] sm:$0xff]  ;;  %v3431_v24 = vld [vmem:[%s3711_s4 + $0x90] sm:$0xff] }
  0xe2   : > { %1331 = vmatpush.msrb.mxu2 %v845_v21  ;;  %1350 = vmatpush.msrb.mxu3 %v913_v22  ;;  %v897_v42 = vld [vmem:[%s3712_s5 + $0x698] sm:$0xff]  ;;  %v3437_v21 = vld [vmem:[%s3711_s4 + $0x8] sm:$0xff] }
  0xe3   : > { %1292 = vmatpush.msrb.mxu0 %v713_v29  ;;  %1311 = vmatpush.msrb.mxu1 %v781_v17  ;;  %v697_v43 = vld [vmem:[%s3712_s5 + $0x58] sm:$0xff]  ;;  %v3443_v22 = vld [vmem:[%s3711_s4 + $0x168] sm:$0xff]  ;;  %v3455_v17 = vld [vmem:[%s3711_s4] sm:$0xff] }
  0xe4   : > { %1332 = vmatpush.msrb.mxu2 %v841_v23  ;;  %1351 = vmatpush.msrb.mxu3 %v909_v32  ;;  %v765_v44 = vld [vmem:[%s3712_s5 + $0x278] sm:$0xff]  ;;  %v3449_v29 = vld [vmem:[%s3711_s4 + $0x88] sm:$0xff]  ;;  %v3463_v32 = vld [vmem:[%s3711_s4 + $0x160] sm:$0xff] }
  0xe5   : > { %1293 = vmatpush.msrb.mxu0 %v709_v33  ;;  %1312 = vmatpush.msrb.mxu1 %v777_v35  ;;  %v825_v47 = vld [vmem:[%s3712_s5 + $0x458] sm:$0xff]  ;;  %v3469_v33 = vld [vmem:[%s3711_s4 + $0x80] sm:$0xff] }
  0xe6   : > { %1333 = vmatpush.msrb.mxu2 %v837_v30  ;;  %1352 = vmatpush.msrb.mxu3 %v905_v31  ;;  %v893_v25 = vld [vmem:[%s3712_s5 + $0x678] sm:$0xff] }
  0xe7   : > { %1294 = vmatpush.msrb.mxu0 %v705_v36  ;;  %1313 = vmatpush.msrb.mxu1 %v773_v34  ;;  %v693_v27 = vld [vmem:[%s3712_s5 + $0x38] sm:$0xff]  ;;  %v3485_v34 = vld [vmem:[%s3711_s4 + $0x150] sm:$0xff] }
  0xe8   : > { %1334 = vmatpush.msrb.mxu2 %v833_v37  ;;  %1353 = vmatpush.msrb.mxu3 %v901_v38  ;;  %v761_v48 = vld [vmem:[%s3712_s5 + $0x258] sm:$0xff]  ;;  %v3497_v37 = vld [vmem:[%s3711_s4 + $0x148] sm:$0xff] }
  0xe9   : > { %1295 = vmatpush.msrb.mxu0 %v701_v39  ;;  %1314 = vmatpush.msrb.mxu1 %v769_v40  ;;  %v821_v28 = vld [vmem:[%s3712_s5 + $0x438] sm:$0xff]  ;;  %v3505_v39 = vld [vmem:[%s3711_s4 + $0x140] sm:$0xff] }
  0xea   : > { %1335 = vmatpush.msrb.mxu2 %v829_v41  ;;  %1354 = vmatpush.msrb.mxu3 %v897_v42  ;;  %v889_v50 = vld [vmem:[%s3712_s5 + $0x658] sm:$0xff]  ;;  %v3507_v41 = vld [vmem:[%s430_s16] sm:$0xf] }
  0xeb   : > { %1296 = vmatpush.msrb.mxu0 %v697_v43  ;;  %1315 = vmatpush.msrb.mxu1 %v765_v44  ;;  %v689_v51 = vld [vmem:[%s3712_s5 + $0x18] sm:$0xff]  ;;  %v3515_v44 = vld [vmem:[%s3714_s7] sm:$0xf] }
  0xec   : > { %1336 = vmatpush.msrb.mxu2 %v825_v47  ;;  %1355 = vmatpush.msrb.mxu3 %v893_v25  ;;  %v757_v52 = vld [vmem:[%s3712_s5 + $0x238] sm:$0xff]  ;;  %v1365_v47 = vperm.slane %v3507_v41, 0 }
  0xed   : > { %1297 = vmatpush.msrb.mxu0 %v693_v27  ;;  %1316 = vmatpush.msrb.mxu1 %v761_v48  ;;  %v817_v53 = vld [vmem:[%s3712_s5 + $0x418] sm:$0xff] }
  0xee   : > { %v885_v55 = vld [vmem:[%s3712_s5 + $0x638] sm:$0xff]  ;;  %1337 = vmatpush.msrb.mxu2 %v821_v28  ;;  %1356 = vmatpush.msrb.mxu3 %v889_v50  ;;  %v1379_v28 = vperm.slane %v3515_v44, 0  ;;  %v3533_v50 = vld [vmem:[%s3711_s4 + $0x130] sm:$0xff] }
  0xef   : > { %1298 = vmatpush.msrb.mxu0 %v689_v51  ;;  %1317 = vmatpush.msrb.mxu1 %v757_v52  ;;  %v753_v56 = vld [vmem:[%s3712_s5 + $0x218] sm:$0xff]  ;;  %v3538_v51 = vld [vmem:[%s3711_s4 + $0x128] sm:$0xff] }
  0xf0   : > { %v881_v57 = vld [vmem:[%s3712_s5 + $0x618] sm:$0xff]  ;;  %1338 = vmatpush.msrb.mxu2 %v817_v53  ;;  %1357 = vmatpush.msrb.mxu3 %v885_v55  ;;  %v3546_v53 = vld [vmem:[%s3711_s4 + $0x120] sm:$0xff] }
  0xf1   : > { %v3254_v59 = vld [vmem:[%s3711_s4 + $0x78] sm:$0xff]  ;;  %1299 = vmatmul.f32.vlgmr.msrb.gmra.mxu0 %v3043_v45  ;;  %1339 = vmatmul.f32.vlgmr.msrb.gmra.mxu2 %v3047_v46  ;;  %v3273_v45 = vld [vmem:[%s3711_s4 + $0xf0] sm:$0xff]  ;;  %v3279_v46 = vld [vmem:[%s3711_s4 + $0x68] sm:$0xff] }
  0xf2   : > { %v3261_v54 = vld [vmem:[%s3711_s4 + $0xf8] sm:$0xff]  ;;  %1318 = vmatpush.msrb.mxu1 %v753_v56  ;;  %1358 = vmatpush.msrb.mxu3 %v881_v57 }
  0xf3   : > { %1455 = vmatpush.msra.mxu0 %v3254_v59  ;;  %1319 = vmatmul.f32.vlgmr.msrb.gmra.mxu1 %v3063_v49  ;;  %v3286_v49 = vld [vmem:[%s3711_s4 + $0xe8] sm:$0xff]  ;;  %v3303_v63 = vld [vmem:[%s3711_s4 + $0x58] sm:$0xff] }
  0xf4   : > { %1359 = vmatmul.f32.vlgmr.msrb.gmra.mxu3 %v3067_v26  ;;  %1475 = vmatpush.msra.mxu1 %v3261_v54  ;;  %v3298_v26 = vld [vmem:[%s3711_s4 + $0xe0] sm:$0xff]  ;;  %v3310_v0 = vld [vmem:[%s3711_s4 + $0xd8] sm:$0xff] }
  0xf5   : > { %1456 = vmatpush.msra.mxu0 %v3266_v60  ;;  %v3351_v7 = vld [vmem:[%s3711_s4 + $0x38] sm:$0xff] }
  0xf6   : > { %1476 = vmatpush.msra.mxu1 %v3273_v45  ;;  %v3358_v8 = vld [vmem:[%s3711_s4 + $0xb8] sm:$0xff] }
  0xf7   : > { %1457 = vmatpush.msra.mxu0 %v3279_v46  ;;  %v3399_v14 = vld [vmem:[%s3711_s4 + $0x18] sm:$0xff] }
  0xf8   : > { %1477 = vmatpush.msra.mxu1 %v3286_v49  ;;  %v3405_v1 = vld [vmem:[%s3711_s4 + $0x178] sm:$0xff] }
  0xf9   : > { %1458 = vmatpush.msra.mxu0 %v3291_v61  ;;  %v3411_v16 = vld [vmem:[%s3711_s4 + $0x98] sm:$0xff]  ;;  %1495 = vmatpush.msra.mxu2 %v3405_v1 }
  0xfa   : > { %1478 = vmatpush.msra.mxu1 %v3298_v26  ;;  %v3476_v30 = vld [vmem:[%s3711_s4 + $0x158] sm:$0xff] }
  0xfb   : > { %1459 = vmatpush.msra.mxu0 %v3303_v63  ;;  %1496 = vmatpush.msra.mxu2 %v3423_v19  ;;  %v3524_v25 = vld [vmem:[%s3711_s4 + $0x138] sm:$0xff] }
  0xfc   : > { %1479 = vmatpush.msra.mxu1 %v3310_v0  ;;  %v3551_v55 = vld [vmem:[%s3711_s4 + $0x1f8] sm:$0xff] }
  0xfd   : > { %1460 = vmatpush.msra.mxu0 %v3315_v2  ;;  %1497 = vmatpush.msra.mxu2 %v3443_v22  ;;  %v3562_v57 = vld [vmem:[%s3711_s4 + $0x118] sm:$0xff] }
  0xfe   : > { %1480 = vmatpush.msra.mxu1 %v3322_v3  ;;  %1515 = vmatpush.msra.mxu3 %v3551_v55 }
  0xff   : > { %1461 = vmatpush.msra.mxu0 %v3327_v4  ;;  %1498 = vmatpush.msra.mxu2 %v3463_v32 }
 0x100   : > { %1481 = vmatpush.msra.mxu1 %v3334_v58 }
 0x101   : > { %1462 = vmatpush.msra.mxu0 %v3339_v5  ;;  %1499 = vmatpush.msra.mxu2 %v3476_v30 }
 0x102   : > { %1482 = vmatpush.msra.mxu1 %v3346_v6 }
 0x103   : > { %1463 = vmatpush.msra.mxu0 %v3351_v7  ;;  %1500 = vmatpush.msra.mxu2 %v3485_v34 }
 0x104   : > { %1483 = vmatpush.msra.mxu1 %v3358_v8 }
 0x105   : > { %1464 = vmatpush.msra.mxu0 %v3363_v62  ;;  %1501 = vmatpush.msra.mxu2 %v3497_v37 }
 0x106   : > { %1484 = vmatpush.msra.mxu1 %v3370_v9 }
 0x107   : > { %1465 = vmatpush.msra.mxu0 %v3375_v10  ;;  %v980_v13 = vpop.f32.mrf.mxu0  ;;  %v3426_v20 = vpop.f32.mrf.mxu1  ;;  %1502 = vmatpush.msra.mxu2 %v3505_v39 }
 0x108   : > { %1485 = vmatpush.msra.mxu1 %v3382_v11 }
 0x109   : > { %1466 = vmatpush.msra.mxu0 %v3387_v12  ;;  %1503 = vmatpush.msra.mxu2 %v3524_v25 }
 0x10a   : > { %1486 = vmatpush.msra.mxu1 %v3394_v15 }
 0x10b   : > { %1467 = vmatpush.msra.mxu0 %v3399_v14  ;;  %1504 = vmatpush.msra.mxu2 %v3533_v50 }
 0x10c   : > { %1487 = vmatpush.msra.mxu1 %v3411_v16 }
 0x10d   : > { %1468 = vmatpush.msra.mxu0 %v3417_v18  ;;  %1505 = vmatpush.msra.mxu2 %v3538_v51 }
 0x10e   : > { %v3457_v23 = vpop.f32.mrf.mxu2  ;;  %1488 = vmatpush.msra.mxu1 %v3431_v24  ;;  %v3479_v31 = vpop.f32.mrf.mxu3 }
 0x10f   : > { %1469 = vmatpush.msra.mxu0 %v3437_v21  ;;  %1506 = vmatpush.msra.mxu2 %v3546_v53 }
 0x110   : > { %v1060_v35 = vpop.f32.mrf.mxu0  ;;  %1489 = vmatpush.msra.mxu1 %v3449_v29 }
 0x111   : > { %1470 = vmatpush.msra.mxu0 %v3455_v17  ;;  %v1061_v36 = vadd.f32 %v1060_v35, %v980_v13  ;;  %1507 = vmatpush.msra.mxu2 %v3562_v57  ;;  %v1367_v35 = vperm.slane %v3507_v41, 2 }
 0x112   : > { %1490 = vmatpush.msra.mxu1 %v3469_v33 }
 0x113   : > { %1539 = vmatpush.msrb.mxu0 %v3254_v59  ;;  %v1080_v38 = vpop.f32.mrf.mxu1  ;;  %v3569_v59 = vld [vmem:[%s3711_s4 + $0x110] sm:$0xff] }
 0x114   : > { %1559 = vmatpush.msrb.mxu1 %v3261_v54  ;;  %v1081_v40 = vadd.f32 %v1080_v38, %v1061_v36  ;;  %v3576_v54 = vld [vmem:[%s3711_s4 + $0x1f0] sm:$0xff]  ;;  %1508 = vmatpush.msra.mxu2 %v3569_v59 }
 0x115   : > { %1540 = vmatpush.msrb.mxu0 %v3266_v60  ;;  %v3581_v60 = vld [vmem:[%s3711_s4 + $0x1e8] sm:$0xff]  ;;  %1516 = vmatpush.msra.mxu3 %v3576_v54 }
 0x116   : > { %1560 = vmatpush.msrb.mxu1 %v3273_v45  ;;  %v1100_v42 = vpop.f32.mrf.mxu2  ;;  %v3587_v45 = vld [vmem:[%s3711_s4 + $0x108] sm:$0xff] }
 0x117   : > { %1541 = vmatpush.msrb.mxu0 %v3279_v46  ;;  %v1101_v43 = vadd.f32 %v1100_v42, %v1081_v40  ;;  %v3595_v46 = vld [vmem:[%s3711_s4 + $0x1e0] sm:$0xff]  ;;  %1517 = vmatpush.msra.mxu3 %v3581_v60 }
 0x118   : > { %1561 = vmatpush.msrb.mxu1 %v3286_v49  ;;  %v3601_v49 = vld [vmem:[%s3711_s4 + $0x100] sm:$0xff]  ;;  %1509 = vmatpush.msra.mxu2 %v3587_v45 }
 0x119   : > { %1542 = vmatpush.msrb.mxu0 %v3291_v61  ;;  %v1120_v27 = vpop.f32.mrf.mxu3  ;;  %1518 = vmatpush.msra.mxu3 %v3595_v46 }
 0x11a   : > { %1562 = vmatpush.msrb.mxu1 %v3298_v26  ;;  %v1121_v48 = vadd.f32 %v1120_v27, %v1101_v43  ;;  %1510 = vmatpush.msra.mxu2 %v3601_v49  ;;  %v1368_v27 = vperm.slane %v3507_v41, 3 }
 0x11b   : > { %1543 = vmatpush.msrb.mxu0 %v3303_v63 }
 0x11c   : > { %1563 = vmatpush.msrb.mxu1 %v3310_v0  ;;  %v1373_v52 = vadd.f32 %v1365_v47, %v1121_v48  ;;  %1579 = vmatpush.msrb.mxu2 %v3405_v1  ;;  %v1450_v0 = vld [vmem:[%s3711_s4 + $0x1d8] sm:$0xff]  ;;  %v1443_v1 = vld [vmem:[%s3711_s4 + $0x1a0] sm:$0xff] }
 0x11d   : > { %1544 = vmatpush.msrb.mxu0 %v3315_v2  ;;  %1519 = vmatpush.msra.mxu3 %v1450_v0 }
 0x11e   : > { %1564 = vmatpush.msrb.mxu1 %v3322_v3  ;;  %v1387_v56 = vadd.f32 %v1379_v28, %v1373_v52  ;;  %1580 = vmatpush.msrb.mxu2 %v3423_v19  ;;  %v1441_v19 = vld [vmem:[%s3711_s4 + $0x190] sm:$0xff] }
 0x11f   : > { %1545 = vmatpush.msrb.mxu0 %v3327_v4 }
 0x120   : > { %1565 = vmatpush.msrb.mxu1 %v3334_v58  ;;  %1471 = vmatmul.f32.vlgmr.msra.gmra.mxu0 %v1387_v56  ;;  %v1535_v2 = vmul.f32 %v1387_v56, %v1387_v56  ;;  %v1449_v58 = vld [vmem:[%s3711_s4 + $0x1d0] sm:$0xff] }
 0x121   : > { %1546 = vmatpush.msrb.mxu0 %v3339_v5  ;;  %1581 = vmatpush.msrb.mxu2 %v3443_v22 }
 0x122   : > { %1566 = vmatpush.msrb.mxu1 %v3346_v6  ;;  %v1448_v6 = vld [vmem:[%s3711_s4 + $0x1c8] sm:$0xff]  ;;  %1520 = vmatpush.msra.mxu3 %v1449_v58 }
 0x123   : > { %1547 = vmatpush.msrb.mxu0 %v3351_v7  ;;  %1582 = vmatpush.msrb.mxu2 %v3463_v32  ;;  %v1366_v7 = vperm.slane %v3507_v41, 1 }
 0x124   : > { %1567 = vmatpush.msrb.mxu1 %v3358_v8  ;;  %1521 = vmatpush.msra.mxu3 %v1448_v6 }
 0x125   : > { %1548 = vmatpush.msrb.mxu0 %v3363_v62  ;;  %1583 = vmatpush.msrb.mxu2 %v3476_v30  ;;  %v1447_v62 = vld [vmem:[%s3711_s4 + $0x1c0] sm:$0xff] }
 0x126   : > { %1568 = vmatpush.msrb.mxu1 %v3370_v9  ;;  %1522 = vmatpush.msra.mxu3 %v1447_v62 }
 0x127   : > { %1549 = vmatpush.msrb.mxu0 %v3375_v10  ;;  %v1380_v10 = vperm.slane %v3515_v44, 1  ;;  %1584 = vmatpush.msrb.mxu2 %v3485_v34  ;;  %v1381_v34 = vperm.slane %v3515_v44, 2 }
 0x128   : > { %1569 = vmatpush.msrb.mxu1 %v3382_v11 }
 0x129   : > { %1550 = vmatpush.msrb.mxu0 %v3387_v12  ;;  %1585 = vmatpush.msrb.mxu2 %v3497_v37  ;;  %v1446_v12 = vld [vmem:[%s3711_s4 + $0x1b8] sm:$0xff] }
 0x12a   : > { %1570 = vmatpush.msrb.mxu1 %v3394_v15  ;;  %v1140_v61 = vpop.f32.mrf.mxu0  ;;  %1523 = vmatpush.msra.mxu3 %v1446_v12  ;;  %v1445_v15 = vld [vmem:[%s3711_s4 + $0x1b0] sm:$0xff] }
 0x12b   : > { %1551 = vmatpush.msrb.mxu0 %v3399_v14  ;;  %v1141_v26 = vadd.f32 %v1140_v61, %v3426_v20  ;;  %1586 = vmatpush.msrb.mxu2 %v3505_v39  ;;  %v1444_v14 = vld [vmem:[%s3711_s4 + $0x1a8] sm:$0xff] }
 0x12c   : > { %1571 = vmatpush.msrb.mxu1 %v3411_v16  ;;  %1524 = vmatpush.msra.mxu3 %v1445_v15  ;;  %v1442_v16 = vld [vmem:[%s3711_s4 + $0x198] sm:$0xff]  ;;  %v1440_v20 = vld [vmem:[%s3711_s4 + $0x188] sm:$0xff] }
 0x12d   : > { %1552 = vmatpush.msrb.mxu0 %v3417_v18  ;;  %v1160_v63 = vpop.f32.mrf.mxu1  ;;  %1587 = vmatpush.msrb.mxu2 %v3524_v25 }
 0x12e   : > { %1572 = vmatpush.msrb.mxu1 %v3431_v24  ;;  %v1161_v3 = vadd.f32 %v1160_v63, %v1141_v26  ;;  %1525 = vmatpush.msra.mxu3 %v1444_v14  ;;  %v1439_v24 = vld [vmem:[%s3711_s4 + $0x180] sm:$0xff] }
 0x12f   : > { %1553 = vmatpush.msrb.mxu0 %v3437_v21  ;;  %1588 = vmatpush.msrb.mxu2 %v3533_v50  ;;  %v1382_v50 = vperm.slane %v3515_v44, 3 }
 0x130   : > { %1573 = vmatpush.msrb.mxu1 %v3449_v29  ;;  %v1180_v4 = vpop.f32.mrf.mxu2  ;;  %1526 = vmatpush.msra.mxu3 %v1443_v1 }
 0x131   : > { %1554 = vmatpush.msrb.mxu0 %v3455_v17  ;;  %v1181_v5 = vadd.f32 %v1180_v4, %v1161_v3  ;;  %1589 = vmatpush.msrb.mxu2 %v3538_v51 }
 0x132   : > { %1555 = vmatmul.f32.vlgmr.msrb.gmra.mxu0 %v1535_v2  ;;  %1574 = vmatpush.msrb.mxu1 %v3469_v33 }
 0x133   : > { %v1200_v8 = vpop.f32.mrf.mxu3  ;;  %1590 = vmatpush.msrb.mxu2 %v3546_v53  ;;  %1527 = vmatpush.msra.mxu3 %v1442_v16 }
 0x134   : > { %v1201_v9 = vadd.f32 %v1200_v8, %v1181_v5 }
 0x135   : > { %1591 = vmatpush.msrb.mxu2 %v3562_v57  ;;  %1528 = vmatpush.msra.mxu3 %v1441_v19 }
 0x136   : > { %v1374_v11 = vadd.f32 %v1366_v7, %v1201_v9 }
 0x137   : > { %1592 = vmatpush.msrb.mxu2 %v3569_v59  ;;  %1529 = vmatpush.msra.mxu3 %v1440_v20 }
 0x138   : > { %v1388_v13 = vadd.f32 %v1380_v10, %v1374_v11 }
 0x139   : > { %1593 = vmatpush.msrb.mxu2 %v3587_v45  ;;  %1530 = vmatpush.msra.mxu3 %v1439_v24 }
 0x13a   : > { %1491 = vmatmul.f32.vlgmr.msra.gmra.mxu1 %v1388_v13  ;;  %v1536_v18 = vmul.f32 %v1388_v13, %v1388_v13 }
 0x13b   : > { %1594 = vmatpush.msrb.mxu2 %v3601_v49  ;;  %1599 = vmatpush.msrb.mxu3 %v3551_v55 }
 0x13d   : > { %1600 = vmatpush.msrb.mxu3 %v3576_v54 }
 0x13f   : > { %1601 = vmatpush.msrb.mxu3 %v3581_v60 }
 0x141   : > { %1602 = vmatpush.msrb.mxu3 %v3595_v46 }
 0x142   : > { %1575 = vmatmul.f32.vlgmr.msrb.gmra.mxu1 %v1536_v18 }
 0x143   : > { %1603 = vmatpush.msrb.mxu3 %v1450_v0 }
 0x145   : > { %1604 = vmatpush.msrb.mxu3 %v1449_v58 }
 0x147   : > { %1605 = vmatpush.msrb.mxu3 %v1448_v6 }
 0x149   : > { %1606 = vmatpush.msrb.mxu3 %v1447_v62 }
 0x14b   : > { %1607 = vmatpush.msrb.mxu3 %v1446_v12 }
 0x14c   : > { %v1220_v21 = vpop.f32.mrf.mxu0 }
 0x14d   : > { %v1221_v22 = vadd.f32 %v1220_v21, %v3457_v23  ;;  %1608 = vmatpush.msrb.mxu3 %v1445_v15 }
 0x14f   : > { %v1240_v29 = vpop.f32.mrf.mxu1  ;;  %1609 = vmatpush.msrb.mxu3 %v1444_v14 }
 0x150   : > { %v1241_v17 = vadd.f32 %v1240_v29, %v1221_v22 }
 0x151   : > { %1610 = vmatpush.msrb.mxu3 %v1443_v1 }
 0x152   : > { %v1260_v32 = vpop.f32.mrf.mxu2 }
 0x153   : > { %v1261_v33 = vadd.f32 %v1260_v32, %v1241_v17  ;;  %1611 = vmatpush.msrb.mxu3 %v1442_v16 }
 0x155   : > { %v1280_v30 = vpop.f32.mrf.mxu3  ;;  %1612 = vmatpush.msrb.mxu3 %v1441_v19 }
 0x156   : > { %v1281_v36 = vadd.f32 %v1280_v30, %v1261_v33 }
 0x157   : > { %1613 = vmatpush.msrb.mxu3 %v1440_v20 }
 0x158   : > { %v1375_v37 = vadd.f32 %v1367_v35, %v1281_v36 }
 0x159   : > { %1614 = vmatpush.msrb.mxu3 %v1439_v24 }
 0x15a   : > { %v1389_v38 = vadd.f32 %v1381_v34, %v1375_v37 }
 0x15c   : > { %1511 = vmatmul.f32.vlgmr.msra.gmra.mxu2 %v1389_v38  ;;  %v1537_v23 = vmul.f32 %v1389_v38, %v1389_v38 }
 0x164   : > { %1595 = vmatmul.f32.vlgmr.msrb.gmra.mxu2 %v1537_v23 }
 0x16e   : > { %v1300_v39 = vpop.f32.mrf.mxu0 }
 0x16f   : > { %v1301_v40 = vadd.f32 %v1300_v39, %v3479_v31 }
 0x170   : > { %v1320_v42 = vpop.f32.mrf.mxu1 }
 0x171   : > { %v1321_v43 = vadd.f32 %v1320_v42, %v1301_v40 }
 0x174   : > { %v1340_v47 = vpop.f32.mrf.mxu2 }
 0x175   : > { %v1341_v25 = vadd.f32 %v1340_v47, %v1321_v43 }
 0x177   : > { %v1360_v48 = vpop.f32.mrf.mxu3 }
 0x178   : > { %v1361_v28 = vadd.f32 %v1360_v48, %v1341_v25 }
 0x17a   : > { %v1376_v51 = vadd.f32 %v1368_v27, %v1361_v28 }
 0x17c   : > { %v1390_v52 = vadd.f32 %v1382_v50, %v1376_v51 }
 0x17e   : > { %1531 = vmatmul.f32.vlgmr.msra.gmra.mxu3 %v1390_v52  ;;  %v1538_v53 = vmul.f32 %v1390_v52, %v1390_v52 }
 0x186   : > { %1615 = vmatmul.f32.vlgmr.msrb.gmra.mxu3 %v1538_v53 }
 0x19d   : > { %v1472_v56 = vpop.f32.mrf.mxu0 }
 0x1af   : > { %v1556_v41 = vpop.f32.mrf.mxu0 }
 0x1b7   : > { %v1492_v55 = vpop.f32.mrf.mxu1 }
 0x1b8   : > { %v1493_v59 = vadd.f32 %v1492_v55, %v1472_v56 }
 0x1bf   : > { %v1576_v45 = vpop.f32.mrf.mxu1 }
 0x1c0   : > { %v1577_v26 = vadd.f32 %v1576_v45, %v1556_v41 }
 0x1df   : > { %v1512_v57 = vpop.f32.mrf.mxu2 }
 0x1e0   : > { %v1513_v31 = vadd.f32 %v1512_v57, %v1493_v59 }
 0x1e7   : > { %v1596_v49 = vpop.f32.mrf.mxu2 }
 0x1e8   : > { %v1597_v63 = vadd.f32 %v1596_v49, %v1577_v26 }
 0x201   : > { %v1532_v54 = vpop.f32.mrf.mxu3 }
 0x202   : > { %v1533_v60 = vadd.f32 %v1532_v54, %v1513_v31 }
 0x204   : > { %v1619_v46 = vsel %vm684_vm0, %v1533_v60, 0.0 }
 0x205   : > { %v1620_v61 = vrot.slane %v1619_v46, 4 }
 0x207   : > { %v1621_v44 = vadd.f32 %v1620_v61, %v1619_v46 }
 0x209   : > { %v1622_v0 = vrot.slane %v1621_v44, 2  ;;  %v1616_v2 = vpop.f32.mrf.mxu3 }
 0x20a   : > { %v1617_v3 = vadd.f32 %v1616_v2, %v1597_v63 }
 0x20b   : > { %v1623_v4 = vadd.f32 %v1622_v0, %v1621_v44 }
 0x20c   : > { %v1626_v58 = vsel %vm684_vm0, %v1617_v3, 0.0 }
 0x20d   : > { %v1624_v5 = vrot.slane %v1623_v4, 1  ;;  %v1627_v6 = vrot.slane %v1626_v58, 4 }
 0x20f   : > { %v1625_v7 = vadd.f32 %v1624_v5, %v1623_v4  ;;  %v1628_v8 = vadd.f32 %v1627_v6, %v1626_v58 }
 0x211   : > { %v1629_v62 = vrot.slane %v1628_v8, 2 }
 0x213   : > { %v1630_v9 = vadd.f32 %v1629_v62, %v1628_v8  ;;  %1636 = sbr.rel (%p1831_p7) target bundleno = 538 (0x21a), region = 56 }
 0x215   : > { %v1631_v10 = vrot.slane %v1630_v9, 1 }
 0x217   : > { %v1632_v11 = vadd.f32 %v1631_v10, %v1630_v9 }
 0x218   : > { %vm1637_vm1 = vcmask 254976   ;;  %v1938_v12 = vmov 0.0  }
 0x219   : > { %1638 = vst.msk [vmem:[%s2124_s23] sm:$0x3] %vm1637_vm1, %v1938_v12 }
 0x21a PF: > { %vm1641_vm2 = vcmask 253952  }
 0x220   : > { %v1639_v13 = vld [vmem:[%s2124_s23] sm:$0x1]  ;;  %v1643_v15 = vld [vmem:[%s2124_s23 + $0x1] sm:$0x1] }
 0x221   : > { %v1640_v14 = vadd.f32 %v1639_v13, %v1625_v7  ;;  %v1644_v1 = vadd.f32 %v1643_v15, %v1632_v11 }
 0x223   : > { %1642 = vst.msk [vmem:[%s2124_s23] sm:$0x1] %vm1641_vm2, %v1640_v14 }
 0x224   : > { %1645 = vst.msk [vmem:[%s2124_s23 + $0x1] sm:$0x1] %vm1641_vm2, %v1644_v1 }
 0x225 PF: > { %s20_s13 = sadd.s32 1, %s1935_s13   ;;  %s3741_s30 = smov %s1927_s11 }
 0x226   : > { %p17_p8 = scmp.ge.s32.totalorder %s20_s13, 6   ;;  %s3742_s10 = smov %s1931_s12 }
 0x227   : > { %s3743_s11 = smov %s3746_s14  ;;  %s3744_s12 = smov %s3750_s15 }
 0x228   :  { %19 = sbr.rel (!%p17_p8) target bundleno = 3 (0x3), region = 107 }

// kernel: nonautoregressive_encoder.13
= control target key start
LH: loop header
LB: loop body
LE: loop exit
PB: predicated region body
PF: predicated region fallthrough
CT: control target
= control target key end

     0   :  { %s1884_s25 = smov 0   ;;  %s1886_s26 = smov 0   ;;  %s2882_s0 = inlined_call_operand.vmem [shape: f32[2,16,512], index: 0, kind: input, shape index: {}]   ;;  %s2883_s1 = inlined_call_operand.vmem [shape: f32[2,16,32], index: 1, kind: input, shape index: {}]   ;;  %s2884_s2 = inlined_call_operand.vmem [shape: f32[2,16,128], index: 2, kind: input, shape index: {}]   ;;  %s2885_s3 = inlined_call_operand.vmem [shape: f32[2,1,512], index: 3, kind: input, shape index: {}]   ;;  %s2886_s4 = inlined_call_operand.vmem [shape: f32[2,16,32], index: 4, kind: input, shape index: {}]   ;;  %s2887_s5 = inlined_call_operand.vmem [shape: f32[512,512], index: 5, kind: input, shape index: {}]   ;;  %s2888_s6 = inlined_call_operand.vmem [shape: f32[32,512], index: 6, kind: input, shape index: {}]   ;;  %s2889_s7 = inlined_call_operand.vmem [shape: f32[1,512], index: 7, kind: input, shape index: {}]   ;;  %s2890_s8 = inlined_call_operand.vmem [shape: f32[1,512], index: 8, kind: input, shape index: {}]   ;;  %s2891_s9 = inlined_call_operand.vmem [shape: f32[1,512], index: 9, kind: input, shape index: {}]   ;;  %s2892_s10 = inlined_call_operand.vmem [shape: f32[1,32], index: 10, kind: input, shape index: {}]   ;;  %s2893_s11 = inlined_call_operand.vmem [shape: f32[1,32], index: 11, kind: input, shape index: {}]   ;;  %s2894_s12 = inlined_call_operand.vmem [shape: f32[2,16,32], index: 12, kind: output, shape index: {0}]   ;;  %s2895_s13 = inlined_call_operand.vmem [shape: f32[2,16,512], index: 13, kind: output, shape index: {1}]  }
   0x1   :  { %s1888_s27 = smov 0   ;;  %s1890_s28 = smov 0  }
   0x2   :  { %s1892_s29 = smov 0  }
   0x3 LB: > { %s33_s30 = sadd.s32 1, %s1803_s27  ;;  %s36_s14 = sadd.s32 1, %s1807_s28  ;;  %s1811_s29 = sphi %s1892_s29, %s24_s29   ;;  %s1807_s28 = sphi %s1890_s28, %s2903_s28   ;;  %s1803_s27 = sphi %s1888_s27, %s2902_s27   ;;  %s1799_s26 = sphi %s1886_s26, %s2901_s26   ;;  %s1795_s25 = sphi %s1884_s25, %s2900_s25  }
   0x4   : > { %p34_p0 = scmp.ge.s32.totalorder %s33_s30, 2  ;;  %p1681_p1 = scmp.ge.s32.totalorder %s1811_s29, 1 }
   0x5   : > { %p466_p2 = scmp.lt.s32.totalorder %s1811_s29, 5 }
   0x6   : > { %s2905_s30 = smov (%p34_p0, %s33_s30), 0  ;;  %s2907_s14 = smov (!%p34_p0, %s36_s14), %s1807_s28 }
   0x7   : > { %2896 = sst [smem:[#allocation2_spill]] %s2905_s30  ;;  %p467_p3 = pnand %p1681_p1, %p466_p2 }
   0x8   : > { %p38_p4 = scmp.ge.s32.totalorder %s2907_s14, 2  ;;  %p554_p5 = scmp.lt.s32.totalorder (!%p467_p3), %s1799_s26, 1 }
   0x9   : > { %470 = sbr.rel (%p467_p3) target bundleno = 415 (0x19f), region = 68  ;;  %p556_p6 = scmp.lt.s32.totalorder (!%p467_p3), %s1795_s25, 1 }
   0xa   : > { %s2909_s14 = smov (%p38_p4, %s2907_s14), 0  ;;  %s1813_s21 = smov (!%p467_p3), 64  }
   0xb   : > { %2897 = sst [smem:[#allocation3_spill]] %s2909_s14 }
   0xe   : > { %s2911_s26 = smov (!%p554_p5, %s1799_s26), 1  ;;  %s2913_s25 = smov (!%p556_p6, %s1795_s25), 1  ;;  %v916_v1 = vld [vmem:[%s2888_s6 + $0x60] sm:$0xff]  ;;  %v918_v2 = vld [vmem:[%s2888_s6 + $0x70] sm:$0xff]  ;;  %v917_v4 = vld [vmem:[%s2888_s6 + $0x68] sm:$0xff]  ;;  %vm646_vm4 = vcmask 261120  }
   0xf   : > { %s1685_s15 = sshll.u32 %s2911_s26, 1  ;;  %v912_v3 = vld [vmem:[%s2888_s6 + $0x40] sm:$0xff]  ;;  %937 = vmatpush.msra.mxu0 %v916_v1  ;;  %977 = vmatpush.msra.mxu2 %v918_v2  ;;  %v914_v5 = vld [vmem:[%s2888_s6 + $0x50] sm:$0xff]  ;;  %v919_v6 = vld [vmem:[%s2888_s6 + $0x78] sm:$0xff]  ;;  %s1683_s22 = sshll.u32 %s2911_s26, 3 }
  0x10   : > { %s568_s16 = sadd.s32 %s1685_s15, %s2913_s25  ;;  %957 = vmatpush.msra.mxu1 %v917_v4  ;;  %997 = vmatpush.msra.mxu3 %v919_v6  ;;  %v908_v7 = vld [vmem:[%s2888_s6 + $0x20] sm:$0xff]  ;;  %v913_v8 = vld [vmem:[%s2888_s6 + $0x48] sm:$0xff]  ;;  %v910_v9 = vld [vmem:[%s2888_s6 + $0x30] sm:$0xff] }
  0x11   : > { %s1920_s17 = sshll.u32 %s568_s16, 3  ;;  %938 = vmatpush.msra.mxu0 %v912_v3  ;;  %978 = vmatpush.msra.mxu2 %v914_v5  ;;  %v915_v10 = vld [vmem:[%s2888_s6 + $0x58] sm:$0xff]  ;;  %v909_v11 = vld [vmem:[%s2888_s6 + $0x28] sm:$0xff]  ;;  %v904_v12 = vld [vmem:[%s2888_s6] sm:$0xff] }
  0x12   : > { %s578_s20 = scalar_lea.vmem %s2884_s2, %s1920_s17  ;;  %958 = vmatpush.msra.mxu1 %v913_v8  ;;  %998 = vmatpush.msra.mxu3 %v915_v10  ;;  %v906_v13 = vld [vmem:[%s2888_s6 + $0x10] sm:$0xff]  ;;  %v911_v14 = vld [vmem:[%s2888_s6 + $0x38] sm:$0xff]  ;;  %v708_v15 = vld [vmem:[%s2887_s5 + $0x1e0] sm:$0xff]  ;;  %s570_s24 = scalar_lea.vmem %s2883_s1, %s1920_s17 }
  0x13   : > { %v612_v0 = vld [vmem:[%s578_s20] sm:$0xff]  ;;  %939 = vmatpush.msra.mxu0 %v908_v7  ;;  %979 = vmatpush.msra.mxu2 %v910_v9  ;;  %v905_v17 = vld [vmem:[%s2888_s6 + $0x8] sm:$0xff]  ;;  %v907_v18 = vld [vmem:[%s2888_s6 + $0x18] sm:$0xff]  ;;  %s598_s18 = scalar_lea.vmem %s2894_s12, %s1920_s17  ;;  %s1682_s20 = sshll.u32 %s2913_s25, 2 }
  0x14   : > { %921 = vrot.lane.b32.xlu0 %v612_v0, %s1813_s21  ;;  %v836_v16 = vld [vmem:[%s2887_s5 + $0x5e0] sm:$0xff]  ;;  %959 = vmatpush.msra.mxu1 %v909_v11  ;;  %s590_s21 = scalar_lea.vmem %s2886_s4, %s1920_s17  ;;  %s2191_s14 = sadd.s32 %s1683_s22, %s1682_s20 }
  0x15   : > { %999 = vmatpush.msra.mxu3 %v911_v14  ;;  %940 = vmatpush.msra.mxu0 %v904_v12  ;;  %v704_v19 = vld [vmem:[%s2887_s5 + $0x1c0] sm:$0xff]  ;;  %s1689_s17 = sshll.u32 %s2911_s26, 2 }
  0x16   : > { %980 = vmatpush.msra.mxu2 %v906_v13  ;;  %v772_v20 = vld [vmem:[%s2887_s5 + $0x3e0] sm:$0xff]  ;;  %960 = vmatpush.msra.mxu1 %v905_v17  ;;  %s582_s19 = scalar_lea.vmem %s2885_s3, %s1689_s17 }
  0x17   : > { %1005 = vmatpush.msrb.mxu0 %v708_v15  ;;  %v832_v21 = vld [vmem:[%s2887_s5 + $0x5c0] sm:$0xff]  ;;  %1000 = vmatpush.msra.mxu3 %v907_v18 }
  0x18   : > { %1045 = vmatpush.msrb.mxu2 %v836_v16  ;;  %v900_v22 = vld [vmem:[%s2887_s5 + $0x7e0] sm:$0xff]  ;;  %1025 = vmatpush.msrb.mxu1 %v772_v20 }
  0x19   : > { %v700_v23 = vld [vmem:[%s2887_s5 + $0x1a0] sm:$0xff]  ;;  %1006 = vmatpush.msrb.mxu0 %v704_v19  ;;  %1065 = vmatpush.msrb.mxu3 %v900_v22 }
  0x1a   : > { %v768_v24 = vld [vmem:[%s2887_s5 + $0x3c0] sm:$0xff]  ;;  %1046 = vmatpush.msrb.mxu2 %v832_v21 }
  0x1b   : > { %v828_v25 = vld [vmem:[%s2887_s5 + $0x5a0] sm:$0xff]  ;;  %1007 = vmatpush.msrb.mxu0 %v700_v23  ;;  %1026 = vmatpush.msrb.mxu1 %v768_v24 }
  0x1c   : > { %v896_v26 = vld [vmem:[%s2887_s5 + $0x7c0] sm:$0xff]  ;;  %1047 = vmatpush.msrb.mxu2 %v828_v25 }
  0x1d   : > { %v696_v27 = vld [vmem:[%s2887_s5 + $0x180] sm:$0xff]  ;;  %1066 = vmatpush.msrb.mxu3 %v896_v26 }
  0x1e   : > { %v764_v28 = vld [vmem:[%s2887_s5 + $0x3a0] sm:$0xff]  ;;  %1008 = vmatpush.msrb.mxu0 %v696_v27 }
  0x1f   : > { %v824_v29 = vld [vmem:[%s2887_s5 + $0x580] sm:$0xff]  ;;  %1027 = vmatpush.msrb.mxu1 %v764_v28 }
  0x20   : > { %v892_v30 = vld [vmem:[%s2887_s5 + $0x7a0] sm:$0xff]  ;;  %1048 = vmatpush.msrb.mxu2 %v824_v29 }
  0x21   : > { %v1749_v31 = vld [vmem:[%s2892_s10] ss:$0 sm:$0xff]  ;;  %1067 = vmatpush.msrb.mxu3 %v892_v30 }
  0x22   : > { %v692_v32 = vld [vmem:[%s2887_s5 + $0x160] sm:$0xff] }
  0x23   : > { %v760_v33 = vld [vmem:[%s2887_s5 + $0x380] sm:$0xff]  ;;  %1009 = vmatpush.msrb.mxu0 %v692_v32 }
  0x24   : > { %v613_v34 = vld [vmem:[%s590_s21] sm:$0xff]  ;;  %1028 = vmatpush.msrb.mxu1 %v760_v33 }
  0x25   : > { %v820_v35 = vld [vmem:[%s2887_s5 + $0x560] sm:$0xff]  ;;  %v618_v41 = vmul.f32 %v1749_v31, %v613_v34 }
  0x26   : > { %v888_v36 = vld [vmem:[%s2887_s5 + $0x780] sm:$0xff]  ;;  %1049 = vmatpush.msrb.mxu2 %v820_v35 }
  0x27   : > { %v688_v37 = vld [vmem:[%s2887_s5 + $0x140] sm:$0xff]  ;;  %1068 = vmatpush.msrb.mxu3 %v888_v36 }
  0x28   : > { %v756_v38 = vld [vmem:[%s2887_s5 + $0x360] sm:$0xff]  ;;  %1010 = vmatpush.msrb.mxu0 %v688_v37 }
  0x29   : > { %v816_v39 = vld [vmem:[%s2887_s5 + $0x540] sm:$0xff]  ;;  %1029 = vmatpush.msrb.mxu1 %v756_v38 }
  0x2a   : > { %v884_v40 = vld [vmem:[%s2887_s5 + $0x760] sm:$0xff]  ;;  %1050 = vmatpush.msrb.mxu2 %v816_v39  ;;  %v709_v39 = vld [vmem:[%s2887_s5 + $0x1e8] sm:$0xff] }
  0x2b   : > { %v1750_v42 = vld [vmem:[%s2893_s11] ss:$0 sm:$0xff]  ;;  %1069 = vmatpush.msrb.mxu3 %v884_v40  ;;  %v837_v40 = vld [vmem:[%s2887_s5 + $0x5e8] sm:$0xff] }
  0x2c   : > { %v684_v43 = vld [vmem:[%s2887_s5 + $0x120] sm:$0xff]  ;;  %v2074_v51 = vadd.f32 %v1750_v42, %v618_v41  ;;  %v773_v41 = vld [vmem:[%s2887_s5 + $0x3e8] sm:$0xff] }
  0x2d   : > { %v752_v44 = vld [vmem:[%s2887_s5 + $0x340] sm:$0xff]  ;;  %1011 = vmatpush.msrb.mxu0 %v684_v43  ;;  %v901_v42 = vld [vmem:[%s2887_s5 + $0x7e8] sm:$0xff] }
  0x2e   : > { %v812_v45 = vld [vmem:[%s2887_s5 + $0x520] sm:$0xff]  ;;  %1030 = vmatpush.msrb.mxu1 %v752_v44  ;;  %v1697_v60 = vmul.f32 -1.442695, %v2074_v51  ;;  %v705_v43 = vld [vmem:[%s2887_s5 + $0x1c8] sm:$0xff] }
  0x2f   : > { %v880_v46 = vld [vmem:[%s2887_s5 + $0x740] sm:$0xff]  ;;  %1051 = vmatpush.msrb.mxu2 %v812_v45  ;;  %v833_v44 = vld [vmem:[%s2887_s5 + $0x5c8] sm:$0xff] }
  0x30   : > { %v680_v47 = vld [vmem:[%s2887_s5 + $0x100] sm:$0xff]  ;;  %1070 = vmatpush.msrb.mxu3 %v880_v46  ;;  %1751 = vpow2.f32 %v1697_v60  ;;  %v769_v45 = vld [vmem:[%s2887_s5 + $0x3c8] sm:$0xff] }
  0x31   : > { %v748_v48 = vld [vmem:[%s2887_s5 + $0x320] sm:$0xff]  ;;  %1012 = vmatpush.msrb.mxu0 %v680_v47  ;;  %v897_v46 = vld [vmem:[%s2887_s5 + $0x7c8] sm:$0xff] }
  0x32   : > { %v808_v49 = vld [vmem:[%s2887_s5 + $0x500] sm:$0xff]  ;;  %1031 = vmatpush.msrb.mxu1 %v748_v48  ;;  %v701_v47 = vld [vmem:[%s2887_s5 + $0x1a8] sm:$0xff] }
  0x33   : > { %v876_v50 = vld [vmem:[%s2887_s5 + $0x720] sm:$0xff]  ;;  %1052 = vmatpush.msrb.mxu2 %v808_v49  ;;  %v829_v48 = vld [vmem:[%s2887_s5 + $0x5a8] sm:$0xff] }
  0x34   : > { %v676_v52 = vld [vmem:[%s2887_s5 + $0xe0] sm:$0xff]  ;;  %1071 = vmatpush.msrb.mxu3 %v876_v50  ;;  %v765_v49 = vld [vmem:[%s2887_s5 + $0x3a8] sm:$0xff] }
  0x35   : > { %v744_v53 = vld [vmem:[%s2887_s5 + $0x300] sm:$0xff]  ;;  %1013 = vmatpush.msrb.mxu0 %v676_v52  ;;  %v893_v50 = vld [vmem:[%s2887_s5 + $0x7a8] sm:$0xff] }
  0x36   : > { %v804_v54 = vld [vmem:[%s2887_s5 + $0x4e0] sm:$0xff]  ;;  %1032 = vmatpush.msrb.mxu1 %v744_v53  ;;  %v1752_v17 = vpop.eup %1751  ;;  %v825_v52 = vld [vmem:[%s2887_s5 + $0x588] sm:$0xff] }
  0x37   : > { %v872_v55 = vld [vmem:[%s2887_s5 + $0x700] sm:$0xff]  ;;  %1053 = vmatpush.msrb.mxu2 %v804_v54  ;;  %v628_v18 = vadd.f32 1.0, %v1752_v17  ;;  %v669_v17 = vld [vmem:[%s2887_s5 + $0xa8] sm:$0xff] }
  0x38   : > { %v672_v56 = vld [vmem:[%s2887_s5 + $0xc0] sm:$0xff]  ;;  %1072 = vmatpush.msrb.mxu3 %v872_v55  ;;  %v693_v55 = vld [vmem:[%s2887_s5 + $0x168] sm:$0xff] }
  0x39   : > { %v740_v57 = vld [vmem:[%s2887_s5 + $0x2e0] sm:$0xff]  ;;  %1014 = vmatpush.msrb.mxu0 %v672_v56  ;;  %1753 = vrcp.f32 %v628_v18  ;;  %vm634_vm0 = vweird.f32 %v628_v18  ;;  %v640_v23 = vand.u32 2147483648, %v628_v18  ;;  %v638_v25 = vand.u32 2147483647, %v628_v18  ;;  %v761_v56 = vld [vmem:[%s2887_s5 + $0x388] sm:$0xff] }
  0x3a   : > { %v800_v58 = vld [vmem:[%s2887_s5 + $0x4c0] sm:$0xff]  ;;  %1033 = vmatpush.msrb.mxu1 %v740_v57  ;;  %v821_v57 = vld [vmem:[%s2887_s5 + $0x568] sm:$0xff] }
  0x3b   : > { %v868_v59 = vld [vmem:[%s2887_s5 + $0x6e0] sm:$0xff]  ;;  %1054 = vmatpush.msrb.mxu2 %v800_v58  ;;  %v641_v26 = vor.u32 1.1754944e-38, %v640_v23  ;;  %vm639_vm3 = vcmp.eq.f32.partialorder %v638_v25, 8.507059e+37  ;;  %v889_v58 = vld [vmem:[%s2887_s5 + $0x788] sm:$0xff] }
  0x3c   : > { %v668_v61 = vld [vmem:[%s2887_s5 + $0xa0] sm:$0xff]  ;;  %1073 = vmatpush.msrb.mxu3 %v868_v59  ;;  %v793_v23 = vld [vmem:[%s2887_s5 + $0x488] sm:$0xff] }
  0x3d   : > { %v736_v62 = vld [vmem:[%s2887_s5 + $0x2c0] sm:$0xff]  ;;  %1015 = vmatpush.msrb.mxu0 %v668_v61  ;;  %v689_v61 = vld [vmem:[%s2887_s5 + $0x148] sm:$0xff] }
  0x3e   : > { %v796_v63 = vld [vmem:[%s2887_s5 + $0x4a0] sm:$0xff]  ;;  %1034 = vmatpush.msrb.mxu1 %v736_v62  ;;  %v757_v62 = vld [vmem:[%s2887_s5 + $0x368] sm:$0xff] }
  0x3f   : > { %v864_v0 = vld [vmem:[%s2887_s5 + $0x6c0] sm:$0xff]  ;;  %1055 = vmatpush.msrb.mxu2 %v796_v63  ;;  %v1754_v19 = vpop.eup %1753  ;;  %v817_v63 = vld [vmem:[%s2887_s5 + $0x548] sm:$0xff] }
  0x40   : > { %v664_v1 = vld [vmem:[%s2887_s5 + $0x80] sm:$0xff]  ;;  %1074 = vmatpush.msrb.mxu3 %v864_v0  ;;  %v630_v20 = vmul.f32 %v1754_v19, %v628_v18  ;;  %vm635_vm1 = vweird.f32 %v1754_v19  ;;  %v885_v0 = vld [vmem:[%s2887_s5 + $0x768] sm:$0xff] }
  0x41   : > { %v732_v2 = vld [vmem:[%s2887_s5 + $0x2a0] sm:$0xff]  ;;  %1016 = vmatpush.msrb.mxu0 %v664_v1  ;;  %vm636_vm2 = vmor %vm634_vm0, %vm635_vm1  ;;  %v685_v1 = vld [vmem:[%s2887_s5 + $0x128] sm:$0xff] }
  0x42   : > { %v792_v3 = vld [vmem:[%s2887_s5 + $0x480] sm:$0xff]  ;;  %1035 = vmatpush.msrb.mxu1 %v732_v2  ;;  %v631_v21 = vsub.f32 1.0, %v630_v20  ;;  %v753_v2 = vld [vmem:[%s2887_s5 + $0x348] sm:$0xff] }
  0x43   : > { %v860_v4 = vld [vmem:[%s2887_s5 + $0x6a0] sm:$0xff]  ;;  %1056 = vmatpush.msrb.mxu2 %v792_v3  ;;  %v813_v3 = vld [vmem:[%s2887_s5 + $0x528] sm:$0xff] }
  0x44   : > { %v660_v5 = vld [vmem:[%s2887_s5 + $0x60] sm:$0xff]  ;;  %1075 = vmatpush.msrb.mxu3 %v860_v4  ;;  %v632_v22 = vmul.f32 %v1754_v19, %v631_v21  ;;  %v881_v4 = vld [vmem:[%s2887_s5 + $0x748] sm:$0xff] }
  0x45   : > { %v728_v6 = vld [vmem:[%s2887_s5 + $0x280] sm:$0xff]  ;;  %1017 = vmatpush.msrb.mxu0 %v660_v5  ;;  %v681_v5 = vld [vmem:[%s2887_s5 + $0x108] sm:$0xff] }
  0x46   : > { %v788_v7 = vld [vmem:[%s2887_s5 + $0x460] sm:$0xff]  ;;  %1036 = vmatpush.msrb.mxu1 %v728_v6  ;;  %v633_v24 = vadd.f32 %v1754_v19, %v632_v22  ;;  %v749_v6 = vld [vmem:[%s2887_s5 + $0x328] sm:$0xff] }
  0x47   : > { %v856_v8 = vld [vmem:[%s2887_s5 + $0x680] sm:$0xff]  ;;  %1057 = vmatpush.msrb.mxu2 %v788_v7  ;;  %v809_v7 = vld [vmem:[%s2887_s5 + $0x508] sm:$0xff] }
  0x48   : > { %v656_v9 = vld [vmem:[%s2887_s5 + $0x40] sm:$0xff]  ;;  %1076 = vmatpush.msrb.mxu3 %v856_v8  ;;  %v637_v27 = vsel %vm636_vm2, %v1754_v19, %v633_v24  ;;  %v877_v8 = vld [vmem:[%s2887_s5 + $0x728] sm:$0xff] }
  0x49   : > { %v724_v10 = vld [vmem:[%s2887_s5 + $0x260] sm:$0xff]  ;;  %1018 = vmatpush.msrb.mxu0 %v656_v9  ;;  %v642_v28 = vsel %vm639_vm3, %v641_v26, %v637_v27  ;;  %v677_v9 = vld [vmem:[%s2887_s5 + $0xe8] sm:$0xff] }
  0x4a   : > { %v784_v11 = vld [vmem:[%s2887_s5 + $0x440] sm:$0xff]  ;;  %1037 = vmatpush.msrb.mxu1 %v724_v10  ;;  %v644_v29 = vmul.f32 %v642_v28, %v2074_v51  ;;  %v697_v51 = vld [vmem:[%s2887_s5 + $0x188] sm:$0xff] }
  0x4b   : > { %v852_v12 = vld [vmem:[%s2887_s5 + $0x660] sm:$0xff]  ;;  %1058 = vmatpush.msrb.mxu2 %v784_v11  ;;  %v745_v10 = vld [vmem:[%s2887_s5 + $0x308] sm:$0xff] }
  0x4c   : > { %v652_v13 = vld [vmem:[%s2887_s5 + $0x20] sm:$0xff]  ;;  %1077 = vmatpush.msrb.mxu3 %v852_v12  ;;  %v805_v11 = vld [vmem:[%s2887_s5 + $0x4e8] sm:$0xff] }
  0x4d   : > { %v720_v14 = vld [vmem:[%s2887_s5 + $0x240] sm:$0xff]  ;;  %1019 = vmatpush.msrb.mxu0 %v652_v13  ;;  %v873_v12 = vld [vmem:[%s2887_s5 + $0x708] sm:$0xff] }
  0x4e   : > { %v780_v15 = vld [vmem:[%s2887_s5 + $0x420] sm:$0xff]  ;;  %1038 = vmatpush.msrb.mxu1 %v720_v14  ;;  %v673_v13 = vld [vmem:[%s2887_s5 + $0xc8] sm:$0xff] }
  0x4f   : > { %v848_v16 = vld [vmem:[%s2887_s5 + $0x640] sm:$0xff]  ;;  %1059 = vmatpush.msrb.mxu2 %v780_v15  ;;  %v741_v14 = vld [vmem:[%s2887_s5 + $0x2e8] sm:$0xff] }
  0x50   : > { %1078 = vmatpush.msrb.mxu3 %v848_v16  ;;  %v624_v30 = vld [vmem:[%s570_s24] sm:$0xff]  ;;  %s1684_s24 = sshll.u32 %s2191_s14, 3  ;;  %v801_v15 = vld [vmem:[%s2887_s5 + $0x4c8] sm:$0xff] }
  0x51   : > { %v645_v31 = vadd.f32 %v644_v29, %v624_v30  ;;  %v648_v32 = vld [vmem:[%s2887_s5] sm:$0xff]  ;;  %s2233_s21 = scalar_lea.vmem %s2882_s0, %s1684_s24  ;;  %v869_v16 = vld [vmem:[%s2887_s5 + $0x6e8] sm:$0xff]  ;;  %s2847_s15 = scalar_lea.vmem %s2895_s13, %s1684_s24 }
  0x52   : > { %v716_v33 = vld [vmem:[%s2887_s5 + $0x220] sm:$0xff]  ;;  %1020 = vmatpush.msrb.mxu0 %v648_v32  ;;  %v2251_v54 = vld [vmem:[%s2233_s21 + $0x10] sm:$0xff]  ;;  %v2268_v59 = vld [vmem:[%s2233_s21 + $0x8] sm:$0xff] }
  0x53   : > { %v776_v34 = vld [vmem:[%s2887_s5 + $0x400] sm:$0xff]  ;;  %1039 = vmatpush.msrb.mxu1 %v716_v33  ;;  %647 = vst.msk [vmem:[%s598_s18] sm:$0xff] %vm646_vm4, %v645_v31  ;;  %v2271_v60 = vld [vmem:[%s2233_s21 + $0x18] sm:$0xff]  ;;  %v737_v18 = vld [vmem:[%s2887_s5 + $0x2c8] sm:$0xff] }
  0x54   : > { %v844_v35 = vld [vmem:[%s2887_s5 + $0x620] sm:$0xff]  ;;  %1060 = vmatpush.msrb.mxu2 %v776_v34  ;;  %v797_v19 = vld [vmem:[%s2887_s5 + $0x4a8] sm:$0xff] }
  0x55   : > { %1079 = vmatpush.msrb.mxu3 %v844_v35  ;;  %v712_v36 = vld [vmem:[%s2887_s5 + $0x200] sm:$0xff]  ;;  %v865_v20 = vld [vmem:[%s2887_s5 + $0x6c8] sm:$0xff] }
  0x56   : > { %v840_v37 = vld [vmem:[%s2887_s5 + $0x600] sm:$0xff]  ;;  %1040 = vmatpush.msrb.mxu1 %v712_v36  ;;  %v665_v21 = vld [vmem:[%s2887_s5 + $0x88] sm:$0xff] }
  0x57   : > { %1080 = vmatpush.msrb.mxu3 %v840_v37  ;;  %v2248_v53 = vld [vmem:[%s2233_s21] sm:$0xff]  ;;  %v733_v22 = vld [vmem:[%s2887_s5 + $0x2a8] sm:$0xff] }
  0x58   : > { %v861_v24 = vld [vmem:[%s2887_s5 + $0x6a8] sm:$0xff] }
  0x59   : > { %v661_v25 = vld [vmem:[%s2887_s5 + $0x68] sm:$0xff] }
  0x5a   : > { %v729_v26 = vld [vmem:[%s2887_s5 + $0x288] sm:$0xff] }
  0x5b   : > { %v789_v27 = vld [vmem:[%s2887_s5 + $0x468] sm:$0xff] }
  0x5c   : > { %v857_v28 = vld [vmem:[%s2887_s5 + $0x688] sm:$0xff] }
  0x5d   : > { %v657_v29 = vld [vmem:[%s2887_s5 + $0x48] sm:$0xff] }
  0x5e   : > { %v725_v30 = vld [vmem:[%s2887_s5 + $0x268] sm:$0xff] }
  0x5f   : > { %v785_v31 = vld [vmem:[%s2887_s5 + $0x448] sm:$0xff] }
  0x60   : > { %v853_v32 = vld [vmem:[%s2887_s5 + $0x668] sm:$0xff] }
  0x61   : > { %v653_v33 = vld [vmem:[%s2887_s5 + $0x28] sm:$0xff] }
  0x62   : > { %v721_v34 = vld [vmem:[%s2887_s5 + $0x248] sm:$0xff] }
  0x63   : > { %v781_v35 = vld [vmem:[%s2887_s5 + $0x428] sm:$0xff] }
  0x64   : > { %v849_v36 = vld [vmem:[%s2887_s5 + $0x648] sm:$0xff] }
  0x65   : > { %v649_v37 = vld [vmem:[%s2887_s5 + $0x8] sm:$0xff] }
  0x86   : > { %v922_v38 = vpop.permute.xlu0 %921 }
  0x87   : > { %1698 = vmatmul.msk.f32.vlgmr.msra.gmra.mxu0 %vm646_vm4, %v922_v38  ;;  %1699 = vmatmul.msk.f32.vlgmr.msra.gmra.mxu1 %vm646_vm4, %v922_v38 }
  0x88   : > { %1700 = vmatmul.msk.f32.vlgmr.msra.gmra.mxu2 %vm646_vm4, %v922_v38  ;;  %1701 = vmatmul.msk.f32.vlgmr.msra.gmra.mxu3 %vm646_vm4, %v922_v38  ;;  %v717_v38 = vld [vmem:[%s2887_s5 + $0x228] sm:$0xff] }
  0x89   : > { %1085 = vmatpush.msra.mxu0 %v709_v39  ;;  %1125 = vmatpush.msra.mxu2 %v837_v40  ;;  %v777_v39 = vld [vmem:[%s2887_s5 + $0x408] sm:$0xff] }
  0x8a   : > { %1105 = vmatpush.msra.mxu1 %v773_v41  ;;  %1145 = vmatpush.msra.mxu3 %v901_v42  ;;  %v845_v40 = vld [vmem:[%s2887_s5 + $0x628] sm:$0xff]  ;;  %v710_v41 = vld [vmem:[%s2887_s5 + $0x1f0] sm:$0xff] }
  0x8b   : > { %1086 = vmatpush.msra.mxu0 %v705_v43  ;;  %1126 = vmatpush.msra.mxu2 %v833_v44  ;;  %v838_v42 = vld [vmem:[%s2887_s5 + $0x5f0] sm:$0xff]  ;;  %v713_v43 = vld [vmem:[%s2887_s5 + $0x208] sm:$0xff] }
  0x8c   : > { %1106 = vmatpush.msra.mxu1 %v769_v45  ;;  %1146 = vmatpush.msra.mxu3 %v897_v46  ;;  %v841_v44 = vld [vmem:[%s2887_s5 + $0x608] sm:$0xff]  ;;  %v706_v45 = vld [vmem:[%s2887_s5 + $0x1d0] sm:$0xff] }
  0x8d   : > { %1087 = vmatpush.msra.mxu0 %v701_v47  ;;  %1127 = vmatpush.msra.mxu2 %v829_v48  ;;  %v774_v46 = vld [vmem:[%s2887_s5 + $0x3f0] sm:$0xff] }
  0x8e   : > { %1107 = vmatpush.msra.mxu1 %v765_v49  ;;  %1147 = vmatpush.msra.mxu3 %v893_v50  ;;  %v834_v47 = vld [vmem:[%s2887_s5 + $0x5d0] sm:$0xff] }
  0x8f   : > { %1088 = vmatpush.msra.mxu0 %v697_v51  ;;  %1128 = vmatpush.msra.mxu2 %v825_v52  ;;  %v902_v48 = vld [vmem:[%s2887_s5 + $0x7f0] sm:$0xff] }
  0x90   : > { %1021 = vmatmul.f32.vlgmr.msrb.gmra.mxu0 %v2248_v53  ;;  %1061 = vmatmul.f32.vlgmr.msrb.gmra.mxu2 %v2251_v54  ;;  %v702_v49 = vld [vmem:[%s2887_s5 + $0x1b0] sm:$0xff] }
  0x91   : > { %1089 = vmatpush.msra.mxu0 %v693_v55  ;;  %1108 = vmatpush.msra.mxu1 %v761_v56  ;;  %v770_v50 = vld [vmem:[%s2887_s5 + $0x3d0] sm:$0xff] }
  0x92   : > { %1129 = vmatpush.msra.mxu2 %v821_v57  ;;  %1148 = vmatpush.msra.mxu3 %v889_v58  ;;  %v830_v51 = vld [vmem:[%s2887_s5 + $0x5b0] sm:$0xff] }
  0x93   : > { %1041 = vmatmul.f32.vlgmr.msrb.gmra.mxu1 %v2268_v59  ;;  %1081 = vmatmul.f32.vlgmr.msrb.gmra.mxu3 %v2271_v60  ;;  %v898_v52 = vld [vmem:[%s2887_s5 + $0x7d0] sm:$0xff] }
  0x94   : > { %1090 = vmatpush.msra.mxu0 %v689_v61  ;;  %1109 = vmatpush.msra.mxu1 %v757_v62  ;;  %v698_v55 = vld [vmem:[%s2887_s5 + $0x190] sm:$0xff] }
  0x95   : > { %1130 = vmatpush.msra.mxu2 %v817_v63  ;;  %1149 = vmatpush.msra.mxu3 %v885_v0  ;;  %v766_v56 = vld [vmem:[%s2887_s5 + $0x3b0] sm:$0xff] }
  0x96   : > { %1091 = vmatpush.msra.mxu0 %v685_v1  ;;  %1110 = vmatpush.msra.mxu1 %v753_v2  ;;  %v826_v57 = vld [vmem:[%s2887_s5 + $0x590] sm:$0xff] }
  0x97   : > { %1131 = vmatpush.msra.mxu2 %v813_v3  ;;  %1150 = vmatpush.msra.mxu3 %v881_v4  ;;  %v894_v58 = vld [vmem:[%s2887_s5 + $0x7b0] sm:$0xff] }
  0x98   : > { %1092 = vmatpush.msra.mxu0 %v681_v5  ;;  %1111 = vmatpush.msra.mxu1 %v749_v6  ;;  %v694_v61 = vld [vmem:[%s2887_s5 + $0x170] sm:$0xff] }
  0x99   : > { %1132 = vmatpush.msra.mxu2 %v809_v7  ;;  %1151 = vmatpush.msra.mxu3 %v877_v8  ;;  %v762_v62 = vld [vmem:[%s2887_s5 + $0x390] sm:$0xff] }
  0x9a   : > { %1093 = vmatpush.msra.mxu0 %v677_v9  ;;  %1112 = vmatpush.msra.mxu1 %v745_v10  ;;  %v822_v63 = vld [vmem:[%s2887_s5 + $0x570] sm:$0xff] }
  0x9b   : > { %1133 = vmatpush.msra.mxu2 %v805_v11  ;;  %1152 = vmatpush.msra.mxu3 %v873_v12  ;;  %v890_v0 = vld [vmem:[%s2887_s5 + $0x790] sm:$0xff] }
  0x9c   : > { %1094 = vmatpush.msra.mxu0 %v673_v13  ;;  %1113 = vmatpush.msra.mxu1 %v741_v14  ;;  %v690_v1 = vld [vmem:[%s2887_s5 + $0x150] sm:$0xff] }
  0x9d   : > { %1134 = vmatpush.msra.mxu2 %v801_v15  ;;  %1153 = vmatpush.msra.mxu3 %v869_v16  ;;  %v758_v2 = vld [vmem:[%s2887_s5 + $0x370] sm:$0xff] }
  0x9e   : > { %1095 = vmatpush.msra.mxu0 %v669_v17  ;;  %1114 = vmatpush.msra.mxu1 %v737_v18  ;;  %v818_v3 = vld [vmem:[%s2887_s5 + $0x550] sm:$0xff] }
  0x9f   : > { %1135 = vmatpush.msra.mxu2 %v797_v19  ;;  %1154 = vmatpush.msra.mxu3 %v865_v20  ;;  %v886_v4 = vld [vmem:[%s2887_s5 + $0x770] sm:$0xff] }
  0xa0   : > { %1096 = vmatpush.msra.mxu0 %v665_v21  ;;  %1115 = vmatpush.msra.mxu1 %v733_v22  ;;  %v686_v5 = vld [vmem:[%s2887_s5 + $0x130] sm:$0xff] }
  0xa1   : > { %1136 = vmatpush.msra.mxu2 %v793_v23  ;;  %1155 = vmatpush.msra.mxu3 %v861_v24  ;;  %v754_v6 = vld [vmem:[%s2887_s5 + $0x350] sm:$0xff] }
  0xa2   : > { %1097 = vmatpush.msra.mxu0 %v661_v25  ;;  %1116 = vmatpush.msra.mxu1 %v729_v26  ;;  %v814_v7 = vld [vmem:[%s2887_s5 + $0x530] sm:$0xff] }
  0xa3   : > { %1137 = vmatpush.msra.mxu2 %v789_v27  ;;  %1156 = vmatpush.msra.mxu3 %v857_v28  ;;  %v882_v8 = vld [vmem:[%s2887_s5 + $0x750] sm:$0xff] }
  0xa4   : > { %1098 = vmatpush.msra.mxu0 %v657_v29  ;;  %1117 = vmatpush.msra.mxu1 %v725_v30  ;;  %v682_v9 = vld [vmem:[%s2887_s5 + $0x110] sm:$0xff] }
  0xa5   : > { %1138 = vmatpush.msra.mxu2 %v785_v31  ;;  %1157 = vmatpush.msra.mxu3 %v853_v32  ;;  %v750_v10 = vld [vmem:[%s2887_s5 + $0x330] sm:$0xff] }
  0xa6   : > { %1099 = vmatpush.msra.mxu0 %v653_v33  ;;  %1118 = vmatpush.msra.mxu1 %v721_v34  ;;  %v810_v11 = vld [vmem:[%s2887_s5 + $0x510] sm:$0xff] }
  0xa7   : > { %1139 = vmatpush.msra.mxu2 %v781_v35  ;;  %1158 = vmatpush.msra.mxu3 %v849_v36  ;;  %v878_v12 = vld [vmem:[%s2887_s5 + $0x730] sm:$0xff] }
  0xa8   : > { %1100 = vmatpush.msra.mxu0 %v649_v37  ;;  %1119 = vmatpush.msra.mxu1 %v717_v38  ;;  %v678_v13 = vld [vmem:[%s2887_s5 + $0xf0] sm:$0xff] }
  0xa9   : > { %1140 = vmatpush.msra.mxu2 %v777_v39  ;;  %1159 = vmatpush.msra.mxu3 %v845_v40  ;;  %v746_v14 = vld [vmem:[%s2887_s5 + $0x310] sm:$0xff] }
  0xaa   : > { %1101 = vmatmul.f32.vlgmr.msra.gmra.mxu0 %v2248_v53  ;;  %1141 = vmatmul.f32.vlgmr.msra.gmra.mxu2 %v2251_v54  ;;  %v806_v15 = vld [vmem:[%s2887_s5 + $0x4f0] sm:$0xff] }
  0xab   : > { %1165 = vmatpush.msrb.mxu0 %v710_v41  ;;  %1205 = vmatpush.msrb.mxu2 %v838_v42  ;;  %v874_v16 = vld [vmem:[%s2887_s5 + $0x710] sm:$0xff] }
  0xac   : > { %1120 = vmatpush.msra.mxu1 %v713_v43  ;;  %1160 = vmatpush.msra.mxu3 %v841_v44  ;;  %v674_v17 = vld [vmem:[%s2887_s5 + $0xd0] sm:$0xff] }
  0xad   : > { %1121 = vmatmul.f32.vlgmr.msra.gmra.mxu1 %v2268_v59  ;;  %1161 = vmatmul.f32.vlgmr.msra.gmra.mxu3 %v2271_v60  ;;  %v742_v18 = vld [vmem:[%s2887_s5 + $0x2f0] sm:$0xff] }
  0xae   : > { %1166 = vmatpush.msrb.mxu0 %v706_v45  ;;  %1185 = vmatpush.msrb.mxu1 %v774_v46  ;;  %v802_v19 = vld [vmem:[%s2887_s5 + $0x4d0] sm:$0xff]  ;;  %v711_v45 = vld [vmem:[%s2887_s5 + $0x1f8] sm:$0xff] }
  0xaf   : > { %1206 = vmatpush.msrb.mxu2 %v834_v47  ;;  %1225 = vmatpush.msrb.mxu3 %v902_v48  ;;  %v870_v20 = vld [vmem:[%s2887_s5 + $0x6f0] sm:$0xff]  ;;  %v839_v46 = vld [vmem:[%s2887_s5 + $0x5f8] sm:$0xff] }
  0xb0   : > { %1167 = vmatpush.msrb.mxu0 %v702_v49  ;;  %1186 = vmatpush.msrb.mxu1 %v770_v50  ;;  %v670_v21 = vld [vmem:[%s2887_s5 + $0xb0] sm:$0xff]  ;;  %v707_v49 = vld [vmem:[%s2887_s5 + $0x1d8] sm:$0xff] }
  0xb1   : > { %1207 = vmatpush.msrb.mxu2 %v830_v51  ;;  %1226 = vmatpush.msrb.mxu3 %v898_v52  ;;  %v738_v22 = vld [vmem:[%s2887_s5 + $0x2d0] sm:$0xff]  ;;  %v775_v50 = vld [vmem:[%s2887_s5 + $0x3f8] sm:$0xff] }
  0xb2   : > { %1168 = vmatpush.msrb.mxu0 %v698_v55  ;;  %1187 = vmatpush.msrb.mxu1 %v766_v56  ;;  %v798_v23 = vld [vmem:[%s2887_s5 + $0x4b0] sm:$0xff]  ;;  %v835_v51 = vld [vmem:[%s2887_s5 + $0x5d8] sm:$0xff] }
  0xb3   : > { %1208 = vmatpush.msrb.mxu2 %v826_v57  ;;  %1227 = vmatpush.msrb.mxu3 %v894_v58  ;;  %v866_v24 = vld [vmem:[%s2887_s5 + $0x6d0] sm:$0xff]  ;;  %v903_v52 = vld [vmem:[%s2887_s5 + $0x7f8] sm:$0xff] }
  0xb4   : > { %1169 = vmatpush.msrb.mxu0 %v694_v61  ;;  %1188 = vmatpush.msrb.mxu1 %v762_v62  ;;  %v666_v25 = vld [vmem:[%s2887_s5 + $0x90] sm:$0xff]  ;;  %v703_v55 = vld [vmem:[%s2887_s5 + $0x1b8] sm:$0xff] }
  0xb5   : > { %1209 = vmatpush.msrb.mxu2 %v822_v63  ;;  %1228 = vmatpush.msrb.mxu3 %v890_v0  ;;  %v734_v26 = vld [vmem:[%s2887_s5 + $0x2b0] sm:$0xff]  ;;  %v771_v56 = vld [vmem:[%s2887_s5 + $0x3d8] sm:$0xff] }
  0xb6   : > { %1170 = vmatpush.msrb.mxu0 %v690_v1  ;;  %1189 = vmatpush.msrb.mxu1 %v758_v2  ;;  %v794_v27 = vld [vmem:[%s2887_s5 + $0x490] sm:$0xff]  ;;  %v831_v57 = vld [vmem:[%s2887_s5 + $0x5b8] sm:$0xff] }
  0xb7   : > { %1210 = vmatpush.msrb.mxu2 %v818_v3  ;;  %1229 = vmatpush.msrb.mxu3 %v886_v4  ;;  %v862_v28 = vld [vmem:[%s2887_s5 + $0x6b0] sm:$0xff]  ;;  %v899_v58 = vld [vmem:[%s2887_s5 + $0x7d8] sm:$0xff] }
  0xb8   : > { %1171 = vmatpush.msrb.mxu0 %v686_v5  ;;  %1190 = vmatpush.msrb.mxu1 %v754_v6  ;;  %v662_v29 = vld [vmem:[%s2887_s5 + $0x70] sm:$0xff]  ;;  %v699_v61 = vld [vmem:[%s2887_s5 + $0x198] sm:$0xff] }
  0xb9   : > { %1211 = vmatpush.msrb.mxu2 %v814_v7  ;;  %1230 = vmatpush.msrb.mxu3 %v882_v8  ;;  %v730_v30 = vld [vmem:[%s2887_s5 + $0x290] sm:$0xff]  ;;  %v767_v62 = vld [vmem:[%s2887_s5 + $0x3b8] sm:$0xff] }
  0xba   : > { %1172 = vmatpush.msrb.mxu0 %v682_v9  ;;  %1191 = vmatpush.msrb.mxu1 %v750_v10  ;;  %v790_v31 = vld [vmem:[%s2887_s5 + $0x470] sm:$0xff]  ;;  %v827_v63 = vld [vmem:[%s2887_s5 + $0x598] sm:$0xff] }
  0xbb   : > { %1212 = vmatpush.msrb.mxu2 %v810_v11  ;;  %1231 = vmatpush.msrb.mxu3 %v878_v12  ;;  %v858_v32 = vld [vmem:[%s2887_s5 + $0x690] sm:$0xff]  ;;  %v895_v0 = vld [vmem:[%s2887_s5 + $0x7b8] sm:$0xff] }
  0xbc   : > { %1173 = vmatpush.msrb.mxu0 %v678_v13  ;;  %1192 = vmatpush.msrb.mxu1 %v746_v14  ;;  %v658_v33 = vld [vmem:[%s2887_s5 + $0x50] sm:$0xff]  ;;  %v695_v1 = vld [vmem:[%s2887_s5 + $0x178] sm:$0xff] }
  0xbd   : > { %1213 = vmatpush.msrb.mxu2 %v806_v15  ;;  %1232 = vmatpush.msrb.mxu3 %v874_v16  ;;  %v726_v34 = vld [vmem:[%s2887_s5 + $0x270] sm:$0xff]  ;;  %v763_v2 = vld [vmem:[%s2887_s5 + $0x398] sm:$0xff] }
  0xbe   : > { %1174 = vmatpush.msrb.mxu0 %v674_v17  ;;  %1193 = vmatpush.msrb.mxu1 %v742_v18  ;;  %v786_v35 = vld [vmem:[%s2887_s5 + $0x450] sm:$0xff]  ;;  %v823_v3 = vld [vmem:[%s2887_s5 + $0x578] sm:$0xff] }
  0xbf   : > { %1214 = vmatpush.msrb.mxu2 %v802_v19  ;;  %1233 = vmatpush.msrb.mxu3 %v870_v20  ;;  %v854_v36 = vld [vmem:[%s2887_s5 + $0x670] sm:$0xff]  ;;  %v891_v4 = vld [vmem:[%s2887_s5 + $0x798] sm:$0xff] }
  0xc0   : > { %1175 = vmatpush.msrb.mxu0 %v670_v21  ;;  %1194 = vmatpush.msrb.mxu1 %v738_v22  ;;  %v654_v37 = vld [vmem:[%s2887_s5 + $0x30] sm:$0xff]  ;;  %v691_v5 = vld [vmem:[%s2887_s5 + $0x158] sm:$0xff] }
  0xc1   : > { %1215 = vmatpush.msrb.mxu2 %v798_v23  ;;  %1234 = vmatpush.msrb.mxu3 %v866_v24  ;;  %v722_v38 = vld [vmem:[%s2887_s5 + $0x250] sm:$0xff]  ;;  %v759_v6 = vld [vmem:[%s2887_s5 + $0x378] sm:$0xff] }
  0xc2   : > { %1176 = vmatpush.msrb.mxu0 %v666_v25  ;;  %1195 = vmatpush.msrb.mxu1 %v734_v26  ;;  %v782_v39 = vld [vmem:[%s2887_s5 + $0x430] sm:$0xff]  ;;  %v819_v7 = vld [vmem:[%s2887_s5 + $0x558] sm:$0xff] }
  0xc3   : > { %1216 = vmatpush.msrb.mxu2 %v794_v27  ;;  %1235 = vmatpush.msrb.mxu3 %v862_v28  ;;  %v850_v40 = vld [vmem:[%s2887_s5 + $0x650] sm:$0xff]  ;;  %v887_v8 = vld [vmem:[%s2887_s5 + $0x778] sm:$0xff] }
  0xc4   : > { %1177 = vmatpush.msrb.mxu0 %v662_v29  ;;  %1196 = vmatpush.msrb.mxu1 %v730_v30  ;;  %v650_v41 = vld [vmem:[%s2887_s5 + $0x10] sm:$0xff]  ;;  %v687_v9 = vld [vmem:[%s2887_s5 + $0x138] sm:$0xff] }
  0xc5   : > { %1217 = vmatpush.msrb.mxu2 %v790_v31  ;;  %1236 = vmatpush.msrb.mxu3 %v858_v32  ;;  %v718_v42 = vld [vmem:[%s2887_s5 + $0x230] sm:$0xff]  ;;  %v755_v10 = vld [vmem:[%s2887_s5 + $0x358] sm:$0xff] }
  0xc6   : > { %1178 = vmatpush.msrb.mxu0 %v658_v33  ;;  %1197 = vmatpush.msrb.mxu1 %v726_v34  ;;  %v778_v43 = vld [vmem:[%s2887_s5 + $0x410] sm:$0xff]  ;;  %v815_v11 = vld [vmem:[%s2887_s5 + $0x538] sm:$0xff] }
  0xc7   : > { %1218 = vmatpush.msrb.mxu2 %v786_v35  ;;  %1237 = vmatpush.msrb.mxu3 %v854_v36  ;;  %v846_v44 = vld [vmem:[%s2887_s5 + $0x630] sm:$0xff]  ;;  %v883_v12 = vld [vmem:[%s2887_s5 + $0x758] sm:$0xff] }
  0xc8   : > { %1179 = vmatpush.msrb.mxu0 %v654_v37  ;;  %1198 = vmatpush.msrb.mxu1 %v722_v38  ;;  %v714_v47 = vld [vmem:[%s2887_s5 + $0x210] sm:$0xff]  ;;  %v683_v13 = vld [vmem:[%s2887_s5 + $0x118] sm:$0xff] }
  0xc9   : > { %1219 = vmatpush.msrb.mxu2 %v782_v39  ;;  %1238 = vmatpush.msrb.mxu3 %v850_v40  ;;  %v842_v48 = vld [vmem:[%s2887_s5 + $0x610] sm:$0xff]  ;;  %v751_v14 = vld [vmem:[%s2887_s5 + $0x338] sm:$0xff] }
  0xca   : > { %1180 = vmatpush.msrb.mxu0 %v650_v41  ;;  %1199 = vmatpush.msrb.mxu1 %v718_v42  ;;  %v811_v15 = vld [vmem:[%s2887_s5 + $0x518] sm:$0xff] }
  0xcb   : > { %1220 = vmatpush.msrb.mxu2 %v778_v43  ;;  %1239 = vmatpush.msrb.mxu3 %v846_v44  ;;  %v879_v16 = vld [vmem:[%s2887_s5 + $0x738] sm:$0xff] }
  0xcc   : > { %1181 = vmatmul.f32.vlgmr.msrb.gmra.mxu0 %v2248_v53  ;;  %1221 = vmatmul.f32.vlgmr.msrb.gmra.mxu2 %v2251_v54  ;;  %v679_v17 = vld [vmem:[%s2887_s5 + $0xf8] sm:$0xff] }
  0xcd   : > { %1245 = vmatpush.msra.mxu0 %v711_v45  ;;  %1285 = vmatpush.msra.mxu2 %v839_v46  ;;  %v747_v18 = vld [vmem:[%s2887_s5 + $0x318] sm:$0xff] }
  0xce   : > { %1200 = vmatpush.msrb.mxu1 %v714_v47  ;;  %1240 = vmatpush.msrb.mxu3 %v842_v48  ;;  %v807_v19 = vld [vmem:[%s2887_s5 + $0x4f8] sm:$0xff] }
  0xcf   : > { %1201 = vmatmul.f32.vlgmr.msrb.gmra.mxu1 %v2268_v59  ;;  %1241 = vmatmul.f32.vlgmr.msrb.gmra.mxu3 %v2271_v60  ;;  %v875_v20 = vld [vmem:[%s2887_s5 + $0x718] sm:$0xff] }
  0xd0   : > { %1246 = vmatpush.msra.mxu0 %v707_v49  ;;  %1265 = vmatpush.msra.mxu1 %v775_v50  ;;  %v675_v21 = vld [vmem:[%s2887_s5 + $0xd8] sm:$0xff] }
  0xd1   : > { %1286 = vmatpush.msra.mxu2 %v835_v51  ;;  %1305 = vmatpush.msra.mxu3 %v903_v52  ;;  %v743_v22 = vld [vmem:[%s2887_s5 + $0x2f8] sm:$0xff] }
  0xd2   : > { %1247 = vmatpush.msra.mxu0 %v703_v55  ;;  %1266 = vmatpush.msra.mxu1 %v771_v56  ;;  %v803_v23 = vld [vmem:[%s2887_s5 + $0x4d8] sm:$0xff] }
  0xd3   : > { %1287 = vmatpush.msra.mxu2 %v831_v57  ;;  %1306 = vmatpush.msra.mxu3 %v899_v58  ;;  %v871_v24 = vld [vmem:[%s2887_s5 + $0x6f8] sm:$0xff] }
  0xd4   : > { %1248 = vmatpush.msra.mxu0 %v699_v61  ;;  %1267 = vmatpush.msra.mxu1 %v767_v62  ;;  %v671_v25 = vld [vmem:[%s2887_s5 + $0xb8] sm:$0xff]  ;;  %v2817_v62 = vld [vmem:[%s582_s19] sm:$0xf] }
  0xd5   : > { %1288 = vmatpush.msra.mxu2 %v827_v63  ;;  %1307 = vmatpush.msra.mxu3 %v895_v0  ;;  %v739_v26 = vld [vmem:[%s2887_s5 + $0x2d8] sm:$0xff] }
  0xd6   : > { %1249 = vmatpush.msra.mxu0 %v695_v1  ;;  %1268 = vmatpush.msra.mxu1 %v763_v2  ;;  %v799_v27 = vld [vmem:[%s2887_s5 + $0x4b8] sm:$0xff]  ;;  %v1327_v1 = vperm.slane %v2817_v62, 0 }
  0xd7   : > { %1289 = vmatpush.msra.mxu2 %v823_v3  ;;  %1308 = vmatpush.msra.mxu3 %v891_v4  ;;  %v867_v28 = vld [vmem:[%s2887_s5 + $0x6d8] sm:$0xff]  ;;  %v2828_v3 = vld [vmem:[%s2890_s8] sm:$0xf] }
  0xd8   : > { %1250 = vmatpush.msra.mxu0 %v691_v5  ;;  %1269 = vmatpush.msra.mxu1 %v759_v6  ;;  %v667_v29 = vld [vmem:[%s2887_s5 + $0x98] sm:$0xff]  ;;  %v2834_v6 = vld [vmem:[%s2891_s9] sm:$0xf] }
  0xd9   : > { %1290 = vmatpush.msra.mxu2 %v819_v7  ;;  %1309 = vmatpush.msra.mxu3 %v887_v8  ;;  %v735_v30 = vld [vmem:[%s2887_s5 + $0x2b8] sm:$0xff]  ;;  %v1355_v8 = vperm.slane %v2828_v3, 0 }
  0xda   : > { %1251 = vmatpush.msra.mxu0 %v687_v9  ;;  %1270 = vmatpush.msra.mxu1 %v755_v10  ;;  %v795_v31 = vld [vmem:[%s2887_s5 + $0x498] sm:$0xff]  ;;  %v1369_v10 = vperm.slane %v2834_v6, 0 }
  0xdb   : > { %1291 = vmatpush.msra.mxu2 %v815_v11  ;;  %1310 = vmatpush.msra.mxu3 %v883_v12  ;;  %v863_v32 = vld [vmem:[%s2887_s5 + $0x6b8] sm:$0xff] }
  0xdc   : > { %1252 = vmatpush.msra.mxu0 %v683_v13  ;;  %1271 = vmatpush.msra.mxu1 %v751_v14  ;;  %v663_v33 = vld [vmem:[%s2887_s5 + $0x78] sm:$0xff] }
  0xdd   : > { %1292 = vmatpush.msra.mxu2 %v811_v15  ;;  %1311 = vmatpush.msra.mxu3 %v879_v16  ;;  %v731_v34 = vld [vmem:[%s2887_s5 + $0x298] sm:$0xff] }
  0xde   : > { %1253 = vmatpush.msra.mxu0 %v679_v17  ;;  %1272 = vmatpush.msra.mxu1 %v747_v18  ;;  %v791_v35 = vld [vmem:[%s2887_s5 + $0x478] sm:$0xff] }
  0xdf   : > { %1293 = vmatpush.msra.mxu2 %v807_v19  ;;  %1312 = vmatpush.msra.mxu3 %v875_v20  ;;  %v859_v36 = vld [vmem:[%s2887_s5 + $0x698] sm:$0xff] }
  0xe0   : > { %1254 = vmatpush.msra.mxu0 %v675_v21  ;;  %1273 = vmatpush.msra.mxu1 %v743_v22  ;;  %v659_v37 = vld [vmem:[%s2887_s5 + $0x58] sm:$0xff]  ;;  %v1328_v22 = vperm.slane %v2817_v62, 1 }
  0xe1   : > { %1294 = vmatpush.msra.mxu2 %v803_v23  ;;  %1313 = vmatpush.msra.mxu3 %v871_v24  ;;  %v727_v38 = vld [vmem:[%s2887_s5 + $0x278] sm:$0xff] }
  0xe2   : > { %1255 = vmatpush.msra.mxu0 %v671_v25  ;;  %1274 = vmatpush.msra.mxu1 %v739_v26  ;;  %v787_v39 = vld [vmem:[%s2887_s5 + $0x458] sm:$0xff] }
  0xe3   : > { %1295 = vmatpush.msra.mxu2 %v799_v27  ;;  %1314 = vmatpush.msra.mxu3 %v867_v28  ;;  %v855_v40 = vld [vmem:[%s2887_s5 + $0x678] sm:$0xff] }
  0xe4   : > { %1256 = vmatpush.msra.mxu0 %v667_v29  ;;  %1275 = vmatpush.msra.mxu1 %v735_v30  ;;  %v655_v41 = vld [vmem:[%s2887_s5 + $0x38] sm:$0xff]  ;;  %v1356_v29 = vperm.slane %v2828_v3, 1 }
  0xe5   : > { %1296 = vmatpush.msra.mxu2 %v795_v31  ;;  %1315 = vmatpush.msra.mxu3 %v863_v32  ;;  %v723_v42 = vld [vmem:[%s2887_s5 + $0x258] sm:$0xff]  ;;  %v1370_v32 = vperm.slane %v2834_v6, 1 }
  0xe6   : > { %1257 = vmatpush.msra.mxu0 %v663_v33  ;;  %1276 = vmatpush.msra.mxu1 %v731_v34  ;;  %v783_v43 = vld [vmem:[%s2887_s5 + $0x438] sm:$0xff] }
  0xe7   : > { %1297 = vmatpush.msra.mxu2 %v791_v35  ;;  %1316 = vmatpush.msra.mxu3 %v859_v36  ;;  %v851_v44 = vld [vmem:[%s2887_s5 + $0x658] sm:$0xff] }
  0xe8   : > { %1258 = vmatpush.msra.mxu0 %v659_v37  ;;  %1277 = vmatpush.msra.mxu1 %v727_v38  ;;  %v651_v45 = vld [vmem:[%s2887_s5 + $0x18] sm:$0xff] }
  0xe9   : > { %1298 = vmatpush.msra.mxu2 %v787_v39  ;;  %1317 = vmatpush.msra.mxu3 %v855_v40  ;;  %v719_v46 = vld [vmem:[%s2887_s5 + $0x238] sm:$0xff] }
  0xea   : > { %1259 = vmatpush.msra.mxu0 %v655_v41  ;;  %1278 = vmatpush.msra.mxu1 %v723_v42  ;;  %v779_v47 = vld [vmem:[%s2887_s5 + $0x418] sm:$0xff] }
  0xeb   : > { %v847_v48 = vld [vmem:[%s2887_s5 + $0x638] sm:$0xff]  ;;  %1299 = vmatpush.msra.mxu2 %v783_v43  ;;  %1318 = vmatpush.msra.mxu3 %v851_v44 }
  0xec   : > { %1260 = vmatpush.msra.mxu0 %v651_v45  ;;  %1279 = vmatpush.msra.mxu1 %v719_v46  ;;  %v715_v49 = vld [vmem:[%s2887_s5 + $0x218] sm:$0xff] }
  0xed   : > { %v843_v50 = vld [vmem:[%s2887_s5 + $0x618] sm:$0xff]  ;;  %1300 = vmatpush.msra.mxu2 %v779_v47  ;;  %1319 = vmatpush.msra.mxu3 %v847_v48 }
  0xee   : > { %1261 = vmatmul.f32.vlgmr.msra.gmra.mxu0 %v2248_v53  ;;  %1301 = vmatmul.f32.vlgmr.msra.gmra.mxu2 %v2251_v54 }
  0xef   : > { %1280 = vmatpush.msra.mxu1 %v715_v49  ;;  %1320 = vmatpush.msra.mxu3 %v843_v50 }
  0xf0   : > { %1281 = vmatmul.f32.vlgmr.msra.gmra.mxu1 %v2268_v59  ;;  %1321 = vmatmul.f32.vlgmr.msra.gmra.mxu3 %v2271_v60  ;;  %v2822_v60 = vld [vmem:[%s2889_s7] sm:$0xf] }
  0xf1   : > { %v1341_v5 = vperm.slane %v2822_v60, 0  ;;  %v1342_v25 = vperm.slane %v2822_v60, 1 }
 0x104   : > { %v942_v51 = vpop.f32.mrf.mxu0  ;;  %v962_v52 = vpop.f32.mrf.mxu1 }
 0x10b   : > { %v2809_v55 = vpop.f32.mrf.mxu2  ;;  %v2812_v57 = vpop.f32.mrf.mxu3 }
 0x10d   : > { %v1022_v56 = vpop.f32.mrf.mxu0 }
 0x10e   : > { %v1023_v58 = vadd.f32 %v1022_v56, %v942_v51 }
 0x110   : > { %v1042_v54 = vpop.f32.mrf.mxu1 }
 0x111   : > { %v1043_v61 = vadd.f32 %v1042_v54, %v1023_v58 }
 0x113   : > { %v1062_v63 = vpop.f32.mrf.mxu2 }
 0x114   : > { %v1063_v0 = vadd.f32 %v1062_v63, %v1043_v61 }
 0x116   : > { %v1082_v2 = vpop.f32.mrf.mxu3 }
 0x117   : > { %v1083_v4 = vadd.f32 %v1082_v2, %v1063_v0 }
 0x119   : > { %v1335_v7 = vadd.f32 %v1327_v1, %v1083_v4 }
 0x11b   : > { %v1349_v9 = vadd.f32 %v1341_v5, %v1335_v7 }
 0x11d   : > { %v1363_v11 = vmul.f32 %v1355_v8, %v1349_v9  ;;  %v1357_v9 = vperm.slane %v2828_v3, 2 }
 0x11f   : > { %v1377_v12 = vadd.f32 %v1369_v10, %v1363_v11 }
 0x121   : > { %v1702_v13 = vmul.f32 -1.442695, %v1377_v12 }
 0x123   : > { %1755 = vpow2.f32 %v1702_v13  ;;  %v1371_v13 = vperm.slane %v2834_v6, 2 }
 0x127   : > { %v1102_v14 = vpop.f32.mrf.mxu0 }
 0x128   : > { %v1103_v15 = vadd.f32 %v1102_v14, %v962_v52 }
 0x129   : > { %v1756_v16 = vpop.eup %1755 }
 0x12a   : > { %v1393_v17 = vadd.f32 1.0, %v1756_v16  ;;  %v1122_v18 = vpop.f32.mrf.mxu1 }
 0x12b   : > { %v1123_v19 = vadd.f32 %v1122_v18, %v1103_v15 }
 0x12c   : > { %1757 = vrcp.f32 %v1393_v17  ;;  %v1408_v33 = vand.u32 2147483648, %v1393_v17  ;;  %v1406_v35 = vand.u32 2147483647, %v1393_v17  ;;  %vm1402_vm6 = vweird.f32 %v1393_v17 }
 0x12d   : > { %v1142_v20 = vpop.f32.mrf.mxu2 }
 0x12e   : > { %v1143_v21 = vadd.f32 %v1142_v20, %v1123_v19  ;;  %v1409_v39 = vor.u32 1.1754944e-38, %v1408_v33  ;;  %vm1407_vm8 = vcmp.eq.f32.partialorder %v1406_v35, 8.507059e+37 }
 0x130   : > { %v1162_v23 = vpop.f32.mrf.mxu3 }
 0x131   : > { %v1163_v24 = vadd.f32 %v1162_v23, %v1143_v21 }
 0x132   : > { %v1758_v26 = vpop.eup %1757 }
 0x133   : > { %v1398_v27 = vmul.f32 %v1758_v26, %v1393_v17  ;;  %v1336_v28 = vadd.f32 %v1328_v22, %v1163_v24  ;;  %vm1403_vm5 = vweird.f32 %v1758_v26 }
 0x134   : > { %vm1404_vm7 = vmor %vm1402_vm6, %vm1403_vm5 }
 0x135   : > { %v1399_v30 = vsub.f32 1.0, %v1398_v27  ;;  %v1350_v31 = vadd.f32 %v1342_v25, %v1336_v28 }
 0x137   : > { %v1400_v34 = vmul.f32 %v1758_v26, %v1399_v30  ;;  %v1364_v36 = vmul.f32 %v1356_v29, %v1350_v31 }
 0x139   : > { %v1401_v37 = vadd.f32 %v1758_v26, %v1400_v34  ;;  %v1378_v38 = vadd.f32 %v1370_v32, %v1364_v36  ;;  %v1344_v34 = vperm.slane %v2822_v60, 3 }
 0x13b   : > { %v1405_v40 = vsel %vm1404_vm7, %v1758_v26, %v1401_v37  ;;  %v1703_v41 = vmul.f32 -1.442695, %v1378_v38  ;;  %v1358_v37 = vperm.slane %v2828_v3, 3 }
 0x13c   : > { %v1410_v42 = vsel %vm1407_vm8, %v1409_v39, %v1405_v40  ;;  %v1372_v40 = vperm.slane %v2834_v6, 3 }
 0x13d   : > { %v1457_v43 = vmul.f32 %v1410_v42, %v1377_v12  ;;  %1759 = vpow2.f32 %v1703_v41 }
 0x13f   : > { %v1461_v44 = vadd.f32 %v1457_v43, %v2248_v53  ;;  %v1329_v53 = vperm.slane %v2817_v62, 2  ;;  %v1771_v43 = vld [vmem:[%s2233_s21 + $0x10] sm:$0xff] }
 0x141   : > { %1465 = vst [vmem:[%s2847_s15] sm:$0xff] %v1461_v44 }
 0x143   : > { %v1760_v45 = vpop.eup %1759 }
 0x144   : > { %v1394_v46 = vadd.f32 1.0, %v1760_v45 }
 0x146   : > { %1761 = vrcp.f32 %v1394_v46  ;;  %v1423_v54 = vand.u32 2147483648, %v1394_v46  ;;  %v1421_v0 = vand.u32 2147483647, %v1394_v46  ;;  %vm1417_vm10 = vweird.f32 %v1394_v46 }
 0x148   : > { %v1424_v5 = vor.u32 1.1754944e-38, %v1423_v54  ;;  %vm1422_vm12 = vcmp.eq.f32.partialorder %v1421_v0, 8.507059e+37 }
 0x149   : > { %v1182_v47 = vpop.f32.mrf.mxu0 }
 0x14a   : > { %v1183_v48 = vadd.f32 %v1182_v47, %v2809_v55  ;;  %v1343_v55 = vperm.slane %v2822_v60, 2 }
 0x14c   : > { %v1762_v49 = vpop.eup %1761  ;;  %v1202_v50 = vpop.f32.mrf.mxu1 }
 0x14d   : > { %v1413_v51 = vmul.f32 %v1762_v49, %v1394_v46  ;;  %v1203_v52 = vadd.f32 %v1202_v50, %v1183_v48  ;;  %vm1418_vm9 = vweird.f32 %v1762_v49 }
 0x14e   : > { %vm1419_vm11 = vmor %vm1417_vm10, %vm1418_vm9 }
 0x14f   : > { %v1414_v56 = vsub.f32 1.0, %v1413_v51  ;;  %v1222_v58 = vpop.f32.mrf.mxu2 }
 0x150   : > { %v1223_v61 = vadd.f32 %v1222_v58, %v1203_v52 }
 0x151   : > { %v1415_v63 = vmul.f32 %v1762_v49, %v1414_v56 }
 0x152   : > { %v1242_v1 = vpop.f32.mrf.mxu3 }
 0x153   : > { %v1416_v2 = vadd.f32 %v1762_v49, %v1415_v63  ;;  %v1243_v4 = vadd.f32 %v1242_v1, %v1223_v61  ;;  %v1772_v63 = vld [vmem:[%s2233_s21 + $0x18] sm:$0xff] }
 0x155   : > { %v1420_v7 = vsel %vm1419_vm11, %v1762_v49, %v1416_v2  ;;  %v1337_v8 = vadd.f32 %v1329_v53, %v1243_v4 }
 0x156   : > { %v1425_v10 = vsel %vm1422_vm12, %v1424_v5, %v1420_v7 }
 0x157   : > { %v1458_v11 = vmul.f32 %v1425_v10, %v1378_v38  ;;  %v1351_v12 = vadd.f32 %v1343_v55, %v1337_v8 }
 0x159   : > { %v1462_v14 = vadd.f32 %v1458_v11, %v2268_v59  ;;  %v1365_v15 = vmul.f32 %v1357_v9, %v1351_v12  ;;  %v1330_v59 = vperm.slane %v2817_v62, 3 }
 0x15b   : > { %1466 = vst [vmem:[%s2847_s15 + $0x8] sm:$0xff] %v1462_v14  ;;  %v1379_v16 = vadd.f32 %v1371_v13, %v1365_v15 }
 0x15d   : > { %v1704_v17 = vmul.f32 -1.442695, %v1379_v16 }
 0x15f   : > { %1763 = vpow2.f32 %v1704_v17 }
 0x165   : > { %v1764_v18 = vpop.eup %1763 }
 0x166   : > { %v1395_v19 = vadd.f32 1.0, %v1764_v18 }
 0x168   : > { %1765 = vrcp.f32 %v1395_v19  ;;  %v1438_v28 = vand.u32 2147483648, %v1395_v19  ;;  %v1436_v31 = vand.u32 2147483647, %v1395_v19  ;;  %vm1432_vm14 = vweird.f32 %v1395_v19 }
 0x16a   : > { %vm1437_vm0 = vcmp.eq.f32.partialorder %v1436_v31, 8.507059e+37 }
 0x16b   : > { %v1262_v20 = vpop.f32.mrf.mxu0 }
 0x16c   : > { %v1263_v21 = vadd.f32 %v1262_v20, %v2812_v57  ;;  %v1439_v57 = vor.u32 1.1754944e-38, %v1438_v28 }
 0x16d   : > { %v1282_v22 = vpop.f32.mrf.mxu1 }
 0x16e   : > { %v1766_v23 = vpop.eup %1765  ;;  %v1283_v25 = vadd.f32 %v1282_v22, %v1263_v21 }
 0x16f   : > { %v1428_v24 = vmul.f32 %v1766_v23, %v1395_v19  ;;  %vm1433_vm13 = vweird.f32 %v1766_v23 }
 0x170   : > { %vm1434_vm15 = vmor %vm1432_vm14, %vm1433_vm13 }
 0x171   : > { %v1429_v26 = vsub.f32 1.0, %v1428_v24  ;;  %v1302_v27 = vpop.f32.mrf.mxu2 }
 0x172   : > { %v1303_v29 = vadd.f32 %v1302_v27, %v1283_v25 }
 0x173   : > { %v1430_v30 = vmul.f32 %v1766_v23, %v1429_v26  ;;  %v1322_v32 = vpop.f32.mrf.mxu3 }
 0x174   : > { %v1323_v33 = vadd.f32 %v1322_v32, %v1303_v29 }
 0x175   : > { %v1431_v35 = vadd.f32 %v1766_v23, %v1430_v30 }
 0x176   : > { %v1338_v36 = vadd.f32 %v1330_v59, %v1323_v33 }
 0x177   : > { %v1435_v38 = vsel %vm1434_vm15, %v1766_v23, %v1431_v35 }
 0x178   : > { %v1440_v39 = vsel %vm1437_vm0, %v1439_v57, %v1435_v38  ;;  %v1352_v62 = vadd.f32 %v1344_v34, %v1338_v36 }
 0x179   : > { %v1459_v41 = vmul.f32 %v1440_v39, %v1379_v16 }
 0x17a   : > { %v1366_v42 = vmul.f32 %v1358_v37, %v1352_v62 }
 0x17b   : > { %v1463_v44 = vadd.f32 %v1771_v43, %v1459_v41 }
 0x17c   : > { %v1380_v45 = vadd.f32 %v1372_v40, %v1366_v42 }
 0x17d   : > { %1467 = vst [vmem:[%s2847_s15 + $0x10] sm:$0xff] %v1463_v44 }
 0x17e   : > { %v1705_v60 = vmul.f32 -1.442695, %v1380_v45 }
 0x180   : > { %1767 = vpow2.f32 %v1705_v60 }
 0x186   : > { %v1768_v46 = vpop.eup %1767 }
 0x187   : > { %v1396_v47 = vadd.f32 1.0, %v1768_v46 }
 0x189   : > { %1769 = vrcp.f32 %v1396_v47  ;;  %v1453_v50 = vand.u32 2147483648, %v1396_v47  ;;  %v1451_v6 = vand.u32 2147483647, %v1396_v47  ;;  %vm1447_vm2 = vweird.f32 %v1396_v47 }
 0x18b   : > { %v1454_v56 = vor.u32 1.1754944e-38, %v1453_v50  ;;  %vm1452_vm4 = vcmp.eq.f32.partialorder %v1451_v6, 8.507059e+37 }
 0x18f   : > { %v1770_v48 = vpop.eup %1769 }
 0x190   : > { %v1443_v3 = vmul.f32 %v1770_v48, %v1396_v47  ;;  %vm1448_vm1 = vweird.f32 %v1770_v48 }
 0x191   : > { %vm1449_vm3 = vmor %vm1447_vm2, %vm1448_vm1 }
 0x192   : > { %v1444_v49 = vsub.f32 1.0, %v1443_v3 }
 0x194   : > { %v1445_v51 = vmul.f32 %v1770_v48, %v1444_v49 }
 0x196   : > { %v1446_v52 = vadd.f32 %v1770_v48, %v1445_v51 }
 0x198   : > { %v1450_v58 = vsel %vm1449_vm3, %v1770_v48, %v1446_v52 }
 0x199   : > { %v1455_v54 = vsel %vm1452_vm4, %v1454_v56, %v1450_v58 }
 0x19a   : > { %v1460_v61 = vmul.f32 %v1455_v54, %v1380_v45 }
 0x19c   : > { %v1464_v0 = vadd.f32 %v1772_v63, %v1460_v61 }
 0x19e   : > { %1468 = vst [vmem:[%s2847_s15 + $0x18] sm:$0xff] %v1464_v0 }
 0x19f PF: > { %s24_s29 = sadd.s32 1, %s1811_s29   ;;  %s2898_s14 = sld [smem:[#allocation2_spill]] }
 0x1a0   : > { %p21_p7 = scmp.ge.s32.totalorder %s24_s29, 6   ;;  %s2899_s24 = sld [smem:[#allocation3_spill]] }
 0x1a1   : > { %s2900_s25 = smov %s1803_s27  ;;  %s2901_s26 = smov %s1807_s28 }
 0x1a2   :  { %23 = sbr.rel (!%p21_p7) target bundleno = 3 (0x3), region = 122 }
 0x1a5   : > { %s2902_s27 = smov %s2898_s14 }
 0x1a6   : > { %s2903_s28 = smov %s2899_s24 }

// kernel: nonautoregressive_encoder.19
= control target key start
LH: loop header
LB: loop body
LE: loop exit
PB: predicated region body
PF: predicated region fallthrough
CT: control target
= control target key end

     0   :  { %s3046_s0 = inlined_call_operand.vmem [shape: f32[2,16,512], index: 0, kind: input, shape index: {}]   ;;  %s3047_s1 = inlined_call_operand.vmem [shape: f32[2,16,32], index: 1, kind: input, shape index: {}]   ;;  %s3048_s2 = inlined_call_operand.vmem [shape: f32[2,16,128], index: 2, kind: input, shape index: {}]   ;;  %s3049_s3 = inlined_call_operand.vmem [shape: f32[2,1,512], index: 3, kind: input, shape index: {}]   ;;  %s3050_s4 = inlined_call_operand.vmem [shape: f32[2,16,32], index: 4, kind: input, shape index: {}]   ;;  %s3051_s5 = inlined_call_operand.vmem [shape: f32[512,512], index: 5, kind: input, shape index: {}]   ;;  %s3052_s6 = inlined_call_operand.vmem [shape: f32[32,512], index: 6, kind: input, shape index: {}]   ;;  %s3053_s7 = inlined_call_operand.vmem [shape: f32[1,512], index: 7, kind: input, shape index: {}]   ;;  %s3054_s8 = inlined_call_operand.vmem [shape: f32[1,512], index: 8, kind: input, shape index: {}]   ;;  %s3055_s9 = inlined_call_operand.vmem [shape: f32[1,512], index: 9, kind: input, shape index: {}]   ;;  %s3056_s10 = inlined_call_operand.vmem [shape: f32[1,32], index: 10, kind: input, shape index: {}]   ;;  %s3057_s11 = inlined_call_operand.vmem [shape: f32[1,32], index: 11, kind: input, shape index: {}]   ;;  %s3058_s12 = inlined_call_operand.hbm [shape: f32[2,16,32], index: 12, kind: output, shape index: {0}]   ;;  %s3059_s13 = inlined_call_operand.vmem [shape: f32[2,16,512], index: 13, kind: output, shape index: {1}]  }
   0x1   :  { %3070 = sst [smem:[#allocation14_spill]] %s3046_s0 }
   0x2   :  { %3071 = sst [smem:[#allocation15_spill]] %s3059_s13 }
   0x3   :  { %19 = vsyncpa [#allocation3], 0 }
   0x4   :  { %21 = vsyncpa [#allocation3 + $0x1], 0  ;;  %s1975_s25 = smov 0   ;;  %s1977_s26 = smov 0  }
   0x5   :  { %s1979_s27 = smov 0   ;;  %s1981_s28 = smov 0  }
   0x6   :  { %s1983_s29 = smov 0   ;;  %s1985_s30 = smov 0  }
   0x7   :  { %s1987_s14 = smov 0   ;;  %s1989_s15 = smov 0  }
   0x8 LB: > { %3072 = sst [smem:[#allocation5_spill]] %s1874_s25  ;;  %s1679_s16 = sadd.s32 4294967295, %s1902_s15   ;;  %s1902_s15 = sphi %s1989_s15, %s27_s15   ;;  %s1898_s14 = sphi %s1987_s14, %s3094_s14   ;;  %s1894_s30 = sphi %s1985_s30, %s3093_s30   ;;  %s1890_s29 = sphi %s1983_s29, %s3092_s29   ;;  %s1886_s28 = sphi %s1981_s28, %s3091_s28   ;;  %s1882_s27 = sphi %s1979_s27, %s3090_s27   ;;  %s1878_s26 = sphi %s1977_s26, %s3096_s26   ;;  %s1874_s25 = sphi %s1975_s25, %s3095_s25  }
   0x9   : > { %3073 = sst [smem:[#allocation6_spill]] %s1882_s27  ;;  %s1680_s17 = sadd.s32 4294967294, %s1902_s15  }
   0xa   : > { %3074 = sst [smem:[#allocation7_spill]] %s1894_s30  ;;  %s36_s18 = sadd.s32 1, %s1894_s30 }
   0xb   : > { %3075 = sst [smem:[#allocation8_spill]] %s1898_s14  ;;  %p37_p0 = scmp.ge.s32.totalorder %s36_s18, 2 }
   0xc   : > { %3076 = sst [smem:[#allocation9_spill]] %s1902_s15  ;;  %s39_s19 = sadd.s32 1, %s1898_s14 }
   0xd   : > { %p343_p1 = scmp.ne.s32.totalorder %s1882_s27, %s1878_s26  ;;  %p344_p2 = scmp.eq.s32.totalorder %s1679_s16, 3 }
   0xe   : > { %s3098_s18 = smov (%p37_p0, %s36_s18), 0  ;;  %s3100_s19 = smov (!%p37_p0, %s39_s19), %s1898_s14 }
   0xf   : > { %3077 = sst [smem:[#allocation10_spill]] %s3098_s18  ;;  %s329_s20 = ssub.s32 %s1894_s30, %s3098_s18 }
  0x10   : > { %p2026_p3 = por %p344_p2, %p343_p1  ;;  %p41_p4 = scmp.ge.s32.totalorder %s3100_s19, 2 }
  0x11   : > { %p349_p5 = scmp.ne.s32.totalorder %s1878_s26, %s1874_s25  ;;  %p350_p6 = scmp.eq.s32.totalorder %s1680_s17, 3 }
  0x12   : > { %p1683_p7 = scmp.ge.s32.totalorder %s1902_s15, 1  ;;  %s3102_s19 = smov (%p41_p4, %s3100_s19), 0 }
  0x13   : > { %3079 = sst [smem:[#allocation11_spill]] %s3102_s19  ;;  %p2035_p8 = por %p350_p6, %p349_p5 }
  0x14   : > { %p469_p9 = scmp.lt.s32.totalorder %s1902_s15, 5  ;;  %s328_s23 = ssub.s32 %s1898_s14, %s3102_s19 }
  0x15   : > { %s3080_s22 = scalar_select %p2035_p8, 1, 0 }
  0x16   : > { %s333_s24 = sadd.s32 1, %s1882_s27  ;;  %s330_s16 = sor.u32 %s329_s20, %s328_s23 }
  0x17   : > { %3081 = sst [smem:[#allocation12_spill]] %s3080_s22  ;;  %p470_p10 = pnand %p1683_p7, %p469_p9 }
  0x18   : > { %p331_p11 = scmp.eq.s32.totalorder %s330_s16, 0  ;;  %p554_p12 = scmp.lt.s32.totalorder (!%p470_p10), %s1890_s29, 1 }
  0x19   : > { %473 = sbr.rel (%p470_p10) target bundleno = 432 (0x1b0), region = 68  ;;  %p556_p13 = scmp.lt.s32.totalorder (!%p470_p10), %s1886_s28, 1 }
  0x1a   : > { %s2044_s18 = scalar_select %p331_p11, %s1882_s27, %s333_s24  }
  0x1b   : > { %s3083_s0 = sld [smem:[#allocation14_spill]] (!%p470_p10) }
  0x1c   : > { %3082 = sst [smem:[#allocation13_spill]] %s2044_s18  ;;  %s1904_s18 = smov (!%p470_p10), 64  }
  0x1e   : > { %s2049_s17 = scalar_select %p554_p12, %s1890_s29, 1  ;;  %v908_v1 = vld [vmem:[%s3052_s6 + $0x60] sm:$0xff]  ;;  %v910_v2 = vld [vmem:[%s3052_s6 + $0x70] sm:$0xff]  ;;  %v909_v4 = vld [vmem:[%s3052_s6 + $0x68] sm:$0xff]  ;;  %vm638_vm0 = vcmask 261120  }
  0x1f   : > { %s2052_s30 = scalar_select %p556_p13, %s1886_s28, 1  ;;  %v904_v3 = vld [vmem:[%s3052_s6 + $0x40] sm:$0xff]  ;;  %929 = vmatpush.msra.mxu0 %v908_v1  ;;  %969 = vmatpush.msra.mxu2 %v910_v2  ;;  %v906_v5 = vld [vmem:[%s3052_s6 + $0x50] sm:$0xff]  ;;  %v911_v6 = vld [vmem:[%s3052_s6 + $0x78] sm:$0xff] }
  0x20   : > { %s1688_s19 = sshll.u32 %s2049_s17, 1  ;;  %949 = vmatpush.msra.mxu1 %v909_v4  ;;  %989 = vmatpush.msra.mxu3 %v911_v6  ;;  %v900_v7 = vld [vmem:[%s3052_s6 + $0x20] sm:$0xff]  ;;  %v905_v8 = vld [vmem:[%s3052_s6 + $0x48] sm:$0xff]  ;;  %v902_v9 = vld [vmem:[%s3052_s6 + $0x30] sm:$0xff]  ;;  %s1686_s23 = sshll.u32 %s2049_s17, 3 }
  0x21   : > { %s568_s14 = sadd.s32 %s1688_s19, %s2052_s30  ;;  %930 = vmatpush.msra.mxu0 %v904_v3  ;;  %970 = vmatpush.msra.mxu2 %v906_v5  ;;  %v907_v10 = vld [vmem:[%s3052_s6 + $0x58] sm:$0xff]  ;;  %v901_v11 = vld [vmem:[%s3052_s6 + $0x28] sm:$0xff]  ;;  %v896_v12 = vld [vmem:[%s3052_s6] sm:$0xff]  ;;  %s1692_s13 = sshll.u32 %s2049_s17, 2 }
  0x22   : > { %s2056_s20 = sshll.u32 %s568_s14, 3  ;;  %950 = vmatpush.msra.mxu1 %v905_v8  ;;  %990 = vmatpush.msra.mxu3 %v907_v10  ;;  %v898_v13 = vld [vmem:[%s3052_s6 + $0x10] sm:$0xff]  ;;  %v903_v14 = vld [vmem:[%s3052_s6 + $0x38] sm:$0xff]  ;;  %v700_v15 = vld [vmem:[%s3051_s5 + $0x1e0] sm:$0xff]  ;;  %s1685_s14 = sshll.u32 %s2052_s30, 2 }
  0x23   : > { %s578_s16 = scalar_lea.vmem %s3048_s2, %s2056_s20  ;;  %931 = vmatpush.msra.mxu0 %v900_v7  ;;  %971 = vmatpush.msra.mxu2 %v902_v9  ;;  %v828_v16 = vld [vmem:[%s3051_s5 + $0x5e0] sm:$0xff]  ;;  %v897_v17 = vld [vmem:[%s3052_s6 + $0x8] sm:$0xff]  ;;  %v899_v18 = vld [vmem:[%s3052_s6 + $0x18] sm:$0xff]  ;;  %s2304_s24 = sadd.s32 %s1686_s23, %s1685_s14 }
  0x24   : > { %v604_v0 = vld [vmem:[%s578_s16] sm:$0xff]  ;;  %951 = vmatpush.msra.mxu1 %v901_v11  ;;  %991 = vmatpush.msra.mxu3 %v903_v14  ;;  %s3069_s15 = sshll.u32 %s2304_s24, 3  ;;  %s582_s23 = scalar_lea.vmem %s3049_s3, %s1692_s13 }
  0x25   : > { %913 = vrot.lane.b32.xlu0 %v604_v0, %s1904_s18  ;;  %932 = vmatpush.msra.mxu0 %v896_v12  ;;  %v696_v19 = vld [vmem:[%s3051_s5 + $0x1c0] sm:$0xff]  ;;  %s2340_s14 = scalar_lea.vmem %s3083_s0, %s3069_s15  ;;  %s590_s0 = scalar_lea.vmem %s3050_s4, %s2056_s20 }
  0x26   : > { %972 = vmatpush.msra.mxu2 %v898_v13  ;;  %v764_v20 = vld [vmem:[%s3051_s5 + $0x3e0] sm:$0xff]  ;;  %952 = vmatpush.msra.mxu1 %v897_v17  ;;  %s570_s22 = scalar_lea.vmem %s3047_s1, %s2056_s20  ;;  %s1708_s13 = sshll.u32 %s1890_s29, 1 }
  0x27   : > { %997 = vmatpush.msrb.mxu0 %v700_v15  ;;  %v824_v21 = vld [vmem:[%s3051_s5 + $0x5c0] sm:$0xff]  ;;  %992 = vmatpush.msra.mxu3 %v899_v18  ;;  %v701_v18 = vld [vmem:[%s3051_s5 + $0x1e8] sm:$0xff]  ;;  %s540_s16 = sand.u32 1, %s1878_s26   ;;  %s1481_s19 = sadd.s32 %s1886_s28, %s1708_s13 }
  0x28   : > { %1037 = vmatpush.msrb.mxu2 %v828_v16  ;;  %v892_v22 = vld [vmem:[%s3051_s5 + $0x7e0] sm:$0xff]  ;;  %1017 = vmatpush.msrb.mxu1 %v764_v20  ;;  %v765_v20 = vld [vmem:[%s3051_s5 + $0x3e8] sm:$0xff]  ;;  %s1709_s18 = sshll.u32 %s1481_s19, 3  ;;  %s1462_s28 = scalar_lea.sflag [#allocation3], %s540_s16 }
  0x29   : > { %v692_v23 = vld [vmem:[%s3051_s5 + $0x1a0] sm:$0xff]  ;;  %998 = vmatpush.msrb.mxu0 %v696_v19  ;;  %1057 = vmatpush.msrb.mxu3 %v892_v22  ;;  %v829_v19 = vld [vmem:[%s3051_s5 + $0x5e8] sm:$0xff]  ;;  %s1483_s17 = scalar_lea.hbm %s3058_s12, %s1709_s18  ;;  %s1828_s19 = scalar_lea.hbm %s3058_s12, 32 }
  0x2a   : > { %v760_v24 = vld [vmem:[%s3051_s5 + $0x3c0] sm:$0xff]  ;;  %1038 = vmatpush.msrb.mxu2 %v824_v21  ;;  %v893_v21 = vld [vmem:[%s3051_s5 + $0x7e8] sm:$0xff]  ;;  %s1487_s29 = sshll.u32 %s1483_s17, 4  ;;  %s1488_s29 = int_to_ptr.hbm [resolvable:$true] %s1487_s29 }
  0x2b   : > { %v820_v25 = vld [vmem:[%s3051_s5 + $0x5a0] sm:$0xff]  ;;  %999 = vmatpush.msrb.mxu0 %v692_v23  ;;  %1018 = vmatpush.msrb.mxu1 %v760_v24  ;;  %v697_v22 = vld [vmem:[%s3051_s5 + $0x1c8] sm:$0xff]  ;;  %s1822_s20 = sshra.s32 %s1488_s29, 4  ;;  %s1823_s20 = int_to_ptr.hbm [resolvable:$true] %s1822_s20 }
  0x2c   : > { %v888_v26 = vld [vmem:[%s3051_s5 + $0x7c0] sm:$0xff]  ;;  %1039 = vmatpush.msrb.mxu2 %v820_v25  ;;  %v825_v23 = vld [vmem:[%s3051_s5 + $0x5c8] sm:$0xff]  ;;  %s1824_s25 = scalar_lea.hbm %s1823_s20, 8  ;;  %p1829_p4 = scmp.lt.s32.totalorder %s1823_s20, %s3058_s12 }
  0x2d   : > { %v688_v27 = vld [vmem:[%s3051_s5 + $0x180] sm:$0xff]  ;;  %1058 = vmatpush.msrb.mxu3 %v888_v26  ;;  %v761_v24 = vld [vmem:[%s3051_s5 + $0x3c8] sm:$0xff]  ;;  %p1825_p0 = scmp.ne.s32.totalorder %s1823_s20, %s1824_s25  ;;  %p1830_p5 = scmp.lt.s32.totalorder %s1828_s19, %s1824_s25 }
  0x2e   : > { %v756_v28 = vld [vmem:[%s3051_s5 + $0x3a0] sm:$0xff]  ;;  %1000 = vmatpush.msrb.mxu0 %v688_v27  ;;  %v889_v25 = vld [vmem:[%s3051_s5 + $0x7c8] sm:$0xff] }
  0x2f   : > { %v816_v29 = vld [vmem:[%s3051_s5 + $0x580] sm:$0xff]  ;;  %1019 = vmatpush.msrb.mxu1 %v756_v28  ;;  %v693_v26 = vld [vmem:[%s3051_s5 + $0x1a8] sm:$0xff]  ;;  %p1826_p1 = pnand %p1825_p0, %p2026_p3  ;;  %p1831_p6 = por %p1830_p5, %p1829_p4 }
  0x30   : > { %v884_v30 = vld [vmem:[%s3051_s5 + $0x7a0] sm:$0xff]  ;;  %1040 = vmatpush.msrb.mxu2 %v816_v29  ;;  %v821_v27 = vld [vmem:[%s3051_s5 + $0x5a8] sm:$0xff] }
  0x31   : > { %v684_v31 = vld [vmem:[%s3051_s5 + $0x160] sm:$0xff]  ;;  %1059 = vmatpush.msrb.mxu3 %v884_v30  ;;  %v757_v28 = vld [vmem:[%s3051_s5 + $0x3a8] sm:$0xff]  ;;  %p1827_p2 = pneg %p1826_p1 }
  0x32   : > { %v752_v32 = vld [vmem:[%s3051_s5 + $0x380] sm:$0xff]  ;;  %1001 = vmatpush.msrb.mxu0 %v684_v31  ;;  %v885_v29 = vld [vmem:[%s3051_s5 + $0x7a8] sm:$0xff] }
  0x33   : > { %v812_v33 = vld [vmem:[%s3051_s5 + $0x560] sm:$0xff]  ;;  %1020 = vmatpush.msrb.mxu1 %v752_v32  ;;  %v689_v30 = vld [vmem:[%s3051_s5 + $0x188] sm:$0xff]  ;;  %p1832_p7 = pnand %p1831_p6, %p1827_p2 }
  0x34   : > { %v880_v34 = vld [vmem:[%s3051_s5 + $0x780] sm:$0xff]  ;;  %1041 = vmatpush.msrb.mxu2 %v812_v33  ;;  %v817_v31 = vld [vmem:[%s3051_s5 + $0x588] sm:$0xff]  ;;  %v2364_v33 = vld [vmem:[%s2340_s14 + $0x10] sm:$0xff] }
  0x35   : > { %v680_v35 = vld [vmem:[%s3051_s5 + $0x140] sm:$0xff]  ;;  %1060 = vmatpush.msrb.mxu3 %v880_v34  ;;  %v685_v34 = vld [vmem:[%s3051_s5 + $0x168] sm:$0xff] }
  0x36   : > { %v748_v36 = vld [vmem:[%s3051_s5 + $0x360] sm:$0xff]  ;;  %1002 = vmatpush.msrb.mxu0 %v680_v35  ;;  %v753_v35 = vld [vmem:[%s3051_s5 + $0x388] sm:$0xff] }
  0x37   : > { %v808_v37 = vld [vmem:[%s3051_s5 + $0x540] sm:$0xff]  ;;  %1021 = vmatpush.msrb.mxu1 %v748_v36  ;;  %v813_v36 = vld [vmem:[%s3051_s5 + $0x568] sm:$0xff] }
  0x38   : > { %v876_v38 = vld [vmem:[%s3051_s5 + $0x760] sm:$0xff]  ;;  %1042 = vmatpush.msrb.mxu2 %v808_v37  ;;  %v881_v37 = vld [vmem:[%s3051_s5 + $0x788] sm:$0xff] }
  0x39   : > { %v676_v39 = vld [vmem:[%s3051_s5 + $0x120] sm:$0xff]  ;;  %1061 = vmatpush.msrb.mxu3 %v876_v38  ;;  %v2381_v38 = vld [vmem:[%s2340_s14 + $0x8] sm:$0xff] }
  0x3a   : > { %v744_v40 = vld [vmem:[%s3051_s5 + $0x340] sm:$0xff]  ;;  %1003 = vmatpush.msrb.mxu0 %v676_v39  ;;  %v2384_v39 = vld [vmem:[%s2340_s14 + $0x18] sm:$0xff] }
  0x3b   : > { %v804_v41 = vld [vmem:[%s3051_s5 + $0x520] sm:$0xff]  ;;  %1022 = vmatpush.msrb.mxu1 %v744_v40  ;;  %v681_v40 = vld [vmem:[%s3051_s5 + $0x148] sm:$0xff] }
  0x3c   : > { %v872_v42 = vld [vmem:[%s3051_s5 + $0x740] sm:$0xff]  ;;  %1043 = vmatpush.msrb.mxu2 %v804_v41  ;;  %v749_v41 = vld [vmem:[%s3051_s5 + $0x368] sm:$0xff] }
  0x3d   : > { %v672_v43 = vld [vmem:[%s3051_s5 + $0x100] sm:$0xff]  ;;  %1062 = vmatpush.msrb.mxu3 %v872_v42  ;;  %v809_v42 = vld [vmem:[%s3051_s5 + $0x548] sm:$0xff] }
  0x3e   : > { %v740_v44 = vld [vmem:[%s3051_s5 + $0x320] sm:$0xff]  ;;  %1004 = vmatpush.msrb.mxu0 %v672_v43  ;;  %v877_v43 = vld [vmem:[%s3051_s5 + $0x768] sm:$0xff] }
  0x3f   : > { %v800_v45 = vld [vmem:[%s3051_s5 + $0x500] sm:$0xff]  ;;  %1023 = vmatpush.msrb.mxu1 %v740_v44  ;;  %v677_v44 = vld [vmem:[%s3051_s5 + $0x128] sm:$0xff] }
  0x40   : > { %v868_v46 = vld [vmem:[%s3051_s5 + $0x720] sm:$0xff]  ;;  %1044 = vmatpush.msrb.mxu2 %v800_v45  ;;  %v745_v45 = vld [vmem:[%s3051_s5 + $0x348] sm:$0xff] }
  0x41   : > { %v668_v47 = vld [vmem:[%s3051_s5 + $0xe0] sm:$0xff]  ;;  %1063 = vmatpush.msrb.mxu3 %v868_v46  ;;  %v805_v46 = vld [vmem:[%s3051_s5 + $0x528] sm:$0xff] }
  0x42   : > { %v736_v48 = vld [vmem:[%s3051_s5 + $0x300] sm:$0xff]  ;;  %1005 = vmatpush.msrb.mxu0 %v668_v47  ;;  %v873_v47 = vld [vmem:[%s3051_s5 + $0x748] sm:$0xff] }
  0x43   : > { %v796_v49 = vld [vmem:[%s3051_s5 + $0x4e0] sm:$0xff]  ;;  %1024 = vmatpush.msrb.mxu1 %v736_v48  ;;  %v673_v48 = vld [vmem:[%s3051_s5 + $0x108] sm:$0xff] }
  0x44   : > { %v864_v50 = vld [vmem:[%s3051_s5 + $0x700] sm:$0xff]  ;;  %1045 = vmatpush.msrb.mxu2 %v796_v49  ;;  %v741_v49 = vld [vmem:[%s3051_s5 + $0x328] sm:$0xff] }
  0x45   : > { %v664_v51 = vld [vmem:[%s3051_s5 + $0xc0] sm:$0xff]  ;;  %1064 = vmatpush.msrb.mxu3 %v864_v50  ;;  %v801_v50 = vld [vmem:[%s3051_s5 + $0x508] sm:$0xff] }
  0x46   : > { %v732_v52 = vld [vmem:[%s3051_s5 + $0x2e0] sm:$0xff]  ;;  %1006 = vmatpush.msrb.mxu0 %v664_v51  ;;  %v869_v51 = vld [vmem:[%s3051_s5 + $0x728] sm:$0xff] }
  0x47   : > { %v792_v53 = vld [vmem:[%s3051_s5 + $0x4c0] sm:$0xff]  ;;  %1025 = vmatpush.msrb.mxu1 %v732_v52  ;;  %v669_v52 = vld [vmem:[%s3051_s5 + $0xe8] sm:$0xff] }
  0x48   : > { %v860_v54 = vld [vmem:[%s3051_s5 + $0x6e0] sm:$0xff]  ;;  %1046 = vmatpush.msrb.mxu2 %v792_v53  ;;  %v737_v53 = vld [vmem:[%s3051_s5 + $0x308] sm:$0xff] }
  0x49   : > { %v660_v55 = vld [vmem:[%s3051_s5 + $0xa0] sm:$0xff]  ;;  %1065 = vmatpush.msrb.mxu3 %v860_v54  ;;  %v797_v54 = vld [vmem:[%s3051_s5 + $0x4e8] sm:$0xff] }
  0x4a   : > { %v728_v56 = vld [vmem:[%s3051_s5 + $0x2c0] sm:$0xff]  ;;  %1007 = vmatpush.msrb.mxu0 %v660_v55  ;;  %v865_v55 = vld [vmem:[%s3051_s5 + $0x708] sm:$0xff] }
  0x4b   : > { %v788_v57 = vld [vmem:[%s3051_s5 + $0x4a0] sm:$0xff]  ;;  %1026 = vmatpush.msrb.mxu1 %v728_v56  ;;  %v665_v56 = vld [vmem:[%s3051_s5 + $0xc8] sm:$0xff] }
  0x4c   : > { %v856_v58 = vld [vmem:[%s3051_s5 + $0x6c0] sm:$0xff]  ;;  %1047 = vmatpush.msrb.mxu2 %v788_v57  ;;  %v733_v57 = vld [vmem:[%s3051_s5 + $0x2e8] sm:$0xff] }
  0x4d   : > { %v656_v59 = vld [vmem:[%s3051_s5 + $0x80] sm:$0xff]  ;;  %1066 = vmatpush.msrb.mxu3 %v856_v58  ;;  %v793_v58 = vld [vmem:[%s3051_s5 + $0x4c8] sm:$0xff] }
  0x4e   : > { %v724_v60 = vld [vmem:[%s3051_s5 + $0x2a0] sm:$0xff]  ;;  %1008 = vmatpush.msrb.mxu0 %v656_v59  ;;  %v861_v59 = vld [vmem:[%s3051_s5 + $0x6e8] sm:$0xff] }
  0x4f   : > { %v784_v61 = vld [vmem:[%s3051_s5 + $0x480] sm:$0xff]  ;;  %1027 = vmatpush.msrb.mxu1 %v724_v60  ;;  %v661_v60 = vld [vmem:[%s3051_s5 + $0xa8] sm:$0xff] }
  0x50   : > { %v852_v62 = vld [vmem:[%s3051_s5 + $0x6a0] sm:$0xff]  ;;  %1048 = vmatpush.msrb.mxu2 %v784_v61  ;;  %v729_v61 = vld [vmem:[%s3051_s5 + $0x2c8] sm:$0xff] }
  0x51   : > { %v652_v63 = vld [vmem:[%s3051_s5 + $0x60] sm:$0xff]  ;;  %1067 = vmatpush.msrb.mxu3 %v852_v62  ;;  %v789_v62 = vld [vmem:[%s3051_s5 + $0x4a8] sm:$0xff] }
  0x52   : > { %v720_v0 = vld [vmem:[%s3051_s5 + $0x280] sm:$0xff]  ;;  %1009 = vmatpush.msrb.mxu0 %v652_v63  ;;  %v857_v63 = vld [vmem:[%s3051_s5 + $0x6c8] sm:$0xff] }
  0x53   : > { %v780_v1 = vld [vmem:[%s3051_s5 + $0x460] sm:$0xff]  ;;  %1028 = vmatpush.msrb.mxu1 %v720_v0  ;;  %v657_v0 = vld [vmem:[%s3051_s5 + $0x88] sm:$0xff] }
  0x54   : > { %v848_v2 = vld [vmem:[%s3051_s5 + $0x680] sm:$0xff]  ;;  %1049 = vmatpush.msrb.mxu2 %v780_v1  ;;  %v725_v1 = vld [vmem:[%s3051_s5 + $0x2a8] sm:$0xff] }
  0x55   : > { %v648_v3 = vld [vmem:[%s3051_s5 + $0x40] sm:$0xff]  ;;  %1068 = vmatpush.msrb.mxu3 %v848_v2  ;;  %v785_v2 = vld [vmem:[%s3051_s5 + $0x488] sm:$0xff] }
  0x56   : > { %v716_v4 = vld [vmem:[%s3051_s5 + $0x260] sm:$0xff]  ;;  %1010 = vmatpush.msrb.mxu0 %v648_v3  ;;  %v853_v3 = vld [vmem:[%s3051_s5 + $0x6a8] sm:$0xff] }
  0x57   : > { %v776_v5 = vld [vmem:[%s3051_s5 + $0x440] sm:$0xff]  ;;  %1029 = vmatpush.msrb.mxu1 %v716_v4  ;;  %v653_v4 = vld [vmem:[%s3051_s5 + $0x68] sm:$0xff] }
  0x58   : > { %v844_v6 = vld [vmem:[%s3051_s5 + $0x660] sm:$0xff]  ;;  %1050 = vmatpush.msrb.mxu2 %v776_v5  ;;  %v721_v5 = vld [vmem:[%s3051_s5 + $0x288] sm:$0xff] }
  0x59   : > { %v644_v7 = vld [vmem:[%s3051_s5 + $0x20] sm:$0xff]  ;;  %1069 = vmatpush.msrb.mxu3 %v844_v6  ;;  %v781_v6 = vld [vmem:[%s3051_s5 + $0x468] sm:$0xff] }
  0x5a   : > { %v712_v8 = vld [vmem:[%s3051_s5 + $0x240] sm:$0xff]  ;;  %1011 = vmatpush.msrb.mxu0 %v644_v7  ;;  %v849_v7 = vld [vmem:[%s3051_s5 + $0x688] sm:$0xff] }
  0x5b   : > { %v772_v9 = vld [vmem:[%s3051_s5 + $0x420] sm:$0xff]  ;;  %1030 = vmatpush.msrb.mxu1 %v712_v8  ;;  %v649_v8 = vld [vmem:[%s3051_s5 + $0x48] sm:$0xff] }
  0x5c   : > { %v840_v10 = vld [vmem:[%s3051_s5 + $0x640] sm:$0xff]  ;;  %1051 = vmatpush.msrb.mxu2 %v772_v9  ;;  %v717_v9 = vld [vmem:[%s3051_s5 + $0x268] sm:$0xff] }
  0x5d   : > { %1070 = vmatpush.msrb.mxu3 %v840_v10  ;;  %v640_v11 = vld [vmem:[%s3051_s5] sm:$0xff]  ;;  %v777_v10 = vld [vmem:[%s3051_s5 + $0x448] sm:$0xff] }
  0x5e   : > { %v708_v12 = vld [vmem:[%s3051_s5 + $0x220] sm:$0xff]  ;;  %1012 = vmatpush.msrb.mxu0 %v640_v11  ;;  %v845_v11 = vld [vmem:[%s3051_s5 + $0x668] sm:$0xff] }
  0x5f   : > { %v768_v13 = vld [vmem:[%s3051_s5 + $0x400] sm:$0xff]  ;;  %1031 = vmatpush.msrb.mxu1 %v708_v12  ;;  %v645_v12 = vld [vmem:[%s3051_s5 + $0x28] sm:$0xff] }
  0x60   : > { %v836_v14 = vld [vmem:[%s3051_s5 + $0x620] sm:$0xff]  ;;  %1052 = vmatpush.msrb.mxu2 %v768_v13  ;;  %v713_v13 = vld [vmem:[%s3051_s5 + $0x248] sm:$0xff] }
  0x61   : > { %1071 = vmatpush.msrb.mxu3 %v836_v14  ;;  %v704_v15 = vld [vmem:[%s3051_s5 + $0x200] sm:$0xff]  ;;  %v773_v14 = vld [vmem:[%s3051_s5 + $0x428] sm:$0xff] }
  0x62   : > { %v832_v16 = vld [vmem:[%s3051_s5 + $0x600] sm:$0xff]  ;;  %1032 = vmatpush.msrb.mxu1 %v704_v15  ;;  %v841_v15 = vld [vmem:[%s3051_s5 + $0x648] sm:$0xff] }
  0x63   : > { %1072 = vmatpush.msrb.mxu3 %v832_v16  ;;  %v2361_v32 = vld [vmem:[%s2340_s14] sm:$0xff]  ;;  %v641_v16 = vld [vmem:[%s3051_s5 + $0x8] sm:$0xff] }
  0x97   : > { %v914_v17 = vpop.permute.xlu0 %913 }
  0x98   : > { %1699 = vmatmul.msk.f32.vlgmr.msra.gmra.mxu0 %vm638_vm0, %v914_v17  ;;  %1700 = vmatmul.msk.f32.vlgmr.msra.gmra.mxu1 %vm638_vm0, %v914_v17 }
  0x99   : > { %1701 = vmatmul.msk.f32.vlgmr.msra.gmra.mxu2 %vm638_vm0, %v914_v17  ;;  %1702 = vmatmul.msk.f32.vlgmr.msra.gmra.mxu3 %vm638_vm0, %v914_v17  ;;  %v709_v17 = vld [vmem:[%s3051_s5 + $0x228] sm:$0xff] }
  0x9a   : > { %1077 = vmatpush.msra.mxu0 %v701_v18  ;;  %1117 = vmatpush.msra.mxu2 %v829_v19  ;;  %v769_v18 = vld [vmem:[%s3051_s5 + $0x408] sm:$0xff] }
  0x9b   : > { %1097 = vmatpush.msra.mxu1 %v765_v20  ;;  %1137 = vmatpush.msra.mxu3 %v893_v21  ;;  %v837_v19 = vld [vmem:[%s3051_s5 + $0x628] sm:$0xff]  ;;  %v702_v20 = vld [vmem:[%s3051_s5 + $0x1f0] sm:$0xff] }
  0x9c   : > { %1078 = vmatpush.msra.mxu0 %v697_v22  ;;  %1118 = vmatpush.msra.mxu2 %v825_v23  ;;  %v830_v21 = vld [vmem:[%s3051_s5 + $0x5f0] sm:$0xff]  ;;  %v705_v22 = vld [vmem:[%s3051_s5 + $0x208] sm:$0xff] }
  0x9d   : > { %1098 = vmatpush.msra.mxu1 %v761_v24  ;;  %1138 = vmatpush.msra.mxu3 %v889_v25  ;;  %v833_v23 = vld [vmem:[%s3051_s5 + $0x608] sm:$0xff]  ;;  %v698_v24 = vld [vmem:[%s3051_s5 + $0x1d0] sm:$0xff] }
  0x9e   : > { %1079 = vmatpush.msra.mxu0 %v693_v26  ;;  %1119 = vmatpush.msra.mxu2 %v821_v27  ;;  %v766_v25 = vld [vmem:[%s3051_s5 + $0x3f0] sm:$0xff] }
  0x9f   : > { %1099 = vmatpush.msra.mxu1 %v757_v28  ;;  %1139 = vmatpush.msra.mxu3 %v885_v29  ;;  %v826_v26 = vld [vmem:[%s3051_s5 + $0x5d0] sm:$0xff] }
  0xa0   : > { %1080 = vmatpush.msra.mxu0 %v689_v30  ;;  %1120 = vmatpush.msra.mxu2 %v817_v31  ;;  %v894_v27 = vld [vmem:[%s3051_s5 + $0x7f0] sm:$0xff] }
  0xa1   : > { %1013 = vmatmul.f32.vlgmr.msrb.gmra.mxu0 %v2361_v32  ;;  %1053 = vmatmul.f32.vlgmr.msrb.gmra.mxu2 %v2364_v33  ;;  %v694_v28 = vld [vmem:[%s3051_s5 + $0x1b0] sm:$0xff] }
  0xa2   : > { %1081 = vmatpush.msra.mxu0 %v685_v34  ;;  %1100 = vmatpush.msra.mxu1 %v753_v35  ;;  %v762_v29 = vld [vmem:[%s3051_s5 + $0x3d0] sm:$0xff] }
  0xa3   : > { %1121 = vmatpush.msra.mxu2 %v813_v36  ;;  %1140 = vmatpush.msra.mxu3 %v881_v37  ;;  %v822_v30 = vld [vmem:[%s3051_s5 + $0x5b0] sm:$0xff] }
  0xa4   : > { %1033 = vmatmul.f32.vlgmr.msrb.gmra.mxu1 %v2381_v38  ;;  %1073 = vmatmul.f32.vlgmr.msrb.gmra.mxu3 %v2384_v39  ;;  %v890_v31 = vld [vmem:[%s3051_s5 + $0x7d0] sm:$0xff] }
  0xa5   : > { %1082 = vmatpush.msra.mxu0 %v681_v40  ;;  %1101 = vmatpush.msra.mxu1 %v749_v41  ;;  %v690_v34 = vld [vmem:[%s3051_s5 + $0x190] sm:$0xff] }
  0xa6   : > { %1122 = vmatpush.msra.mxu2 %v809_v42  ;;  %1141 = vmatpush.msra.mxu3 %v877_v43  ;;  %v758_v35 = vld [vmem:[%s3051_s5 + $0x3b0] sm:$0xff] }
  0xa7   : > { %1083 = vmatpush.msra.mxu0 %v677_v44  ;;  %1102 = vmatpush.msra.mxu1 %v745_v45  ;;  %v818_v36 = vld [vmem:[%s3051_s5 + $0x590] sm:$0xff] }
  0xa8   : > { %1123 = vmatpush.msra.mxu2 %v805_v46  ;;  %1142 = vmatpush.msra.mxu3 %v873_v47  ;;  %v886_v37 = vld [vmem:[%s3051_s5 + $0x7b0] sm:$0xff] }
  0xa9   : > { %1084 = vmatpush.msra.mxu0 %v673_v48  ;;  %1103 = vmatpush.msra.mxu1 %v741_v49  ;;  %v686_v40 = vld [vmem:[%s3051_s5 + $0x170] sm:$0xff] }
  0xaa   : > { %1124 = vmatpush.msra.mxu2 %v801_v50  ;;  %1143 = vmatpush.msra.mxu3 %v869_v51  ;;  %v754_v41 = vld [vmem:[%s3051_s5 + $0x390] sm:$0xff] }
  0xab   : > { %1085 = vmatpush.msra.mxu0 %v669_v52  ;;  %1104 = vmatpush.msra.mxu1 %v737_v53  ;;  %v814_v42 = vld [vmem:[%s3051_s5 + $0x570] sm:$0xff] }
  0xac   : > { %1125 = vmatpush.msra.mxu2 %v797_v54  ;;  %1144 = vmatpush.msra.mxu3 %v865_v55  ;;  %v882_v43 = vld [vmem:[%s3051_s5 + $0x790] sm:$0xff] }
  0xad   : > { %1086 = vmatpush.msra.mxu0 %v665_v56  ;;  %1105 = vmatpush.msra.mxu1 %v733_v57  ;;  %v682_v44 = vld [vmem:[%s3051_s5 + $0x150] sm:$0xff] }
  0xae   : > { %1126 = vmatpush.msra.mxu2 %v793_v58  ;;  %1145 = vmatpush.msra.mxu3 %v861_v59  ;;  %v750_v45 = vld [vmem:[%s3051_s5 + $0x370] sm:$0xff] }
  0xaf   : > { %1087 = vmatpush.msra.mxu0 %v661_v60  ;;  %1106 = vmatpush.msra.mxu1 %v729_v61  ;;  %v810_v46 = vld [vmem:[%s3051_s5 + $0x550] sm:$0xff] }
  0xb0   : > { %1127 = vmatpush.msra.mxu2 %v789_v62  ;;  %1146 = vmatpush.msra.mxu3 %v857_v63  ;;  %v878_v47 = vld [vmem:[%s3051_s5 + $0x770] sm:$0xff] }
  0xb1   : > { %1088 = vmatpush.msra.mxu0 %v657_v0  ;;  %1107 = vmatpush.msra.mxu1 %v725_v1  ;;  %v678_v48 = vld [vmem:[%s3051_s5 + $0x130] sm:$0xff] }
  0xb2   : > { %1128 = vmatpush.msra.mxu2 %v785_v2  ;;  %1147 = vmatpush.msra.mxu3 %v853_v3  ;;  %v746_v49 = vld [vmem:[%s3051_s5 + $0x350] sm:$0xff] }
  0xb3   : > { %1089 = vmatpush.msra.mxu0 %v653_v4  ;;  %1108 = vmatpush.msra.mxu1 %v721_v5  ;;  %v806_v50 = vld [vmem:[%s3051_s5 + $0x530] sm:$0xff] }
  0xb4   : > { %1129 = vmatpush.msra.mxu2 %v781_v6  ;;  %1148 = vmatpush.msra.mxu3 %v849_v7  ;;  %v874_v51 = vld [vmem:[%s3051_s5 + $0x750] sm:$0xff] }
  0xb5   : > { %1090 = vmatpush.msra.mxu0 %v649_v8  ;;  %1109 = vmatpush.msra.mxu1 %v717_v9  ;;  %v674_v52 = vld [vmem:[%s3051_s5 + $0x110] sm:$0xff] }
  0xb6   : > { %1130 = vmatpush.msra.mxu2 %v777_v10  ;;  %1149 = vmatpush.msra.mxu3 %v845_v11  ;;  %v742_v53 = vld [vmem:[%s3051_s5 + $0x330] sm:$0xff] }
  0xb7   : > { %1091 = vmatpush.msra.mxu0 %v645_v12  ;;  %1110 = vmatpush.msra.mxu1 %v713_v13  ;;  %v802_v54 = vld [vmem:[%s3051_s5 + $0x510] sm:$0xff] }
  0xb8   : > { %1131 = vmatpush.msra.mxu2 %v773_v14  ;;  %1150 = vmatpush.msra.mxu3 %v841_v15  ;;  %v870_v55 = vld [vmem:[%s3051_s5 + $0x730] sm:$0xff] }
  0xb9   : > { %1092 = vmatpush.msra.mxu0 %v641_v16  ;;  %1111 = vmatpush.msra.mxu1 %v709_v17  ;;  %v670_v56 = vld [vmem:[%s3051_s5 + $0xf0] sm:$0xff] }
  0xba   : > { %1132 = vmatpush.msra.mxu2 %v769_v18  ;;  %1151 = vmatpush.msra.mxu3 %v837_v19  ;;  %v738_v57 = vld [vmem:[%s3051_s5 + $0x310] sm:$0xff] }
  0xbb   : > { %1093 = vmatmul.f32.vlgmr.msra.gmra.mxu0 %v2361_v32  ;;  %1133 = vmatmul.f32.vlgmr.msra.gmra.mxu2 %v2364_v33  ;;  %v798_v58 = vld [vmem:[%s3051_s5 + $0x4f0] sm:$0xff] }
  0xbc   : > { %1157 = vmatpush.msrb.mxu0 %v702_v20  ;;  %1197 = vmatpush.msrb.mxu2 %v830_v21  ;;  %v866_v59 = vld [vmem:[%s3051_s5 + $0x710] sm:$0xff] }
  0xbd   : > { %1112 = vmatpush.msra.mxu1 %v705_v22  ;;  %1152 = vmatpush.msra.mxu3 %v833_v23  ;;  %v666_v60 = vld [vmem:[%s3051_s5 + $0xd0] sm:$0xff] }
  0xbe   : > { %1113 = vmatmul.f32.vlgmr.msra.gmra.mxu1 %v2381_v38  ;;  %1153 = vmatmul.f32.vlgmr.msra.gmra.mxu3 %v2384_v39  ;;  %v734_v61 = vld [vmem:[%s3051_s5 + $0x2f0] sm:$0xff] }
  0xbf   : > { %1158 = vmatpush.msrb.mxu0 %v698_v24  ;;  %1177 = vmatpush.msrb.mxu1 %v766_v25  ;;  %v794_v62 = vld [vmem:[%s3051_s5 + $0x4d0] sm:$0xff]  ;;  %v703_v24 = vld [vmem:[%s3051_s5 + $0x1f8] sm:$0xff] }
  0xc0   : > { %1198 = vmatpush.msrb.mxu2 %v826_v26  ;;  %1217 = vmatpush.msrb.mxu3 %v894_v27  ;;  %v862_v63 = vld [vmem:[%s3051_s5 + $0x6f0] sm:$0xff]  ;;  %v831_v25 = vld [vmem:[%s3051_s5 + $0x5f8] sm:$0xff] }
  0xc1   : > { %1159 = vmatpush.msrb.mxu0 %v694_v28  ;;  %1178 = vmatpush.msrb.mxu1 %v762_v29  ;;  %v662_v0 = vld [vmem:[%s3051_s5 + $0xb0] sm:$0xff]  ;;  %v699_v28 = vld [vmem:[%s3051_s5 + $0x1d8] sm:$0xff] }
  0xc2   : > { %1199 = vmatpush.msrb.mxu2 %v822_v30  ;;  %1218 = vmatpush.msrb.mxu3 %v890_v31  ;;  %v730_v1 = vld [vmem:[%s3051_s5 + $0x2d0] sm:$0xff]  ;;  %v767_v29 = vld [vmem:[%s3051_s5 + $0x3f8] sm:$0xff] }
  0xc3   : > { %1160 = vmatpush.msrb.mxu0 %v690_v34  ;;  %1179 = vmatpush.msrb.mxu1 %v758_v35  ;;  %v790_v2 = vld [vmem:[%s3051_s5 + $0x4b0] sm:$0xff]  ;;  %v827_v30 = vld [vmem:[%s3051_s5 + $0x5d8] sm:$0xff] }
  0xc4   : > { %1200 = vmatpush.msrb.mxu2 %v818_v36  ;;  %1219 = vmatpush.msrb.mxu3 %v886_v37  ;;  %v858_v3 = vld [vmem:[%s3051_s5 + $0x6d0] sm:$0xff]  ;;  %v895_v31 = vld [vmem:[%s3051_s5 + $0x7f8] sm:$0xff] }
  0xc5   : > { %1161 = vmatpush.msrb.mxu0 %v686_v40  ;;  %1180 = vmatpush.msrb.mxu1 %v754_v41  ;;  %v658_v4 = vld [vmem:[%s3051_s5 + $0x90] sm:$0xff]  ;;  %v695_v34 = vld [vmem:[%s3051_s5 + $0x1b8] sm:$0xff] }
  0xc6   : > { %1201 = vmatpush.msrb.mxu2 %v814_v42  ;;  %1220 = vmatpush.msrb.mxu3 %v882_v43  ;;  %v726_v5 = vld [vmem:[%s3051_s5 + $0x2b0] sm:$0xff]  ;;  %v763_v35 = vld [vmem:[%s3051_s5 + $0x3d8] sm:$0xff] }
  0xc7   : > { %1162 = vmatpush.msrb.mxu0 %v682_v44  ;;  %1181 = vmatpush.msrb.mxu1 %v750_v45  ;;  %v786_v6 = vld [vmem:[%s3051_s5 + $0x490] sm:$0xff]  ;;  %v823_v36 = vld [vmem:[%s3051_s5 + $0x5b8] sm:$0xff] }
  0xc8   : > { %1202 = vmatpush.msrb.mxu2 %v810_v46  ;;  %1221 = vmatpush.msrb.mxu3 %v878_v47  ;;  %v854_v7 = vld [vmem:[%s3051_s5 + $0x6b0] sm:$0xff]  ;;  %v891_v37 = vld [vmem:[%s3051_s5 + $0x7d8] sm:$0xff] }
  0xc9   : > { %1163 = vmatpush.msrb.mxu0 %v678_v48  ;;  %1182 = vmatpush.msrb.mxu1 %v746_v49  ;;  %v654_v8 = vld [vmem:[%s3051_s5 + $0x70] sm:$0xff]  ;;  %v691_v40 = vld [vmem:[%s3051_s5 + $0x198] sm:$0xff] }
  0xca   : > { %1203 = vmatpush.msrb.mxu2 %v806_v50  ;;  %1222 = vmatpush.msrb.mxu3 %v874_v51  ;;  %v722_v9 = vld [vmem:[%s3051_s5 + $0x290] sm:$0xff]  ;;  %v759_v41 = vld [vmem:[%s3051_s5 + $0x3b8] sm:$0xff] }
  0xcb   : > { %1164 = vmatpush.msrb.mxu0 %v674_v52  ;;  %1183 = vmatpush.msrb.mxu1 %v742_v53  ;;  %v782_v10 = vld [vmem:[%s3051_s5 + $0x470] sm:$0xff]  ;;  %v819_v42 = vld [vmem:[%s3051_s5 + $0x598] sm:$0xff] }
  0xcc   : > { %1204 = vmatpush.msrb.mxu2 %v802_v54  ;;  %1223 = vmatpush.msrb.mxu3 %v870_v55  ;;  %v850_v11 = vld [vmem:[%s3051_s5 + $0x690] sm:$0xff]  ;;  %v887_v43 = vld [vmem:[%s3051_s5 + $0x7b8] sm:$0xff]  ;;  %v1784_v54 = vld [vmem:[%s3056_s10] ss:$0 sm:$0xff] }
  0xcd   : > { %1165 = vmatpush.msrb.mxu0 %v670_v56  ;;  %1184 = vmatpush.msrb.mxu1 %v738_v57  ;;  %v650_v12 = vld [vmem:[%s3051_s5 + $0x50] sm:$0xff]  ;;  %v687_v44 = vld [vmem:[%s3051_s5 + $0x178] sm:$0xff]  ;;  %v605_v57 = vld [vmem:[%s590_s0] sm:$0xff] }
  0xce   : > { %1205 = vmatpush.msrb.mxu2 %v798_v58  ;;  %1224 = vmatpush.msrb.mxu3 %v866_v59  ;;  %v718_v13 = vld [vmem:[%s3051_s5 + $0x270] sm:$0xff]  ;;  %v755_v45 = vld [vmem:[%s3051_s5 + $0x398] sm:$0xff] }
  0xcf   : > { %1166 = vmatpush.msrb.mxu0 %v666_v60  ;;  %1185 = vmatpush.msrb.mxu1 %v734_v61  ;;  %v778_v14 = vld [vmem:[%s3051_s5 + $0x450] sm:$0xff]  ;;  %v815_v46 = vld [vmem:[%s3051_s5 + $0x578] sm:$0xff] }
  0xd0   : > { %1206 = vmatpush.msrb.mxu2 %v794_v62  ;;  %1225 = vmatpush.msrb.mxu3 %v862_v63  ;;  %v846_v15 = vld [vmem:[%s3051_s5 + $0x670] sm:$0xff]  ;;  %v883_v47 = vld [vmem:[%s3051_s5 + $0x798] sm:$0xff] }
  0xd1   : > { %1167 = vmatpush.msrb.mxu0 %v662_v0  ;;  %1186 = vmatpush.msrb.mxu1 %v730_v1  ;;  %v646_v16 = vld [vmem:[%s3051_s5 + $0x30] sm:$0xff]  ;;  %v683_v48 = vld [vmem:[%s3051_s5 + $0x158] sm:$0xff]  ;;  %v610_v0 = vmul.f32 %v1784_v54, %v605_v57  ;;  %v1785_v1 = vld [vmem:[%s3057_s11] ss:$0 sm:$0xff] }
  0xd2   : > { %1207 = vmatpush.msrb.mxu2 %v790_v2  ;;  %1226 = vmatpush.msrb.mxu3 %v858_v3  ;;  %v714_v17 = vld [vmem:[%s3051_s5 + $0x250] sm:$0xff]  ;;  %v751_v49 = vld [vmem:[%s3051_s5 + $0x378] sm:$0xff] }
  0xd3   : > { %1168 = vmatpush.msrb.mxu0 %v658_v4  ;;  %1187 = vmatpush.msrb.mxu1 %v726_v5  ;;  %v774_v18 = vld [vmem:[%s3051_s5 + $0x430] sm:$0xff]  ;;  %v811_v50 = vld [vmem:[%s3051_s5 + $0x558] sm:$0xff] }
  0xd4   : > { %1208 = vmatpush.msrb.mxu2 %v786_v6  ;;  %1227 = vmatpush.msrb.mxu3 %v854_v7  ;;  %v842_v19 = vld [vmem:[%s3051_s5 + $0x650] sm:$0xff]  ;;  %v879_v51 = vld [vmem:[%s3051_s5 + $0x778] sm:$0xff] }
  0xd5   : > { %1169 = vmatpush.msrb.mxu0 %v654_v8  ;;  %1188 = vmatpush.msrb.mxu1 %v722_v9  ;;  %v642_v20 = vld [vmem:[%s3051_s5 + $0x10] sm:$0xff]  ;;  %v679_v52 = vld [vmem:[%s3051_s5 + $0x138] sm:$0xff] }
  0xd6   : > { %1209 = vmatpush.msrb.mxu2 %v782_v10  ;;  %1228 = vmatpush.msrb.mxu3 %v850_v11  ;;  %v710_v21 = vld [vmem:[%s3051_s5 + $0x230] sm:$0xff]  ;;  %v747_v53 = vld [vmem:[%s3051_s5 + $0x358] sm:$0xff]  ;;  %v2856_v10 = vadd.f32 %v1785_v1, %v610_v0 }
  0xd7   : > { %1170 = vmatpush.msrb.mxu0 %v650_v12  ;;  %1189 = vmatpush.msrb.mxu1 %v718_v13  ;;  %v770_v22 = vld [vmem:[%s3051_s5 + $0x410] sm:$0xff]  ;;  %v807_v55 = vld [vmem:[%s3051_s5 + $0x538] sm:$0xff] }
  0xd8   : > { %1210 = vmatpush.msrb.mxu2 %v778_v14  ;;  %1229 = vmatpush.msrb.mxu3 %v846_v15  ;;  %v838_v23 = vld [vmem:[%s3051_s5 + $0x630] sm:$0xff]  ;;  %v875_v56 = vld [vmem:[%s3051_s5 + $0x758] sm:$0xff] }
  0xd9   : > { %1171 = vmatpush.msrb.mxu0 %v646_v16  ;;  %1190 = vmatpush.msrb.mxu1 %v714_v17  ;;  %v706_v26 = vld [vmem:[%s3051_s5 + $0x210] sm:$0xff]  ;;  %v675_v58 = vld [vmem:[%s3051_s5 + $0x118] sm:$0xff] }
  0xda   : > { %1211 = vmatpush.msrb.mxu2 %v774_v18  ;;  %1230 = vmatpush.msrb.mxu3 %v842_v19  ;;  %v834_v27 = vld [vmem:[%s3051_s5 + $0x610] sm:$0xff]  ;;  %v743_v59 = vld [vmem:[%s3051_s5 + $0x338] sm:$0xff]  ;;  %v1698_v19 = vmul.f32 -1.442695, %v2856_v10 }
  0xdb   : > { %1172 = vmatpush.msrb.mxu0 %v642_v20  ;;  %1191 = vmatpush.msrb.mxu1 %v710_v21  ;;  %v803_v60 = vld [vmem:[%s3051_s5 + $0x518] sm:$0xff] }
  0xdc   : > { %1212 = vmatpush.msrb.mxu2 %v770_v22  ;;  %1231 = vmatpush.msrb.mxu3 %v838_v23  ;;  %v871_v61 = vld [vmem:[%s3051_s5 + $0x738] sm:$0xff]  ;;  %1786 = vpow2.f32 %v1698_v19 }
  0xdd   : > { %1173 = vmatmul.f32.vlgmr.msrb.gmra.mxu0 %v2361_v32  ;;  %1213 = vmatmul.f32.vlgmr.msrb.gmra.mxu2 %v2364_v33  ;;  %v671_v62 = vld [vmem:[%s3051_s5 + $0xf8] sm:$0xff] }
  0xde   : > { %1237 = vmatpush.msra.mxu0 %v703_v24  ;;  %1277 = vmatpush.msra.mxu2 %v831_v25  ;;  %v739_v63 = vld [vmem:[%s3051_s5 + $0x318] sm:$0xff] }
  0xdf   : > { %1192 = vmatpush.msrb.mxu1 %v706_v26  ;;  %1232 = vmatpush.msrb.mxu3 %v834_v27  ;;  %v799_v2 = vld [vmem:[%s3051_s5 + $0x4f8] sm:$0xff] }
  0xe0   : > { %1193 = vmatmul.f32.vlgmr.msrb.gmra.mxu1 %v2381_v38  ;;  %1233 = vmatmul.f32.vlgmr.msrb.gmra.mxu3 %v2384_v39  ;;  %v867_v3 = vld [vmem:[%s3051_s5 + $0x718] sm:$0xff] }
  0xe1   : > { %1238 = vmatpush.msra.mxu0 %v699_v28  ;;  %1257 = vmatpush.msra.mxu1 %v767_v29  ;;  %v667_v4 = vld [vmem:[%s3051_s5 + $0xd8] sm:$0xff] }
  0xe2   : > { %1278 = vmatpush.msra.mxu2 %v827_v30  ;;  %1297 = vmatpush.msra.mxu3 %v895_v31  ;;  %v735_v5 = vld [vmem:[%s3051_s5 + $0x2f8] sm:$0xff] }
  0xe3   : > { %1239 = vmatpush.msra.mxu0 %v695_v34  ;;  %1258 = vmatpush.msra.mxu1 %v763_v35  ;;  %v795_v6 = vld [vmem:[%s3051_s5 + $0x4d8] sm:$0xff] }
  0xe4   : > { %1279 = vmatpush.msra.mxu2 %v823_v36  ;;  %1298 = vmatpush.msra.mxu3 %v891_v37  ;;  %v863_v7 = vld [vmem:[%s3051_s5 + $0x6f8] sm:$0xff] }
  0xe5   : > { %1240 = vmatpush.msra.mxu0 %v691_v40  ;;  %1259 = vmatpush.msra.mxu1 %v759_v41  ;;  %v663_v8 = vld [vmem:[%s3051_s5 + $0xb8] sm:$0xff]  ;;  %v1787_v40 = vpop.eup %1786 }
  0xe6   : > { %1280 = vmatpush.msra.mxu2 %v819_v42  ;;  %1299 = vmatpush.msra.mxu3 %v887_v43  ;;  %v731_v9 = vld [vmem:[%s3051_s5 + $0x2d8] sm:$0xff]  ;;  %v620_v41 = vadd.f32 1.0, %v1787_v40 }
  0xe7   : > { %1241 = vmatpush.msra.mxu0 %v687_v44  ;;  %1260 = vmatpush.msra.mxu1 %v755_v45  ;;  %v791_v11 = vld [vmem:[%s3051_s5 + $0x4b8] sm:$0xff] }
  0xe8   : > { %1281 = vmatpush.msra.mxu2 %v815_v46  ;;  %1300 = vmatpush.msra.mxu3 %v883_v47  ;;  %v859_v12 = vld [vmem:[%s3051_s5 + $0x6d8] sm:$0xff]  ;;  %1788 = vrcp.f32 %v620_v41  ;;  %vm626_vm1 = vweird.f32 %v620_v41 }
  0xe9   : > { %1242 = vmatpush.msra.mxu0 %v683_v48  ;;  %1261 = vmatpush.msra.mxu1 %v751_v49  ;;  %v659_v13 = vld [vmem:[%s3051_s5 + $0x98] sm:$0xff]  ;;  %v630_v49 = vand.u32 2147483647, %v620_v41 }
  0xea   : > { %1282 = vmatpush.msra.mxu2 %v811_v50  ;;  %1301 = vmatpush.msra.mxu3 %v879_v51  ;;  %v727_v14 = vld [vmem:[%s3051_s5 + $0x2b8] sm:$0xff] }
  0xeb   : > { %1243 = vmatpush.msra.mxu0 %v679_v52  ;;  %1262 = vmatpush.msra.mxu1 %v747_v53  ;;  %v787_v15 = vld [vmem:[%s3051_s5 + $0x498] sm:$0xff]  ;;  %vm631_vm4 = vcmp.eq.f32.partialorder %v630_v49, 8.507059e+37 }
  0xec   : > { %1283 = vmatpush.msra.mxu2 %v807_v55  ;;  %1302 = vmatpush.msra.mxu3 %v875_v56  ;;  %v855_v16 = vld [vmem:[%s3051_s5 + $0x6b8] sm:$0xff] }
  0xed   : > { %1244 = vmatpush.msra.mxu0 %v675_v58  ;;  %1263 = vmatpush.msra.mxu1 %v743_v59  ;;  %v655_v17 = vld [vmem:[%s3051_s5 + $0x78] sm:$0xff]  ;;  %v2949_v58 = vld [vmem:[%s582_s23] sm:$0xf]  ;;  %s1684_s23 = sshll.u32 %s540_s16, 3 }
  0xee   : > { %1284 = vmatpush.msra.mxu2 %v803_v60  ;;  %1303 = vmatpush.msra.mxu3 %v871_v61  ;;  %v723_v18 = vld [vmem:[%s3051_s5 + $0x298] sm:$0xff]  ;;  %v1789_v42 = vpop.eup %1788  ;;  %v1319_v0 = vperm.slane %v2949_v58, 0  ;;  %s542_s0 = scalar_lea.vmem [#allocation2], %s1684_s23 }
  0xef   : > { %1245 = vmatpush.msra.mxu0 %v671_v62  ;;  %1264 = vmatpush.msra.mxu1 %v739_v63  ;;  %v783_v20 = vld [vmem:[%s3051_s5 + $0x478] sm:$0xff]  ;;  %v622_v43 = vmul.f32 %v1789_v42, %v620_v41  ;;  %vm627_vm2 = vweird.f32 %v1789_v42  ;;  %v2955_v62 = vld [vmem:[%s3053_s7] sm:$0xf]  ;;  %s1485_s15 = sshll.u32 %s542_s0, 4  ;;  %s1486_s15 = int_to_ptr.vmem [resolvable:$true] %s1485_s15 }
  0xf0   : > { %1285 = vmatpush.msra.mxu2 %v799_v2  ;;  %1304 = vmatpush.msra.mxu3 %v867_v3  ;;  %v851_v21 = vld [vmem:[%s3051_s5 + $0x698] sm:$0xff]  ;;  %vm628_vm3 = vmor %vm626_vm1, %vm627_vm2  ;;  %v616_v63 = vld [vmem:[%s570_s22] sm:$0xff] }
  0xf1   : > { %1246 = vmatpush.msra.mxu0 %v667_v4  ;;  %1265 = vmatpush.msra.mxu1 %v735_v5  ;;  %v651_v22 = vld [vmem:[%s3051_s5 + $0x58] sm:$0xff]  ;;  %v623_v44 = vsub.f32 1.0, %v622_v43  ;;  %v2961_v2 = vld [vmem:[%s3054_s8] sm:$0xf]  ;;  %v1333_v4 = vperm.slane %v2955_v62, 0 }
  0xf2   : > { %1286 = vmatpush.msra.mxu2 %v795_v6  ;;  %1305 = vmatpush.msra.mxu3 %v863_v7  ;;  %v719_v23 = vld [vmem:[%s3051_s5 + $0x278] sm:$0xff]  ;;  %v2967_v6 = vld [vmem:[%s3055_s9] sm:$0xf] }
  0xf3   : > { %1247 = vmatpush.msra.mxu0 %v663_v8  ;;  %1266 = vmatpush.msra.mxu1 %v731_v9  ;;  %v779_v24 = vld [vmem:[%s3051_s5 + $0x458] sm:$0xff]  ;;  %v624_v46 = vmul.f32 %v1789_v42, %v623_v44  ;;  %v1347_v8 = vperm.slane %v2961_v2, 0 }
  0xf4   : > { %1287 = vmatpush.msra.mxu2 %v791_v11  ;;  %1306 = vmatpush.msra.mxu3 %v859_v12  ;;  %v847_v25 = vld [vmem:[%s3051_s5 + $0x678] sm:$0xff] }
  0xf5   : > { %1248 = vmatpush.msra.mxu0 %v659_v13  ;;  %1267 = vmatpush.msra.mxu1 %v727_v14  ;;  %v647_v26 = vld [vmem:[%s3051_s5 + $0x38] sm:$0xff]  ;;  %v625_v48 = vadd.f32 %v1789_v42, %v624_v46 }
  0xf6   : > { %1288 = vmatpush.msra.mxu2 %v787_v15  ;;  %1307 = vmatpush.msra.mxu3 %v855_v16  ;;  %v715_v27 = vld [vmem:[%s3051_s5 + $0x258] sm:$0xff] }
  0xf7   : > { %1249 = vmatpush.msra.mxu0 %v655_v17  ;;  %1268 = vmatpush.msra.mxu1 %v723_v18  ;;  %v775_v28 = vld [vmem:[%s3051_s5 + $0x438] sm:$0xff]  ;;  %v629_v52 = vsel %vm628_vm3, %v1789_v42, %v625_v48 }
  0xf8   : > { %1289 = vmatpush.msra.mxu2 %v783_v20  ;;  %1308 = vmatpush.msra.mxu3 %v851_v21  ;;  %v843_v29 = vld [vmem:[%s3051_s5 + $0x658] sm:$0xff] }
  0xf9   : > { %1250 = vmatpush.msra.mxu0 %v651_v22  ;;  %1269 = vmatpush.msra.mxu1 %v719_v23  ;;  %v643_v30 = vld [vmem:[%s3051_s5 + $0x18] sm:$0xff] }
  0xfa   : > { %1290 = vmatpush.msra.mxu2 %v779_v24  ;;  %1309 = vmatpush.msra.mxu3 %v847_v25  ;;  %v711_v31 = vld [vmem:[%s3051_s5 + $0x238] sm:$0xff] }
  0xfb   : > { %1251 = vmatpush.msra.mxu0 %v647_v26  ;;  %1270 = vmatpush.msra.mxu1 %v715_v27  ;;  %v771_v34 = vld [vmem:[%s3051_s5 + $0x418] sm:$0xff] }
  0xfc   : > { %v839_v35 = vld [vmem:[%s3051_s5 + $0x638] sm:$0xff]  ;;  %1291 = vmatpush.msra.mxu2 %v775_v28  ;;  %1310 = vmatpush.msra.mxu3 %v843_v29 }
  0xfd   : > { %1252 = vmatpush.msra.mxu0 %v643_v30  ;;  %1271 = vmatpush.msra.mxu1 %v711_v31  ;;  %v707_v36 = vld [vmem:[%s3051_s5 + $0x218] sm:$0xff] }
  0xfe   : > { %v835_v37 = vld [vmem:[%s3051_s5 + $0x618] sm:$0xff]  ;;  %1292 = vmatpush.msra.mxu2 %v771_v34  ;;  %1311 = vmatpush.msra.mxu3 %v839_v35 }
  0xff   : > { %1253 = vmatmul.f32.vlgmr.msra.gmra.mxu0 %v2361_v32  ;;  %1293 = vmatmul.f32.vlgmr.msra.gmra.mxu2 %v2364_v33  ;;  %v632_v33 = vand.u32 2147483648, %v620_v41 }
 0x100   : > { %1272 = vmatpush.msra.mxu1 %v707_v36  ;;  %1312 = vmatpush.msra.mxu3 %v835_v37 }
 0x101   : > { %1273 = vmatmul.f32.vlgmr.msra.gmra.mxu1 %v2381_v38  ;;  %1313 = vmatmul.f32.vlgmr.msra.gmra.mxu3 %v2384_v39  ;;  %v633_v39 = vor.u32 1.1754944e-38, %v632_v33 }
 0x103   : > { %v634_v56 = vsel %vm631_vm4, %v633_v39, %v629_v52 }
 0x104   : > { %v636_v60 = vmul.f32 %v634_v56, %v2856_v10  ;;  %v1361_v10 = vperm.slane %v2967_v6, 0 }
 0x106   : > { %v637_v5 = vadd.f32 %v636_v60, %v616_v63 }
 0x108   : > { %639 = vst.msk [vmem:[%s542_s0] sm:$0xff] %vm638_vm0, %v637_v5 }
 0x115   : > { %v934_v45 = vpop.f32.mrf.mxu0  ;;  %v2935_v47 = vpop.f32.mrf.mxu1 }
 0x11c   : > { %v2937_v50 = vpop.f32.mrf.mxu2  ;;  %v2940_v53 = vpop.f32.mrf.mxu3 }
 0x11e   : > { %v1014_v51 = vpop.f32.mrf.mxu0 }
 0x11f   : > { %v1015_v54 = vadd.f32 %v1014_v51, %v934_v45 }
 0x121   : > { %v1034_v55 = vpop.f32.mrf.mxu1 }
 0x122   : > { %v1035_v57 = vadd.f32 %v1034_v55, %v1015_v54 }
 0x124   : > { %v1054_v59 = vpop.f32.mrf.mxu2 }
 0x125   : > { %v1055_v61 = vadd.f32 %v1054_v59, %v1035_v57 }
 0x127   : > { %v1074_v1 = vpop.f32.mrf.mxu3 }
 0x128   : > { %v1075_v3 = vadd.f32 %v1074_v1, %v1055_v61 }
 0x12a   : > { %v1327_v7 = vadd.f32 %v1319_v0, %v1075_v3 }
 0x12c   : > { %v1341_v9 = vadd.f32 %v1333_v4, %v1327_v7 }
 0x12e   : > { %v1355_v11 = vmul.f32 %v1347_v8, %v1341_v9 }
 0x130   : > { %v1369_v12 = vadd.f32 %v1361_v10, %v1355_v11 }
 0x131   : > { %1835 = shalt.err (!%p1832_p7)
}
 0x132   : > { %1712 = dma.vmem_to_hbm [thread:$0]  (%p2026_p3), %s1486_s15, 128, %s1488_s29, %s1462_s28   ;;  %v1703_v13 = vmul.f32 -1.442695, %v1369_v12  ;;  %v1320_v22 = vperm.slane %v2949_v58, 1  ;;  %v1334_v25 = vperm.slane %v2955_v62, 1  ;;  %v1348_v29 = vperm.slane %v2961_v2, 1 }
 0x133   : > { %v1362_v34 = vperm.slane %v2967_v6, 1  ;;  %s3084_s21 = sshll.u32 %s2304_s24, 3  ;;  %s3085_s22 = sld [smem:[#allocation15_spill]]  ;;  %v1349_v9 = vperm.slane %v2961_v2, 2 }
 0x134   : > { %1790 = vpow2.f32 %v1703_v13  ;;  %v1363_v13 = vperm.slane %v2967_v6, 2 }
 0x138   : > { %v1094_v14 = vpop.f32.mrf.mxu0 }
 0x139   : > { %v1095_v15 = vadd.f32 %v1094_v14, %v2935_v47  ;;  %s2998_s17 = scalar_lea.vmem %s3085_s22, %s3084_s21 }
 0x13a   : > { %v1791_v16 = vpop.eup %1790 }
 0x13b   : > { %v1385_v17 = vadd.f32 1.0, %v1791_v16  ;;  %v1114_v18 = vpop.f32.mrf.mxu1 }
 0x13c   : > { %v1115_v19 = vadd.f32 %v1114_v18, %v1095_v15 }
 0x13d   : > { %1792 = vrcp.f32 %v1385_v17  ;;  %v1400_v35 = vand.u32 2147483648, %v1385_v17  ;;  %v1398_v37 = vand.u32 2147483647, %v1385_v17  ;;  %vm1394_vm6 = vweird.f32 %v1385_v17 }
 0x13e   : > { %v1134_v20 = vpop.f32.mrf.mxu2 }
 0x13f   : > { %v1135_v21 = vadd.f32 %v1134_v20, %v1115_v19  ;;  %v1401_v43 = vor.u32 1.1754944e-38, %v1400_v35  ;;  %vm1399_vm8 = vcmp.eq.f32.partialorder %v1398_v37, 8.507059e+37 }
 0x141   : > { %v1154_v23 = vpop.f32.mrf.mxu3 }
 0x142   : > { %v1155_v24 = vadd.f32 %v1154_v23, %v1135_v21 }
 0x143   : > { %v1793_v26 = vpop.eup %1792 }
 0x144   : > { %v1390_v27 = vmul.f32 %v1793_v26, %v1385_v17  ;;  %v1328_v28 = vadd.f32 %v1320_v22, %v1155_v24  ;;  %vm1395_vm5 = vweird.f32 %v1793_v26 }
 0x145   : > { %vm1396_vm7 = vmor %vm1394_vm6, %vm1395_vm5 }
 0x146   : > { %v1391_v30 = vsub.f32 1.0, %v1390_v27  ;;  %v1342_v31 = vadd.f32 %v1334_v25, %v1328_v28 }
 0x148   : > { %v1392_v36 = vmul.f32 %v1793_v26, %v1391_v30  ;;  %v1356_v40 = vmul.f32 %v1348_v29, %v1342_v31 }
 0x14a   : > { %v1393_v41 = vadd.f32 %v1793_v26, %v1392_v36  ;;  %v1370_v42 = vadd.f32 %v1362_v34, %v1356_v40  ;;  %v1336_v36 = vperm.slane %v2955_v62, 3 }
 0x14c   : > { %v1397_v44 = vsel %vm1396_vm7, %v1793_v26, %v1393_v41  ;;  %v1704_v45 = vmul.f32 -1.442695, %v1370_v42  ;;  %v1350_v41 = vperm.slane %v2961_v2, 3 }
 0x14d   : > { %v1402_v46 = vsel %vm1399_vm8, %v1401_v43, %v1397_v44  ;;  %v1364_v44 = vperm.slane %v2967_v6, 3 }
 0x14e   : > { %v1449_v47 = vmul.f32 %v1402_v46, %v1369_v12  ;;  %1794 = vpow2.f32 %v1704_v45 }
 0x150   : > { %v1453_v33 = vadd.f32 %v1449_v47, %v2361_v32  ;;  %v1321_v32 = vperm.slane %v2949_v58, 2  ;;  %v1806_v47 = vld [vmem:[%s2340_s14 + $0x10] sm:$0xff] }
 0x152   : > { %1457 = vst [vmem:[%s2998_s17] sm:$0xff] %v1453_v33 }
 0x154   : > { %v1795_v48 = vpop.eup %1794 }
 0x155   : > { %v1386_v49 = vadd.f32 1.0, %v1795_v48 }
 0x157   : > { %1796 = vrcp.f32 %v1386_v49  ;;  %v1415_v60 = vand.u32 2147483648, %v1386_v49  ;;  %v1413_v0 = vand.u32 2147483647, %v1386_v49  ;;  %vm1409_vm10 = vweird.f32 %v1386_v49 }
 0x159   : > { %v1416_v5 = vor.u32 1.1754944e-38, %v1415_v60  ;;  %vm1414_vm12 = vcmp.eq.f32.partialorder %v1413_v0, 8.507059e+37 }
 0x15a   : > { %v1174_v39 = vpop.f32.mrf.mxu0 }
 0x15b   : > { %v1175_v51 = vadd.f32 %v1174_v39, %v2937_v50  ;;  %v1335_v50 = vperm.slane %v2955_v62, 2 }
 0x15d   : > { %v1797_v52 = vpop.eup %1796  ;;  %v1194_v54 = vpop.f32.mrf.mxu1 }
 0x15e   : > { %v1405_v55 = vmul.f32 %v1797_v52, %v1386_v49  ;;  %v1195_v56 = vadd.f32 %v1194_v54, %v1175_v51  ;;  %vm1410_vm9 = vweird.f32 %v1797_v52 }
 0x15f   : > { %vm1411_vm11 = vmor %vm1409_vm10, %vm1410_vm9 }
 0x160   : > { %v1406_v57 = vsub.f32 1.0, %v1405_v55  ;;  %v1214_v59 = vpop.f32.mrf.mxu2 }
 0x161   : > { %v1215_v61 = vadd.f32 %v1214_v59, %v1195_v56 }
 0x162   : > { %v1407_v63 = vmul.f32 %v1797_v52, %v1406_v57 }
 0x163   : > { %v1234_v1 = vpop.f32.mrf.mxu3 }
 0x164   : > { %v1408_v3 = vadd.f32 %v1797_v52, %v1407_v63  ;;  %v1235_v4 = vadd.f32 %v1234_v1, %v1215_v61  ;;  %v1807_v63 = vld [vmem:[%s2340_s14 + $0x18] sm:$0xff] }
 0x166   : > { %v1412_v7 = vsel %vm1411_vm11, %v1797_v52, %v1408_v3  ;;  %v1329_v8 = vadd.f32 %v1321_v32, %v1235_v4 }
 0x167   : > { %v1417_v10 = vsel %vm1414_vm12, %v1416_v5, %v1412_v7 }
 0x168   : > { %v1450_v11 = vmul.f32 %v1417_v10, %v1370_v42  ;;  %v1343_v12 = vadd.f32 %v1335_v50, %v1329_v8 }
 0x16a   : > { %v1454_v14 = vadd.f32 %v1450_v11, %v2381_v38  ;;  %v1357_v15 = vmul.f32 %v1349_v9, %v1343_v12  ;;  %v1322_v38 = vperm.slane %v2949_v58, 3 }
 0x16c   : > { %1458 = vst [vmem:[%s2998_s17 + $0x8] sm:$0xff] %v1454_v14  ;;  %v1371_v16 = vadd.f32 %v1363_v13, %v1357_v15 }
 0x16e   : > { %v1705_v17 = vmul.f32 -1.442695, %v1371_v16 }
 0x170   : > { %1798 = vpow2.f32 %v1705_v17 }
 0x176   : > { %v1799_v18 = vpop.eup %1798 }
 0x177   : > { %v1387_v19 = vadd.f32 1.0, %v1799_v18 }
 0x179   : > { %1800 = vrcp.f32 %v1387_v19  ;;  %v1430_v28 = vand.u32 2147483648, %v1387_v19  ;;  %v1428_v31 = vand.u32 2147483647, %v1387_v19  ;;  %vm1424_vm14 = vweird.f32 %v1387_v19 }
 0x17b   : > { %vm1429_vm0 = vcmp.eq.f32.partialorder %v1428_v31, 8.507059e+37 }
 0x17c   : > { %v1254_v20 = vpop.f32.mrf.mxu0 }
 0x17d   : > { %v1255_v21 = vadd.f32 %v1254_v20, %v2940_v53  ;;  %v1431_v53 = vor.u32 1.1754944e-38, %v1430_v28 }
 0x17e   : > { %v1274_v22 = vpop.f32.mrf.mxu1 }
 0x17f   : > { %v1801_v23 = vpop.eup %1800  ;;  %v1275_v25 = vadd.f32 %v1274_v22, %v1255_v21 }
 0x180   : > { %v1420_v24 = vmul.f32 %v1801_v23, %v1387_v19  ;;  %vm1425_vm13 = vweird.f32 %v1801_v23 }
 0x181   : > { %vm1426_vm15 = vmor %vm1424_vm14, %vm1425_vm13 }
 0x182   : > { %v1421_v26 = vsub.f32 1.0, %v1420_v24  ;;  %v1294_v27 = vpop.f32.mrf.mxu2 }
 0x183   : > { %v1295_v29 = vadd.f32 %v1294_v27, %v1275_v25 }
 0x184   : > { %v1422_v30 = vmul.f32 %v1801_v23, %v1421_v26  ;;  %v1314_v34 = vpop.f32.mrf.mxu3 }
 0x185   : > { %v1315_v35 = vadd.f32 %v1314_v34, %v1295_v29 }
 0x186   : > { %v1423_v37 = vadd.f32 %v1801_v23, %v1422_v30 }
 0x187   : > { %v1330_v40 = vadd.f32 %v1322_v38, %v1315_v35 }
 0x188   : > { %v1427_v42 = vsel %vm1426_vm15, %v1801_v23, %v1423_v37 }
 0x189   : > { %v1432_v43 = vsel %vm1429_vm0, %v1431_v53, %v1427_v42  ;;  %v1344_v58 = vadd.f32 %v1336_v36, %v1330_v40 }
 0x18a   : > { %v1451_v45 = vmul.f32 %v1432_v43, %v1371_v16 }
 0x18b   : > { %v1358_v46 = vmul.f32 %v1350_v41, %v1344_v58 }
 0x18c   : > { %v1455_v33 = vadd.f32 %v1806_v47, %v1451_v45 }
 0x18d   : > { %v1372_v48 = vadd.f32 %v1364_v44, %v1358_v46 }
 0x18e   : > { %1459 = vst [vmem:[%s2998_s17 + $0x10] sm:$0xff] %v1455_v33 }
 0x18f   : > { %v1706_v62 = vmul.f32 -1.442695, %v1372_v48 }
 0x191   : > { %1802 = vpow2.f32 %v1706_v62 }
 0x197   : > { %v1803_v49 = vpop.eup %1802 }
 0x198   : > { %v1388_v39 = vadd.f32 1.0, %v1803_v49 }
 0x19a   : > { %1804 = vrcp.f32 %v1388_v39  ;;  %v1445_v54 = vand.u32 2147483648, %v1388_v39  ;;  %v1443_v6 = vand.u32 2147483647, %v1388_v39  ;;  %vm1439_vm2 = vweird.f32 %v1388_v39 }
 0x19c   : > { %v1446_v57 = vor.u32 1.1754944e-38, %v1445_v54  ;;  %vm1444_vm4 = vcmp.eq.f32.partialorder %v1443_v6, 8.507059e+37 }
 0x1a0   : > { %v1805_v51 = vpop.eup %1804 }
 0x1a1   : > { %v1435_v2 = vmul.f32 %v1805_v51, %v1388_v39  ;;  %vm1440_vm1 = vweird.f32 %v1805_v51 }
 0x1a2   : > { %vm1441_vm3 = vmor %vm1439_vm2, %vm1440_vm1 }
 0x1a3   : > { %v1436_v52 = vsub.f32 1.0, %v1435_v2 }
 0x1a5   : > { %v1437_v55 = vmul.f32 %v1805_v51, %v1436_v52 }
 0x1a7   : > { %v1438_v56 = vadd.f32 %v1805_v51, %v1437_v55 }
 0x1a9   : > { %v1442_v59 = vsel %vm1441_vm3, %v1805_v51, %v1438_v56 }
 0x1aa   : > { %v1447_v60 = vsel %vm1444_vm4, %v1446_v57, %v1442_v59 }
 0x1ab   : > { %v1452_v61 = vmul.f32 %v1447_v60, %v1372_v48 }
 0x1ad   : > { %v1456_v0 = vadd.f32 %v1807_v63, %v1452_v61 }
 0x1af   : > { %1460 = vst [vmem:[%s2998_s17 + $0x18] sm:$0xff] %v1456_v0 }
 0x1b0 PF: > { %s3086_s24 = sld [smem:[#allocation9_spill]] }
 0x1b1   : > { %s3087_s0 = sld [smem:[#allocation5_spill]] }
 0x1b6   : > { %p1718_p3 = scmp.ge.s32.totalorder %s3086_s24, 2 }
 0x1b7   : > { %s1502_s29 = sand.u32 1, %s3087_s0  }
 0x1b8   : > { %p1715_p9 = pnand %p1718_p3, %p2035_p8  ;;  %s1503_s28 = scalar_lea.sflag [#allocation3], %s1502_s29 }
 0x1ba   : > { %p1716_p10 = pneg %p1715_p9 }
 0x1bc   : > { %1869 = dma.done.wait (%p1716_p10), %s1503_s28, 128  }
 0x1bd   : > { %1871 = vsyncadd (%p1716_p10), %s1503_s28, 4294967168  ;;  %s27_s15 = sadd.s32 1, %s3086_s24   ;;  %s3089_s20 = sld [smem:[#allocation6_spill]] }
 0x1be   : > { %p24_p11 = scmp.ge.s32.totalorder %s27_s15, 6   ;;  %s3090_s27 = sld [smem:[#allocation13_spill]] }
 0x1bf   : > { %s3091_s28 = sld [smem:[#allocation7_spill]]  ;;  %s3095_s25 = smov %s1878_s26 }
 0x1c0   : > { %s3092_s29 = sld [smem:[#allocation8_spill]]  ;;  %26 = sbr.rel (!%p24_p11) target bundleno = 8 (0x8), region = 127 }
 0x1c1   : > { %s3093_s30 = sld [smem:[#allocation10_spill]] }
 0x1c2   : > { %s3094_s14 = sld [smem:[#allocation11_spill]] }
 0x1c3   : > { %s3096_s26 = smov %s3089_s20 }
 0x1c5   :  { %1521 = vsyncpa [#allocation3], 1 }
 0x1c6   :  { %1523 = vsyncpa [#allocation3 + $0x1], 1 }

</bundles_post_ra>
